<compile_context>
chip_gen: v7x
topology: tpu7x:2x2x1
jax: 0.10.0
libtpu: 0.0.40
codegen_flags: <defaults>
</compile_context>

<pallas_src>
import functools

import jax
import jax.numpy as jnp
from jax.experimental import pallas as pl
from jax.experimental.pallas import tpu as pltpu

# Keep f32 matmul accuracy so the one-hot gathers / feature dots stay bit-faithful
# (the 0/1 structural operands are exact; features remain f32).
jax.config.update("jax_default_matmul_precision", "highest")

_CP = pltpu.CompilerParams(dimension_semantics=("arbitrary",))

# Bounds the [Nd, chunk, h] select/broadcast intermediate in the max/min reduction.
_CHUNK_E = 256


def _full_spec(shape):
    nd = len(shape)
    return pl.BlockSpec(shape, lambda i: (0,) * nd)


# ---------------------------------------------------------------------------
# The single fused forward kernel.
# Ref order: [nf_gc, nf_gs, 6 graph mats, 38 preprocessed params, out_fc, out_fs]
# ---------------------------------------------------------------------------
def _fused_kernel(*refs, n_hid, chunk_e=_CHUNK_E):
    h = n_hid
    (nf_gc_ref, nf_gs_ref,
     srcA_s2c_ref, dstA_s2c_ref, dmask_s2c_ref,
     srcA_c2s_ref, dstA_c2s_ref, dmask_c2s_ref,
     lin_gc_w, lin_gc_b, lin_gs_w, lin_gs_b,
     s2c_w1s, s2c_w1d, s2c_b1, s2c_w2f, s2c_b2f, s2c_w2k, s2c_b2k,
     s2c_red_wx, s2c_red_wsum, s2c_red_wmx, s2c_red_wmn, s2c_red_b,
     c2s_w1s, c2s_w1d, c2s_b1, c2s_w2f, c2s_b2f, c2s_w2k, c2s_b2k,
     c2s_red_wx, c2s_red_wsum, c2s_red_wmx, c2s_red_wmn, c2s_red_b,
     gc_w1x, gc_w1n, gc_b1, gc_w2, gc_b2,
     gs_w1x, gs_w1n, gs_b1, gs_w2, gs_b2,
     out_fc_ref, out_fs_ref) = refs

    f32 = jnp.float32

    def dot(a, b):
        return jnp.dot(a, b, preferred_element_type=f32)

    # ---- node embeddings (stay resident for the whole forward) ----
    gc_x = dot(nf_gc_ref[...], lin_gc_w[...]) + lin_gc_b[...]      # [N_gc, h]
    gs_x = dot(nf_gs_ref[...], lin_gs_w[...]) + lin_gs_b[...]      # [N_gs, h]

    def edge_block(x_src, x_dst, srcA_ref, dstA_ref, dmask_ref,
                   w1s, w1d, b1, w2f, b2f, w2k, b2k,
                   red_wx, red_wsum, red_wmx, red_wmn, red_b):
        # gather src/dst node features per edge (one-hot matmul; bf16 0/1 is exact)
        xs = dot(srcA_ref[...].astype(f32), x_src)                 # [E, h]
        xd = dot(dstA_ref[...].astype(f32), x_dst)                 # [E, h]

        # message MLP: Linear(2h,2h) -> ReLU -> Linear(2h,4h+1), concat input as split dots
        h1 = jnp.maximum(dot(xs, w1s[...]) + dot(xd, w1d[...]) + b1[...], 0.0)   # [E, 2h]

        # 1-wide gate column handled as a VPU multiply + lane reduce (w2k stored [1,2h])
        gate_logit = jnp.sum(h1 * w2k[...], axis=1, keepdims=True) + b2k[...]    # [E, 1]
        gate = 1.0 / (1.0 + jnp.exp(-gate_logit))                                # sigmoid (EUP)

        # lane-dense [2h, 4h] feature dot, gated -> [f1*k | f2*k | f3*k | f4*k]
        fg = (dot(h1, w2f[...]) + b2f[...]) * gate                                # [E, 4h]

        mask = dmask_ref[...].astype(f32)                                         # [Nd, E]
        Nd, E = mask.shape

        # segment sums for all 4 slices in one MXU dot; unused middle columns are
        # zeroed out later by red_wsum (no lane slicing of `sums`)
        sums = dot(mask, fg)                                                      # [Nd, 4h]

        # streaming segment max / min over E chunks with [Nd, h] accumulators
        f2 = fg[:, h:2 * h]
        f3 = fg[:, 2 * h:3 * h]
        mx = jnp.full((Nd, h), -jnp.inf, f32)
        mn = jnp.full((Nd, h), jnp.inf, f32)
        for e0 in range(0, E, chunk_e):
            e1 = min(e0 + chunk_e, E)
            sel = mask[:, e0:e1][:, :, None] > 0.5                                # [Nd, ce, 1]
            mx = jnp.maximum(mx, jnp.max(jnp.where(sel, f2[e0:e1][None, :, :], -jnp.inf), axis=1))
            mn = jnp.minimum(mn, jnp.min(jnp.where(sel, f3[e0:e1][None, :, :], jnp.inf), axis=1))
        deg = jnp.sum(mask, axis=1, keepdims=True)                                # [Nd, 1]
        mx = jnp.where(deg > 0.5, mx, 0.0)     # DGL fills empty-neighborhood reductions with 0
        mn = jnp.where(deg > 0.5, mn, 0.0)

        # reduce MLP: Linear(5h, h) on cat([x, s1, mx, mn, s4]) as split dots
        return (dot(x_dst, red_wx[...]) + dot(sums, red_wsum[...])
                + dot(mx, red_wmx[...]) + dot(mn, red_wmn[...]) + red_b[...])     # [Nd, h]

    # gs -> gc
    new_cx = edge_block(gs_x, gc_x, srcA_s2c_ref, dstA_s2c_ref, dmask_s2c_ref,
                        s2c_w1s, s2c_w1d, s2c_b1, s2c_w2f, s2c_b2f, s2c_w2k, s2c_b2k,
                        s2c_red_wx, s2c_red_wsum, s2c_red_wmx, s2c_red_wmn, s2c_red_b)
    # gc -> gs
    new_sx = edge_block(gc_x, gs_x, srcA_c2s_ref, dstA_c2s_ref, dmask_c2s_ref,
                        c2s_w1s, c2s_w1d, c2s_b1, c2s_w2f, c2s_b2f, c2s_w2k, c2s_b2k,
                        c2s_red_wx, c2s_red_wsum, c2s_red_wmx, c2s_red_wmn, c2s_red_b)

    # output heads: MLP(2h, h, h) on cat([x, new_x]) as split dots
    h1c = jnp.maximum(dot(gc_x, gc_w1x[...]) + dot(new_cx, gc_w1n[...]) + gc_b1[...], 0.0)
    out_fc_ref[...] = (dot(h1c, gc_w2[...]) + gc_b2[...]).astype(out_fc_ref.dtype)
    h1s = jnp.maximum(dot(gs_x, gs_w1x[...]) + dot(new_sx, gs_w1n[...]) + gs_b1[...], 0.0)
    out_fs_ref[...] = (dot(h1s, gs_w2[...]) + gs_b2[...]).astype(out_fs_ref.dtype)


# ---------------------------------------------------------------------------
# One-time parameter preprocessing (weight splits / permutations hoisted out of the
# per-call path). Returns a flat list in the exact order the kernel unpacks.
# ---------------------------------------------------------------------------
def preprocess_params(p, n_hid):
    h = n_hid

    def side(msg, red):
        w1, b1 = p[msg + '_w1'], p[msg + '_b1']
        w2, b2 = p[msg + '_w2'], p[msg + '_b2']
        rw, rb = p[red + '_w'], p[red + '_b']
        w1s, w1d = w1[:h], w1[h:]                       # split cat([src, dst]) input rows
        w2k = w2[:, :1].T                               # gate column (torch split: k first) -> [1, 2h]
        b2k = b2[:1].reshape(1, 1)
        w2f = w2[:, 1:]                                 # [2h, 4h] feature columns
        b2f = b2[1:].reshape(1, -1)
        red_wx = rw[0:h]                                # rows for node 'x'
        red_wsum = jnp.concatenate(                     # rows for s1 | (zeros for max/min slots) | s4
            [rw[h:2 * h], jnp.zeros((2 * h, h), rw.dtype), rw[4 * h:5 * h]], axis=0)
        red_wmx = rw[2 * h:3 * h]
        red_wmn = rw[3 * h:4 * h]
        return [w1s, w1d, b1.reshape(1, -1), w2f, b2f, w2k, b2k,
                red_wx, red_wsum, red_wmx, red_wmn, rb.reshape(1, -1)]

    flat = [p['lin_gc_w'], p['lin_gc_b'].reshape(1, -1),
            p['lin_gs_w'], p['lin_gs_b'].reshape(1, -1)]
    flat += side('msg_s2c', 'red_s2c')
    flat += side('msg_c2s', 'red_c2s')
    for w1, b1, w2, b2 in [(p['gc_w1'], p['gc_b1'], p['gc_w2'], p['gc_b2']),
                           (p['gs_w1'], p['gs_b1'], p['gs_w2'], p['gs_b2'])]:
        flat += [w1[:h], w1[h:], b1.reshape(1, -1), w2, b2.reshape(1, -1)]
    return flat


# ---------------------------------------------------------------------------
# Wrapper: one fused pallas_call for the whole forward.
# ---------------------------------------------------------------------------
def pallas_forward(flat_params, nf_gc, nf_gs, graph_mats, n_hid):
    inputs = [nf_gc, nf_gs, *graph_mats, *flat_params]
    N_gc, N_gs = nf_gc.shape[0], nf_gs.shape[0]
    out_shape = (jax.ShapeDtypeStruct((N_gc, n_hid), jnp.float32),
                 jax.ShapeDtypeStruct((N_gs, n_hid), jnp.float32))
    return pl.pallas_call(
        functools.partial(_fused_kernel, n_hid=n_hid),
        grid=(1,),
        in_specs=[_full_spec(a.shape) for a in inputs],
        out_specs=[_full_spec(s.shape) for s in out_shape],
        out_shape=out_shape,
        compiler_params=_CP,
    )(*inputs)


# ---------------------------------------------------------------------------
# Pure-JAX reference (independent formulation: index gathers + segment ops)
# ---------------------------------------------------------------------------
def ref_forward(p, nf_gc, nf_gs, src_s2c, dst_s2c, src_c2s, dst_c2s, n_hid):
    h = n_hid
    N_gc, N_gs = nf_gc.shape[0], nf_gs.shape[0]
    gc_x = nf_gc @ p['lin_gc_w'] + p['lin_gc_b']
    gs_x = nf_gs @ p['lin_gs_w'] + p['lin_gs_b']

    def msg_and_agg(x_src, x_dst, src, dst, w1, b1, w2, b2, n_dst):
        xe = jnp.concatenate([x_src[src], x_dst[dst]], axis=1)
        y = jnp.maximum(xe @ w1 + b1, 0.0) @ w2 + b2
        k = jax.nn.sigmoid(y[:, :1])
        f = [y[:, 1 + i * h: 1 + (i + 1) * h] * k for i in range(4)]
        a1 = jax.ops.segment_sum(f[0], dst, n_dst)
        a2 = jax.ops.segment_max(f[1], dst, n_dst)
        a3 = jax.ops.segment_min(f[2], dst, n_dst)
        a4 = jax.ops.segment_sum(f[3], dst, n_dst)
        return jnp.concatenate([a1, a2, a3, a4], axis=1)

    agg_c = msg_and_agg(gs_x, gc_x, src_s2c, dst_s2c, p['msg_s2c_w1'], p['msg_s2c_b1'],
                        p['msg_s2c_w2'], p['msg_s2c_b2'], N_gc)
    new_cx = jnp.concatenate([gc_x, agg_c], 1) @ p['red_s2c_w'] + p['red_s2c_b']
    agg_s = msg_and_agg(gc_x, gs_x, src_c2s, dst_c2s, p['msg_c2s_w1'], p['msg_c2s_b1'],
                        p['msg_c2s_w2'], p['msg_c2s_b2'], N_gs)
    new_sx = jnp.concatenate([gs_x, agg_s], 1) @ p['red_c2s_w'] + p['red_c2s_b']

    out_fc = (jnp.maximum(jnp.concatenate([gc_x, new_cx], 1) @ p['gc_w1'] + p['gc_b1'], 0.0)
              @ p['gc_w2'] + p['gc_b2'])
    out_fs = (jnp.maximum(jnp.concatenate([gs_x, new_sx], 1) @ p['gs_w1'] + p['gs_b1'], 0.0)
              @ p['gs_w2'] + p['gs_b2'])
    return out_fc, out_fs


# ---------------------------------------------------------------------------
# Deterministic parameter init (shapes from Embedding_Model.__init__)
# ---------------------------------------------------------------------------
def init_params(key, n_gc, n_gs, n_hid):
    h = n_hid
    spec = [
        ('lin_gc_w', (n_gc, h)), ('lin_gc_b', (h,)),
        ('lin_gs_w', (n_gs, h)), ('lin_gs_b', (h,)),
        ('msg_s2c_w1', (2 * h, 2 * h)), ('msg_s2c_b1', (2 * h,)),
        ('msg_s2c_w2', (2 * h, 4 * h + 1)), ('msg_s2c_b2', (4 * h + 1,)),
        ('red_s2c_w', (5 * h, h)), ('red_s2c_b', (h,)),
        ('msg_c2s_w1', (2 * h, 2 * h)), ('msg_c2s_b1', (2 * h,)),
        ('msg_c2s_w2', (2 * h, 4 * h + 1)), ('msg_c2s_b2', (4 * h + 1,)),
        ('red_c2s_w', (5 * h, h)), ('red_c2s_b', (h,)),
        ('gc_w1', (2 * h, h)), ('gc_b1', (h,)),
        ('gc_w2', (h, h)), ('gc_b2', (h,)),
        ('gs_w1', (2 * h, h)), ('gs_b1', (h,)),
        ('gs_w2', (h, h)), ('gs_b2', (h,)),
    ]
    keys = jax.random.split(key, len(spec))
    return {name: 0.1 * jax.random.normal(k, shp, jnp.float32)
            for k, (name, shp) in zip(keys, spec)}


if __name__ == "__main__":
    n_gc_feat, n_gs_feat, n_hid = 6, 5, 32      # raw 'gc'/'gs' feature dims, hidden dim
    N_gc, N_gs = 8, 8                           # number of gc / gs nodes
    deg = 3                                     # out-degree per source node

    key = jax.random.PRNGKey(0)
    kp, kx1, kx2 = jax.random.split(key, 3)
    params = init_params(kp, n_gc_feat, n_gs_feat, n_hid)
    nf_gc = jax.random.normal(kx1, (N_gc, n_gc_feat), jnp.float32)
    nf_gs = jax.random.normal(kx2, (N_gs, n_gs_feat), jnp.float32)

    # deterministic bipartite graph; every node receives >= 1 edge on both edge types
    src_s2c = jnp.repeat(jnp.arange(N_gs), deg)
    dst_s2c = (jnp.repeat(jnp.arange(N_gs), deg) + jnp.tile(jnp.arange(deg), N_gs)) % N_gc
    src_c2s = jnp.repeat(jnp.arange(N_gc), deg)
    dst_c2s = (jnp.repeat(jnp.arange(N_gc), deg) + 2 * jnp.tile(jnp.arange(deg), N_gc) + 1) % N_gs

    # structural matrices stored in bf16 (0/1 exact); cast back to f32 in-kernel
    bf = jnp.bfloat16
    dstA_s2c = jax.nn.one_hot(dst_s2c, N_gc, dtype=jnp.float32)
    dstA_c2s = jax.nn.one_hot(dst_c2s, N_gs, dtype=jnp.float32)
    graph_mats = (
        jax.nn.one_hot(src_s2c, N_gs, dtype=jnp.float32).astype(bf),   # srcA_s2c [E, N_gs]
        dstA_s2c.astype(bf),                                           # dstA_s2c [E, N_gc]
        dstA_s2c.T.astype(bf),                                         # dmask_s2c [N_gc, E]
        jax.nn.one_hot(src_c2s, N_gc, dtype=jnp.float32).astype(bf),   # srcA_c2s [E, N_gc]
        dstA_c2s.astype(bf),                                           # dstA_c2s [E, N_gs]
        dstA_c2s.T.astype(bf),                                         # dmask_c2s [N_gs, E]
    )

    # one-time weight preprocessing (splits / zero-padded reduce weight), outside jit
    flat_params = jax.tree_util.tree_map(lambda x: x, preprocess_params(params, n_hid))

    fwd = jax.jit(functools.partial(pallas_forward, n_hid=n_hid))
    out_fc, out_fs = fwd(flat_params, nf_gc, nf_gs, graph_mats)
    jax.block_until_ready((out_fc, out_fs))

    ref_fc, ref_fs = ref_forward(params, nf_gc, nf_gs, src_s2c, dst_s2c,
                                 src_c2s, dst_c2s, n_hid)
    assert out_fc.shape == (N_gc, n_hid) and out_fs.shape == (N_gs, n_hid)
    assert jnp.allclose(out_fc, ref_fc, atol=1e-3, rtol=1e-3)
    assert jnp.allclose(out_fs, ref_fs, atol=1e-3, rtol=1e-3)
    print("KERNEL_OK")
</pallas_src>

<mosaic_0001>
module attributes {stable_mosaic.version = 11 : i64} {
  func.func @_fused_kernel(%arg0: i32, %arg1: memref<8x6xf32, #tpu.memory_space<vmem>>, %arg2: memref<8x5xf32, #tpu.memory_space<vmem>>, %arg3: memref<24x8xbf16, #tpu.memory_space<vmem>>, %arg4: memref<24x8xbf16, #tpu.memory_space<vmem>>, %arg5: memref<8x24xbf16, #tpu.memory_space<vmem>>, %arg6: memref<24x8xbf16, #tpu.memory_space<vmem>>, %arg7: memref<24x8xbf16, #tpu.memory_space<vmem>>, %arg8: memref<8x24xbf16, #tpu.memory_space<vmem>>, %arg9: memref<6x32xf32, #tpu.memory_space<vmem>>, %arg10: memref<1x32xf32, #tpu.memory_space<vmem>>, %arg11: memref<5x32xf32, #tpu.memory_space<vmem>>, %arg12: memref<1x32xf32, #tpu.memory_space<vmem>>, %arg13: memref<32x64xf32, #tpu.memory_space<vmem>>, %arg14: memref<32x64xf32, #tpu.memory_space<vmem>>, %arg15: memref<1x64xf32, #tpu.memory_space<vmem>>, %arg16: memref<64x128xf32, #tpu.memory_space<vmem>>, %arg17: memref<1x128xf32, #tpu.memory_space<vmem>>, %arg18: memref<1x64xf32, #tpu.memory_space<vmem>>, %arg19: memref<1x1xf32, #tpu.memory_space<vmem>>, %arg20: memref<32x32xf32, #tpu.memory_space<vmem>>, %arg21: memref<128x32xf32, #tpu.memory_space<vmem>>, %arg22: memref<32x32xf32, #tpu.memory_space<vmem>>, %arg23: memref<32x32xf32, #tpu.memory_space<vmem>>, %arg24: memref<1x32xf32, #tpu.memory_space<vmem>>, %arg25: memref<32x64xf32, #tpu.memory_space<vmem>>, %arg26: memref<32x64xf32, #tpu.memory_space<vmem>>, %arg27: memref<1x64xf32, #tpu.memory_space<vmem>>, %arg28: memref<64x128xf32, #tpu.memory_space<vmem>>, %arg29: memref<1x128xf32, #tpu.memory_space<vmem>>, %arg30: memref<1x64xf32, #tpu.memory_space<vmem>>, %arg31: memref<1x1xf32, #tpu.memory_space<vmem>>, %arg32: memref<32x32xf32, #tpu.memory_space<vmem>>, %arg33: memref<128x32xf32, #tpu.memory_space<vmem>>, %arg34: memref<32x32xf32, #tpu.memory_space<vmem>>, %arg35: memref<32x32xf32, #tpu.memory_space<vmem>>, %arg36: memref<1x32xf32, #tpu.memory_space<vmem>>, %arg37: memref<32x32xf32, #tpu.memory_space<vmem>>, %arg38: memref<32x32xf32, #tpu.memory_space<vmem>>, %arg39: memref<1x32xf32, #tpu.memory_space<vmem>>, %arg40: memref<32x32xf32, #tpu.memory_space<vmem>>, %arg41: memref<1x32xf32, #tpu.memory_space<vmem>>, %arg42: memref<32x32xf32, #tpu.memory_space<vmem>>, %arg43: memref<32x32xf32, #tpu.memory_space<vmem>>, %arg44: memref<1x32xf32, #tpu.memory_space<vmem>>, %arg45: memref<32x32xf32, #tpu.memory_space<vmem>>, %arg46: memref<1x32xf32, #tpu.memory_space<vmem>>, %arg47: memref<8x32xf32, #tpu.memory_space<vmem>>, %arg48: memref<8x32xf32, #tpu.memory_space<vmem>>) attributes {dimension_semantics = [#tpu.dimension_semantics<arbitrary>], iteration_bounds = array<i64: 1>, scalar_prefetch = 0 : i64, scratch_operands = 0 : i64, tpu.core_type = #tpu.core_type<tc>, window_params = [{pipeline_mode = #tpu.pipeline_mode<synchronous>, transform_indices = @transform_0, window_bounds = array<i64: 8, 6>}, {pipeline_mode = #tpu.pipeline_mode<synchronous>, transform_indices = @transform_1, window_bounds = array<i64: 8, 5>}, {pipeline_mode = #tpu.pipeline_mode<synchronous>, transform_indices = @transform_2, window_bounds = array<i64: 24, 8>}, {pipeline_mode = #tpu.pipeline_mode<synchronous>, transform_indices = @transform_3, window_bounds = array<i64: 24, 8>}, {pipeline_mode = #tpu.pipeline_mode<synchronous>, transform_indices = @transform_4, window_bounds = array<i64: 8, 24>}, {pipeline_mode = #tpu.pipeline_mode<synchronous>, transform_indices = @transform_5, window_bounds = array<i64: 24, 8>}, {pipeline_mode = #tpu.pipeline_mode<synchronous>, transform_indices = @transform_6, window_bounds = array<i64: 24, 8>}, {pipeline_mode = #tpu.pipeline_mode<synchronous>, transform_indices = @transform_7, window_bounds = array<i64: 8, 24>}, {pipeline_mode = #tpu.pipeline_mode<synchronous>, transform_indices = @transform_8, window_bounds = array<i64: 6, 32>}, {pipeline_mode = #tpu.pipeline_mode<synchronous>, transform_indices = @transform_9, window_bounds = array<i64: 1, 32>}, {pipeline_mode = #tpu.pipeline_mode<synchronous>, transform_indices = @transform_10, window_bounds = array<i64: 5, 32>}, {pipeline_mode = #tpu.pipeline_mode<synchronous>, transform_indices = @transform_11, window_bounds = array<i64: 1, 32>}, {pipeline_mode = #tpu.pipeline_mode<synchronous>, transform_indices = @transform_12, window_bounds = array<i64: 32, 64>}, {pipeline_mode = #tpu.pipeline_mode<synchronous>, transform_indices = @transform_13, window_bounds = array<i64: 32, 64>}, {pipeline_mode = #tpu.pipeline_mode<synchronous>, transform_indices = @transform_14, window_bounds = array<i64: 1, 64>}, {pipeline_mode = #tpu.pipeline_mode<synchronous>, transform_indices = @transform_15, window_bounds = array<i64: 64, 128>}, {pipeline_mode = #tpu.pipeline_mode<synchronous>, transform_indices = @transform_16, window_bounds = array<i64: 1, 128>}, {pipeline_mode = #tpu.pipeline_mode<synchronous>, transform_indices = @transform_17, window_bounds = array<i64: 1, 64>}, {pipeline_mode = #tpu.pipeline_mode<synchronous>, transform_indices = @transform_18, window_bounds = array<i64: 1, 1>}, {pipeline_mode = #tpu.pipeline_mode<synchronous>, transform_indices = @transform_19, window_bounds = array<i64: 32, 32>}, {pipeline_mode = #tpu.pipeline_mode<synchronous>, transform_indices = @transform_20, window_bounds = array<i64: 128, 32>}, {pipeline_mode = #tpu.pipeline_mode<synchronous>, transform_indices = @transform_21, window_bounds = array<i64: 32, 32>}, {pipeline_mode = #tpu.pipeline_mode<synchronous>, transform_indices = @transform_22, window_bounds = array<i64: 32, 32>}, {pipeline_mode = #tpu.pipeline_mode<synchronous>, transform_indices = @transform_23, window_bounds = array<i64: 1, 32>}, {pipeline_mode = #tpu.pipeline_mode<synchronous>, transform_indices = @transform_24, window_bounds = array<i64: 32, 64>}, {pipeline_mode = #tpu.pipeline_mode<synchronous>, transform_indices = @transform_25, window_bounds = array<i64: 32, 64>}, {pipeline_mode = #tpu.pipeline_mode<synchronous>, transform_indices = @transform_26, window_bounds = array<i64: 1, 64>}, {pipeline_mode = #tpu.pipeline_mode<synchronous>, transform_indices = @transform_27, window_bounds = array<i64: 64, 128>}, {pipeline_mode = #tpu.pipeline_mode<synchronous>, transform_indices = @transform_28, window_bounds = array<i64: 1, 128>}, {pipeline_mode = #tpu.pipeline_mode<synchronous>, transform_indices = @transform_29, window_bounds = array<i64: 1, 64>}, {pipeline_mode = #tpu.pipeline_mode<synchronous>, transform_indices = @transform_30, window_bounds = array<i64: 1, 1>}, {pipeline_mode = #tpu.pipeline_mode<synchronous>, transform_indices = @transform_31, window_bounds = array<i64: 32, 32>}, {pipeline_mode = #tpu.pipeline_mode<synchronous>, transform_indices = @transform_32, window_bounds = array<i64: 128, 32>}, {pipeline_mode = #tpu.pipeline_mode<synchronous>, transform_indices = @transform_33, window_bounds = array<i64: 32, 32>}, {pipeline_mode = #tpu.pipeline_mode<synchronous>, transform_indices = @transform_34, window_bounds = array<i64: 32, 32>}, {pipeline_mode = #tpu.pipeline_mode<synchronous>, transform_indices = @transform_35, window_bounds = array<i64: 1, 32>}, {pipeline_mode = #tpu.pipeline_mode<synchronous>, transform_indices = @transform_36, window_bounds = array<i64: 32, 32>}, {pipeline_mode = #tpu.pipeline_mode<synchronous>, transform_indices = @transform_37, window_bounds = array<i64: 32, 32>}, {pipeline_mode = #tpu.pipeline_mode<synchronous>, transform_indices = @transform_38, window_bounds = array<i64: 1, 32>}, {pipeline_mode = #tpu.pipeline_mode<synchronous>, transform_indices = @transform_39, window_bounds = array<i64: 32, 32>}, {pipeline_mode = #tpu.pipeline_mode<synchronous>, transform_indices = @transform_40, window_bounds = array<i64: 1, 32>}, {pipeline_mode = #tpu.pipeline_mode<synchronous>, transform_indices = @transform_41, window_bounds = array<i64: 32, 32>}, {pipeline_mode = #tpu.pipeline_mode<synchronous>, transform_indices = @transform_42, window_bounds = array<i64: 32, 32>}, {pipeline_mode = #tpu.pipeline_mode<synchronous>, transform_indices = @transform_43, window_bounds = array<i64: 1, 32>}, {pipeline_mode = #tpu.pipeline_mode<synchronous>, transform_indices = @transform_44, window_bounds = array<i64: 32, 32>}, {pipeline_mode = #tpu.pipeline_mode<synchronous>, transform_indices = @transform_45, window_bounds = array<i64: 1, 32>}, {pipeline_mode = #tpu.pipeline_mode<synchronous>, transform_indices = @transform_46, window_bounds = array<i64: 8, 32>}, {pipeline_mode = #tpu.pipeline_mode<synchronous>, transform_indices = @transform_47, window_bounds = array<i64: 8, 32>}]} {
    %c0 = arith.constant 0 : index
    %c0_0 = arith.constant 0 : index
    %0 = vector.load %arg1[%c0, %c0_0] : memref<8x6xf32, #tpu.memory_space<vmem>>, vector<8x6xf32>
    %c0_1 = arith.constant 0 : index
    %c0_2 = arith.constant 0 : index
    %1 = vector.load %arg9[%c0_1, %c0_2] : memref<6x32xf32, #tpu.memory_space<vmem>>, vector<6x32xf32>
    %cst = arith.constant dense<0.000000e+00> : vector<8x32xf32>
    %2 = tpu.matmul %0, %1, %cst {dimension_numbers = #tpu.dot_dimension_numbers<[1], [0], [0], [1], [0, 0, 1, 1], [], []>, precision = #tpu.contract_precision<fp32>} : vector<8x6xf32>, vector<6x32xf32>, vector<8x32xf32> -> vector<8x32xf32>
    %c0_3 = arith.constant 0 : index
    %c0_4 = arith.constant 0 : index
    %3 = vector.load %arg10[%c0_3, %c0_4] : memref<1x32xf32, #tpu.memory_space<vmem>>, vector<1x32xf32>
    %4 = vector.broadcast %3 : vector<1x32xf32> to vector<8x32xf32>
    %5 = arith.addf %2, %4 : vector<8x32xf32>
    %c0_5 = arith.constant 0 : index
    %c0_6 = arith.constant 0 : index
    %6 = vector.load %arg2[%c0_5, %c0_6] : memref<8x5xf32, #tpu.memory_space<vmem>>, vector<8x5xf32>
    %c0_7 = arith.constant 0 : index
    %c0_8 = arith.constant 0 : index
    %7 = vector.load %arg11[%c0_7, %c0_8] : memref<5x32xf32, #tpu.memory_space<vmem>>, vector<5x32xf32>
    %cst_9 = arith.constant dense<0.000000e+00> : vector<8x32xf32>
    %8 = tpu.matmul %6, %7, %cst_9 {dimension_numbers = #tpu.dot_dimension_numbers<[1], [0], [0], [1], [0, 0, 1, 1], [], []>, precision = #tpu.contract_precision<fp32>} : vector<8x5xf32>, vector<5x32xf32>, vector<8x32xf32> -> vector<8x32xf32>
    %c0_10 = arith.constant 0 : index
    %c0_11 = arith.constant 0 : index
    %9 = vector.load %arg12[%c0_10, %c0_11] : memref<1x32xf32, #tpu.memory_space<vmem>>, vector<1x32xf32>
    %10 = vector.broadcast %9 : vector<1x32xf32> to vector<8x32xf32>
    %11 = arith.addf %8, %10 : vector<8x32xf32>
    %c0_12 = arith.constant 0 : index
    %c0_13 = arith.constant 0 : index
    %12 = vector.load %arg3[%c0_12, %c0_13] : memref<24x8xbf16, #tpu.memory_space<vmem>>, vector<24x8xbf16>
    %13 = arith.extf %12 : vector<24x8xbf16> to vector<24x8xf32>
    %cst_14 = arith.constant dense<0.000000e+00> : vector<24x32xf32>
    %14 = tpu.matmul %13, %11, %cst_14 {dimension_numbers = #tpu.dot_dimension_numbers<[1], [0], [0], [1], [0, 0, 1, 1], [], []>, precision = #tpu.contract_precision<fp32>} : vector<24x8xf32>, vector<8x32xf32>, vector<24x32xf32> -> vector<24x32xf32>
    %c0_15 = arith.constant 0 : index
    %c0_16 = arith.constant 0 : index
    %15 = vector.load %arg4[%c0_15, %c0_16] : memref<24x8xbf16, #tpu.memory_space<vmem>>, vector<24x8xbf16>
    %16 = arith.extf %15 : vector<24x8xbf16> to vector<24x8xf32>
    %cst_17 = arith.constant dense<0.000000e+00> : vector<24x32xf32>
    %17 = tpu.matmul %16, %5, %cst_17 {dimension_numbers = #tpu.dot_dimension_numbers<[1], [0], [0], [1], [0, 0, 1, 1], [], []>, precision = #tpu.contract_precision<fp32>} : vector<24x8xf32>, vector<8x32xf32>, vector<24x32xf32> -> vector<24x32xf32>
    %c0_18 = arith.constant 0 : index
    %c0_19 = arith.constant 0 : index
    %18 = vector.load %arg13[%c0_18, %c0_19] : memref<32x64xf32, #tpu.memory_space<vmem>>, vector<32x64xf32>
    %cst_20 = arith.constant dense<0.000000e+00> : vector<24x64xf32>
    %19 = tpu.matmul %14, %18, %cst_20 {dimension_numbers = #tpu.dot_dimension_numbers<[1], [0], [0], [1], [0, 0, 1, 1], [], []>, precision = #tpu.contract_precision<fp32>} : vector<24x32xf32>, vector<32x64xf32>, vector<24x64xf32> -> vector<24x64xf32>
    %c0_21 = arith.constant 0 : index
    %c0_22 = arith.constant 0 : index
    %20 = vector.load %arg14[%c0_21, %c0_22] : memref<32x64xf32, #tpu.memory_space<vmem>>, vector<32x64xf32>
    %cst_23 = arith.constant dense<0.000000e+00> : vector<24x64xf32>
    %21 = tpu.matmul %17, %20, %cst_23 {dimension_numbers = #tpu.dot_dimension_numbers<[1], [0], [0], [1], [0, 0, 1, 1], [], []>, precision = #tpu.contract_precision<fp32>} : vector<24x32xf32>, vector<32x64xf32>, vector<24x64xf32> -> vector<24x64xf32>
    %22 = arith.addf %19, %21 : vector<24x64xf32>
    %c0_24 = arith.constant 0 : index
    %c0_25 = arith.constant 0 : index
    %23 = vector.load %arg15[%c0_24, %c0_25] : memref<1x64xf32, #tpu.memory_space<vmem>>, vector<1x64xf32>
    %24 = vector.broadcast %23 : vector<1x64xf32> to vector<24x64xf32>
    %25 = arith.addf %22, %24 : vector<24x64xf32>
    %cst_26 = arith.constant 0.000000e+00 : f32
    %26 = vector.broadcast %cst_26 : f32 to vector<24x64xf32>
    %27 = arith.maximumf %25, %26 : vector<24x64xf32>
    %c0_27 = arith.constant 0 : index
    %c0_28 = arith.constant 0 : index
    %28 = vector.load %arg18[%c0_27, %c0_28] : memref<1x64xf32, #tpu.memory_space<vmem>>, vector<1x64xf32>
    %29 = vector.broadcast %28 : vector<1x64xf32> to vector<24x64xf32>
    %30 = arith.mulf %27, %29 : vector<24x64xf32>
    %cst_29 = arith.constant dense<0.000000e+00> : vector<24xf32>
    %31 = vector.multi_reduction <add>, %30, %cst_29 [1] : vector<24x64xf32> to vector<24xf32>
    %32 = vector.shape_cast %31 : vector<24xf32> to vector<24x1xf32>
    %c0_30 = arith.constant 0 : index
    %c0_31 = arith.constant 0 : index
    %33 = vector.load %arg19[%c0_30, %c0_31] : memref<1x1xf32, #tpu.memory_space<vmem>>, vector<1x1xf32>
    %34 = vector.broadcast %33 : vector<1x1xf32> to vector<24x1xf32>
    %35 = arith.addf %32, %34 : vector<24x1xf32>
    %cst_32 = arith.constant 0.000000e+00 : f32
    %36 = vector.broadcast %cst_32 : f32 to vector<24x1xf32>
    %37 = arith.subf %36, %35 : vector<24x1xf32>
    %38 = math.exp %37 : vector<24x1xf32>
    %cst_33 = arith.constant 1.000000e+00 : f32
    %39 = vector.broadcast %cst_33 : f32 to vector<24x1xf32>
    %40 = arith.addf %39, %38 : vector<24x1xf32>
    %cst_34 = arith.constant 1.000000e+00 : f32
    %41 = vector.broadcast %cst_34 : f32 to vector<24x1xf32>
    %42 = arith.divf %41, %40 : vector<24x1xf32>
    %c0_35 = arith.constant 0 : index
    %c0_36 = arith.constant 0 : index
    %43 = vector.load %arg16[%c0_35, %c0_36] : memref<64x128xf32, #tpu.memory_space<vmem>>, vector<64x128xf32>
    %cst_37 = arith.constant dense<0.000000e+00> : vector<24x128xf32>
    %44 = tpu.matmul %27, %43, %cst_37 {dimension_numbers = #tpu.dot_dimension_numbers<[1], [0], [0], [1], [0, 0, 1, 1], [], []>, precision = #tpu.contract_precision<fp32>} : vector<24x64xf32>, vector<64x128xf32>, vector<24x128xf32> -> vector<24x128xf32>
    %c0_38 = arith.constant 0 : index
    %c0_39 = arith.constant 0 : index
    %45 = vector.load %arg17[%c0_38, %c0_39] : memref<1x128xf32, #tpu.memory_space<vmem>>, vector<1x128xf32>
    %46 = vector.broadcast %45 : vector<1x128xf32> to vector<24x128xf32>
    %47 = arith.addf %44, %46 : vector<24x128xf32>
    %48 = vector.broadcast %42 : vector<24x1xf32> to vector<24x128xf32>
    %49 = arith.mulf %47, %48 : vector<24x128xf32>
    %c0_40 = arith.constant 0 : index
    %c0_41 = arith.constant 0 : index
    %50 = vector.load %arg5[%c0_40, %c0_41] : memref<8x24xbf16, #tpu.memory_space<vmem>>, vector<8x24xbf16>
    %51 = arith.extf %50 : vector<8x24xbf16> to vector<8x24xf32>
    %cst_42 = arith.constant dense<0.000000e+00> : vector<8x128xf32>
    %52 = tpu.matmul %51, %49, %cst_42 {dimension_numbers = #tpu.dot_dimension_numbers<[1], [0], [0], [1], [0, 0, 1, 1], [], []>, precision = #tpu.contract_precision<fp32>} : vector<8x24xf32>, vector<24x128xf32>, vector<8x128xf32> -> vector<8x128xf32>
    %53 = vector.extract_strided_slice %49 {offsets = [0, 32], sizes = [24, 32], strides = [1, 1]} : vector<24x128xf32> to vector<24x32xf32>
    %54 = vector.extract_strided_slice %49 {offsets = [0, 64], sizes = [24, 32], strides = [1, 1]} : vector<24x128xf32> to vector<24x32xf32>
    %cst_43 = arith.constant 0xFF800000 : f32
    %55 = vector.broadcast %cst_43 : f32 to vector<8x32xf32>
    %cst_44 = arith.constant 0x7F800000 : f32
    %56 = vector.broadcast %cst_44 : f32 to vector<8x32xf32>
    %57 = vector.shape_cast %51 : vector<8x24xf32> to vector<8x24x1xf32>
    %cst_45 = arith.constant 5.000000e-01 : f32
    %58 = vector.broadcast %cst_45 : f32 to vector<8x24x1xf32>
    %59 = arith.cmpf ogt, %57, %58 : vector<8x24x1xf32>
    %60 = vector.shape_cast %53 : vector<24x32xf32> to vector<1x24x32xf32>
    %cst_46 = arith.constant 0xFF800000 : f32
    %61 = vector.shape_cast %59 : vector<8x24x1xi1> to vector<8x24x1xi1>
    %62 = vector.broadcast %61 : vector<8x24x1xi1> to vector<8x24x32xi1>
    %63 = vector.shape_cast %60 : vector<1x24x32xf32> to vector<1x24x32xf32>
    %64 = vector.broadcast %63 : vector<1x24x32xf32> to vector<8x24x32xf32>
    %65 = vector.broadcast %cst_46 : f32 to vector<8x24x32xf32>
    %66 = arith.select %62, %64, %65 : vector<8x24x32xi1>, vector<8x24x32xf32>
    %cst_47 = arith.constant dense<0xFF800000> : vector<8x32xf32>
    %67 = vector.multi_reduction <maximumf>, %66, %cst_47 [1] : vector<8x24x32xf32> to vector<8x32xf32>
    %68 = arith.maximumf %55, %67 : vector<8x32xf32>
    %69 = vector.shape_cast %54 : vector<24x32xf32> to vector<1x24x32xf32>
    %cst_48 = arith.constant 0x7F800000 : f32
    %70 = vector.shape_cast %59 : vector<8x24x1xi1> to vector<8x24x1xi1>
    %71 = vector.broadcast %70 : vector<8x24x1xi1> to vector<8x24x32xi1>
    %72 = vector.shape_cast %69 : vector<1x24x32xf32> to vector<1x24x32xf32>
    %73 = vector.broadcast %72 : vector<1x24x32xf32> to vector<8x24x32xf32>
    %74 = vector.broadcast %cst_48 : f32 to vector<8x24x32xf32>
    %75 = arith.select %71, %73, %74 : vector<8x24x32xi1>, vector<8x24x32xf32>
    %cst_49 = arith.constant dense<0x7F800000> : vector<8x32xf32>
    %76 = vector.multi_reduction <minimumf>, %75, %cst_49 [1] : vector<8x24x32xf32> to vector<8x32xf32>
    %77 = arith.minimumf %56, %76 : vector<8x32xf32>
    %cst_50 = arith.constant dense<0.000000e+00> : vector<8xf32>
    %78 = vector.multi_reduction <add>, %51, %cst_50 [1] : vector<8x24xf32> to vector<8xf32>
    %79 = vector.shape_cast %78 : vector<8xf32> to vector<8x1xf32>
    %cst_51 = arith.constant 5.000000e-01 : f32
    %80 = vector.broadcast %cst_51 : f32 to vector<8x1xf32>
    %81 = arith.cmpf ogt, %79, %80 : vector<8x1xf32>
    %cst_52 = arith.constant 0.000000e+00 : f32
    %82 = vector.shape_cast %81 : vector<8x1xi1> to vector<8x1xi1>
    %83 = vector.broadcast %82 : vector<8x1xi1> to vector<8x32xi1>
    %84 = vector.broadcast %cst_52 : f32 to vector<8x32xf32>
    %85 = arith.select %83, %68, %84 : vector<8x32xi1>, vector<8x32xf32>
    %cst_53 = arith.constant 5.000000e-01 : f32
    %86 = vector.broadcast %cst_53 : f32 to vector<8x1xf32>
    %87 = arith.cmpf ogt, %79, %86 : vector<8x1xf32>
    %cst_54 = arith.constant 0.000000e+00 : f32
    %88 = vector.shape_cast %87 : vector<8x1xi1> to vector<8x1xi1>
    %89 = vector.broadcast %88 : vector<8x1xi1> to vector<8x32xi1>
    %90 = vector.broadcast %cst_54 : f32 to vector<8x32xf32>
    %91 = arith.select %89, %77, %90 : vector<8x32xi1>, vector<8x32xf32>
    %c0_55 = arith.constant 0 : index
    %c0_56 = arith.constant 0 : index
    %92 = vector.load %arg20[%c0_55, %c0_56] : memref<32x32xf32, #tpu.memory_space<vmem>>, vector<32x32xf32>
    %cst_57 = arith.constant dense<0.000000e+00> : vector<8x32xf32>
    %93 = tpu.matmul %5, %92, %cst_57 {dimension_numbers = #tpu.dot_dimension_numbers<[1], [0], [0], [1], [0, 0, 1, 1], [], []>, precision = #tpu.contract_precision<fp32>} : vector<8x32xf32>, vector<32x32xf32>, vector<8x32xf32> -> vector<8x32xf32>
    %c0_58 = arith.constant 0 : index
    %c0_59 = arith.constant 0 : index
    %94 = vector.load %arg21[%c0_58, %c0_59] : memref<128x32xf32, #tpu.memory_space<vmem>>, vector<128x32xf32>
    %cst_60 = arith.constant dense<0.000000e+00> : vector<8x32xf32>
    %95 = tpu.matmul %52, %94, %cst_60 {dimension_numbers = #tpu.dot_dimension_numbers<[1], [0], [0], [1], [0, 0, 1, 1], [], []>, precision = #tpu.contract_precision<fp32>} : vector<8x128xf32>, vector<128x32xf32>, vector<8x32xf32> -> vector<8x32xf32>
    %96 = arith.addf %93, %95 : vector<8x32xf32>
    %c0_61 = arith.constant 0 : index
    %c0_62 = arith.constant 0 : index
    %97 = vector.load %arg22[%c0_61, %c0_62] : memref<32x32xf32, #tpu.memory_space<vmem>>, vector<32x32xf32>
    %cst_63 = arith.constant dense<0.000000e+00> : vector<8x32xf32>
    %98 = tpu.matmul %85, %97, %cst_63 {dimension_numbers = #tpu.dot_dimension_numbers<[1], [0], [0], [1], [0, 0, 1, 1], [], []>, precision = #tpu.contract_precision<fp32>} : vector<8x32xf32>, vector<32x32xf32>, vector<8x32xf32> -> vector<8x32xf32>
    %99 = arith.addf %96, %98 : vector<8x32xf32>
    %c0_64 = arith.constant 0 : index
    %c0_65 = arith.constant 0 : index
    %100 = vector.load %arg23[%c0_64, %c0_65] : memref<32x32xf32, #tpu.memory_space<vmem>>, vector<32x32xf32>
    %cst_66 = arith.constant dense<0.000000e+00> : vector<8x32xf32>
    %101 = tpu.matmul %91, %100, %cst_66 {dimension_numbers = #tpu.dot_dimension_numbers<[1], [0], [0], [1], [0, 0, 1, 1], [], []>, precision = #tpu.contract_precision<fp32>} : vector<8x32xf32>, vector<32x32xf32>, vector<8x32xf32> -> vector<8x32xf32>
    %102 = arith.addf %99, %101 : vector<8x32xf32>
    %c0_67 = arith.constant 0 : index
    %c0_68 = arith.constant 0 : index
    %103 = vector.load %arg24[%c0_67, %c0_68] : memref<1x32xf32, #tpu.memory_space<vmem>>, vector<1x32xf32>
    %104 = vector.broadcast %103 : vector<1x32xf32> to vector<8x32xf32>
    %105 = arith.addf %102, %104 : vector<8x32xf32>
    %c0_69 = arith.constant 0 : index
    %c0_70 = arith.constant 0 : index
    %106 = vector.load %arg6[%c0_69, %c0_70] : memref<24x8xbf16, #tpu.memory_space<vmem>>, vector<24x8xbf16>
    %107 = arith.extf %106 : vector<24x8xbf16> to vector<24x8xf32>
    %cst_71 = arith.constant dense<0.000000e+00> : vector<24x32xf32>
    %108 = tpu.matmul %107, %5, %cst_71 {dimension_numbers = #tpu.dot_dimension_numbers<[1], [0], [0], [1], [0, 0, 1, 1], [], []>, precision = #tpu.contract_precision<fp32>} : vector<24x8xf32>, vector<8x32xf32>, vector<24x32xf32> -> vector<24x32xf32>
    %c0_72 = arith.constant 0 : index
    %c0_73 = arith.constant 0 : index
    %109 = vector.load %arg7[%c0_72, %c0_73] : memref<24x8xbf16, #tpu.memory_space<vmem>>, vector<24x8xbf16>
    %110 = arith.extf %109 : vector<24x8xbf16> to vector<24x8xf32>
    %cst_74 = arith.constant dense<0.000000e+00> : vector<24x32xf32>
    %111 = tpu.matmul %110, %11, %cst_74 {dimension_numbers = #tpu.dot_dimension_numbers<[1], [0], [0], [1], [0, 0, 1, 1], [], []>, precision = #tpu.contract_precision<fp32>} : vector<24x8xf32>, vector<8x32xf32>, vector<24x32xf32> -> vector<24x32xf32>
    %c0_75 = arith.constant 0 : index
    %c0_76 = arith.constant 0 : index
    %112 = vector.load %arg25[%c0_75, %c0_76] : memref<32x64xf32, #tpu.memory_space<vmem>>, vector<32x64xf32>
    %cst_77 = arith.constant dense<0.000000e+00> : vector<24x64xf32>
    %113 = tpu.matmul %108, %112, %cst_77 {dimension_numbers = #tpu.dot_dimension_numbers<[1], [0], [0], [1], [0, 0, 1, 1], [], []>, precision = #tpu.contract_precision<fp32>} : vector<24x32xf32>, vector<32x64xf32>, vector<24x64xf32> -> vector<24x64xf32>
    %c0_78 = arith.constant 0 : index
    %c0_79 = arith.constant 0 : index
    %114 = vector.load %arg26[%c0_78, %c0_79] : memref<32x64xf32, #tpu.memory_space<vmem>>, vector<32x64xf32>
    %cst_80 = arith.constant dense<0.000000e+00> : vector<24x64xf32>
    %115 = tpu.matmul %111, %114, %cst_80 {dimension_numbers = #tpu.dot_dimension_numbers<[1], [0], [0], [1], [0, 0, 1, 1], [], []>, precision = #tpu.contract_precision<fp32>} : vector<24x32xf32>, vector<32x64xf32>, vector<24x64xf32> -> vector<24x64xf32>
    %116 = arith.addf %113, %115 : vector<24x64xf32>
    %c0_81 = arith.constant 0 : index
    %c0_82 = arith.constant 0 : index
    %117 = vector.load %arg27[%c0_81, %c0_82] : memref<1x64xf32, #tpu.memory_space<vmem>>, vector<1x64xf32>
    %118 = vector.broadcast %117 : vector<1x64xf32> to vector<24x64xf32>
    %119 = arith.addf %116, %118 : vector<24x64xf32>
    %cst_83 = arith.constant 0.000000e+00 : f32
    %120 = vector.broadcast %cst_83 : f32 to vector<24x64xf32>
    %121 = arith.maximumf %119, %120 : vector<24x64xf32>
    %c0_84 = arith.constant 0 : index
    %c0_85 = arith.constant 0 : index
    %122 = vector.load %arg30[%c0_84, %c0_85] : memref<1x64xf32, #tpu.memory_space<vmem>>, vector<1x64xf32>
    %123 = vector.broadcast %122 : vector<1x64xf32> to vector<24x64xf32>
    %124 = arith.mulf %121, %123 : vector<24x64xf32>
    %cst_86 = arith.constant dense<0.000000e+00> : vector<24xf32>
    %125 = vector.multi_reduction <add>, %124, %cst_86 [1] : vector<24x64xf32> to vector<24xf32>
    %126 = vector.shape_cast %125 : vector<24xf32> to vector<24x1xf32>
    %c0_87 = arith.constant 0 : index
    %c0_88 = arith.constant 0 : index
    %127 = vector.load %arg31[%c0_87, %c0_88] : memref<1x1xf32, #tpu.memory_space<vmem>>, vector<1x1xf32>
    %128 = vector.broadcast %127 : vector<1x1xf32> to vector<24x1xf32>
    %129 = arith.addf %126, %128 : vector<24x1xf32>
    %cst_89 = arith.constant 0.000000e+00 : f32
    %130 = vector.broadcast %cst_89 : f32 to vector<24x1xf32>
    %131 = arith.subf %130, %129 : vector<24x1xf32>
    %132 = math.exp %131 : vector<24x1xf32>
    %cst_90 = arith.constant 1.000000e+00 : f32
    %133 = vector.broadcast %cst_90 : f32 to vector<24x1xf32>
    %134 = arith.addf %133, %132 : vector<24x1xf32>
    %cst_91 = arith.constant 1.000000e+00 : f32
    %135 = vector.broadcast %cst_91 : f32 to vector<24x1xf32>
    %136 = arith.divf %135, %134 : vector<24x1xf32>
    %c0_92 = arith.constant 0 : index
    %c0_93 = arith.constant 0 : index
    %137 = vector.load %arg28[%c0_92, %c0_93] : memref<64x128xf32, #tpu.memory_space<vmem>>, vector<64x128xf32>
    %cst_94 = arith.constant dense<0.000000e+00> : vector<24x128xf32>
    %138 = tpu.matmul %121, %137, %cst_94 {dimension_numbers = #tpu.dot_dimension_numbers<[1], [0], [0], [1], [0, 0, 1, 1], [], []>, precision = #tpu.contract_precision<fp32>} : vector<24x64xf32>, vector<64x128xf32>, vector<24x128xf32> -> vector<24x128xf32>
    %c0_95 = arith.constant 0 : index
    %c0_96 = arith.constant 0 : index
    %139 = vector.load %arg29[%c0_95, %c0_96] : memref<1x128xf32, #tpu.memory_space<vmem>>, vector<1x128xf32>
    %140 = vector.broadcast %139 : vector<1x128xf32> to vector<24x128xf32>
    %141 = arith.addf %138, %140 : vector<24x128xf32>
    %142 = vector.broadcast %136 : vector<24x1xf32> to vector<24x128xf32>
    %143 = arith.mulf %141, %142 : vector<24x128xf32>
    %c0_97 = arith.constant 0 : index
    %c0_98 = arith.constant 0 : index
    %144 = vector.load %arg8[%c0_97, %c0_98] : memref<8x24xbf16, #tpu.memory_space<vmem>>, vector<8x24xbf16>
    %145 = arith.extf %144 : vector<8x24xbf16> to vector<8x24xf32>
    %cst_99 = arith.constant dense<0.000000e+00> : vector<8x128xf32>
    %146 = tpu.matmul %145, %143, %cst_99 {dimension_numbers = #tpu.dot_dimension_numbers<[1], [0], [0], [1], [0, 0, 1, 1], [], []>, precision = #tpu.contract_precision<fp32>} : vector<8x24xf32>, vector<24x128xf32>, vector<8x128xf32> -> vector<8x128xf32>
    %147 = vector.extract_strided_slice %143 {offsets = [0, 32], sizes = [24, 32], strides = [1, 1]} : vector<24x128xf32> to vector<24x32xf32>
    %148 = vector.extract_strided_slice %143 {offsets = [0, 64], sizes = [24, 32], strides = [1, 1]} : vector<24x128xf32> to vector<24x32xf32>
    %cst_100 = arith.constant 0xFF800000 : f32
    %149 = vector.broadcast %cst_100 : f32 to vector<8x32xf32>
    %cst_101 = arith.constant 0x7F800000 : f32
    %150 = vector.broadcast %cst_101 : f32 to vector<8x32xf32>
    %151 = vector.shape_cast %145 : vector<8x24xf32> to vector<8x24x1xf32>
    %cst_102 = arith.constant 5.000000e-01 : f32
    %152 = vector.broadcast %cst_102 : f32 to vector<8x24x1xf32>
    %153 = arith.cmpf ogt, %151, %152 : vector<8x24x1xf32>
    %154 = vector.shape_cast %147 : vector<24x32xf32> to vector<1x24x32xf32>
    %cst_103 = arith.constant 0xFF800000 : f32
    %155 = vector.shape_cast %153 : vector<8x24x1xi1> to vector<8x24x1xi1>
    %156 = vector.broadcast %155 : vector<8x24x1xi1> to vector<8x24x32xi1>
    %157 = vector.shape_cast %154 : vector<1x24x32xf32> to vector<1x24x32xf32>
    %158 = vector.broadcast %157 : vector<1x24x32xf32> to vector<8x24x32xf32>
    %159 = vector.broadcast %cst_103 : f32 to vector<8x24x32xf32>
    %160 = arith.select %156, %158, %159 : vector<8x24x32xi1>, vector<8x24x32xf32>
    %cst_104 = arith.constant dense<0xFF800000> : vector<8x32xf32>
    %161 = vector.multi_reduction <maximumf>, %160, %cst_104 [1] : vector<8x24x32xf32> to vector<8x32xf32>
    %162 = arith.maximumf %149, %161 : vector<8x32xf32>
    %163 = vector.shape_cast %148 : vector<24x32xf32> to vector<1x24x32xf32>
    %cst_105 = arith.constant 0x7F800000 : f32
    %164 = vector.shape_cast %153 : vector<8x24x1xi1> to vector<8x24x1xi1>
    %165 = vector.broadcast %164 : vector<8x24x1xi1> to vector<8x24x32xi1>
    %166 = vector.shape_cast %163 : vector<1x24x32xf32> to vector<1x24x32xf32>
    %167 = vector.broadcast %166 : vector<1x24x32xf32> to vector<8x24x32xf32>
    %168 = vector.broadcast %cst_105 : f32 to vector<8x24x32xf32>
    %169 = arith.select %165, %167, %168 : vector<8x24x32xi1>, vector<8x24x32xf32>
    %cst_106 = arith.constant dense<0x7F800000> : vector<8x32xf32>
    %170 = vector.multi_reduction <minimumf>, %169, %cst_106 [1] : vector<8x24x32xf32> to vector<8x32xf32>
    %171 = arith.minimumf %150, %170 : vector<8x32xf32>
    %cst_107 = arith.constant dense<0.000000e+00> : vector<8xf32>
    %172 = vector.multi_reduction <add>, %145, %cst_107 [1] : vector<8x24xf32> to vector<8xf32>
    %173 = vector.shape_cast %172 : vector<8xf32> to vector<8x1xf32>
    %cst_108 = arith.constant 5.000000e-01 : f32
    %174 = vector.broadcast %cst_108 : f32 to vector<8x1xf32>
    %175 = arith.cmpf ogt, %173, %174 : vector<8x1xf32>
    %cst_109 = arith.constant 0.000000e+00 : f32
    %176 = vector.shape_cast %175 : vector<8x1xi1> to vector<8x1xi1>
    %177 = vector.broadcast %176 : vector<8x1xi1> to vector<8x32xi1>
    %178 = vector.broadcast %cst_109 : f32 to vector<8x32xf32>
    %179 = arith.select %177, %162, %178 : vector<8x32xi1>, vector<8x32xf32>
    %cst_110 = arith.constant 5.000000e-01 : f32
    %180 = vector.broadcast %cst_110 : f32 to vector<8x1xf32>
    %181 = arith.cmpf ogt, %173, %180 : vector<8x1xf32>
    %cst_111 = arith.constant 0.000000e+00 : f32
    %182 = vector.shape_cast %181 : vector<8x1xi1> to vector<8x1xi1>
    %183 = vector.broadcast %182 : vector<8x1xi1> to vector<8x32xi1>
    %184 = vector.broadcast %cst_111 : f32 to vector<8x32xf32>
    %185 = arith.select %183, %171, %184 : vector<8x32xi1>, vector<8x32xf32>
    %c0_112 = arith.constant 0 : index
    %c0_113 = arith.constant 0 : index
    %186 = vector.load %arg32[%c0_112, %c0_113] : memref<32x32xf32, #tpu.memory_space<vmem>>, vector<32x32xf32>
    %cst_114 = arith.constant dense<0.000000e+00> : vector<8x32xf32>
    %187 = tpu.matmul %11, %186, %cst_114 {dimension_numbers = #tpu.dot_dimension_numbers<[1], [0], [0], [1], [0, 0, 1, 1], [], []>, precision = #tpu.contract_precision<fp32>} : vector<8x32xf32>, vector<32x32xf32>, vector<8x32xf32> -> vector<8x32xf32>
    %c0_115 = arith.constant 0 : index
    %c0_116 = arith.constant 0 : index
    %188 = vector.load %arg33[%c0_115, %c0_116] : memref<128x32xf32, #tpu.memory_space<vmem>>, vector<128x32xf32>
    %cst_117 = arith.constant dense<0.000000e+00> : vector<8x32xf32>
    %189 = tpu.matmul %146, %188, %cst_117 {dimension_numbers = #tpu.dot_dimension_numbers<[1], [0], [0], [1], [0, 0, 1, 1], [], []>, precision = #tpu.contract_precision<fp32>} : vector<8x128xf32>, vector<128x32xf32>, vector<8x32xf32> -> vector<8x32xf32>
    %190 = arith.addf %187, %189 : vector<8x32xf32>
    %c0_118 = arith.constant 0 : index
    %c0_119 = arith.constant 0 : index
    %191 = vector.load %arg34[%c0_118, %c0_119] : memref<32x32xf32, #tpu.memory_space<vmem>>, vector<32x32xf32>
    %cst_120 = arith.constant dense<0.000000e+00> : vector<8x32xf32>
    %192 = tpu.matmul %179, %191, %cst_120 {dimension_numbers = #tpu.dot_dimension_numbers<[1], [0], [0], [1], [0, 0, 1, 1], [], []>, precision = #tpu.contract_precision<fp32>} : vector<8x32xf32>, vector<32x32xf32>, vector<8x32xf32> -> vector<8x32xf32>
    %193 = arith.addf %190, %192 : vector<8x32xf32>
    %c0_121 = arith.constant 0 : index
    %c0_122 = arith.constant 0 : index
    %194 = vector.load %arg35[%c0_121, %c0_122] : memref<32x32xf32, #tpu.memory_space<vmem>>, vector<32x32xf32>
    %cst_123 = arith.constant dense<0.000000e+00> : vector<8x32xf32>
    %195 = tpu.matmul %185, %194, %cst_123 {dimension_numbers = #tpu.dot_dimension_numbers<[1], [0], [0], [1], [0, 0, 1, 1], [], []>, precision = #tpu.contract_precision<fp32>} : vector<8x32xf32>, vector<32x32xf32>, vector<8x32xf32> -> vector<8x32xf32>
    %196 = arith.addf %193, %195 : vector<8x32xf32>
    %c0_124 = arith.constant 0 : index
    %c0_125 = arith.constant 0 : index
    %197 = vector.load %arg36[%c0_124, %c0_125] : memref<1x32xf32, #tpu.memory_space<vmem>>, vector<1x32xf32>
    %198 = vector.broadcast %197 : vector<1x32xf32> to vector<8x32xf32>
    %199 = arith.addf %196, %198 : vector<8x32xf32>
    %c0_126 = arith.constant 0 : index
    %c0_127 = arith.constant 0 : index
    %200 = vector.load %arg37[%c0_126, %c0_127] : memref<32x32xf32, #tpu.memory_space<vmem>>, vector<32x32xf32>
    %cst_128 = arith.constant dense<0.000000e+00> : vector<8x32xf32>
    %201 = tpu.matmul %5, %200, %cst_128 {dimension_numbers = #tpu.dot_dimension_numbers<[1], [0], [0], [1], [0, 0, 1, 1], [], []>, precision = #tpu.contract_precision<fp32>} : vector<8x32xf32>, vector<32x32xf32>, vector<8x32xf32> -> vector<8x32xf32>
    %c0_129 = arith.constant 0 : index
    %c0_130 = arith.constant 0 : index
    %202 = vector.load %arg38[%c0_129, %c0_130] : memref<32x32xf32, #tpu.memory_space<vmem>>, vector<32x32xf32>
    %cst_131 = arith.constant dense<0.000000e+00> : vector<8x32xf32>
    %203 = tpu.matmul %105, %202, %cst_131 {dimension_numbers = #tpu.dot_dimension_numbers<[1], [0], [0], [1], [0, 0, 1, 1], [], []>, precision = #tpu.contract_precision<fp32>} : vector<8x32xf32>, vector<32x32xf32>, vector<8x32xf32> -> vector<8x32xf32>
    %204 = arith.addf %201, %203 : vector<8x32xf32>
    %c0_132 = arith.constant 0 : index
    %c0_133 = arith.constant 0 : index
    %205 = vector.load %arg39[%c0_132, %c0_133] : memref<1x32xf32, #tpu.memory_space<vmem>>, vector<1x32xf32>
    %206 = vector.broadcast %205 : vector<1x32xf32> to vector<8x32xf32>
    %207 = arith.addf %204, %206 : vector<8x32xf32>
    %cst_134 = arith.constant 0.000000e+00 : f32
    %208 = vector.broadcast %cst_134 : f32 to vector<8x32xf32>
    %209 = arith.maximumf %207, %208 : vector<8x32xf32>
    %c0_135 = arith.constant 0 : index
    %c0_136 = arith.constant 0 : index
    %210 = vector.load %arg40[%c0_135, %c0_136] : memref<32x32xf32, #tpu.memory_space<vmem>>, vector<32x32xf32>
    %cst_137 = arith.constant dense<0.000000e+00> : vector<8x32xf32>
    %211 = tpu.matmul %209, %210, %cst_137 {dimension_numbers = #tpu.dot_dimension_numbers<[1], [0], [0], [1], [0, 0, 1, 1], [], []>, precision = #tpu.contract_precision<fp32>} : vector<8x32xf32>, vector<32x32xf32>, vector<8x32xf32> -> vector<8x32xf32>
    %c0_138 = arith.constant 0 : index
    %c0_139 = arith.constant 0 : index
    %212 = vector.load %arg41[%c0_138, %c0_139] : memref<1x32xf32, #tpu.memory_space<vmem>>, vector<1x32xf32>
    %213 = vector.broadcast %212 : vector<1x32xf32> to vector<8x32xf32>
    %214 = arith.addf %211, %213 : vector<8x32xf32>
    %c0_140 = arith.constant 0 : index
    %c0_141 = arith.constant 0 : index
    %215 = vector.load %arg47[%c0_140, %c0_141] : memref<8x32xf32, #tpu.memory_space<vmem>>, vector<8x32xf32>
    tpu.vector_store %arg47[%c0_140, %c0_141], %214 {strides = array<i32>} : memref<8x32xf32, #tpu.memory_space<vmem>>, vector<8x32xf32>,
    %c0_142 = arith.constant 0 : index
    %c0_143 = arith.constant 0 : index
    %216 = vector.load %arg42[%c0_142, %c0_143] : memref<32x32xf32, #tpu.memory_space<vmem>>, vector<32x32xf32>
    %cst_144 = arith.constant dense<0.000000e+00> : vector<8x32xf32>
    %217 = tpu.matmul %11, %216, %cst_144 {dimension_numbers = #tpu.dot_dimension_numbers<[1], [0], [0], [1], [0, 0, 1, 1], [], []>, precision = #tpu.contract_precision<fp32>} : vector<8x32xf32>, vector<32x32xf32>, vector<8x32xf32> -> vector<8x32xf32>
    %c0_145 = arith.constant 0 : index
    %c0_146 = arith.constant 0 : index
    %218 = vector.load %arg43[%c0_145, %c0_146] : memref<32x32xf32, #tpu.memory_space<vmem>>, vector<32x32xf32>
    %cst_147 = arith.constant dense<0.000000e+00> : vector<8x32xf32>
    %219 = tpu.matmul %199, %218, %cst_147 {dimension_numbers = #tpu.dot_dimension_numbers<[1], [0], [0], [1], [0, 0, 1, 1], [], []>, precision = #tpu.contract_precision<fp32>} : vector<8x32xf32>, vector<32x32xf32>, vector<8x32xf32> -> vector<8x32xf32>
    %220 = arith.addf %217, %219 : vector<8x32xf32>
    %c0_148 = arith.constant 0 : index
    %c0_149 = arith.constant 0 : index
    %221 = vector.load %arg44[%c0_148, %c0_149] : memref<1x32xf32, #tpu.memory_space<vmem>>, vector<1x32xf32>
    %222 = vector.broadcast %221 : vector<1x32xf32> to vector<8x32xf32>
    %223 = arith.addf %220, %222 : vector<8x32xf32>
    %cst_150 = arith.constant 0.000000e+00 : f32
    %224 = vector.broadcast %cst_150 : f32 to vector<8x32xf32>
    %225 = arith.maximumf %223, %224 : vector<8x32xf32>
    %c0_151 = arith.constant 0 : index
    %c0_152 = arith.constant 0 : index
    %226 = vector.load %arg45[%c0_151, %c0_152] : memref<32x32xf32, #tpu.memory_space<vmem>>, vector<32x32xf32>
    %cst_153 = arith.constant dense<0.000000e+00> : vector<8x32xf32>
    %227 = tpu.matmul %225, %226, %cst_153 {dimension_numbers = #tpu.dot_dimension_numbers<[1], [0], [0], [1], [0, 0, 1, 1], [], []>, precision = #tpu.contract_precision<fp32>} : vector<8x32xf32>, vector<32x32xf32>, vector<8x32xf32> -> vector<8x32xf32>
    %c0_154 = arith.constant 0 : index
    %c0_155 = arith.constant 0 : index
    %228 = vector.load %arg46[%c0_154, %c0_155] : memref<1x32xf32, #tpu.memory_space<vmem>>, vector<1x32xf32>
    %229 = vector.broadcast %228 : vector<1x32xf32> to vector<8x32xf32>
    %230 = arith.addf %227, %229 : vector<8x32xf32>
    %c0_156 = arith.constant 0 : index
    %c0_157 = arith.constant 0 : index
    %231 = vector.load %arg48[%c0_156, %c0_157] : memref<8x32xf32, #tpu.memory_space<vmem>>, vector<8x32xf32>
    tpu.vector_store %arg48[%c0_156, %c0_157], %230 {strides = array<i32>} : memref<8x32xf32, #tpu.memory_space<vmem>>, vector<8x32xf32>,
    return
  }
  func.func @transform_0(%arg0: i32) -> (i32, i32) {
    %c0_i32 = arith.constant 0 : i32
    %c0_i32_0 = arith.constant 0 : i32
    %c0_i32_1 = arith.constant 0 : i32
    return %c0_i32, %c0_i32_0 : i32, i32
  }
  func.func @transform_1(%arg0: i32) -> (i32, i32) {
    %c0_i32 = arith.constant 0 : i32
    %c0_i32_0 = arith.constant 0 : i32
    %c0_i32_1 = arith.constant 0 : i32
    return %c0_i32, %c0_i32_0 : i32, i32
  }
  func.func @transform_2(%arg0: i32) -> (i32, i32) {
    %c0_i32 = arith.constant 0 : i32
    %c0_i32_0 = arith.constant 0 : i32
    %c0_i32_1 = arith.constant 0 : i32
    return %c0_i32, %c0_i32_0 : i32, i32
  }
  func.func @transform_3(%arg0: i32) -> (i32, i32) {
    %c0_i32 = arith.constant 0 : i32
    %c0_i32_0 = arith.constant 0 : i32
    %c0_i32_1 = arith.constant 0 : i32
    return %c0_i32, %c0_i32_0 : i32, i32
  }
  func.func @transform_4(%arg0: i32) -> (i32, i32) {
    %c0_i32 = arith.constant 0 : i32
    %c0_i32_0 = arith.constant 0 : i32
    %c0_i32_1 = arith.constant 0 : i32
    return %c0_i32, %c0_i32_0 : i32, i32
  }
  func.func @transform_5(%arg0: i32) -> (i32, i32) {
    %c0_i32 = arith.constant 0 : i32
    %c0_i32_0 = arith.constant 0 : i32
    %c0_i32_1 = arith.constant 0 : i32
    return %c0_i32, %c0_i32_0 : i32, i32
  }
  func.func @transform_6(%arg0: i32) -> (i32, i32) {
    %c0_i32 = arith.constant 0 : i32
    %c0_i32_0 = arith.constant 0 : i32
    %c0_i32_1 = arith.constant 0 : i32
    return %c0_i32, %c0_i32_0 : i32, i32
  }
  func.func @transform_7(%arg0: i32) -> (i32, i32) {
    %c0_i32 = arith.constant 0 : i32
    %c0_i32_0 = arith.constant 0 : i32
    %c0_i32_1 = arith.constant 0 : i32
    return %c0_i32, %c0_i32_0 : i32, i32
  }
  func.func @transform_8(%arg0: i32) -> (i32, i32) {
    %c0_i32 = arith.constant 0 : i32
    %c0_i32_0 = arith.constant 0 : i32
    %c0_i32_1 = arith.constant 0 : i32
    return %c0_i32, %c0_i32_0 : i32, i32
  }
  func.func @transform_9(%arg0: i32) -> (i32, i32) {
    %c0_i32 = arith.constant 0 : i32
    %c0_i32_0 = arith.constant 0 : i32
    %c0_i32_1 = arith.constant 0 : i32
    return %c0_i32, %c0_i32_0 : i32, i32
  }
  func.func @transform_10(%arg0: i32) -> (i32, i32) {
    %c0_i32 = arith.constant 0 : i32
    %c0_i32_0 = arith.constant 0 : i32
    %c0_i32_1 = arith.constant 0 : i32
    return %c0_i32, %c0_i32_0 : i32, i32
  }
  func.func @transform_11(%arg0: i32) -> (i32, i32) {
    %c0_i32 = arith.constant 0 : i32
    %c0_i32_0 = arith.constant 0 : i32
    %c0_i32_1 = arith.constant 0 : i32
    return %c0_i32, %c0_i32_0 : i32, i32
  }
  func.func @transform_12(%arg0: i32) -> (i32, i32) {
    %c0_i32 = arith.constant 0 : i32
    %c0_i32_0 = arith.constant 0 : i32
    %c0_i32_1 = arith.constant 0 : i32
    return %c0_i32, %c0_i32_0 : i32, i32
  }
  func.func @transform_13(%arg0: i32) -> (i32, i32) {
    %c0_i32 = arith.constant 0 : i32
    %c0_i32_0 = arith.constant 0 : i32
    %c0_i32_1 = arith.constant 0 : i32
    return %c0_i32, %c0_i32_0 : i32, i32
  }
  func.func @transform_14(%arg0: i32) -> (i32, i32) {
    %c0_i32 = arith.constant 0 : i32
    %c0_i32_0 = arith.constant 0 : i32
    %c0_i32_1 = arith.constant 0 : i32
    return %c0_i32, %c0_i32_0 : i32, i32
  }
  func.func @transform_15(%arg0: i32) -> (i32, i32) {
    %c0_i32 = arith.constant 0 : i32
    %c0_i32_0 = arith.constant 0 : i32
    %c0_i32_1 = arith.constant 0 : i32
    return %c0_i32, %c0_i32_0 : i32, i32
  }
  func.func @transform_16(%arg0: i32) -> (i32, i32) {
    %c0_i32 = arith.constant 0 : i32
    %c0_i32_0 = arith.constant 0 : i32
    %c0_i32_1 = arith.constant 0 : i32
    return %c0_i32, %c0_i32_0 : i32, i32
  }
  func.func @transform_17(%arg0: i32) -> (i32, i32) {
    %c0_i32 = arith.constant 0 : i32
    %c0_i32_0 = arith.constant 0 : i32
    %c0_i32_1 = arith.constant 0 : i32
    return %c0_i32, %c0_i32_0 : i32, i32
  }
  func.func @transform_18(%arg0: i32) -> (i32, i32) {
    %c0_i32 = arith.constant 0 : i32
    %c0_i32_0 = arith.constant 0 : i32
    %c0_i32_1 = arith.constant 0 : i32
    return %c0_i32, %c0_i32_0 : i32, i32
  }
  func.func @transform_19(%arg0: i32) -> (i32, i32) {
    %c0_i32 = arith.constant 0 : i32
    %c0_i32_0 = arith.constant 0 : i32
    %c0_i32_1 = arith.constant 0 : i32
    return %c0_i32, %c0_i32_0 : i32, i32
  }
  func.func @transform_20(%arg0: i32) -> (i32, i32) {
    %c0_i32 = arith.constant 0 : i32
    %c0_i32_0 = arith.constant 0 : i32
    %c0_i32_1 = arith.constant 0 : i32
    return %c0_i32, %c0_i32_0 : i32, i32
  }
  func.func @transform_21(%arg0: i32) -> (i32, i32) {
    %c0_i32 = arith.constant 0 : i32
    %c0_i32_0 = arith.constant 0 : i32
    %c0_i32_1 = arith.constant 0 : i32
    return %c0_i32, %c0_i32_0 : i32, i32
  }
  func.func @transform_22(%arg0: i32) -> (i32, i32) {
    %c0_i32 = arith.constant 0 : i32
    %c0_i32_0 = arith.constant 0 : i32
    %c0_i32_1 = arith.constant 0 : i32
    return %c0_i32, %c0_i32_0 : i32, i32
  }
  func.func @transform_23(%arg0: i32) -> (i32, i32) {
    %c0_i32 = arith.constant 0 : i32
    %c0_i32_0 = arith.constant 0 : i32
    %c0_i32_1 = arith.constant 0 : i32
    return %c0_i32, %c0_i32_0 : i32, i32
  }
  func.func @transform_24(%arg0: i32) -> (i32, i32) {
    %c0_i32 = arith.constant 0 : i32
    %c0_i32_0 = arith.constant 0 : i32
    %c0_i32_1 = arith.constant 0 : i32
    return %c0_i32, %c0_i32_0 : i32, i32
  }
  func.func @transform_25(%arg0: i32) -> (i32, i32) {
    %c0_i32 = arith.constant 0 : i32
    %c0_i32_0 = arith.constant 0 : i32
    %c0_i32_1 = arith.constant 0 : i32
    return %c0_i32, %c0_i32_0 : i32, i32
  }
  func.func @transform_26(%arg0: i32) -> (i32, i32) {
    %c0_i32 = arith.constant 0 : i32
    %c0_i32_0 = arith.constant 0 : i32
    %c0_i32_1 = arith.constant 0 : i32
    return %c0_i32, %c0_i32_0 : i32, i32
  }
  func.func @transform_27(%arg0: i32) -> (i32, i32) {
    %c0_i32 = arith.constant 0 : i32
    %c0_i32_0 = arith.constant 0 : i32
    %c0_i32_1 = arith.constant 0 : i32
    return %c0_i32, %c0_i32_0 : i32, i32
  }
  func.func @transform_28(%arg0: i32) -> (i32, i32) {
    %c0_i32 = arith.constant 0 : i32
    %c0_i32_0 = arith.constant 0 : i32
    %c0_i32_1 = arith.constant 0 : i32
    return %c0_i32, %c0_i32_0 : i32, i32
  }
  func.func @transform_29(%arg0: i32) -> (i32, i32) {
    %c0_i32 = arith.constant 0 : i32
    %c0_i32_0 = arith.constant 0 : i32
    %c0_i32_1 = arith.constant 0 : i32
    return %c0_i32, %c0_i32_0 : i32, i32
  }
  func.func @transform_30(%arg0: i32) -> (i32, i32) {
    %c0_i32 = arith.constant 0 : i32
    %c0_i32_0 = arith.constant 0 : i32
    %c0_i32_1 = arith.constant 0 : i32
    return %c0_i32, %c0_i32_0 : i32, i32
  }
  func.func @transform_31(%arg0: i32) -> (i32, i32) {
    %c0_i32 = arith.constant 0 : i32
    %c0_i32_0 = arith.constant 0 : i32
    %c0_i32_1 = arith.constant 0 : i32
    return %c0_i32, %c0_i32_0 : i32, i32
  }
  func.func @transform_32(%arg0: i32) -> (i32, i32) {
    %c0_i32 = arith.constant 0 : i32
    %c0_i32_0 = arith.constant 0 : i32
    %c0_i32_1 = arith.constant 0 : i32
    return %c0_i32, %c0_i32_0 : i32, i32
  }
  func.func @transform_33(%arg0: i32) -> (i32, i32) {
    %c0_i32 = arith.constant 0 : i32
    %c0_i32_0 = arith.constant 0 : i32
    %c0_i32_1 = arith.constant 0 : i32
    return %c0_i32, %c0_i32_0 : i32, i32
  }
  func.func @transform_34(%arg0: i32) -> (i32, i32) {
    %c0_i32 = arith.constant 0 : i32
    %c0_i32_0 = arith.constant 0 : i32
    %c0_i32_1 = arith.constant 0 : i32
    return %c0_i32, %c0_i32_0 : i32, i32
  }
  func.func @transform_35(%arg0: i32) -> (i32, i32) {
    %c0_i32 = arith.constant 0 : i32
    %c0_i32_0 = arith.constant 0 : i32
    %c0_i32_1 = arith.constant 0 : i32
    return %c0_i32, %c0_i32_0 : i32, i32
  }
  func.func @transform_36(%arg0: i32) -> (i32, i32) {
    %c0_i32 = arith.constant 0 : i32
    %c0_i32_0 = arith.constant 0 : i32
    %c0_i32_1 = arith.constant 0 : i32
    return %c0_i32, %c0_i32_0 : i32, i32
  }
  func.func @transform_37(%arg0: i32) -> (i32, i32) {
    %c0_i32 = arith.constant 0 : i32
    %c0_i32_0 = arith.constant 0 : i32
    %c0_i32_1 = arith.constant 0 : i32
    return %c0_i32, %c0_i32_0 : i32, i32
  }
  func.func @transform_38(%arg0: i32) -> (i32, i32) {
    %c0_i32 = arith.constant 0 : i32
    %c0_i32_0 = arith.constant 0 : i32
    %c0_i32_1 = arith.constant 0 : i32
    return %c0_i32, %c0_i32_0 : i32, i32
  }
  func.func @transform_39(%arg0: i32) -> (i32, i32) {
    %c0_i32 = arith.constant 0 : i32
    %c0_i32_0 = arith.constant 0 : i32
    %c0_i32_1 = arith.constant 0 : i32
    return %c0_i32, %c0_i32_0 : i32, i32
  }
  func.func @transform_40(%arg0: i32) -> (i32, i32) {
    %c0_i32 = arith.constant 0 : i32
    %c0_i32_0 = arith.constant 0 : i32
    %c0_i32_1 = arith.constant 0 : i32
    return %c0_i32, %c0_i32_0 : i32, i32
  }
  func.func @transform_41(%arg0: i32) -> (i32, i32) {
    %c0_i32 = arith.constant 0 : i32
    %c0_i32_0 = arith.constant 0 : i32
    %c0_i32_1 = arith.constant 0 : i32
    return %c0_i32, %c0_i32_0 : i32, i32
  }
  func.func @transform_42(%arg0: i32) -> (i32, i32) {
    %c0_i32 = arith.constant 0 : i32
    %c0_i32_0 = arith.constant 0 : i32
    %c0_i32_1 = arith.constant 0 : i32
    return %c0_i32, %c0_i32_0 : i32, i32
  }
  func.func @transform_43(%arg0: i32) -> (i32, i32) {
    %c0_i32 = arith.constant 0 : i32
    %c0_i32_0 = arith.constant 0 : i32
    %c0_i32_1 = arith.constant 0 : i32
    return %c0_i32, %c0_i32_0 : i32, i32
  }
  func.func @transform_44(%arg0: i32) -> (i32, i32) {
    %c0_i32 = arith.constant 0 : i32
    %c0_i32_0 = arith.constant 0 : i32
    %c0_i32_1 = arith.constant 0 : i32
    return %c0_i32, %c0_i32_0 : i32, i32
  }
  func.func @transform_45(%arg0: i32) -> (i32, i32) {
    %c0_i32 = arith.constant 0 : i32
    %c0_i32_0 = arith.constant 0 : i32
    %c0_i32_1 = arith.constant 0 : i32
    return %c0_i32, %c0_i32_0 : i32, i32
  }
  func.func @transform_46(%arg0: i32) -> (i32, i32) {
    %c0_i32 = arith.constant 0 : i32
    %c0_i32_0 = arith.constant 0 : i32
    %c0_i32_1 = arith.constant 0 : i32
    return %c0_i32, %c0_i32_0 : i32, i32
  }
  func.func @transform_47(%arg0: i32) -> (i32, i32) {
    %c0_i32 = arith.constant 0 : i32
    %c0_i32_0 = arith.constant 0 : i32
    %c0_i32_1 = arith.constant 0 : i32
    return %c0_i32, %c0_i32_0 : i32, i32
  }
}

</mosaic_0001>

<bundles_post_ra>
// kernel: pallas_forward.1
= control target key start
LH: loop header
LB: loop body
LE: loop exit
PB: predicated region body
PF: predicated region fallthrough
CT: control target
= control target key end

     0   :  { %s22049_s6 = smov 1   ;;  %s22050_s10 = smov 2   ;;  %s26362_s0 = inlined_call_operand.smem [shape: u32[48], index: -1, kind: input, shape index: {}] }
   0x1   :  { %s22137_s5 = sld [smem:[%s26362_s0]]   ;;  %s22051_s14 = smov 3  }
   0x2   :  { %s22142_s9 = sld [smem:[%s26362_s0 + %s22049_s6]]   ;;  %s22052_s18 = smov 4  }
   0x3   :  { %s22147_s13 = sld [smem:[%s26362_s0 + %s22050_s10]]   ;;  %s22053_s22 = smov 5  }
   0x4   :  { %s22152_s17 = sld [smem:[%s26362_s0 + %s22051_s14]]   ;;  %s22054_s26 = smov 6  }
   0x5   :  { %s22157_s21 = sld [smem:[%s26362_s0 + %s22052_s18]]   ;;  %s22055_s30 = smov 7  }
   0x6   :  { %s22162_s25 = sld [smem:[%s26362_s0 + %s22053_s22]]   ;;  %s22056_s4 = smov 8  }
   0x7   :  { %26470 = sst [smem:[#allocation57_spill]] %s22137_s5  ;;  %s22057_s10 = smov 9  }
   0x8   :  { %s22167_s29 = sld [smem:[%s26362_s0 + %s22054_s26]]   ;;  %s22058_s15 = smov 10  }
   0x9   :  { %26471 = sst [smem:[#allocation58_spill]] %s22147_s13  ;;  %s22059_s20 = smov 11  }
   0xa   :  { %26472 = sst [smem:[#allocation59_spill]] %s22152_s17  ;;  %s22060_s26 = smov 12  }
   0xb   :  { %26473 = sst [smem:[#allocation60_spill]] %s22157_s21  ;;  %s22061_s1 = smov 13  }
   0xc   :  { %26474 = sst [smem:[#allocation61_spill]] %s22162_s25  ;;  %s22062_s7 = smov 14  }
   0xd   :  { %s22172_s3 = sld [smem:[%s26362_s0 + %s22055_s30]]   ;;  %s22064_s22 = smov 16  }
   0xe   :  { %26475 = sst [smem:[#allocation62_spill]] %s22167_s29  ;;  %s22065_s28 = smov 17  }
   0xf   :  { %s22177_s8 = sld [smem:[%s26362_s0 + %s22056_s4]]   ;;  %s22067_s16 = smov 19  }
  0x10   :  { %s22182_s14 = sld [smem:[%s26362_s0 + %s22057_s10]]   ;;  %s22068_s23 = smov 20  }
  0x11   :  { %s22187_s19 = sld [smem:[%s26362_s0 + %s22058_s15]]   ;;  %s22063_s15 = smov 15  }
  0x12   :  { %s22192_s24 = sld [smem:[%s26362_s0 + %s22059_s20]]   ;;  %s22070_s10 = smov 22  }
  0x13   :  { %26476 = sst [smem:[#allocation63_spill]] %s22172_s3 }
  0x14   :  { %s22197_s30 = sld [smem:[%s26362_s0 + %s22060_s26]]  }
  0x15   :  { %s22202_s6 = sld [smem:[%s26362_s0 + %s22061_s1]]   ;;  %s22069_s1 = smov 21  }
  0x16   :  { %s22207_s12 = sld [smem:[%s26362_s0 + %s22062_s7]]   ;;  %s22066_s7 = smov 18  }
  0x17   :  { %s22212_s20 = sld [smem:[%s26362_s0 + %s22063_s15]]   ;;  %s22075_s15 = smov 27  }
  0x18   :  { %s22217_s27 = sld [smem:[%s26362_s0 + %s22064_s22]]  }
  0x19   :  { %s22222_s4 = sld [smem:[%s26362_s0 + %s22065_s28]]  }
  0x1a   :  { %26477 = sst [smem:[#allocation64_spill]] %s22197_s30 }
  0x1b   :  { %26478 = sst [smem:[#allocation65_spill]] %s22202_s6 }
  0x1c   :  { %s16586_s3 = sld [smem:[%s26362_s0 + %s22066_s7]]  }
  0x1d   :  { %26479 = sst [smem:[#allocation66_spill]] %s22212_s20 }
  0x1e   :  { %26480 = sst [smem:[#allocation67_spill]] %s22217_s27 }
  0x1f   :  { %s22230_s25 = sld [smem:[%s26362_s0 + %s22067_s16]]   ;;  %s22071_s16 = smov 23  }
  0x20   :  { %s22235_s29 = sld [smem:[%s26362_s0 + %s22068_s23]]   ;;  %s22072_s23 = smov 24  }
  0x21   :  { %s22240_s21 = sld [smem:[%s26362_s0 + %s22069_s1]]   ;;  %s22073_s1 = smov 25  }
  0x22   :  { %s22245_s20 = sld [smem:[%s26362_s0 + %s22070_s10]]   ;;  %v101_v0 = vstv %s16586_s3  ;;  %s22074_s10 = smov 26  }
  0x23   :  { %s22260_s7 = sld [smem:[%s26362_s0 + %s22073_s1]]   ;;  %102 = vst [vmem:[#allocation2] sm:$0x1] %v101_v0  ;;  %s22076_s3 = smov 28  }
  0x24   :  { %s22275_s28 = sld [smem:[%s26362_s0 + %s22076_s3]]   ;;  %s22077_s1 = smov 29  }
  0x25   :  { %26481 = sst [smem:[#allocation68_spill]] %s22230_s25  ;;  %s22080_s3 = smov 33  }
  0x26   :  { %26482 = sst [smem:[#allocation69_spill]] %s22235_s29 }
  0x27   :  { %26483 = sst [smem:[#allocation70_spill]] %s22240_s21  ;;  %s22079_s21 = smov 32  }
  0x28   :  { %26484 = sst [smem:[#allocation71_spill]] %s22245_s20  ;;  %s22078_s20 = smov 31  }
  0x29   :  { %s22250_s25 = sld [smem:[%s26362_s0 + %s22071_s16]]  }
  0x2a   :  { %s22255_s29 = sld [smem:[%s26362_s0 + %s22072_s23]]  }
  0x2b   :  { %26487 = sst [smem:[#allocation74_spill]] %s22260_s7 }
  0x2c   :  { %s22265_s16 = sld [smem:[%s26362_s0 + %s22074_s10]]  }
  0x2d   :  { %s22270_s23 = sld [smem:[%s26362_s0 + %s22075_s15]]  }
  0x2e   :  { %26489 = sst [smem:[#allocation76_spill]] %s22275_s28 }
  0x2f   :  { %26485 = sst [smem:[#allocation72_spill]] %s22250_s25 }
  0x30   :  { %26486 = sst [smem:[#allocation73_spill]] %s22255_s29  ;;  %s22081_s29 = smov 34  }
  0x31   :  { %s22280_s7 = sld [smem:[%s26362_s0 + %s22077_s1]]  }
  0x32   :  { %s22285_s30 = sld [smem:[%s26362_s0 + %s22078_s20]]   ;;  %s22082_s20 = smov 35  }
  0x33   :  { %26488 = sst [smem:[#allocation75_spill]] %s22270_s23 }
  0x34   :  { %s22290_s23 = sld [smem:[%s26362_s0 + %s22079_s21]]   ;;  %s22083_s21 = smov 36  }
  0x35   :  { %s22295_s6 = sld [smem:[%s26362_s0 + %s22080_s3]]   ;;  %s22084_s3 = smov 37  }
  0x36   :  { %s22300_s17 = sld [smem:[%s26362_s0 + %s22081_s29]]   ;;  %s22085_s29 = smov 38  }
  0x37   :  { %s22315_s13 = sld [smem:[%s26362_s0 + %s22084_s3]]   ;;  %s22088_s3 = smov 41  }
  0x38   :  { %26490 = sst [smem:[#allocation77_spill]] %s22285_s30 }
  0x39   :  { %s22305_s30 = sld [smem:[%s26362_s0 + %s22082_s20]]   ;;  %s22086_s20 = smov 39  }
  0x3a   :  { %26491 = sst [smem:[#allocation78_spill]] %s22290_s23 }
  0x3b   :  { %26492 = sst [smem:[#allocation79_spill]] %s22295_s6 }
  0x3c   :  { %26493 = sst [smem:[#allocation80_spill]] %s22300_s17 }
  0x3d   :  { %s22310_s23 = sld [smem:[%s26362_s0 + %s22083_s21]]   ;;  %s22087_s21 = smov 40  }
  0x3e   :  { %s22320_s17 = sld [smem:[%s26362_s0 + %s22085_s29]]   ;;  %s22089_s29 = smov 42  }
  0x3f   :  { %s22325_s5 = sld [smem:[%s26362_s0 + %s22086_s20]]   ;;  %s22090_s20 = smov 43  }
  0x40   :  { %s22335_s6 = sld [smem:[%s26362_s0 + %s22088_s3]]   ;;  %s22092_s3 = smov 45  }
  0x41   :  { %s22345_s28 = sld [smem:[%s26362_s0 + %s22090_s20]]   ;;  %s22094_s20 = smov 47  }
  0x42   :  { %s22355_s25 = sld [smem:[%s26362_s0 + %s22092_s3]]  }
  0x43   :  { %26494 = sst [smem:[#allocation81_spill]] %s22310_s23 }
  0x44   :  { %26495 = sst [smem:[#allocation82_spill]] %s22320_s17 }
  0x45   :  { %s22330_s23 = sld [smem:[%s26362_s0 + %s22087_s21]]   ;;  %s22091_s21 = smov 44  }
  0x46   :  { %s22340_s17 = sld [smem:[%s26362_s0 + %s22089_s29]]   ;;  %s22093_s29 = smov 46  }
  0x47   :  { %26498 = sst [smem:[#allocation85_spill]] %s22345_s28 }
  0x48   :  { %s22365_s28 = sld [smem:[%s26362_s0 + %s22094_s20]]  }
  0x4b   :  { %26496 = sst [smem:[#allocation83_spill]] %s22330_s23 }
  0x4c   :  { %26497 = sst [smem:[#allocation84_spill]] %s22340_s17 }
  0x4d   :  { %s22350_s23 = sld [smem:[%s26362_s0 + %s22091_s21]]   ;;  %s22095_s21 = smov 30  }
  0x4e   :  { %s22360_s17 = sld [smem:[%s26362_s0 + %s22093_s29]]  }
  0x4f   :  { %s16598_s27 = sld [smem:[%s26362_s0 + %s22095_s21]]  }
  0x55   :  { %v103_v1 = vstv %s16598_s27 }
  0x56   :  { %104 = vst [vmem:[#allocation3] sm:$0x1] %v103_v1 }
  0x57   :  { %105 = vsyncpa [#allocation5], 0 }
  0x58   :  { %106 = vsyncpa [#allocation8], 0 }
  0x59   :  { %107 = vsyncpa [#allocation11], 0 }
  0x5a   :  { %108 = vsyncpa [#allocation14], 0 }
  0x5b   :  { %109 = vsyncpa [#allocation17], 0 }
  0x5c   :  { %110 = vsyncpa [#allocation20], 0 }
  0x5d   :  { %111 = vsyncpa [#allocation23], 0 }
  0x5e   :  { %112 = vsyncpa [#allocation26], 0 }
  0x5f   :  { %113 = vsyncpa [#allocation29], 0 }
  0x60   :  { %114 = vsyncpa [#allocation32], 0 }
  0x61   :  { %115 = vsyncpa [#allocation35], 0 }
  0x62   :  { %116 = vsyncpa [#allocation38], 0 }
  0x63   :  { %117 = vsyncpa [#allocation6], 0 }
  0x64   :  { %118 = vsyncpa [#allocation42], 0  ;;  %s22096_s0 = smov [#allocation7]   ;;  %s22097_s3 = smov [#allocation10]  }
  0x65   :  { %s149_s27 = sshll.u32 %s22096_s0, 4  ;;  %s169_s22 = sshll.u32 %s22097_s3, 4  ;;  %s150_s27 = int_to_ptr.vmem [resolvable:$true] %s149_s27  ;;  %s170_s22 = int_to_ptr.vmem [resolvable:$true] %s169_s22 }
  0x66   :  { %s21471_s26 = scalar_lea.hbm %s22177_s8, 128 }
  0x67   :  { %p21472_p0 = scmp.ne.s32.totalorder %s22177_s8, %s21471_s26  ;;  %p21475_p1 = scmp.lt.u32.totalorder %s21471_s26, %s22177_s8 }
  0x69   :  { %p21477_p2 = pnand %p21475_p1, %p21472_p0 }
  0x6b   :  { %21480 = shalt.err (!%p21477_p2)
}
  0x6c   :  { %s21481_s29 = scalar_lea.vmem %s150_s27, 128  ;;  %p21486_p4 = scmp.lt.s32.totalorder %s150_s27, %s150_s27 }
  0x6d   :  { %p21482_p3 = scmp.ne.s32.totalorder %s150_s27, %s21481_s29  ;;  %p21487_p5 = scmp.lt.s32.totalorder %s21481_s29, %s21481_s29 }
  0x6f   :  { %p21488_p6 = por %p21487_p5, %p21486_p4 }
  0x71   :  { %p21489_p7 = pnand %p21488_p6, %p21482_p3 }
  0x73   :  { %21492 = shalt.err (!%p21489_p7)
}
  0x74   :  { %152 = dma.hbm_to_vmem [thread:$0]  %s22177_s8, 128, %s150_s27, [#allocation8]  }
  0x75   :  { %s21493_s1 = scalar_lea.hbm %s22187_s19, 128 }
  0x76   :  { %p21494_p8 = scmp.ne.s32.totalorder %s22187_s19, %s21493_s1  ;;  %p21497_p9 = scmp.lt.u32.totalorder %s21493_s1, %s22187_s19 }
  0x78   :  { %p21499_p10 = pnand %p21497_p9, %p21494_p8 }
  0x7a   :  { %21502 = shalt.err (!%p21499_p10)
}
  0x7b   :  { %s21503_s2 = scalar_lea.vmem %s170_s22, 128  ;;  %p21508_p12 = scmp.lt.s32.totalorder %s170_s22, %s170_s22 }
  0x7c   :  { %p21504_p11 = scmp.ne.s32.totalorder %s170_s22, %s21503_s2  ;;  %p21509_p13 = scmp.lt.s32.totalorder %s21503_s2, %s21503_s2 }
  0x7e   :  { %p21510_p0 = por %p21509_p13, %p21508_p12 }
  0x80   :  { %p21511_p1 = pnand %p21510_p0, %p21504_p11 }
  0x82   :  { %21514 = shalt.err (!%p21511_p1)
}
  0x83   :  { %172 = dma.hbm_to_vmem [thread:$0]  %s22187_s19, 128, %s170_s22, [#allocation11]  }
  0x84   :  { %s22098_s20 = smov [#allocation13]   ;;  %s22099_s8 = smov [#allocation16]  }
  0x85   :  { %s193_s10 = sshll.u32 %s22098_s20, 4  ;;  %s215_s11 = sshll.u32 %s22099_s8, 4  ;;  %s194_s10 = int_to_ptr.vmem [resolvable:$true] %s193_s10  ;;  %s216_s11 = int_to_ptr.vmem [resolvable:$true] %s215_s11 }
  0x86   :  { %s21515_s21 = scalar_lea.hbm %s22207_s12, 16 }
  0x87   :  { %p21516_p2 = scmp.ne.s32.totalorder %s22207_s12, %s21515_s21  ;;  %p21519_p3 = scmp.lt.u32.totalorder %s21515_s21, %s22207_s12 }
  0x89   :  { %p21521_p4 = pnand %p21519_p3, %p21516_p2 }
  0x8b   :  { %21524 = shalt.err (!%p21521_p4)
}
  0x8c   :  { %s21525_s15 = scalar_lea.vmem %s194_s10, 16  ;;  %s21529_s18 = scalar_lea.vmem %s194_s10, 32 }
  0x8d   :  { %p21526_p5 = scmp.ne.s32.totalorder %s194_s10, %s21525_s15  ;;  %p21530_p6 = scmp.lt.s32.totalorder %s194_s10, %s194_s10 }
  0x8e   :  { %p21531_p7 = scmp.lt.s32.totalorder %s21529_s18, %s21525_s15 }
  0x90   :  { %p21532_p8 = por %p21531_p7, %p21530_p6 }
  0x92   :  { %p21533_p9 = pnand %p21532_p8, %p21526_p5 }
  0x94   :  { %21536 = shalt.err (!%p21533_p9)
}
  0x95   :  { %196 = dma.hbm_to_vmem [thread:$0]  %s22207_s12, 16, %s194_s10, [#allocation14]  }
  0x96   :  { %s21537_s19 = scalar_lea.hbm %s22222_s4, 16 }
  0x97   :  { %p21538_p10 = scmp.ne.s32.totalorder %s22222_s4, %s21537_s19  ;;  %p21541_p11 = scmp.lt.u32.totalorder %s21537_s19, %s22222_s4 }
  0x99   :  { %p21543_p12 = pnand %p21541_p11, %p21538_p10 }
  0x9b   :  { %21546 = shalt.err (!%p21543_p12)
}
  0x9c   :  { %s21547_s0 = scalar_lea.vmem %s216_s11, 16  ;;  %s21551_s27 = scalar_lea.vmem %s216_s11, 32 }
  0x9d   :  { %p21548_p13 = scmp.ne.s32.totalorder %s216_s11, %s21547_s0  ;;  %p21552_p0 = scmp.lt.s32.totalorder %s216_s11, %s216_s11 }
  0x9e   :  { %p21553_p1 = scmp.lt.s32.totalorder %s21551_s27, %s21547_s0 }
  0xa0   :  { %p21554_p2 = por %p21553_p1, %p21552_p0 }
  0xa2   :  { %p21555_p3 = pnand %p21554_p2, %p21548_p13 }
  0xa4   :  { %21558 = shalt.err (!%p21555_p3)
}
  0xa5   :  { %218 = dma.hbm_to_vmem [thread:$0]  %s22222_s4, 16, %s216_s11, [#allocation17]  }
  0xa6   :  { %s22100_s3 = smov [#allocation19]   ;;  %s22101_s22 = smov [#allocation22]  }
  0xa7   :  { %s249_s12 = sshll.u32 %s22100_s3, 4  ;;  %s271_s26 = sshll.u32 %s22101_s22, 4  ;;  %s250_s12 = int_to_ptr.vmem [resolvable:$true] %s249_s12  ;;  %s272_s26 = int_to_ptr.vmem [resolvable:$true] %s271_s26 }
  0xa8   :  { %s21559_s29 = scalar_lea.hbm %s22265_s16, 16 }
  0xa9   :  { %p21560_p4 = scmp.ne.s32.totalorder %s22265_s16, %s21559_s29  ;;  %p21563_p5 = scmp.lt.u32.totalorder %s21559_s29, %s22265_s16 }
  0xab   :  { %p21565_p6 = pnand %p21563_p5, %p21560_p4 }
  0xad   :  { %21568 = shalt.err (!%p21565_p6)
}
  0xae   :  { %s21569_s1 = scalar_lea.vmem %s250_s12, 16  ;;  %s21573_s2 = scalar_lea.vmem %s250_s12, 32 }
  0xaf   :  { %p21570_p7 = scmp.ne.s32.totalorder %s250_s12, %s21569_s1  ;;  %p21574_p8 = scmp.lt.s32.totalorder %s250_s12, %s250_s12 }
  0xb0   :  { %p21575_p9 = scmp.lt.s32.totalorder %s21573_s2, %s21569_s1 }
  0xb2   :  { %p21576_p10 = por %p21575_p9, %p21574_p8 }
  0xb4   :  { %p21577_p11 = pnand %p21576_p10, %p21570_p7 }
  0xb6   :  { %21580 = shalt.err (!%p21577_p11)
}
  0xb7   :  { %252 = dma.hbm_to_vmem [thread:$0]  %s22265_s16, 16, %s250_s12, [#allocation20]  }
  0xb8   :  { %s21581_s4 = scalar_lea.hbm %s22280_s7, 16 }
  0xb9   :  { %p21582_p12 = scmp.ne.s32.totalorder %s22280_s7, %s21581_s4  ;;  %p21585_p13 = scmp.lt.u32.totalorder %s21581_s4, %s22280_s7 }
  0xbb   :  { %p21587_p0 = pnand %p21585_p13, %p21582_p12 }
  0xbd   :  { %21590 = shalt.err (!%p21587_p0)
}
  0xbe   :  { %s21591_s20 = scalar_lea.vmem %s272_s26, 16  ;;  %s21595_s10 = scalar_lea.vmem %s272_s26, 32 }
  0xbf   :  { %p21592_p1 = scmp.ne.s32.totalorder %s272_s26, %s21591_s20  ;;  %p21596_p2 = scmp.lt.s32.totalorder %s272_s26, %s272_s26 }
  0xc0   :  { %p21597_p3 = scmp.lt.s32.totalorder %s21595_s10, %s21591_s20 }
  0xc2   :  { %p21598_p4 = por %p21597_p3, %p21596_p2 }
  0xc4   :  { %p21599_p5 = pnand %p21598_p4, %p21592_p1 }
  0xc6   :  { %21602 = shalt.err (!%p21599_p5)
}
  0xc7   :  { %274 = dma.hbm_to_vmem [thread:$0]  %s22280_s7, 16, %s272_s26, [#allocation23]  }
  0xc8   :  { %s22102_s8 = smov [#allocation25]   ;;  %s21603_s11 = scalar_lea.hbm %s22305_s30, 16 }
  0xc9   :  { %s301_s16 = sshll.u32 %s22102_s8, 4  ;;  %p21604_p6 = scmp.ne.s32.totalorder %s22305_s30, %s21603_s11  ;;  %s302_s16 = int_to_ptr.vmem [resolvable:$true] %s301_s16 }
  0xca   :  { %p21607_p7 = scmp.lt.u32.totalorder %s21603_s11, %s22305_s30 }
  0xcc   :  { %p21609_p8 = pnand %p21607_p7, %p21604_p6 }
  0xce   :  { %21612 = shalt.err (!%p21609_p8)
}
  0xcf   :  { %s21613_s21 = scalar_lea.vmem %s302_s16, 16  ;;  %s21617_s15 = scalar_lea.vmem %s302_s16, 32 }
  0xd0   :  { %p21614_p9 = scmp.ne.s32.totalorder %s302_s16, %s21613_s21  ;;  %p21618_p10 = scmp.lt.s32.totalorder %s302_s16, %s302_s16 }
  0xd1   :  { %p21619_p11 = scmp.lt.s32.totalorder %s21617_s15, %s21613_s21 }
  0xd3   :  { %p21620_p12 = por %p21619_p11, %p21618_p10 }
  0xd5   :  { %p21621_p13 = pnand %p21620_p12, %p21614_p9 }
  0xd7   :  { %21624 = shalt.err (!%p21621_p13)
}
  0xd8   :  { %304 = dma.hbm_to_vmem [thread:$0]  %s22305_s30, 16, %s302_s16, [#allocation26]  }
  0xd9   :  { %s22103_s7 = smov [#allocation28]   ;;  %s22104_s19 = smov [#allocation31]  }
  0xda   :  { %s322_s18 = sshll.u32 %s22103_s7, 4  ;;  %s344_s0 = sshll.u32 %s22104_s19, 4  ;;  %s323_s18 = int_to_ptr.vmem [resolvable:$true] %s322_s18  ;;  %s345_s0 = int_to_ptr.vmem [resolvable:$true] %s344_s0 }
  0xdb   :  { %s21625_s27 = scalar_lea.hbm %s22315_s13, 512 }
  0xdc   :  { %p21626_p0 = scmp.ne.s32.totalorder %s22315_s13, %s21625_s27  ;;  %p21629_p1 = scmp.lt.u32.totalorder %s21625_s27, %s22315_s13 }
  0xde   :  { %p21631_p2 = pnand %p21629_p1, %p21626_p0 }
  0xe0   :  { %21634 = shalt.err (!%p21631_p2)
}
  0xe1   :  { %s21635_s3 = scalar_lea.vmem %s323_s18, 512  ;;  %p21640_p4 = scmp.lt.s32.totalorder %s323_s18, %s323_s18 }
  0xe2   :  { %p21636_p3 = scmp.ne.s32.totalorder %s323_s18, %s21635_s3  ;;  %p21641_p5 = scmp.lt.s32.totalorder %s21635_s3, %s21635_s3 }
  0xe4   :  { %p21642_p6 = por %p21641_p5, %p21640_p4 }
  0xe6   :  { %p21643_p7 = pnand %p21642_p6, %p21636_p3 }
  0xe8   :  { %21646 = shalt.err (!%p21643_p7)
}
  0xe9   :  { %s22105_s12 = smov 128   ;;  %s22106_s30 = smov 8  }
  0xea   :  { %328 = dma.hbm_to_vmem [thread:$0]  %s22315_s13, 512, %s323_s18, [#allocation29], %s22105_s12, %s22105_s12, %s22106_s30  }
  0xeb   :  { %s21647_s22 = scalar_lea.hbm %s22325_s5, 512 }
  0xec   :  { %p21648_p8 = scmp.ne.s32.totalorder %s22325_s5, %s21647_s22  ;;  %p21651_p9 = scmp.lt.u32.totalorder %s21647_s22, %s22325_s5 }
  0xee   :  { %p21653_p10 = pnand %p21651_p9, %p21648_p8 }
  0xf0   :  { %21656 = shalt.err (!%p21653_p10)
}
  0xf1   :  { %s21657_s26 = scalar_lea.vmem %s345_s0, 512  ;;  %p21662_p12 = scmp.lt.s32.totalorder %s345_s0, %s345_s0 }
  0xf2   :  { %p21658_p11 = scmp.ne.s32.totalorder %s345_s0, %s21657_s26  ;;  %p21663_p13 = scmp.lt.s32.totalorder %s21657_s26, %s21657_s26 }
  0xf4   :  { %p21664_p0 = por %p21663_p13, %p21662_p12 }
  0xf6   :  { %p21665_p1 = pnand %p21664_p0, %p21658_p11 }
  0xf8   :  { %21668 = shalt.err (!%p21665_p1)
}
  0xf9   :  { %350 = dma.hbm_to_vmem [thread:$0]  %s22325_s5, 512, %s345_s0, [#allocation32], %s22105_s12, %s22105_s12, %s22106_s30  }
  0xfa   :  { %s22107_s13 = smov [#allocation34]   ;;  %s22108_s1 = smov [#allocation37]  }
  0xfb   :  { %s366_s29 = sshll.u32 %s22107_s13, 4  ;;  %s390_s2 = sshll.u32 %s22108_s1, 4  ;;  %s367_s29 = int_to_ptr.vmem [resolvable:$true] %s366_s29  ;;  %s391_s2 = int_to_ptr.vmem [resolvable:$true] %s390_s2 }
  0xfc   :  { %s21669_s4 = scalar_lea.hbm %s22335_s6, 512 }
  0xfd   :  { %p21670_p2 = scmp.ne.s32.totalorder %s22335_s6, %s21669_s4  ;;  %p21673_p3 = scmp.lt.u32.totalorder %s21669_s4, %s22335_s6 }
  0xff   :  { %p21675_p4 = pnand %p21673_p3, %p21670_p2 }
 0x101   :  { %21678 = shalt.err (!%p21675_p4)
}
 0x102   :  { %s21679_s20 = scalar_lea.vmem %s367_s29, 512  ;;  %p21684_p6 = scmp.lt.s32.totalorder %s367_s29, %s367_s29 }
 0x103   :  { %p21680_p5 = scmp.ne.s32.totalorder %s367_s29, %s21679_s20  ;;  %p21685_p7 = scmp.lt.s32.totalorder %s21679_s20, %s21679_s20 }
 0x105   :  { %p21686_p8 = por %p21685_p7, %p21684_p6 }
 0x107   :  { %p21687_p9 = pnand %p21686_p8, %p21680_p5 }
 0x109   :  { %21690 = shalt.err (!%p21687_p9)
}
 0x10a   :  { %372 = dma.hbm_to_vmem [thread:$0]  %s22335_s6, 512, %s367_s29, [#allocation35], %s22105_s12, %s22105_s12, %s22106_s30  }
 0x10b   :  { %s21691_s5 = scalar_lea.hbm %s22350_s23, 512 }
 0x10c   :  { %p21692_p10 = scmp.ne.s32.totalorder %s22350_s23, %s21691_s5  ;;  %p21695_p11 = scmp.lt.u32.totalorder %s21691_s5, %s22350_s23 }
 0x10e   :  { %p21697_p12 = pnand %p21695_p11, %p21692_p10 }
 0x110   :  { %21700 = shalt.err (!%p21697_p12)
}
 0x111   :  { %s21701_s10 = scalar_lea.vmem %s391_s2, 512  ;;  %p21706_p0 = scmp.lt.s32.totalorder %s391_s2, %s391_s2 }
 0x112   :  { %p21702_p13 = scmp.ne.s32.totalorder %s391_s2, %s21701_s10  ;;  %p21707_p1 = scmp.lt.s32.totalorder %s21701_s10, %s21701_s10 }
 0x114   :  { %p21708_p2 = por %p21707_p1, %p21706_p0 }
 0x116   :  { %p21709_p3 = pnand %p21708_p2, %p21702_p13 }
 0x118   :  { %21712 = shalt.err (!%p21709_p3)
}
 0x119   :  { %396 = dma.hbm_to_vmem [thread:$0]  %s22350_s23, 512, %s391_s2, [#allocation38], %s22105_s12, %s22105_s12, %s22106_s30  }
 0x11a   :  { %s22109_s6 = smov [#allocation4]   ;;  %s22110_s16 = smov [#allocation9]  }
 0x11b   :  { %s127_s8 = sshll.u32 %s22109_s6, 4  ;;  %s159_s11 = sshll.u32 %s22110_s16, 4  ;;  %s128_s8 = int_to_ptr.vmem [resolvable:$true] %s127_s8  ;;  %s160_s11 = int_to_ptr.vmem [resolvable:$true] %s159_s11 }
 0x11c   :  { %s21713_s21 = scalar_lea.hbm %s22142_s9, 128 }
 0x11d   :  { %p21714_p4 = scmp.ne.s32.totalorder %s22142_s9, %s21713_s21  ;;  %p21717_p5 = scmp.lt.u32.totalorder %s21713_s21, %s22142_s9 }
 0x11f   :  { %p21719_p6 = pnand %p21717_p5, %p21714_p4 }
 0x121   :  { %21722 = shalt.err (!%p21719_p6)
}
 0x122   :  { %s21723_s15 = scalar_lea.vmem %s128_s8, 128  ;;  %p21728_p8 = scmp.lt.s32.totalorder %s128_s8, %s128_s8 }
 0x123   :  { %p21724_p7 = scmp.ne.s32.totalorder %s128_s8, %s21723_s15  ;;  %p21729_p9 = scmp.lt.s32.totalorder %s21723_s15, %s21723_s15 }
 0x125   :  { %p21730_p10 = por %p21729_p9, %p21728_p8 }
 0x127   :  { %p21731_p11 = pnand %p21730_p10, %p21724_p7 }
 0x129   :  { %21734 = shalt.err (!%p21731_p11)
}
 0x12a   :  { %130 = dma.hbm_to_vmem [thread:$0]  %s22142_s9, 128, %s128_s8, [#allocation5]  }
 0x12b   :  { %s21735_s23 = scalar_lea.hbm %s22182_s14, 16 }
 0x12c   :  { %p21736_p12 = scmp.ne.s32.totalorder %s22182_s14, %s21735_s23  ;;  %p21739_p13 = scmp.lt.u32.totalorder %s21735_s23, %s22182_s14 }
 0x12e   :  { %p21741_p0 = pnand %p21739_p13, %p21736_p12 }
 0x130   :  { %21744 = shalt.err (!%p21741_p0)
}
 0x131   :  { %s21745_s7 = scalar_lea.vmem %s160_s11, 16  ;;  %s21749_s18 = scalar_lea.vmem %s160_s11, 32 }
 0x132   :  { %p21746_p1 = scmp.ne.s32.totalorder %s160_s11, %s21745_s7  ;;  %p21750_p2 = scmp.lt.s32.totalorder %s160_s11, %s160_s11 }
 0x133   :  { %p21751_p3 = scmp.lt.s32.totalorder %s21749_s18, %s21745_s7 }
 0x135   :  { %p21752_p4 = por %p21751_p3, %p21750_p2 }
 0x137   :  { %p21753_p5 = pnand %p21752_p4, %p21746_p1 }
 0x139   :  { %21756 = shalt.err (!%p21753_p5)
}
 0x13a   :  { %162 = dma.hbm_to_vmem [thread:$0]  %s22182_s14, 16, %s160_s11, [#allocation8]  }
 0x13b   :  { %s22111_s9 = smov [#allocation12]   ;;  %s22112_s0 = smov [#allocation15]  }
 0x13c   :  { %s179_s19 = sshll.u32 %s22111_s9, 4  ;;  %s205_s27 = sshll.u32 %s22112_s0, 4  ;;  %s180_s19 = int_to_ptr.vmem [resolvable:$true] %s179_s19  ;;  %s206_s27 = int_to_ptr.vmem [resolvable:$true] %s205_s27 }
 0x13d   :  { %s21757_s3 = scalar_lea.hbm %s22192_s24, 16 }
 0x13e   :  { %p21758_p6 = scmp.ne.s32.totalorder %s22192_s24, %s21757_s3  ;;  %p21761_p7 = scmp.lt.u32.totalorder %s21757_s3, %s22192_s24 }
 0x140   :  { %p21763_p8 = pnand %p21761_p7, %p21758_p6 }
 0x142   :  { %21766 = shalt.err (!%p21763_p8)
}
 0x143   :  { %s21767_s22 = scalar_lea.vmem %s180_s19, 16  ;;  %s21771_s26 = scalar_lea.vmem %s180_s19, 32 }
 0x144   :  { %p21768_p9 = scmp.ne.s32.totalorder %s180_s19, %s21767_s22  ;;  %p21772_p10 = scmp.lt.s32.totalorder %s180_s19, %s180_s19 }
 0x145   :  { %p21773_p11 = scmp.lt.s32.totalorder %s21771_s26, %s21767_s22 }
 0x147   :  { %p21774_p12 = por %p21773_p11, %p21772_p10 }
 0x149   :  { %p21775_p13 = pnand %p21774_p12, %p21768_p9 }
 0x14b   :  { %21778 = shalt.err (!%p21775_p13)
}
 0x14c   :  { %s26499_s14 = sld [smem:[#allocation67_spill]] }
 0x14d   :  { %182 = dma.hbm_to_vmem [thread:$0]  %s22192_s24, 16, %s180_s19, [#allocation11]  }
 0x152   :  { %s21779_s13 = scalar_lea.hbm %s26499_s14, 16 }
 0x153   :  { %p21780_p0 = scmp.ne.s32.totalorder %s26499_s14, %s21779_s13  ;;  %p21783_p1 = scmp.lt.u32.totalorder %s21779_s13, %s26499_s14 }
 0x155   :  { %p21785_p2 = pnand %p21783_p1, %p21780_p0 }
 0x157   :  { %21788 = shalt.err (!%p21785_p2)
}
 0x158   :  { %s21789_s29 = scalar_lea.vmem %s206_s27, 16  ;;  %s21793_s1 = scalar_lea.vmem %s206_s27, 32 }
 0x159   :  { %p21790_p3 = scmp.ne.s32.totalorder %s206_s27, %s21789_s29  ;;  %p21794_p4 = scmp.lt.s32.totalorder %s206_s27, %s206_s27 }
 0x15a   :  { %p21795_p5 = scmp.lt.s32.totalorder %s21793_s1, %s21789_s29 }
 0x15c   :  { %p21796_p6 = por %p21795_p5, %p21794_p4 }
 0x15e   :  { %p21797_p7 = pnand %p21796_p6, %p21790_p3 }
 0x160   :  { %21800 = shalt.err (!%p21797_p7)
}
 0x161   :  { %s26500_s2 = sld [smem:[#allocation72_spill]]  ;;  %s22113_s24 = smov [#allocation18]  }
 0x162   :  { %208 = dma.hbm_to_vmem [thread:$0]  %s26499_s14, 16, %s206_s27, [#allocation14]  }
 0x163   :  { %s235_s4 = sshll.u32 %s22113_s24, 4  ;;  %s22114_s20 = smov [#allocation21]   ;;  %s236_s4 = int_to_ptr.vmem [resolvable:$true] %s235_s4 }
 0x164   :  { %s261_s5 = sshll.u32 %s22114_s20, 4  ;;  %s262_s5 = int_to_ptr.vmem [resolvable:$true] %s261_s5 }
 0x167   :  { %s21801_s10 = scalar_lea.hbm %s26500_s2, 16 }
 0x168   :  { %p21802_p8 = scmp.ne.s32.totalorder %s26500_s2, %s21801_s10  ;;  %p21805_p9 = scmp.lt.u32.totalorder %s21801_s10, %s26500_s2 }
 0x16a   :  { %p21807_p10 = pnand %p21805_p9, %p21802_p8 }
 0x16c   :  { %21810 = shalt.err (!%p21807_p10)
}
 0x16d   :  { %s21811_s6 = scalar_lea.vmem %s236_s4, 16  ;;  %s21815_s8 = scalar_lea.vmem %s236_s4, 32 }
 0x16e   :  { %p21812_p11 = scmp.ne.s32.totalorder %s236_s4, %s21811_s6  ;;  %p21816_p12 = scmp.lt.s32.totalorder %s236_s4, %s236_s4 }
 0x16f   :  { %p21817_p13 = scmp.lt.s32.totalorder %s21815_s8, %s21811_s6 }
 0x171   :  { %p21818_p0 = por %p21817_p13, %p21816_p12 }
 0x173   :  { %p21819_p1 = pnand %p21818_p0, %p21812_p11 }
 0x175   :  { %21822 = shalt.err (!%p21819_p1)
}
 0x176   :  { %s26501_s16 = sld [smem:[#allocation76_spill]] }
 0x177   :  { %238 = dma.hbm_to_vmem [thread:$0]  %s26500_s2, 16, %s236_s4, [#allocation17]  }
 0x17c   :  { %s21823_s11 = scalar_lea.hbm %s26501_s16, 16 }
 0x17d   :  { %p21824_p2 = scmp.ne.s32.totalorder %s26501_s16, %s21823_s11  ;;  %p21827_p3 = scmp.lt.u32.totalorder %s21823_s11, %s26501_s16 }
 0x17f   :  { %p21829_p4 = pnand %p21827_p3, %p21824_p2 }
 0x181   :  { %21832 = shalt.err (!%p21829_p4)
}
 0x182   :  { %s21833_s21 = scalar_lea.vmem %s262_s5, 16  ;;  %s21837_s15 = scalar_lea.vmem %s262_s5, 32 }
 0x183   :  { %p21834_p5 = scmp.ne.s32.totalorder %s262_s5, %s21833_s21  ;;  %p21838_p6 = scmp.lt.s32.totalorder %s262_s5, %s262_s5 }
 0x184   :  { %p21839_p7 = scmp.lt.s32.totalorder %s21837_s15, %s21833_s21 }
 0x186   :  { %p21840_p8 = por %p21839_p7, %p21838_p6 }
 0x188   :  { %p21841_p9 = pnand %p21840_p8, %p21834_p5 }
 0x18a   :  { %21844 = shalt.err (!%p21841_p9)
}
 0x18b   :  { %s26502_s23 = sld [smem:[#allocation79_spill]]  ;;  %s22115_s7 = smov [#allocation24]  }
 0x18c   :  { %264 = dma.hbm_to_vmem [thread:$0]  %s26501_s16, 16, %s262_s5, [#allocation20]  }
 0x18d   :  { %s286_s18 = sshll.u32 %s22115_s7, 4  ;;  %s22116_s9 = smov [#allocation27]   ;;  %s287_s18 = int_to_ptr.vmem [resolvable:$true] %s286_s18 }
 0x18e   :  { %s310_s19 = sshll.u32 %s22116_s9, 4  ;;  %s311_s19 = int_to_ptr.vmem [resolvable:$true] %s310_s19 }
 0x191   :  { %s21845_s0 = scalar_lea.hbm %s26502_s23, 512 }
 0x192   :  { %p21846_p10 = scmp.ne.s32.totalorder %s26502_s23, %s21845_s0  ;;  %p21849_p11 = scmp.lt.u32.totalorder %s21845_s0, %s26502_s23 }
 0x194   :  { %p21851_p12 = pnand %p21849_p11, %p21846_p10 }
 0x196   :  { %21854 = shalt.err (!%p21851_p12)
}
 0x197   :  { %s21855_s27 = scalar_lea.vmem %s287_s18, 512  ;;  %p21860_p0 = scmp.lt.s32.totalorder %s287_s18, %s287_s18 }
 0x198   :  { %p21856_p13 = scmp.ne.s32.totalorder %s287_s18, %s21855_s27  ;;  %p21861_p1 = scmp.lt.s32.totalorder %s21855_s27, %s21855_s27 }
 0x19a   :  { %p21862_p2 = por %p21861_p1, %p21860_p0 }
 0x19c   :  { %p21863_p3 = pnand %p21862_p2, %p21856_p13 }
 0x19e   :  { %21866 = shalt.err (!%p21863_p3)
}
 0x19f   :  { %s26503_s3 = sld [smem:[#allocation81_spill]] }
 0x1a0   :  { %292 = dma.hbm_to_vmem [thread:$0]  %s26502_s23, 512, %s287_s18, [#allocation23], %s22105_s12, %s22105_s12, %s22106_s30  }
 0x1a5   :  { %s21867_s22 = scalar_lea.hbm %s26503_s3, 512 }
 0x1a6   :  { %p21868_p4 = scmp.ne.s32.totalorder %s26503_s3, %s21867_s22  ;;  %p21871_p5 = scmp.lt.u32.totalorder %s21867_s22, %s26503_s3 }
 0x1a8   :  { %p21873_p6 = pnand %p21871_p5, %p21868_p4 }
 0x1aa   :  { %21876 = shalt.err (!%p21873_p6)
}
 0x1ab   :  { %s21877_s26 = scalar_lea.vmem %s311_s19, 512  ;;  %p21882_p8 = scmp.lt.s32.totalorder %s311_s19, %s311_s19 }
 0x1ac   :  { %p21878_p7 = scmp.ne.s32.totalorder %s311_s19, %s21877_s26  ;;  %p21883_p9 = scmp.lt.s32.totalorder %s21877_s26, %s21877_s26 }
 0x1ae   :  { %p21884_p10 = por %p21883_p9, %p21882_p8 }
 0x1b0   :  { %p21885_p11 = pnand %p21884_p10, %p21878_p7 }
 0x1b2   :  { %21888 = shalt.err (!%p21885_p11)
}
 0x1b3   :  { %s26504_s14 = sld [smem:[#allocation82_spill]]  ;;  %s22117_s13 = smov [#allocation30]  }
 0x1b4   :  { %316 = dma.hbm_to_vmem [thread:$0]  %s26503_s3, 512, %s311_s19, [#allocation26], %s22105_s12, %s22105_s12, %s22106_s30  }
 0x1b5   :  { %s335_s29 = sshll.u32 %s22117_s13, 4  ;;  %s22118_s1 = smov [#allocation33]   ;;  %s336_s29 = int_to_ptr.vmem [resolvable:$true] %s335_s29 }
 0x1b6   :  { %s357_s2 = sshll.u32 %s22118_s1, 4  ;;  %s358_s2 = int_to_ptr.vmem [resolvable:$true] %s357_s2 }
 0x1b9   :  { %s21889_s24 = scalar_lea.hbm %s26504_s14, 16 }
 0x1ba   :  { %p21890_p12 = scmp.ne.s32.totalorder %s26504_s14, %s21889_s24  ;;  %p21893_p13 = scmp.lt.u32.totalorder %s21889_s24, %s26504_s14 }
 0x1bc   :  { %p21895_p0 = pnand %p21893_p13, %p21890_p12 }
 0x1be   :  { %21898 = shalt.err (!%p21895_p0)
}
 0x1bf   :  { %s21899_s4 = scalar_lea.vmem %s336_s29, 16  ;;  %s21903_s20 = scalar_lea.vmem %s336_s29, 32 }
 0x1c0   :  { %p21900_p1 = scmp.ne.s32.totalorder %s336_s29, %s21899_s4  ;;  %p21904_p2 = scmp.lt.s32.totalorder %s336_s29, %s336_s29 }
 0x1c1   :  { %p21905_p3 = scmp.lt.s32.totalorder %s21903_s20, %s21899_s4 }
 0x1c3   :  { %p21906_p4 = por %p21905_p3, %p21904_p2 }
 0x1c5   :  { %p21907_p5 = pnand %p21906_p4, %p21900_p1 }
 0x1c7   :  { %21910 = shalt.err (!%p21907_p5)
}
 0x1c8   :  { %s26505_s12 = sld [smem:[#allocation83_spill]] }
 0x1c9   :  { %338 = dma.hbm_to_vmem [thread:$0]  %s26504_s14, 16, %s336_s29, [#allocation29]  }
 0x1ce   :  { %s21911_s30 = scalar_lea.hbm %s26505_s12, 16 }
 0x1cf   :  { %p21912_p6 = scmp.ne.s32.totalorder %s26505_s12, %s21911_s30  ;;  %p21915_p7 = scmp.lt.u32.totalorder %s21911_s30, %s26505_s12 }
 0x1d1   :  { %p21917_p8 = pnand %p21915_p7, %p21912_p6 }
 0x1d3   :  { %21920 = shalt.err (!%p21917_p8)
}
 0x1d4   :  { %s21921_s5 = scalar_lea.vmem %s358_s2, 16  ;;  %s21925_s10 = scalar_lea.vmem %s358_s2, 32 }
 0x1d5   :  { %p21922_p9 = scmp.ne.s32.totalorder %s358_s2, %s21921_s5  ;;  %p21926_p10 = scmp.lt.s32.totalorder %s358_s2, %s358_s2 }
 0x1d6   :  { %p21927_p11 = scmp.lt.s32.totalorder %s21925_s10, %s21921_s5 }
 0x1d8   :  { %p21928_p12 = por %p21927_p11, %p21926_p10 }
 0x1da   :  { %p21929_p13 = pnand %p21928_p12, %p21922_p9 }
 0x1dc   :  { %21932 = shalt.err (!%p21929_p13)
}
 0x1dd   :  { %s26506_s6 = sld [smem:[#allocation85_spill]]  ;;  %s22119_s8 = smov [#allocation36]  }
 0x1de   :  { %360 = dma.hbm_to_vmem [thread:$0]  %s26505_s12, 16, %s358_s2, [#allocation32]  }
 0x1df   :  { %s381_s16 = sshll.u32 %s22119_s8, 4  ;;  %s22120_s11 = smov [#allocation39]   ;;  %s382_s16 = int_to_ptr.vmem [resolvable:$true] %s381_s16 }
 0x1e0   :  { %s403_s21 = sshll.u32 %s22120_s11, 4  ;;  %s404_s21 = int_to_ptr.vmem [resolvable:$true] %s403_s21 }
 0x1e3   :  { %s21933_s15 = scalar_lea.hbm %s26506_s6, 16 }
 0x1e4   :  { %p21934_p0 = scmp.ne.s32.totalorder %s26506_s6, %s21933_s15  ;;  %p21937_p1 = scmp.lt.u32.totalorder %s21933_s15, %s26506_s6 }
 0x1e6   :  { %p21939_p2 = pnand %p21937_p1, %p21934_p0 }
 0x1e8   :  { %21942 = shalt.err (!%p21939_p2)
}
 0x1e9   :  { %s21943_s23 = scalar_lea.vmem %s382_s16, 16  ;;  %s21947_s7 = scalar_lea.vmem %s382_s16, 32 }
 0x1ea   :  { %p21944_p3 = scmp.ne.s32.totalorder %s382_s16, %s21943_s23  ;;  %p21948_p4 = scmp.lt.s32.totalorder %s382_s16, %s382_s16 }
 0x1eb   :  { %p21949_p5 = scmp.lt.s32.totalorder %s21947_s7, %s21943_s23 }
 0x1ed   :  { %p21950_p6 = por %p21949_p5, %p21948_p4 }
 0x1ef   :  { %p21951_p7 = pnand %p21950_p6, %p21944_p3 }
 0x1f1   :  { %21954 = shalt.err (!%p21951_p7)
}
 0x1f2   :  { %384 = dma.hbm_to_vmem [thread:$0]  %s26506_s6, 16, %s382_s16, [#allocation35]  }
 0x1f3   :  { %s21955_s18 = scalar_lea.hbm %s22355_s25, 16 }
 0x1f4   :  { %p21956_p8 = scmp.ne.s32.totalorder %s22355_s25, %s21955_s18  ;;  %p21959_p9 = scmp.lt.u32.totalorder %s21955_s18, %s22355_s25 }
 0x1f6   :  { %p21961_p10 = pnand %p21959_p9, %p21956_p8 }
 0x1f8   :  { %21964 = shalt.err (!%p21961_p10)
}
 0x1f9   :  { %s21965_s9 = scalar_lea.vmem %s404_s21, 16  ;;  %s21969_s19 = scalar_lea.vmem %s404_s21, 32 }
 0x1fa   :  { %p21966_p11 = scmp.ne.s32.totalorder %s404_s21, %s21965_s9  ;;  %p21970_p12 = scmp.lt.s32.totalorder %s404_s21, %s404_s21 }
 0x1fb   :  { %p21971_p13 = scmp.lt.s32.totalorder %s21969_s19, %s21965_s9 }
 0x1fd   :  { %p21972_p0 = por %p21971_p13, %p21970_p12 }
 0x1ff   :  { %p21973_p1 = pnand %p21972_p0, %p21966_p11 }
 0x201   :  { %21976 = shalt.err (!%p21973_p1)
}
 0x202   :  { %406 = dma.hbm_to_vmem [thread:$0]  %s22355_s25, 16, %s404_s21, [#allocation38]  }
 0x203   :  { %22021 = dma.done.wait [#allocation5], 128  }
 0x204   :  { %22022 = vsyncadd [#allocation5], 4294967168 }
 0x205   :  { %22023 = dma.done.wait [#allocation8], 144  }
 0x206   :  { %22024 = vsyncadd [#allocation8], 4294967152 }
 0x207   :  { %22025 = dma.done.wait [#allocation11], 144  }
 0x208   :  { %22026 = vsyncadd [#allocation11], 4294967152 }
 0x209   :  { %22027 = dma.done.wait [#allocation14], 32  }
 0x20a   :  { %22028 = vsyncadd [#allocation14], 4294967264 }
 0x20b   :  { %22029 = dma.done.wait [#allocation17], 32  }
 0x20c   :  { %22030 = vsyncadd [#allocation17], 4294967264 }
 0x20d   :  { %22031 = dma.done.wait [#allocation20], 32  }
 0x20e   :  { %22032 = vsyncadd [#allocation20], 4294967264 }
 0x20f   :  { %22033 = dma.done.wait [#allocation23], 528  }
 0x210   :  { %22034 = vsyncadd [#allocation23], 4294966768 }
 0x211   :  { %22035 = dma.done.wait [#allocation26], 528  }
 0x212   :  { %22036 = vsyncadd [#allocation26], 4294966768 }
 0x213   :  { %22037 = dma.done.wait [#allocation29], 528  }
 0x214   :  { %22038 = vsyncadd [#allocation29], 4294966768 }
 0x215   :  { %22039 = dma.done.wait [#allocation32], 528  }
 0x216   :  { %22040 = vsyncadd [#allocation32], 4294966768 }
 0x217   :  { %22041 = dma.done.wait [#allocation35], 528  }
 0x218   :  { %22042 = vsyncadd [#allocation35], 4294966768 }
 0x219   :  { %22043 = dma.done.wait [#allocation38], 528  }
 0x21a   :  { %22044 = vsyncadd [#allocation38], 4294966768  ;;  %s26507_s25 = sld [smem:[#allocation57_spill]]  ;;  %v26405_v2 = vmov 0.0   ;;  %vm22122_vm0 = vmmov 0   ;;  %vm489_vm1 = vcmask 1045504  }
 0x21b   :  { %17722 = vmatprep.subr.mxu0 %v26405_v2  ;;  %17752 = vmatprep.subr.mxu1 %v26405_v2  ;;  %vm952_vm2 = vcmask 1044480   ;;  %vm485_vm3 = vcmask 48128   ;;  %vm948_vm4 = vcmask 39936   ;;  %v477_v3 = vld [vmem:[#allocation7] sm:$0x3f]  ;;  %v939_v9 = vld [vmem:[#allocation4] sm:$0xff] }
 0x21c   :  { %17724 = vmatprep.mubr.msk.f32.mxu0 %vm22122_vm0, %v26405_v2  ;;  %17754 = vmatprep.mubr.msk.f32.mxu1 %vm22122_vm0, %v26405_v2  ;;  %v940_v4 = vld [vmem:[#allocation10] sm:$0x1f]  ;;  %v491_v6 = vsel %vm489_vm1, %v477_v3, 0  ;;  %v950_v13 = vsel %vm948_vm4, %v939_v9, 0  ;;  %s26508_s0 = sld [smem:[#allocation58_spill]]  ;;  %s26509_s27 = sld [smem:[#allocation59_spill]] }
 0x21d   :  { %v954_v7 = vsel %vm952_vm2, %v940_v4, 0  ;;  %v494_v10 = vand.u32 4294901760, %v491_v6  ;;  %v1022_v14 = vand.u32 4294901760, %v950_v13  ;;  %vm1408_vm5 = vcmask 64512   ;;  %v16616_v48 = vld [vmem:[#allocation9] ss:$0 sm:$0xff] }
 0x21e   :  { %v957_v11 = vand.u32 4294901760, %v954_v7  ;;  %v16617_v50 = vld [vmem:[#allocation12] ss:$0 sm:$0xff]  ;;  %s26511_s3 = sld [smem:[#allocation65_spill]]  ;;  %s26512_s22 = sld [smem:[#allocation64_spill]]  ;;  %vm2505_vm6 = vcmask 261120  }
 0x21f   :  { %17723 = vmatpush3.msra.mxu0 %v494_v10  ;;  %v571_v15 = vsub.f32 %v491_v6, %v494_v10  ;;  %v1023_v18 = vsub.f32 %v950_v13, %v1022_v14  ;;  %s26513_s26 = sld [smem:[#allocation66_spill]]  ;;  %vm3689_vm7 = vcmask 523264   ;;  %s26514_s14 = sld [smem:[#allocation60_spill]]  ;;  %vm4394_vm8 = vcmask 195584  }
 0x220   :  { %v476_v5 = vld [vmem:[%s26507_s25] sm:$0xff]  ;;  %17753 = vmatpush3.msra.mxu1 %v957_v11  ;;  %v1034_v16 = vsub.f32 %v954_v7, %v957_v11  ;;  %17727 = vmatprep.subr.mxu0 %v26405_v2  ;;  %vm5086_vm11 = vcmask 523520   ;;  %vm5199_vm13 = vcmask 785920   ;;  %s26515_s13 = sld [smem:[#allocation69_spill]]  ;;  %s22125_s29 = smov 96  }
 0x221   :  { %v487_v8 = vsel %vm485_vm3, %v476_v5, 0  ;;  %17757 = vmatprep.subr.mxu1 %v26405_v2  ;;  %v572_v20 = vand.u32 4294901760, %v571_v15  ;;  %v1024_v22 = vand.u32 4294901760, %v1023_v18  ;;  %s22126_s1 = smov 64   ;;  %s26516_s2 = sld [smem:[#allocation68_spill]] }
 0x222   :  { %v559_v12 = vand.u32 4294901760, %v487_v8  ;;  %v1035_v21 = vand.u32 4294901760, %v1034_v16  ;;  %v16675_v31 = vld [vmem:[%s26508_s0] sm:$0xff]   ;;  %v1404_v34 = vld [vmem:[%s26508_s0 + $0x8] sm:$0xf]  ;;  %s26517_s24 = sld [smem:[#allocation70_spill]] }
 0x223   :  { %v573_v24 = vsub.f32 %v571_v15, %v572_v20  ;;  %v1025_v26 = vsub.f32 %v1023_v18, %v1024_v22  ;;  %v22524_v32 = vunpack.c.l.bf16 %v16675_v31  ;;  %v22526_v33 = vunpack.c.h.bf16 %v16675_v31  ;;  %v16679_v38 = vld [vmem:[%s26509_s27] sm:$0xff]   ;;  %v1952_v49 = vld [vmem:[%s26509_s27 + $0x8] sm:$0xf]  ;;  %s26518_s4 = sld [smem:[#allocation71_spill]]  ;;  %s26540_s20 = sld [smem:[#allocation62_spill]] }
 0x224   :  { %v560_v17 = vsub.f32 %v487_v8, %v559_v12  ;;  %v1036_v25 = vsub.f32 %v1034_v16, %v1035_v21  ;;  %v22533_v37 = vunpack.c.l.bf16 %v1404_v34  ;;  %v22542_v42 = vunpack.c.l.bf16 %v16679_v38  ;;  %s26552_s12 = sld [smem:[#allocation61_spill]]  ;;  %s26555_s30 = sld [smem:[#allocation74_spill]] }
 0x225   :  { %v574_v28 = vand.u32 4294901760, %v573_v24  ;;  %v1026_v30 = vand.u32 4294901760, %v1025_v26  ;;  %v1410_v35 = vsel %vm1408_vm5, %v22524_v32, 0  ;;  %v1413_v36 = vsel %vm1408_vm5, %v22526_v33, 0  ;;  %v2501_v26 = vld [vmem:[%s26511_s3] sm:$0xff]  ;;  %s26556_s5 = sld [smem:[#allocation73_spill]] }
 0x226   :  { %v561_v19 = vand.u32 4294901760, %v560_v17  ;;  %v1037_v29 = vand.u32 4294901760, %v1036_v25  ;;  %v22536_v39 = vsub.f32 %v1410_v35, %v1410_v35  ;;  %v22538_v40 = vsub.f32 %v1413_v36, %v1413_v36  ;;  %s26557_s10 = sld [smem:[#allocation75_spill]]  ;;  %s26558_s6 = sld [smem:[#allocation63_spill]] }
 0x227   :  { %17755 = vmatmul.mubr.f32.vlgmr.msra.gmra.mrb[0].mxu1 %v1026_v30  ;;  %v1416_v41 = vsel %vm1408_vm5, %v22533_v37, 0  ;;  %v1957_v46 = vsel %vm1408_vm5, %v22542_v42, 0  ;;  %v22550_v47 = vunpack.c.h.bf16 %v16679_v38  ;;  %v22566_v60 = vunpack.c.l.bf16 %v1952_v49  ;;  %s26567_s8 = sld [smem:[#allocation78_spill]]  ;;  %s26568_s16 = sld [smem:[#allocation77_spill]] }
 0x228   :  { %v562_v23 = vsub.f32 %v560_v17, %v561_v19  ;;  %17758 = vmatpush3.msra.mxu1 %v1037_v29  ;;  %17759 = vmatprep.mubr.msk.f32.mxu1 %vm22122_vm0, %v26405_v2  ;;  %v1486_v43 = vand.u32 4294901760, %v22536_v39  ;;  %v1496_v44 = vand.u32 4294901760, %v22538_v40  ;;  %v22546_v45 = vsub.f32 %v1416_v41, %v1416_v41  ;;  %s26569_s11 = sld [smem:[#allocation80_spill]]  ;;  %s26637_s21 = sld [smem:[#allocation84_spill]] }
 0x229   :  { %17762 = vmatprep.subr.mxu1 %v26405_v2  ;;  %v22560_v55 = vsub.f32 %v1957_v46, %v1957_v46  ;;  %v1960_v59 = vsel %vm1408_vm5, %v22550_v47, 0  ;;  %v1963_v8 = vsel %vm1408_vm5, %v22566_v60, 0  ;;  %v26451_v49 = vmov 0.0|0.0   ;;  %s22127_s15 = smov [#allocation40]  }
 0x22a   :  { %v563_v27 = vand.u32 4294901760, %v562_v23  ;;  %v1487_v51 = vsub.f32 %v22536_v39, %v1486_v43  ;;  %v1497_v52 = vsub.f32 %v22538_v40, %v1496_v44  ;;  %v1506_v53 = vand.u32 4294901760, %v22546_v45  ;;  %s16535_s23 = sshll.u32 %s22127_s15, 4  ;;  %s16536_s23 = int_to_ptr.vmem [resolvable:$true] %s16535_s23 }
 0x22b   :  { %v2033_v5 = vand.u32 4294901760, %v22560_v55  ;;  %v22580_v6 = vsub.f32 %v1960_v59, %v1960_v59  ;;  %s21977_s7 = scalar_lea.vmem %s16536_s23, 128  ;;  %p21982_p3 = scmp.lt.s32.totalorder %s16536_s23, %s16536_s23 }
 0x22c   :  { %17725 = vmatmul.mubr.f32.vlgmr.msra.gmra.mrb[0].mxu0 %v563_v27  ;;  %v1488_v0 = vand.u32 4294901760, %v1487_v51  ;;  %v1498_v1 = vand.u32 4294901760, %v1497_v52  ;;  %v1507_v3 = vsub.f32 %v22546_v45, %v1506_v53  ;;  %v2502_v27 = vld [vmem:[%s26511_s3 + $0x8] sm:$0xff]  ;;  %p21978_p2 = scmp.ne.s32.totalorder %s16536_s23, %s21977_s7  ;;  %p21983_p4 = scmp.lt.s32.totalorder %s21977_s7, %s21977_s7 }
 0x22d   :  { %17728 = vmatpush3.msra.mxu0 %v574_v28  ;;  %17729 = vmatprep.mubr.msk.f32.mxu0 %vm22122_vm0, %v26405_v2  ;;  %v2034_v13 = vsub.f32 %v22560_v55, %v2033_v5  ;;  %v2516_v28 = vand.u32 4294901760, %v2501_v26  ;;  %v2519_v29 = vand.u32 4294901760, %v2502_v27 }
 0x22e   :  { %17732 = vmatprep.subr.mxu0 %v26405_v2  ;;  %p21984_p5 = por %p21983_p4, %p21982_p3 }
 0x22f   :  { %17760 = vmatmul.mubr.f32.vlgmr.msra.gmra.mrb[0].mxu1 %v1022_v14  ;;  %v22771_v30 = vsub.f32 %v2501_v26, %v2516_v28  ;;  %v22773_v31 = vsub.f32 %v2502_v27, %v2519_v29 }
 0x230   :  { %17763 = vmatpush3.msra.mxu1 %v1034_v16  ;;  %17764 = vmatprep.mubr.msk.f32.mxu1 %vm22122_vm0, %v26405_v2  ;;  %p21985_p6 = pnand %p21984_p5, %p21978_p2 }
 0x231   :  { %17767 = vmatprep.subr.mxu1 %v26405_v2  ;;  %v2617_v34 = vand.u32 4294901760, %v22771_v30  ;;  %v2624_v35 = vand.u32 4294901760, %v22773_v31 }
 0x233   :  { %v2618_v38 = vsub.f32 %v22771_v30, %v2617_v34 }
 0x234   :  { %17730 = vmatmul.mubr.f32.vlgmr.msra.gmra.mrb[0].mxu0 %v559_v12 }
 0x235   :  { %17733 = vmatpush3.msra.mxu0 %v571_v15  ;;  %17734 = vmatprep.mubr.msk.f32.mxu0 %vm22122_vm0, %v26405_v2  ;;  %v22607_v15 = vsub.f32 %v1963_v8, %v1963_v8 }
 0x236   :  { %17737 = vmatprep.subr.mxu0 %v26405_v2 }
 0x237   :  { %17765 = vmatmul.mubr.f32.vlgmr.msra.gmra.mrb[0].mxu1 %v1023_v18 }
 0x238   :  { %17768 = vmatpush3.msra.mxu1 %v957_v11  ;;  %17769 = vmatprep.mubr.msk.f32.mxu1 %vm22122_vm0, %v26405_v2 }
 0x239   :  { %17772 = vmatprep.subr.mxu1 %v26405_v2 }
 0x23c   :  { %17735 = vmatmul.mubr.f32.vlgmr.msra.gmra.mrb[0].mxu0 %v560_v17 }
 0x23d   :  { %17738 = vmatpush3.msra.mxu0 %v494_v10  ;;  %17739 = vmatprep.mubr.msk.f32.mxu0 %vm22122_vm0, %v26405_v2 }
 0x23e   :  { %17742 = vmatprep.subr.mxu0 %v26405_v2 }
 0x23f   :  { %17770 = vmatmul.mubr.f32.vlgmr.msra.gmra.mrb[0].mxu1 %v1024_v22 }
 0x240   :  { %17773 = vmatpush3.msra.mxu1 %v1035_v21  ;;  %17774 = vmatprep.mubr.msk.f32.mxu1 %vm22122_vm0, %v26405_v2  ;;  %v2053_v21 = vand.u32 4294901760, %v22607_v15 }
 0x241   :  { %17777 = vmatprep.subr.mxu1 %v26405_v2 }
 0x242   :  { %v2054_v24 = vsub.f32 %v22607_v15, %v2053_v21 }
 0x244   :  { %17740 = vmatmul.mubr.f32.vlgmr.msra.gmra.mrb[0].mxu0 %v561_v19  ;;  %v2035_v19 = vand.u32 4294901760, %v2034_v13  ;;  %v2055_v25 = vand.u32 4294901760, %v2054_v24 }
 0x245   :  { %17743 = vmatpush3.msra.mxu0 %v572_v20  ;;  %17744 = vmatprep.mubr.msk.f32.mxu0 %vm22122_vm0, %v26405_v2 }
 0x246   :  { %17747 = vmatprep.subr.mxu0 %v26405_v2 }
 0x247   :  { %17775 = vmatmul.mubr.f32.vlgmr.msra.gmra.mrb[0].mxu1 %v1022_v14 }
 0x248   :  { %17778 = vmatpush3.msra.mxu1 %v957_v11  ;;  %17779 = vmatprep.mubr.msk.f32.mxu1 %vm22122_vm0, %v26405_v2 }
 0x249   :  { %21118 = vmatprep.subr.mxu1 %v26405_v2 }
 0x24c   :  { %17745 = vmatmul.mubr.f32.vlgmr.msra.gmra.mrb[0].mxu0 %v559_v12 }
 0x24d   :  { %17748 = vmatpush3.msra.mxu0 %v494_v10  ;;  %17749 = vmatprep.mubr.msk.f32.mxu0 %vm22122_vm0, %v26405_v2  ;;  %v1508_v10 = vand.u32 4294901760, %v1507_v3 }
 0x24e   :  { %17782 = vmatprep.subr.mxu0 %v26405_v2 }
 0x24f   :  { %17780 = vmatmul.mubr.f32.vlgmr.msra.gmra.mrb[0].mxu1 %v1022_v14  ;;  %v2043_v14 = vand.u32 4294901760, %v22580_v6 }
 0x250   :  { %17787 = vmatprep.mubr.msk.f32.mxu1 %vm22122_vm0, %v26405_v2 }
 0x251   :  { %v2044_v20 = vsub.f32 %v22580_v6, %v2043_v14 }
 0x253   :  { %v2045_v23 = vand.u32 4294901760, %v2044_v20 }
 0x254   :  { %17750 = vmatmul.mubr.f32.vlgmr.msra.gmra.mrb[0].mxu0 %v559_v12 }
 0x255   :  { %17784 = vmatprep.mubr.msk.f32.mxu0 %vm22122_vm0, %v26405_v2 }
 0x322   :  { %v1398_v57 = vpop.f32.mrb[0].mxu1 }
 0x323   :  { %v22568_v61 = vadd.f32 %v16617_v50, %v1398_v57  ;;  %v17781_v62 = vpop.f32.mrb[1].mxu1 }
 0x325   :  { %26510 = vst [vmem:[#allocation86_spill] sm:$0xff] %v22568_v61  ;;  %v22577_v4 = vand.u32 4294901760, %v22568_v61 }
 0x327   :  { %v935_v54 = vpop.f32.mrb[0].mxu0  ;;  %v22590_v9 = vsub.f32 %v22568_v61, %v22577_v4  ;;  %17783 = vmatpush3.msra.mxu0 %v22577_v4  ;;  %21119 = vmatpush3.msra.mxu1 %v22577_v4 }
 0x328   :  { %v22562_v56 = vadd.f32 %v16616_v48, %v935_v54  ;;  %v17751_v58 = vpop.f32.mrb[1].mxu0  ;;  %17785 = vmatmul.mubr.f32.vlgmr.msra.gmra.mrb[2].mxu0 %v1488_v0  ;;  %17788 = vmatmul.mubr.f32.vlgmr.msra.gmra.mrb[2].mxu1 %v1498_v1 }
 0x329   :  { %17848 = vmatprep.subr.mxu1 %v26405_v2  ;;  %17790 = vmatprep.mubr.msk.f32.mxu1 %vm22122_vm0, %v26405_v2  ;;  %v22601_v12 = vand.u32 4294901760, %v22590_v9  ;;  %v22805_v58 = vpack.c.bf16 %v2624_v35, %v2617_v34 }
 0x32a   :  { %v22571_v63 = vand.u32 4294901760, %v22562_v56  ;;  %17793 = vmatprep.subr.mxu0 %v26405_v2  ;;  %17795 = vmatprep.mubr.msk.f32.mxu0 %vm22122_vm0, %v26405_v2 }
 0x32b   :  { %v1518_v17 = vsub.f32 %v22590_v9, %v22601_v12 }
 0x32c   :  { %v22584_v7 = vsub.f32 %v22562_v56, %v22571_v63  ;;  %17849 = vmatpush3.msra.mxu1 %v22571_v63 }
 0x32d   :  { %17859 = vmatprep.subr.mxu1 %v26405_v2  ;;  %17791 = vmatmul.mubr.f32.gmra.mrb[4].mxu1 %v1508_v10  ;;  %v22618_v18 = vand.u32 4294901760, %v1518_v17 }
 0x32e   :  { %v22595_v11 = vand.u32 4294901760, %v22584_v7  ;;  %17850 = vmatprep.mubr.msk.f32.mxu1 %vm22122_vm0, %v26405_v2 }
 0x32f   :  { %17794 = vmatpush3.msra.mxu0 %v22618_v18 }
 0x330   :  { %v2065_v16 = vsub.f32 %v22584_v7, %v22595_v11  ;;  %17796 = vmatmul.mubr.msk.f32.vlgmr.msra.gmra.mrb[2].mxu0 %vm1408_vm5, %v22524_v32  ;;  %17804 = vmatprep.subr.mxu0 %v26405_v2 }
 0x331   :  { %17851 = vmatmul.mubr.f32.vlgmr.msra.gmra.mrb[6].mxu1 %v2035_v19  ;;  %17805 = vmatpush3.msra.mxu0 %v22590_v9 }
 0x332   :  { %v22626_v22 = vand.u32 4294901760, %v2065_v16  ;;  %17798 = vmatprep.mubr.msk.f32.mxu0 %vm22122_vm0, %v26405_v2  ;;  %17853 = vmatprep.mubr.msk.f32.mxu1 %vm22122_vm0, %v26405_v2 }
 0x333   :  { %17815 = vmatprep.subr.mxu0 %v26405_v2 }
 0x334   :  { %17860 = vmatpush3.msra.mxu1 %v22626_v22  ;;  %17799 = vmatmul.mubr.msk.f32.gmra.mrb[4].mxu0 %vm1408_vm5, %v22526_v33 }
 0x335   :  { %17870 = vmatprep.subr.mxu1 %v26405_v2  ;;  %17854 = vmatmul.mubr.f32.gmra.mrb[8].mxu1 %v2045_v23  ;;  %v22822_v23 = vld [vmem:[%s26512_s22 + $0x8] sm:$0xff] }
 0x336   :  { %17801 = vmatprep.mubr.msk.f32.mxu0 %vm22122_vm0, %v26405_v2  ;;  %17856 = vmatprep.mubr.msk.f32.mxu1 %vm22122_vm0, %v26405_v2 }
 0x338   :  { %17802 = vmatmul.mubr.msk.f32.gmra.mrb[6].mxu0 %vm1408_vm5, %v22533_v37 }
 0x339   :  { %17857 = vmatmul.mubr.f32.gmra.mrb[10].mxu1 %v2055_v25  ;;  %17806 = vmatprep.mubr.msk.f32.mxu0 %vm22122_vm0, %v26405_v2 }
 0x33a   :  { %17861 = vmatprep.mubr.msk.f32.mxu1 %vm22122_vm0, %v26405_v2 }
 0x33c   :  { %17807 = vmatmul.mubr.f32.vlgmr.msra.gmra.mrb[2].mxu0 %v22536_v39  ;;  %v2625_v39 = vsub.f32 %v22773_v31, %v2624_v35 }
 0x33d   :  { %17816 = vmatpush3.msra.mxu0 %v22577_v4  ;;  %17862 = vmatmul.mubr.msk.f32.vlgmr.msra.gmra.mrb[6].mxu1 %vm1408_vm5, %v22542_v42 }
 0x33e   :  { %17871 = vmatpush3.msra.mxu1 %v22584_v7  ;;  %17809 = vmatprep.mubr.msk.f32.mxu0 %vm22122_vm0, %v26405_v2 }
 0x33f   :  { %17864 = vmatprep.mubr.msk.f32.mxu1 %vm22122_vm0, %v26405_v2  ;;  %17826 = vmatprep.subr.mxu0 %v26405_v2 }
 0x340   :  { %17810 = vmatmul.mubr.f32.gmra.mrb[4].mxu0 %v22538_v40  ;;  %17881 = vmatprep.subr.mxu1 %v26405_v2 }
 0x341   :  { %17865 = vmatmul.mubr.msk.f32.gmra.mrb[8].mxu1 %vm1408_vm5, %v22550_v47  ;;  %17812 = vmatprep.mubr.msk.f32.mxu0 %vm22122_vm0, %v26405_v2 }
 0x342   :  { %17867 = vmatprep.mubr.msk.f32.mxu1 %vm22122_vm0, %v26405_v2 }
 0x344   :  { %17813 = vmatmul.mubr.f32.gmra.mrb[6].mxu0 %v22546_v45 }
 0x345   :  { %17868 = vmatmul.mubr.msk.f32.gmra.mrb[10].mxu1 %vm1408_vm5, %v22566_v60  ;;  %17817 = vmatprep.mubr.msk.f32.mxu0 %vm22122_vm0, %v26405_v2 }
 0x346   :  { %17872 = vmatprep.mubr.msk.f32.mxu1 %vm22122_vm0, %v26405_v2 }
 0x348   :  { %17818 = vmatmul.mubr.f32.vlgmr.msra.gmra.mrb[2].mxu0 %v1486_v43  ;;  %v2626_v43 = vand.u32 4294901760, %v2625_v39 }
 0x349   :  { %17827 = vmatpush3.msra.mxu0 %v22601_v12  ;;  %17873 = vmatmul.mubr.f32.vlgmr.msra.gmra.mrb[6].mxu1 %v22560_v55  ;;  %v20087_v55 = vpack.c.bf16 %v22773_v31, %v22771_v30 }
 0x34a   :  { %17882 = vmatpush3.msra.mxu1 %v22571_v63  ;;  %17820 = vmatprep.mubr.msk.f32.mxu0 %vm22122_vm0, %v26405_v2 }
 0x34b   :  { %17875 = vmatprep.mubr.msk.f32.mxu1 %vm22122_vm0, %v26405_v2  ;;  %17837 = vmatprep.subr.mxu0 %v26405_v2 }
 0x34c   :  { %17821 = vmatmul.mubr.f32.gmra.mrb[4].mxu0 %v1496_v44  ;;  %17892 = vmatprep.subr.mxu1 %v26405_v2 }
 0x34d   :  { %17876 = vmatmul.mubr.f32.gmra.mrb[8].mxu1 %v22580_v6  ;;  %17823 = vmatprep.mubr.msk.f32.mxu0 %vm22122_vm0, %v26405_v2 }
 0x34e   :  { %17878 = vmatprep.mubr.msk.f32.mxu1 %vm22122_vm0, %v26405_v2 }
 0x350   :  { %17824 = vmatmul.mubr.f32.gmra.mrb[6].mxu0 %v1506_v53  ;;  %v22793_v53 = vpack.c.bf16 %v2519_v29, %v2516_v28  ;;  %v3099_v29 = vand.u32 4294901760, %v22822_v23 }
 0x351   :  { %17879 = vmatmul.mubr.f32.gmra.mrb[10].mxu1 %v22607_v15  ;;  %17828 = vmatprep.mubr.msk.f32.mxu0 %vm22122_vm0, %v26405_v2 }
 0x352   :  { %17883 = vmatprep.mubr.msk.f32.mxu1 %vm22122_vm0, %v26405_v2 }
 0x354   :  { %17829 = vmatmul.mubr.msk.f32.vlgmr.msra.gmra.mrb[2].mxu0 %vm1408_vm5, %v22524_v32 }
 0x355   :  { %17838 = vmatpush3.msra.mxu0 %v22577_v4  ;;  %17884 = vmatmul.mubr.f32.vlgmr.msra.gmra.mrb[6].mxu1 %v2033_v5 }
 0x356   :  { %17893 = vmatpush3.msra.mxu1 %v22595_v11  ;;  %17831 = vmatprep.mubr.msk.f32.mxu0 %vm22122_vm0, %v26405_v2 }
 0x357   :  { %17886 = vmatprep.mubr.msk.f32.mxu1 %vm22122_vm0, %v26405_v2  ;;  %17903 = vmatprep.subr.mxu1 %v26405_v2 }
 0x358   :  { %17832 = vmatmul.mubr.msk.f32.gmra.mrb[4].mxu0 %vm1408_vm5, %v22526_v33  ;;  %20074 = vmatprep.subr.bf16.mxu0 %v26451_v49 }
 0x359   :  { %17887 = vmatmul.mubr.f32.gmra.mrb[8].mxu1 %v2043_v14  ;;  %17834 = vmatprep.mubr.msk.f32.mxu0 %vm22122_vm0, %v26405_v2 }
 0x35a   :  { %17889 = vmatprep.mubr.msk.f32.mxu1 %vm22122_vm0, %v26405_v2 }
 0x35c   :  { %17835 = vmatmul.mubr.msk.f32.gmra.mrb[6].mxu0 %vm1408_vm5, %v22533_v37 }
 0x35d   :  { %17890 = vmatmul.mubr.f32.gmra.mrb[10].mxu1 %v2053_v21  ;;  %17839 = vmatprep.mubr.msk.f32.mxu0 %vm22122_vm0, %v26405_v2  ;;  %v22819_v21 = vld [vmem:[%s26512_s22] sm:$0xff] }
 0x35e   :  { %17894 = vmatprep.mubr.msk.f32.mxu1 %vm22122_vm0, %v26405_v2  ;;  %v3096_v28 = vand.u32 4294901760, %v22819_v21 }
 0x360   :  { %17840 = vmatmul.mubr.msk.f32.vlgmr.msra.gmra.mrb[2].mxu0 %vm1408_vm5, %v22524_v32  ;;  %v2503_v32 = vld [vmem:[%s26511_s3 + $0x10] sm:$0xff]  ;;  %v22854_v39 = vsub.f32 %v22819_v21, %v3096_v28 }
 0x361   :  { %17895 = vmatmul.mubr.msk.f32.vlgmr.msra.gmra.mrb[6].mxu1 %vm1408_vm5, %v22542_v42  ;;  %17842 = vmatprep.mubr.msk.f32.mxu0 %vm22122_vm0, %v26405_v2  ;;  %v2522_v36 = vand.u32 4294901760, %v2503_v32 }
 0x362   :  { %17904 = vmatpush3.msra.mxu1 %v22571_v63  ;;  %17897 = vmatprep.mubr.msk.f32.mxu1 %vm22122_vm0, %v26405_v2 }
 0x363   :  { %v22781_v40 = vsub.f32 %v2503_v32, %v2522_v36  ;;  %20080 = vmatprep.subr.bf16.mxu1 %v26451_v49  ;;  %20076 = vmatpush3.bf16.msra.mxu0 %v22793_v53  ;;  %v22839_v32 = vld [vmem:[%s26512_s22 + $0x10] sm:$0xff] }
 0x364   :  { %17843 = vmatmul.mubr.msk.f32.gmra.mrb[4].mxu0 %vm1408_vm5, %v22526_v33  ;;  %v2504_v33 = vld [vmem:[%s26511_s3 + $0x18] sm:$0xff]  ;;  %20077 = vmatprep.subr.bf16.mxu0 %v26451_v49 }
 0x365   :  { %17898 = vmatmul.mubr.msk.f32.gmra.mrb[8].mxu1 %vm1408_vm5, %v22550_v47  ;;  %17845 = vmatprep.mubr.msk.f32.mxu0 %vm22122_vm0, %v26405_v2  ;;  %v2631_v44 = vand.u32 4294901760, %v22781_v40 }
 0x366   :  { %17900 = vmatprep.mubr.msk.f32.mxu1 %vm22122_vm0, %v26405_v2 }
 0x368   :  { %17846 = vmatmul.mubr.msk.f32.gmra.mrb[6].mxu0 %vm1408_vm5, %v22533_v37  ;;  %v2525_v37 = vand.u32 4294901760, %v2504_v33 }
 0x369   :  { %17901 = vmatmul.mubr.msk.f32.gmra.mrb[10].mxu1 %vm1408_vm5, %v22566_v60  ;;  %17922 = vmatprep.mubr.msk.f32.mxu0 %vm22122_vm0, %v26405_v2 }
 0x36a   :  { %17905 = vmatprep.mubr.msk.f32.mxu1 %vm22122_vm0, %v26405_v2  ;;  %v22783_v41 = vsub.f32 %v2504_v33, %v2525_v37  ;;  %v22797_v54 = vpack.c.bf16 %v2525_v37, %v2522_v36  ;;  %v22842_v33 = vld [vmem:[%s26512_s22 + $0x18] sm:$0xff] }
 0x36c   :  { %v2638_v45 = vand.u32 4294901760, %v22783_v41  ;;  %20079 = vmatpush3.bf16.msra.mxu0 %v22797_v54  ;;  %v20090_v57 = vpack.c.bf16 %v22783_v41, %v22781_v40 }
 0x36d   :  { %17906 = vmatmul.mubr.msk.f32.vlgmr.msra.gmra.mrb[6].mxu1 %vm1408_vm5, %v22542_v42  ;;  %v2619_v42 = vand.u32 4294901760, %v2618_v38  ;;  %20086 = vmatprep.subr.bf16.mxu0 %v26451_v49 }
 0x36e   :  { %17908 = vmatprep.mubr.msk.f32.mxu1 %vm22122_vm0, %v26405_v2  ;;  %v2639_v48 = vsub.f32 %v22783_v41, %v2638_v45  ;;  %v22807_v59 = vpack.c.bf16 %v2638_v45, %v2631_v44 }
 0x36f   :  { %v20081_v46 = vpack.c.bf16 %v2626_v43, %v2619_v42  ;;  %v22859_v42 = vsub.f32 %v22822_v23, %v3099_v29  ;;  %v3102_v43 = vand.u32 4294901760, %v22839_v32 }
 0x370   :  { %v2640_v51 = vand.u32 4294901760, %v2639_v48 }
 0x371   :  { %17909 = vmatmul.mubr.msk.f32.gmra.mrb[8].mxu1 %vm1408_vm5, %v22550_v47  ;;  %v2632_v47 = vsub.f32 %v22781_v40, %v2631_v44 }
 0x372   :  { %17911 = vmatprep.mubr.msk.f32.mxu1 %vm22122_vm0, %v26405_v2  ;;  %20082 = vmatpush3.bf16.msra.mxu1 %v20081_v46 }
 0x373   :  { %v2633_v50 = vand.u32 4294901760, %v2632_v47  ;;  %20083 = vmatprep.subr.bf16.mxu1 %v26451_v49  ;;  %v3105_v47 = vand.u32 4294901760, %v22842_v33 }
 0x375   :  { %17912 = vmatmul.mubr.msk.f32.gmra.mrb[10].mxu1 %vm1408_vm5, %v22566_v60  ;;  %v20084_v52 = vpack.c.bf16 %v2640_v51, %v2633_v50  ;;  %v3197_v51 = vand.u32 4294901760, %v22854_v39 }
 0x376   :  { %17939 = vmatprep.mubr.msk.f32.mxu1 %vm22122_vm0, %v26405_v2 }
 0x377   :  { %20085 = vmatpush3.bf16.msra.mxu1 %v20084_v52  ;;  %v3204_v52 = vand.u32 4294901760, %v22859_v42 }
 0x378   :  { %20092 = vmatprep.subr.bf16.mxu1 %v26451_v49 }
 0x3fb   :  { %v1500_v60 = vpop.f32.mrb[2].mxu1 }
 0x3fc   :  { %v17789_v62 = vpop.f32.mrb[3].mxu1 }
 0x400   :  { %v1510_v0 = vpop.f32.mrb[4].mxu1 }
 0x401   :  { %v17792_v1 = vpop.f32.mrb[5].mxu1 }
 0x402   :  { %v22882_v1 = vsub.f32 %v22842_v33, %v3105_v47 }
 0x433   :  { %v22809_v3 = vpop.f32.mrb[2].mxu0 }
 0x434   :  { %v17841_v5 = vpop.f32.mrb[3].mxu0 }
 0x437   :  { %v1940_v6 = vpop.f32.mrb[4].mxu0 }
 0x438   :  { %v22811_v8 = vadd.f32 %v1940_v6, %v1500_v60  ;;  %v17844_v10 = vpop.f32.mrb[5].mxu0 }
 0x439   :  { %v3205_v10 = vsub.f32 %v22859_v42, %v3204_v52 }
 0x43b   :  { %v1946_v13 = vpop.f32.mrb[6].mxu0  ;;  %v3206_v41 = vand.u32 4294901760, %v3205_v10  ;;  %v3732_v10 = vld [vmem:[%s26513_s26 + $0x28] sm:$0xff] }
 0x43c   :  { %v22813_v14 = vadd.f32 %v1946_v13, %v1510_v0  ;;  %v17847_v15 = vpop.f32.mrb[7].mxu0  ;;  %v22877_v0 = vsub.f32 %v22839_v32, %v3102_v43  ;;  %v20123_v32 = vpack.c.bf16 %v22859_v42, %v22854_v39  ;;  %v3728_v42 = vld [vmem:[%s26513_s26 + $0x8] sm:$0xff] }
 0x43d   :  { %v3218_v15 = vand.u32 4294901760, %v22882_v1 }
 0x43e   :  { %v3211_v13 = vand.u32 4294901760, %v22877_v0 }
 0x440   :  { %v2481_v16 = vpop.f32.mrb[6].mxu1 }
 0x441   :  { %v2507_v17 = vsel %vm2505_vm6, %v2481_v16, 0  ;;  %v17907_v19 = vpop.f32.mrb[7].mxu1 }
 0x442   :  { %v22816_v20 = vand.u32 4294901760, %v2507_v17  ;;  %v3087_v19 = vsel %vm2505_vm6, %v22809_v3, 0  ;;  %v3090_v3 = vsel %vm2505_vm6, %v22811_v8, 0  ;;  %v20111_v8 = vpack.c.bf16 %v3099_v29, %v3096_v28 }
 0x444   :  { %v22825_v24 = vsub.f32 %v2507_v17, %v22816_v20  ;;  %v2487_v25 = vpop.f32.mrb[8].mxu1  ;;  %17940 = vmatmul.mubr.f32.vlgmr.msra.gmra.mrb[12].mxu1 %v22816_v20 }
 0x445   :  { %v2510_v26 = vsel %vm2505_vm6, %v2487_v25, 0  ;;  %v17910_v27 = vpop.f32.mrb[9].mxu1  ;;  %17942 = vmatprep.mubr.msk.f32.mxu1 %vm22122_vm0, %v26405_v2  ;;  %20094 = vmatpush3.bf16.msra.mxu1 %v22793_v53  ;;  %v22942_v25 = vand.u32 4294901760, %v3090_v3 }
 0x446   :  { %v2586_v30 = vand.u32 4294901760, %v22825_v24  ;;  %v22835_v31 = vand.u32 4294901760, %v2510_v26  ;;  %20095 = vmatprep.subr.bf16.mxu1 %v26451_v49 }
 0x447   :  { %v3175_v21 = vsub.f32 %v3090_v3, %v22942_v25  ;;  %v3734_v3 = vld [vmem:[%s26513_s26 + $0x38] sm:$0xff] }
 0x448   :  { %v2587_v34 = vsub.f32 %v22825_v24, %v2586_v30  ;;  %v2595_v35 = vsub.f32 %v2510_v26, %v22835_v31  ;;  %v2493_v36 = vpop.f32.mrb[10].mxu1  ;;  %17943 = vmatmul.mubr.f32.gmra.mrb[14].mxu1 %v22835_v31  ;;  %v3093_v26 = vsel %vm2505_vm6, %v22813_v14, 0  ;;  %v20114_v14 = vpack.c.bf16 %v3105_v47, %v3102_v43 }
 0x449   :  { %v2513_v37 = vsel %vm2505_vm6, %v2493_v36, 0  ;;  %v17913_v38 = vpop.f32.mrb[11].mxu1  ;;  %17945 = vmatprep.mubr.msk.f32.mxu1 %vm22122_vm0, %v26405_v2  ;;  %20097 = vmatpush3.bf16.msra.mxu1 %v22797_v54  ;;  %v22958_v23 = vand.u32 4294901760, %v3093_v26  ;;  %v3176_v29 = vand.u32 4294901760, %v3175_v21  ;;  %v20126_v36 = vpack.c.bf16 %v22882_v1, %v22877_v0 }
 0x44a   :  { %v2588_v44 = vand.u32 4294901760, %v2587_v34  ;;  %v2596_v45 = vand.u32 4294901760, %v2595_v35  ;;  %v22862_v46 = vand.u32 4294901760, %v2513_v37  ;;  %20104 = vmatprep.subr.bf16.mxu1 %v26451_v49  ;;  %v20135_v38 = vpack.c.bf16 %v3204_v52, %v3197_v51 }
 0x44b   :  { %v3185_v28 = vsub.f32 %v3093_v26, %v22958_v23  ;;  %v20138_v43 = vpack.c.bf16 %v3218_v15, %v3211_v13  ;;  %v3773_v26 = vand.u32 4294901760, %v3734_v3 }
 0x44c   :  { %v2605_v48 = vsub.f32 %v2513_v37, %v22862_v46  ;;  %17923 = vmatmul.mubr.f32.vlgmr.msra.gmra.mrb[8].mxu0 %v2588_v44  ;;  %17946 = vmatmul.mubr.f32.gmra.mrb[16].mxu1 %v22862_v46  ;;  %v2597_v50 = vsub.f32 %v2595_v35, %v2596_v45 }
 0x44d   :  { %17925 = vmatprep.mubr.msk.f32.mxu0 %vm22122_vm0, %v26405_v2  ;;  %17973 = vmatprep.mubr.msk.f32.mxu1 %vm22122_vm0, %v26405_v2  ;;  %v3186_v33 = vand.u32 4294901760, %v3185_v28 }
 0x44e   :  { %v2606_v60 = vand.u32 4294901760, %v2605_v48  ;;  %v2598_v62 = vand.u32 4294901760, %v2597_v50  ;;  %20088 = vmatpush3.bf16.msra.mxu0 %v20087_v55  ;;  %v3198_v55 = vsub.f32 %v22854_v39, %v3197_v51  ;;  %v3727_v39 = vld [vmem:[%s26513_s26] sm:$0xff]  ;;  %v3730_v50 = vld [vmem:[%s26513_s26 + $0x18] sm:$0xff] }
 0x44f   :  { %20089 = vmatprep.subr.bf16.mxu0 %v26451_v49  ;;  %v3752_v44 = vand.u32 4294901760, %v3727_v39 }
 0x450   :  { %17926 = vmatmul.mubr.f32.gmra.mrb[10].mxu0 %v2598_v62  ;;  %17974 = vmatmul.mubr.f32.vlgmr.msra.gmra.mrb[18].mxu1 %v2586_v30  ;;  %v2607_v5 = vsub.f32 %v2605_v48, %v2606_v60  ;;  %v3199_v40 = vand.u32 4294901760, %v3198_v55  ;;  %v3761_v62 = vand.u32 4294901760, %v3730_v50 }
 0x451   :  { %17928 = vmatprep.mubr.msk.f32.mxu0 %vm22122_vm0, %v26405_v2  ;;  %17976 = vmatprep.mubr.msk.f32.mxu1 %vm22122_vm0, %v26405_v2 }
 0x452   :  { %v2608_v6 = vand.u32 4294901760, %v2607_v5  ;;  %20091 = vmatpush3.bf16.msra.mxu0 %v20090_v57  ;;  %20106 = vmatpush3.bf16.msra.mxu1 %v22793_v53  ;;  %v3212_v53 = vsub.f32 %v22877_v0, %v3211_v13  ;;  %v3219_v57 = vsub.f32 %v22882_v1, %v3218_v15  ;;  %v23056_v55 = vsub.f32 %v3730_v50, %v3761_v62 }
 0x453   :  { %20107 = vmatprep.subr.bf16.mxu1 %v26451_v49  ;;  %20098 = vmatprep.subr.bf16.mxu0 %v26451_v49 }
 0x454   :  { %17929 = vmatmul.mubr.f32.gmra.mrb[12].mxu0 %v2608_v6  ;;  %17977 = vmatmul.mubr.f32.gmra.mrb[20].mxu1 %v2596_v45  ;;  %v3213_v16 = vand.u32 4294901760, %v3212_v53  ;;  %v3220_v17 = vand.u32 4294901760, %v3219_v57  ;;  %v3755_v45 = vand.u32 4294901760, %v3728_v42  ;;  %v3731_v6 = vld [vmem:[%s26513_s26 + $0x20] sm:$0xff]  ;;  %v3767_v57 = vand.u32 4294901760, %v3732_v10 }
 0x455   :  { %17956 = vmatprep.mubr.msk.f32.mxu0 %vm22122_vm0, %v26405_v2  ;;  %17979 = vmatprep.mubr.msk.f32.mxu1 %vm22122_vm0, %v26405_v2  ;;  %v3764_v53 = vand.u32 4294901760, %v3731_v6 }
 0x456   :  { %20109 = vmatpush3.bf16.msra.mxu1 %v22797_v54  ;;  %v20117_v54 = vpack.c.bf16 %v3206_v41, %v3199_v40  ;;  %v23042_v47 = vsub.f32 %v3728_v42, %v3755_v45  ;;  %v3878_v41 = vand.u32 4294901760, %v23056_v55 }
 0x457   :  { %20116 = vmatprep.subr.bf16.mxu1 %v26451_v49 }
 0x458   :  { %17957 = vmatmul.mubr.f32.vlgmr.msra.gmra.mrb[14].mxu0 %v22825_v24  ;;  %17980 = vmatmul.mubr.f32.gmra.mrb[22].mxu1 %v2606_v60  ;;  %v22929_v24 = vand.u32 4294901760, %v3087_v19  ;;  %v3864_v52 = vand.u32 4294901760, %v23042_v47 }
 0x459   :  { %17959 = vmatprep.mubr.msk.f32.mxu0 %vm22122_vm0, %v26405_v2  ;;  %18007 = vmatprep.mubr.msk.f32.mxu1 %vm22122_vm0, %v26405_v2 }
 0x45a   :  { %20100 = vmatpush3.bf16.msra.mxu0 %v22805_v58  ;;  %v20120_v58 = vpack.c.bf16 %v3220_v17, %v3213_v16  ;;  %v3865_v1 = vsub.f32 %v23042_v47, %v3864_v52  ;;  %v3879_v17 = vsub.f32 %v23056_v55, %v3878_v41 }
 0x45b   :  { %20101 = vmatprep.subr.bf16.mxu0 %v26451_v49 }
 0x45c   :  { %17960 = vmatmul.mubr.f32.gmra.mrb[16].mxu0 %v2595_v35  ;;  %18008 = vmatmul.mubr.f32.vlgmr.msra.gmra.mrb[24].mxu1 %v22816_v20  ;;  %v3187_v35 = vsub.f32 %v3185_v28, %v3186_v33  ;;  %v3866_v15 = vand.u32 4294901760, %v3865_v1 }
 0x45d   :  { %17962 = vmatprep.mubr.msk.f32.mxu0 %vm22122_vm0, %v26405_v2  ;;  %18010 = vmatprep.mubr.msk.f32.mxu1 %vm22122_vm0, %v26405_v2 }
 0x45e   :  { %20103 = vmatpush3.bf16.msra.mxu0 %v22807_v59  ;;  %20118 = vmatpush3.bf16.msra.mxu1 %v20117_v54  ;;  %v3165_v59 = vsub.f32 %v3087_v19, %v22929_v24  ;;  %v3188_v37 = vand.u32 4294901760, %v3187_v35  ;;  %v23064_v19 = vsub.f32 %v3731_v6, %v3764_v53 }
 0x45f   :  { %20119 = vmatprep.subr.bf16.mxu1 %v26451_v49  ;;  %20110 = vmatprep.subr.bf16.mxu0 %v26451_v49 }
 0x460   :  { %17963 = vmatmul.mubr.f32.gmra.mrb[18].mxu0 %v2605_v48  ;;  %18011 = vmatmul.mubr.f32.gmra.mrb[26].mxu1 %v22835_v31  ;;  %v3166_v27 = vand.u32 4294901760, %v3165_v59  ;;  %v3729_v48 = vld [vmem:[%s26513_s26 + $0x10] sm:$0xff] }
 0x461   :  { %17990 = vmatprep.mubr.msk.f32.mxu0 %vm22122_vm0, %v26405_v2  ;;  %18013 = vmatprep.mubr.msk.f32.mxu1 %vm22122_vm0, %v26405_v2  ;;  %v3758_v60 = vand.u32 4294901760, %v3729_v48 }
 0x462   :  { %20121 = vmatpush3.bf16.msra.mxu1 %v20120_v58  ;;  %v3733_v58 = vld [vmem:[%s26513_s26 + $0x30] sm:$0xff] }
 0x463   :  { %20128 = vmatprep.subr.bf16.mxu1 %v26451_v49  ;;  %v23054_v5 = vsub.f32 %v3729_v48, %v3758_v60  ;;  %v23089_v42 = vpack.c.bf16 %v3761_v62, %v3758_v60 }
 0x464   :  { %17991 = vmatmul.mubr.f32.vlgmr.msra.gmra.mrb[20].mxu0 %v22816_v20  ;;  %18014 = vmatmul.mubr.f32.gmra.mrb[28].mxu1 %v22862_v46  ;;  %v3167_v20 = vsub.f32 %v3165_v59, %v3166_v27 }
 0x465   :  { %17993 = vmatprep.mubr.msk.f32.mxu0 %vm22122_vm0, %v26405_v2  ;;  %18041 = vmatprep.mubr.msk.f32.mxu1 %vm22122_vm0, %v26405_v2  ;;  %v3871_v40 = vand.u32 4294901760, %v23054_v5  ;;  %v20174_v48 = vpack.c.bf16 %v23056_v55, %v23054_v5 }
 0x466   :  { %20112 = vmatpush3.bf16.msra.mxu0 %v20111_v8  ;;  %v3168_v30 = vand.u32 4294901760, %v3167_v20  ;;  %v23075_v20 = vsub.f32 %v3734_v3, %v3773_v26 }
 0x467   :  { %20113 = vmatprep.subr.bf16.mxu0 %v26451_v49  ;;  %v3872_v16 = vsub.f32 %v23054_v5, %v3871_v40  ;;  %v23116_v1 = vpack.c.bf16 %v3878_v41, %v3871_v40 }
 0x468   :  { %17994 = vmatmul.mubr.f32.gmra.mrb[22].mxu0 %v22835_v31  ;;  %18042 = vmatmul.mubr.f32.vlgmr.msra.gmra.mrb[30].mxu1 %v22929_v24  ;;  %v3177_v31 = vsub.f32 %v3175_v21, %v3176_v29 }
 0x469   :  { %17996 = vmatprep.mubr.msk.f32.mxu0 %vm22122_vm0, %v26405_v2  ;;  %18044 = vmatprep.mubr.msk.f32.mxu1 %vm22122_vm0, %v26405_v2 }
 0x46a   :  { %20115 = vmatpush3.bf16.msra.mxu0 %v20114_v14  ;;  %20130 = vmatpush3.bf16.msra.mxu1 %v20111_v8  ;;  %v3178_v34 = vand.u32 4294901760, %v3177_v31  ;;  %v3906_v31 = vand.u32 4294901760, %v23075_v20 }
 0x46b   :  { %20131 = vmatprep.subr.bf16.mxu1 %v26451_v49  ;;  %20122 = vmatprep.subr.bf16.mxu0 %v26451_v49 }
 0x46c   :  { %17997 = vmatmul.mubr.f32.gmra.mrb[24].mxu0 %v22862_v46  ;;  %18045 = vmatmul.mubr.f32.gmra.mrb[32].mxu1 %v22942_v25  ;;  %v23040_v46 = vsub.f32 %v3727_v39, %v3752_v44  ;;  %v3907_v35 = vsub.f32 %v23075_v20, %v3906_v31 }
 0x46d   :  { %18024 = vmatprep.mubr.msk.f32.mxu0 %vm22122_vm0, %v26405_v2  ;;  %18047 = vmatprep.mubr.msk.f32.mxu1 %vm22122_vm0, %v26405_v2 }
 0x46e   :  { %20133 = vmatpush3.bf16.msra.mxu1 %v20114_v14  ;;  %v3857_v51 = vand.u32 4294901760, %v23040_v46 }
 0x46f   :  { %20140 = vmatprep.subr.bf16.mxu1 %v26451_v49 }
 0x470   :  { %18025 = vmatmul.mubr.f32.vlgmr.msra.gmra.mrb[26].mxu0 %v3168_v30  ;;  %18048 = vmatmul.mubr.f32.gmra.mrb[34].mxu1 %v22958_v23  ;;  %v3858_v0 = vsub.f32 %v23040_v46, %v3857_v51 }
 0x471   :  { %18027 = vmatprep.mubr.msk.f32.mxu0 %vm22122_vm0, %v26405_v2  ;;  %18075 = vmatprep.mubr.msk.f32.mxu1 %vm22122_vm0, %v26405_v2 }
 0x472   :  { %20124 = vmatpush3.bf16.msra.mxu0 %v20123_v32  ;;  %v3859_v13 = vand.u32 4294901760, %v3858_v0  ;;  %v23114_v0 = vpack.c.bf16 %v3864_v52, %v3857_v51 }
 0x473   :  { %20125 = vmatprep.subr.bf16.mxu0 %v26451_v49 }
 0x474   :  { %18028 = vmatmul.mubr.f32.gmra.mrb[28].mxu0 %v3178_v34  ;;  %18076 = vmatmul.mubr.f32.vlgmr.msra.gmra.mrb[36].mxu1 %v3166_v27  ;;  %v20159_v54 = vpack.c.bf16 %v3866_v15, %v3859_v13  ;;  %v3885_v27 = vand.u32 4294901760, %v23064_v19 }
 0x475   :  { %18030 = vmatprep.mubr.msk.f32.mxu0 %vm22122_vm0, %v26405_v2  ;;  %18078 = vmatprep.mubr.msk.f32.mxu1 %vm22122_vm0, %v26405_v2 }
 0x476   :  { %20127 = vmatpush3.bf16.msra.mxu0 %v20126_v36  ;;  %20142 = vmatpush3.bf16.msra.mxu1 %v20111_v8  ;;  %v3770_v8 = vand.u32 4294901760, %v3733_v58 }
 0x477   :  { %20143 = vmatprep.subr.bf16.mxu1 %v26451_v49  ;;  %20134 = vmatprep.subr.bf16.mxu0 %v26451_v49 }
 0x478   :  { %18031 = vmatmul.mubr.f32.gmra.mrb[30].mxu0 %v3188_v37  ;;  %18079 = vmatmul.mubr.f32.gmra.mrb[38].mxu1 %v3176_v29  ;;  %v23084_v37 = vpack.c.bf16 %v3755_v45, %v3752_v44  ;;  %v20171_v44 = vpack.c.bf16 %v23042_v47, %v23040_v46  ;;  %v23096_v45 = vpack.c.bf16 %v3767_v57, %v3764_v53 }
 0x479   :  { %18058 = vmatprep.mubr.msk.f32.mxu0 %vm22122_vm0, %v26405_v2  ;;  %18081 = vmatprep.mubr.msk.f32.mxu1 %vm22122_vm0, %v26405_v2  ;;  %v23102_v50 = vpack.c.bf16 %v3773_v26, %v3770_v8 }
 0x47a   :  { %20145 = vmatpush3.bf16.msra.mxu1 %v20114_v14  ;;  %v23073_v14 = vsub.f32 %v3733_v58, %v3770_v8 }
 0x47b   :  { %20146 = vmatprep.subr.bf16.mxu1 %v26451_v49 }
 0x47c   :  { %18059 = vmatmul.mubr.f32.vlgmr.msra.gmra.mrb[32].mxu0 %v3165_v59  ;;  %18082 = vmatmul.mubr.f32.gmra.mrb[40].mxu1 %v3186_v33  ;;  %v3873_v59 = vand.u32 4294901760, %v3872_v16  ;;  %v3899_v30 = vand.u32 4294901760, %v23073_v14  ;;  %v20180_v62 = vpack.c.bf16 %v23075_v20, %v23073_v14 }
 0x47d   :  { %18061 = vmatprep.mubr.msk.f32.mxu0 %vm22122_vm0, %v26405_v2  ;;  %18109 = vmatprep.mubr.msk.f32.mxu1 %vm22122_vm0, %v26405_v2 }
 0x47e   :  { %20136 = vmatpush3.bf16.msra.mxu0 %v20135_v38  ;;  %v3900_v34 = vsub.f32 %v23073_v14, %v3899_v30  ;;  %v16638_v14 = vld [vmem:[#allocation2] ss:$0 sm:$0xff] }
 0x47f   :  { %20137 = vmatprep.subr.bf16.mxu0 %v26451_v49 }
 0x480   :  { %18062 = vmatmul.mubr.f32.gmra.mrb[34].mxu0 %v3175_v21  ;;  %18110 = vmatmul.mubr.f32.vlgmr.msra.gmra.mrb[42].mxu1 %v22929_v24  ;;  %v3901_v38 = vand.u32 4294901760, %v3900_v34 }
 0x481   :  { %18064 = vmatprep.mubr.msk.f32.mxu0 %vm22122_vm0, %v26405_v2  ;;  %18112 = vmatprep.mubr.msk.f32.mxu1 %vm22122_vm0, %v26405_v2 }
 0x482   :  { %20139 = vmatpush3.bf16.msra.mxu0 %v20138_v43  ;;  %v3908_v43 = vand.u32 4294901760, %v3907_v35  ;;  %20148 = vmatpush3.bf16.msra.mxu1 %v23084_v37 }
 0x483   :  { %20158 = vmatprep.subr.bf16.mxu0 %v26451_v49  ;;  %20149 = vmatprep.subr.bf16.mxu1 %v26451_v49 }
 0x484   :  { %18065 = vmatmul.mubr.f32.gmra.mrb[36].mxu0 %v3185_v28  ;;  %18113 = vmatmul.mubr.f32.gmra.mrb[44].mxu1 %v22942_v25  ;;  %v3886_v28 = vsub.f32 %v23064_v19, %v3885_v27  ;;  %v20168_v39 = vpack.c.bf16 %v3908_v43, %v3901_v38 }
 0x485   :  { %18092 = vmatprep.mubr.msk.f32.mxu0 %vm22122_vm0, %v26405_v2  ;;  %18115 = vmatprep.mubr.msk.f32.mxu1 %vm22122_vm0, %v26405_v2 }
 0x486   :  { %v3887_v32 = vand.u32 4294901760, %v3886_v28  ;;  %20151 = vmatpush3.bf16.msra.mxu1 %v23089_v42 }
 0x487   :  { %20152 = vmatprep.subr.bf16.mxu1 %v26451_v49 }
 0x488   :  { %18093 = vmatmul.mubr.f32.vlgmr.msra.gmra.mrb[38].mxu0 %v22929_v24  ;;  %18116 = vmatmul.mubr.f32.gmra.mrb[46].mxu1 %v22958_v23  ;;  %v23066_v24 = vsub.f32 %v3732_v10, %v3767_v57  ;;  %v23120_v10 = vpack.c.bf16 %v3906_v31, %v3899_v30 }
 0x489   :  { %18095 = vmatprep.mubr.msk.f32.mxu0 %vm22122_vm0, %v26405_v2  ;;  %18134 = vmatprep.mubr.msk.f32.mxu1 %vm22122_vm0, %v26405_v2 }
 0x48a   :  { %20160 = vmatpush3.bf16.msra.mxu0 %v20159_v54  ;;  %v3892_v21 = vand.u32 4294901760, %v23066_v24  ;;  %20154 = vmatpush3.bf16.msra.mxu1 %v23096_v45  ;;  %v20177_v60 = vpack.c.bf16 %v23066_v24, %v23064_v19 }
 0x48b   :  { %20161 = vmatprep.subr.bf16.mxu0 %v26451_v49  ;;  %20155 = vmatprep.subr.bf16.mxu1 %v26451_v49 }
 0x48c   :  { %18096 = vmatmul.mubr.f32.gmra.mrb[40].mxu0 %v22942_v25  ;;  %v3880_v25 = vand.u32 4294901760, %v3879_v17  ;;  %v3893_v29 = vsub.f32 %v23066_v24, %v3892_v21  ;;  %v23118_v6 = vpack.c.bf16 %v3892_v21, %v3885_v27  ;;  %v22124_v24 = vmov 0  }
 0x48d   :  { %18098 = vmatprep.mubr.msk.f32.mxu0 %vm22122_vm0, %v26405_v2  ;;  %21445 = vset.pattern.permute.xlu1 %v22124_v24 }
 0x48e   :  { %v3894_v33 = vand.u32 4294901760, %v3893_v29  ;;  %20157 = vmatpush3.bf16.msra.mxu1 %v23102_v50  ;;  %21446 = vset.pattern.permute.xlu0 %v22124_v24 }
 0x48f   :  { %20218 = vmatprep.subr.bf16.mxu1 %v26451_v49 }
 0x490   :  { %18099 = vmatmul.mubr.f32.gmra.mrb[42].mxu0 %v22958_v23  ;;  %v20162_v23 = vpack.c.bf16 %v3880_v25, %v3873_v59  ;;  %v20165_v36 = vpack.c.bf16 %v3894_v33, %v3887_v32 }
 0x491   :  { %18159 = vmatprep.mubr.msk.f32.mxu0 %vm22122_vm0, %v26405_v2 }
 0x492   :  { %20163 = vmatpush3.bf16.msra.mxu0 %v20162_v23 }
 0x493   :  { %20164 = vmatprep.subr.bf16.mxu0 %v26451_v49 }
 0x496   :  { %20166 = vmatpush3.bf16.msra.mxu0 %v20165_v36 }
 0x497   :  { %20167 = vmatprep.subr.bf16.mxu0 %v26451_v49 }
 0x49a   :  { %20169 = vmatpush3.bf16.msra.mxu0 %v20168_v39 }
 0x49b   :  { %20170 = vmatprep.subr.bf16.mxu0 %v26451_v49 }
 0x517   :  { %v2701_v13 = vpop.f32.mrb[12].mxu1 }
 0x518   :  { %v17941_v15 = vpop.f32.mrb[13].mxu1 }
 0x51b   :  { %v2707_v53 = vpop.f32.mrb[14].mxu1 }
 0x51c   :  { %v17944_v57 = vpop.f32.mrb[15].mxu1 }
 0x51f   :  { %v2590_v54 = vpop.f32.mrb[8].mxu0  ;;  %v2713_v16 = vpop.f32.mrb[16].mxu1 }
 0x520   :  { %v2702_v17 = vadd.f32 %v2701_v13, %v2590_v54  ;;  %v17924_v58 = vpop.f32.mrb[9].mxu0  ;;  %v17947_v3 = vpop.f32.mrb[17].mxu1 }
 0x523   :  { %v2600_v59 = vpop.f32.mrb[10].mxu0  ;;  %v2884_v25 = vpop.f32.mrb[18].mxu1 }
 0x524   :  { %v2708_v8 = vadd.f32 %v2707_v53, %v2600_v59  ;;  %v17927_v51 = vpop.f32.mrb[11].mxu0  ;;  %v17975_v52 = vpop.f32.mrb[19].mxu1 }
 0x527   :  { %v2610_v40 = vpop.f32.mrb[12].mxu0  ;;  %v2892_v41 = vpop.f32.mrb[20].mxu1 }
 0x528   :  { %v2714_v26 = vadd.f32 %v2713_v16, %v2610_v40  ;;  %v17930_v27 = vpop.f32.mrb[13].mxu0  ;;  %v17978_v21 = vpop.f32.mrb[21].mxu1 }
 0x52b   :  { %v2793_v23 = vpop.f32.mrb[14].mxu0  ;;  %v2900_v28 = vpop.f32.mrb[22].mxu1 }
 0x52c   :  { %v2794_v29 = vadd.f32 %v2793_v23, %v2702_v17  ;;  %v17958_v30 = vpop.f32.mrb[15].mxu0  ;;  %v17981_v31 = vpop.f32.mrb[23].mxu1 }
 0x52e   :  { %v2885_v32 = vadd.f32 %v2884_v25, %v2794_v29 }
 0x52f   :  { %v2800_v33 = vpop.f32.mrb[16].mxu0  ;;  %v3070_v34 = vpop.f32.mrb[24].mxu1 }
 0x530   :  { %v2801_v35 = vadd.f32 %v2800_v33, %v2708_v8  ;;  %v17961_v36 = vpop.f32.mrb[17].mxu0  ;;  %v18009_v38 = vpop.f32.mrb[25].mxu1 }
 0x532   :  { %v2893_v43 = vadd.f32 %v2892_v41, %v2801_v35 }
 0x533   :  { %v2807_v39 = vpop.f32.mrb[18].mxu0  ;;  %v3076_v13 = vpop.f32.mrb[26].mxu1 }
 0x534   :  { %v2808_v15 = vadd.f32 %v2807_v39, %v2714_v26  ;;  %v17964_v53 = vpop.f32.mrb[19].mxu0  ;;  %v18012_v57 = vpop.f32.mrb[27].mxu1 }
 0x536   :  { %v2901_v54 = vadd.f32 %v2900_v28, %v2808_v15 }
 0x537   :  { %v2983_v16 = vpop.f32.mrb[20].mxu0  ;;  %v3082_v58 = vpop.f32.mrb[28].mxu1 }
 0x538   :  { %v2984_v3 = vadd.f32 %v2983_v16, %v2885_v32  ;;  %v17992_v59 = vpop.f32.mrb[21].mxu0  ;;  %v18015_v17 = vpop.f32.mrb[29].mxu1 }
 0x53a   :  { %v3071_v51 = vadd.f32 %v3070_v34, %v2984_v3 }
 0x53b   :  { %v2989_v52 = vpop.f32.mrb[22].mxu0  ;;  %v3281_v25 = vpop.f32.mrb[30].mxu1 }
 0x53c   :  { %v2990_v40 = vadd.f32 %v2989_v52, %v2893_v43  ;;  %v17995_v27 = vpop.f32.mrb[23].mxu0  ;;  %v18043_v8 = vpop.f32.mrb[31].mxu1 }
 0x53e   :  { %v3077_v21 = vadd.f32 %v3076_v13, %v2990_v40 }
 0x53f   :  { %v2995_v23 = vpop.f32.mrb[24].mxu0  ;;  %v3287_v41 = vpop.f32.mrb[32].mxu1 }
 0x540   :  { %v2996_v29 = vadd.f32 %v2995_v23, %v2901_v54  ;;  %v17998_v30 = vpop.f32.mrb[25].mxu0  ;;  %v18046_v26 = vpop.f32.mrb[33].mxu1 }
 0x542   :  { %v3083_v31 = vadd.f32 %v3082_v58, %v2996_v29 }
 0x543   :  { %v3170_v33 = vpop.f32.mrb[26].mxu0  ;;  %v3293_v28 = vpop.f32.mrb[34].mxu1 }
 0x544   :  { %v3171_v35 = vadd.f32 %v3170_v33, %v3071_v51  ;;  %v18026_v36 = vpop.f32.mrb[27].mxu0  ;;  %v18049_v32 = vpop.f32.mrb[35].mxu1 }
 0x546   :  { %v3282_v38 = vadd.f32 %v3281_v25, %v3171_v35 }
 0x547   :  { %v3180_v39 = vpop.f32.mrb[28].mxu0  ;;  %v3464_v34 = vpop.f32.mrb[36].mxu1 }
 0x548   :  { %v3181_v15 = vadd.f32 %v3180_v39, %v3077_v21  ;;  %v18029_v53 = vpop.f32.mrb[29].mxu0  ;;  %v18077_v43 = vpop.f32.mrb[37].mxu1 }
 0x549   :  { %v16636_v43 = vld [vmem:[#allocation13] ss:$0 sm:$0xff] }
 0x54a   :  { %v3288_v57 = vadd.f32 %v3287_v41, %v3181_v15 }
 0x54b   :  { %v3190_v16 = vpop.f32.mrb[30].mxu0  ;;  %v3472_v13 = vpop.f32.mrb[38].mxu1 }
 0x54c   :  { %v3191_v3 = vadd.f32 %v3190_v16, %v3083_v31  ;;  %v18032_v59 = vpop.f32.mrb[31].mxu0  ;;  %v18080_v54 = vpop.f32.mrb[39].mxu1 }
 0x54d   :  { %v16637_v54 = vld [vmem:[#allocation16] ss:$0 sm:$0xff] }
 0x54e   :  { %v3294_v17 = vadd.f32 %v3293_v28, %v3191_v3 }
 0x54f   :  { %v3373_v52 = vpop.f32.mrb[32].mxu0  ;;  %v3480_v58 = vpop.f32.mrb[40].mxu1 }
 0x550   :  { %v3374_v40 = vadd.f32 %v3373_v52, %v3282_v38  ;;  %v18060_v27 = vpop.f32.mrb[33].mxu0  ;;  %v18083_v51 = vpop.f32.mrb[41].mxu1 }
 0x552   :  { %v3465_v8 = vadd.f32 %v3464_v34, %v3374_v40 }
 0x553   :  { %v3380_v23 = vpop.f32.mrb[34].mxu0  ;;  %v3650_v25 = vpop.f32.mrb[42].mxu1 }
 0x554   :  { %v3381_v29 = vadd.f32 %v3380_v23, %v3288_v57  ;;  %v18063_v30 = vpop.f32.mrb[35].mxu0  ;;  %v18111_v21 = vpop.f32.mrb[43].mxu1 }
 0x556   :  { %v3473_v26 = vadd.f32 %v3472_v13, %v3381_v29 }
 0x557   :  { %v3387_v33 = vpop.f32.mrb[36].mxu0  ;;  %v3656_v41 = vpop.f32.mrb[44].mxu1 }
 0x558   :  { %v3388_v35 = vadd.f32 %v3387_v33, %v3294_v17  ;;  %v18066_v36 = vpop.f32.mrb[37].mxu0  ;;  %v18114_v31 = vpop.f32.mrb[45].mxu1 }
 0x55a   :  { %v3481_v32 = vadd.f32 %v3480_v58, %v3388_v35 }
 0x55b   :  { %v3563_v39 = vpop.f32.mrb[38].mxu0  ;;  %v3662_v28 = vpop.f32.mrb[46].mxu1 }
 0x55c   :  { %v3564_v15 = vadd.f32 %v3563_v39, %v3465_v8  ;;  %v18094_v53 = vpop.f32.mrb[39].mxu0  ;;  %v18117_v38 = vpop.f32.mrb[47].mxu1 }
 0x55e   :  { %v3651_v16 = vadd.f32 %v3650_v25, %v3564_v15 }
 0x55f   :  { %v3569_v34 = vpop.f32.mrb[40].mxu0 }
 0x560   :  { %v3673_v3 = vadd.f32 %v16636_v43, %v3651_v16  ;;  %v3570_v59 = vadd.f32 %v3569_v34, %v3473_v26  ;;  %v18097_v57 = vpop.f32.mrb[41].mxu0 }
 0x562   :  { %v3676_v13 = vmax.f32 %v3673_v3, 0.0  ;;  %v3657_v52 = vadd.f32 %v3656_v41, %v3570_v59 }
 0x563   :  { %v3575_v40 = vpop.f32.mrb[42].mxu0 }
 0x564   :  { %v3743_v17 = vsel %vm3689_vm7, %v3676_v13, 0  ;;  %v3674_v27 = vadd.f32 %v16636_v43, %v3657_v52  ;;  %v3576_v58 = vadd.f32 %v3575_v40, %v3481_v32  ;;  %v18100_v51 = vpop.f32.mrb[43].mxu0  ;;  %v3686_v23 = vmul.f32 %v16637_v54, %v3676_v13 }
 0x565   :  { %v23123_v8 = vand.u32 4294901760, %v3743_v17  ;;  %v4870_v13 = vlaneseq }
 0x566   :  { %v3677_v29 = vmax.f32 %v3674_v27, 0.0  ;;  %v3663_v30 = vadd.f32 %v3662_v28, %v3576_v58  ;;  %v3690_v25 = vsel %vm3689_vm7, %v3686_v23, 0.0  ;;  %v4392_v27 = vld [vmem:[%s26514_s14] sm:$0xf] }
 0x567   :  { %v3825_v21 = vsub.f32 %v3743_v17, %v23123_v8  ;;  %18160 = vmatmul.mubr.f32.vlgmr.msra.gmra.mrb[44].mxu0 %v23123_v8  ;;  %3691 = vadd.xlane.f32.xlu0 %v3690_v25  ;;  %v23222_v17 = vshrl.u32 %v4870_v13, 7  ;;  %v23225_v51 = vunpack.c.l.bf16 %v4392_v27 }
 0x568   :  { %v3746_v26 = vsel %vm3689_vm7, %v3677_v29, 0  ;;  %v3675_v33 = vadd.f32 %v16636_v43, %v3663_v30  ;;  %20172 = vmatpush3.bf16.msra.mxu0 %v20171_v44  ;;  %18162 = vmatprep.mubr.msk.f32.mxu0 %vm22122_vm0, %v26405_v2  ;;  %v3687_v41 = vmul.f32 %v16637_v54, %v3677_v29 }
 0x569   :  { %v3826_v35 = vand.u32 4294901760, %v3825_v21  ;;  %20173 = vmatprep.subr.bf16.mxu0 %v26451_v49  ;;  %v23135_v36 = vand.u32 4294901760, %v3746_v26  ;;  %v26395_v23 = vsub.s32 1, %v23222_v17  ;;  %v26393_v30 = vsub.s32 3, %v23222_v17 }
 0x56a   :  { %v3678_v31 = vmax.f32 %v3675_v33, 0.0  ;;  %v3693_v32 = vsel %vm3689_vm7, %v3687_v41, 0.0  ;;  %v26396_v25 = vsub.s32 0, %v23222_v17  ;;  %v26392_v33 = vsub.s32 4, %v23222_v17 }
 0x56b   :  { %18163 = vmatmul.mubr.f32.gmra.mrb[46].mxu0 %v23135_v36  ;;  %3694 = vadd.xlane.f32.xlu0 %v3693_v32  ;;  %v3827_v39 = vsub.f32 %v3825_v21, %v3826_v35  ;;  %v3835_v28 = vsub.f32 %v3746_v26, %v23135_v36  ;;  %v4888_v29 = vrot.slane %v23225_v51, %v26395_v23  ;;  %v26390_v32 = vsub.s32 6, %v23222_v17 }
 0x56c   :  { %v3749_v46 = vsel %vm3689_vm7, %v3678_v31, 0  ;;  %20175 = vmatpush3.bf16.msra.mxu0 %v20174_v48  ;;  %18165 = vmatprep.mubr.msk.f32.mxu0 %vm22122_vm0, %v26405_v2  ;;  %v3688_v47 = vmul.f32 %v16637_v54, %v3678_v31  ;;  %v4918_v26 = vrot.slane %v23225_v51, %v26393_v30  ;;  %v4873_v41 = vrot.slane %v23225_v51, %v26396_v25 }
 0x56d   :  { %20176 = vmatprep.subr.bf16.mxu0 %v26451_v49  ;;  %v3828_v44 = vand.u32 4294901760, %v3827_v39  ;;  %v23147_v15 = vand.u32 4294901760, %v3749_v46  ;;  %v3836_v53 = vand.u32 4294901760, %v3835_v28  ;;  %v26394_v39 = vsub.s32 2, %v23222_v17 }
 0x56e   :  { %v3696_v38 = vsel %vm3689_vm7, %v3688_v47, 0.0  ;;  %v26389_v47 = vsub.s32 7, %v23222_v17 }
 0x56f   :  { %18135 = vmatmul.mubr.f32.vlgmr.msra.gmra.mrb[48].mxu1 %v3828_v44  ;;  %18166 = vmatmul.mubr.f32.gmra.mrb[48].mxu0 %v23147_v15  ;;  %v3837_v43 = vsub.f32 %v3835_v28, %v3836_v53  ;;  %v3845_v16 = vsub.f32 %v3749_v46, %v23147_v15  ;;  %v4903_v46 = vrot.slane %v23225_v51, %v26394_v39 }
 0x570   :  { %20178 = vmatpush3.bf16.msra.mxu0 %v20177_v60  ;;  %3697 = vadd.xlane.f32.xlu1 %v3696_v38  ;;  %v4978_v44 = vrot.slane %v23225_v51, %v26389_v47 }
 0x571   :  { %18137 = vmatprep.mubr.msk.f32.mxu1 %vm22122_vm0, %v26405_v2  ;;  %20179 = vmatprep.subr.bf16.mxu0 %v26451_v49  ;;  %v3838_v5 = vand.u32 4294901760, %v3837_v43  ;;  %v3846_v55 = vand.u32 4294901760, %v3845_v16 }
 0x572   :  { %18184 = vmatprep.mubr.msk.f32.mxu0 %vm22122_vm0, %v26405_v2 }
 0x573   :  { %18138 = vmatmul.mubr.f32.gmra.mrb[50].mxu1 %v3838_v5  ;;  %v3847_v48 = vsub.f32 %v3845_v16, %v3846_v55 }
 0x574   :  { %20181 = vmatpush3.bf16.msra.mxu0 %v20180_v62  ;;  %18140 = vmatprep.mubr.msk.f32.mxu1 %vm22122_vm0, %v26405_v2 }
 0x575   :  { %20182 = vmatprep.subr.bf16.mxu0 %v26451_v49  ;;  %v3848_v19 = vand.u32 4294901760, %v3847_v48 }
 0x577   :  { %18185 = vmatmul.mubr.f32.vlgmr.msra.gmra.mrb[44].mxu0 %v3825_v21  ;;  %18141 = vmatmul.mubr.f32.gmra.mrb[52].mxu1 %v3848_v19  ;;  %v5288_v19 = vsel %vm4394_vm8, %v23225_v51, 0.0 }
 0x578   :  { %20184 = vmatpush3.bf16.msra.mxu0 %v23084_v37  ;;  %18187 = vmatprep.mubr.msk.f32.mxu0 %vm22122_vm0, %v26405_v2 }
 0x579   :  { %20185 = vmatprep.subr.bf16.mxu0 %v26451_v49  ;;  %18274 = vmatprep.mubr.msk.f32.mxu1 %vm22122_vm0, %v26405_v2 }
 0x57b   :  { %18188 = vmatmul.mubr.f32.gmra.mrb[46].mxu0 %v3835_v28  ;;  %v4963_v28 = vrot.slane %v23225_v51, %v26390_v32 }
 0x57c   :  { %20187 = vmatpush3.bf16.msra.mxu0 %v23089_v42  ;;  %18190 = vmatprep.mubr.msk.f32.mxu0 %vm22122_vm0, %v26405_v2 }
 0x57d   :  { %20188 = vmatprep.subr.bf16.mxu0 %v26451_v49 }
 0x57f   :  { %18191 = vmatmul.mubr.f32.gmra.mrb[48].mxu0 %v3845_v16 }
 0x580   :  { %20190 = vmatpush3.bf16.msra.mxu0 %v23096_v45  ;;  %18209 = vmatprep.mubr.msk.f32.mxu0 %vm22122_vm0, %v26405_v2 }
 0x581   :  { %20191 = vmatprep.subr.bf16.mxu0 %v26451_v49 }
 0x584   :  { %20193 = vmatpush3.bf16.msra.mxu0 %v23102_v50 }
 0x585   :  { %20194 = vmatprep.subr.bf16.mxu0 %v26451_v49 }
 0x587   :  { %18210 = vmatmul.mubr.f32.vlgmr.msra.gmra.mrb[44].mxu0 %v3826_v35  ;;  %v4933_v35 = vrot.slane %v23225_v51, %v26392_v33 }
 0x588   :  { %20196 = vmatpush3.bf16.msra.mxu0 %v23114_v0  ;;  %18212 = vmatprep.mubr.msk.f32.mxu0 %vm22122_vm0, %v26405_v2 }
 0x589   :  { %20197 = vmatprep.subr.bf16.mxu0 %v26451_v49 }
 0x58b   :  { %18213 = vmatmul.mubr.f32.gmra.mrb[46].mxu0 %v3836_v53 }
 0x58c   :  { %20199 = vmatpush3.bf16.msra.mxu0 %v23116_v1  ;;  %18215 = vmatprep.mubr.msk.f32.mxu0 %vm22122_vm0, %v26405_v2 }
 0x58d   :  { %20200 = vmatprep.subr.bf16.mxu0 %v26451_v49 }
 0x58f   :  { %18216 = vmatmul.mubr.f32.gmra.mrb[48].mxu0 %v3846_v55  ;;  %v16639_v55 = vld [vmem:[#allocation15] ss:$0 sm:$0xff] }
 0x590   :  { %20202 = vmatpush3.bf16.msra.mxu0 %v23118_v6  ;;  %18234 = vmatprep.mubr.msk.f32.mxu0 %vm22122_vm0, %v26405_v2 }
 0x591   :  { %20203 = vmatprep.subr.bf16.mxu0 %v26451_v49 }
 0x594   :  { %20205 = vmatpush3.bf16.msra.mxu0 %v23120_v10 }
 0x595   :  { %20206 = vmatprep.subr.bf16.mxu0 %v26451_v49 }
 0x597   :  { %18235 = vmatmul.mubr.f32.vlgmr.msra.gmra.mrb[44].mxu0 %v23123_v8 }
 0x598   :  { %20208 = vmatpush3.bf16.msra.mxu0 %v23084_v37  ;;  %18237 = vmatprep.mubr.msk.f32.mxu0 %vm22122_vm0, %v26405_v2 }
 0x599   :  { %20209 = vmatprep.subr.bf16.mxu0 %v26451_v49 }
 0x59b   :  { %18238 = vmatmul.mubr.f32.gmra.mrb[46].mxu0 %v23135_v36 }
 0x59c   :  { %20211 = vmatpush3.bf16.msra.mxu0 %v23089_v42  ;;  %18240 = vmatprep.mubr.msk.f32.mxu0 %vm22122_vm0, %v26405_v2 }
 0x59d   :  { %20212 = vmatprep.subr.bf16.mxu0 %v26451_v49 }
 0x59f   :  { %18241 = vmatmul.mubr.f32.gmra.mrb[48].mxu0 %v23147_v15 }
 0x5a0   :  { %20214 = vmatpush3.bf16.msra.mxu0 %v23096_v45  ;;  %18259 = vmatprep.mubr.msk.f32.mxu0 %vm22122_vm0, %v26405_v2 }
 0x5a1   :  { %20215 = vmatprep.subr.bf16.mxu0 %v26451_v49 }
 0x5a4   :  { %20217 = vmatpush3.bf16.msra.mxu0 %v23102_v50 }
 0x5a5   :  { %20284 = vmatprep.subr.bf16.mxu0 %v26451_v49 }
 0x5a7   :  { %18260 = vmatmul.mubr.f32.vlgmr.msra.gmra.mrb[44].mxu0 %v23123_v8 }
 0x5a8   :  { %18262 = vmatprep.mubr.msk.f32.mxu0 %vm22122_vm0, %v26405_v2 }
 0x5ab   :  { %18263 = vmatmul.mubr.f32.gmra.mrb[46].mxu0 %v23135_v36  ;;  %v26391_v36 = vsub.s32 5, %v23222_v17 }
 0x5ac   :  { %18265 = vmatprep.mubr.msk.f32.mxu0 %vm22122_vm0, %v26405_v2 }
 0x5ad   :  { %v4948_v31 = vrot.slane %v23225_v51, %v26391_v36 }
 0x5af   :  { %18266 = vmatmul.mubr.f32.gmra.mrb[48].mxu0 %v23147_v15 }
 0x5b0   :  { %18424 = vmatprep.mubr.msk.f32.mxu0 %vm22122_vm0, %v26405_v2 }
 0x5f4   :  { %v3692_v20 = vpop.xlane.xlu0 %3691 }
 0x5f5   :  { %v3706_v37 = vadd.f32 %v16638_v14, %v3692_v20 }
 0x5f7   :  { %v3709_v42 = vsub.f32 0.0, %v3706_v37 }
 0x5f8   :  { %v3695_v45 = vpop.xlane.xlu0 %3694 }
 0x5f9   :  { %v3712_v50 = vmul.f32 1.442695, %v3709_v42  ;;  %v3707_v60 = vadd.f32 %v16638_v14, %v3695_v45 }
 0x5fb   :  { %21447 = vpow2.f32 %v3712_v50  ;;  %v3710_v62 = vsub.f32 0.0, %v3707_v60 }
 0x5fd   :  { %v3714_v0 = vmul.f32 1.442695, %v3710_v62  ;;  %v3698_v1 = vpop.xlane.xlu1 %3697 }
 0x5fe   :  { %v3708_v6 = vadd.f32 %v16638_v14, %v3698_v1 }
 0x5ff   :  { %21449 = vpow2.f32 %v3714_v0 }
 0x600   :  { %v3711_v10 = vsub.f32 0.0, %v3708_v6  ;;  %v4396_v6 = vsel %vm4394_vm8, %v23225_v51, 0 }
 0x602   :  { %v3716_v34 = vmul.f32 1.442695, %v3711_v10 }
 0x604   :  { %21451 = vpow2.f32 %v3716_v34  ;;  %v23263_v34 = vsub.f32 %v4396_v6, %v4396_v6 }
 0x605   :  { %v21448_v3 = vpop.eup %21447 }
 0x606   :  { %v3718_v59 = vadd.f32 1.0, %v21448_v3 }
 0x608   :  { %21453 = vrcp.f32 %v3718_v59 }
 0x609   :  { %v21450_v57 = vpop.eup %21449 }
 0x60a   :  { %v3719_v54 = vadd.f32 1.0, %v21450_v57 }
 0x60c   :  { %21455 = vrcp.f32 %v3719_v54  ;;  %v4468_v54 = vand.u32 4294901760, %v23263_v34 }
 0x60e   :  { %v21452_v52 = vpop.eup %21451 }
 0x60f   :  { %v3720_v40 = vadd.f32 1.0, %v21452_v52 }
 0x611   :  { %21457 = vrcp.f32 %v3720_v40 }
 0x612   :  { %v21454_v58 = vpop.eup %21453 }
 0x613   :  { %4376 = vperm.xlu1 %21445, %v21454_v58   ;;  %v4469_v58 = vsub.f32 %v23263_v34, %v4468_v54 }
 0x616   :  { %v21456_v8 = vpop.eup %21455 }
 0x617   :  { %4381 = vperm.xlu0 %21446, %v21456_v8  }
 0x61b   :  { %v21458_v21 = vpop.eup %21457  ;;  %4898 = vbcast.lane.b32.xlu0 %v4888_v29, 272 }
 0x61c   :  { %4386 = vperm.xlu1 %21445, %v21458_v21  }
 0x61f   :  { %4924 = vbcast.lane.b32.xlu0 %v4918_v26, 264 }
 0x620   :  { %4875 = vbcast.lane.b32.xlu1 %v4873_v41, 256 }
 0x623   :  { %4935 = vbcast.lane.b32.xlu0 %v4933_v35, 256 }
 0x624   :  { %4879 = vbcast.lane.b32.xlu1 %v4873_v41, 264 }
 0x627   :  { %4928 = vbcast.lane.b32.xlu0 %v4918_v26, 272 }
 0x628   :  { %4890 = vbcast.lane.b32.xlu1 %v4888_v29, 256 }
 0x62b   :  { %4954 = vbcast.lane.b32.xlu0 %v4948_v31, 264 }
 0x62c   :  { %4894 = vbcast.lane.b32.xlu1 %v4888_v29, 264 }
 0x62f   :  { %4965 = vbcast.lane.b32.xlu0 %v4963_v28, 256 }
 0x630   :  { %4905 = vbcast.lane.b32.xlu1 %v4903_v46, 256 }
 0x633   :  { %4958 = vbcast.lane.b32.xlu0 %v4948_v31, 272 }
 0x634   :  { %4909 = vbcast.lane.b32.xlu1 %v4903_v46, 264 }
 0x637   :  { %4984 = vbcast.lane.b32.xlu0 %v4978_v44, 264 }
 0x638   :  { %4883 = vbcast.lane.b32.xlu1 %v4873_v41, 272 }
 0x63b   :  { %4988 = vbcast.lane.b32.xlu0 %v4978_v44, 272 }
 0x63c   :  { %4920 = vbcast.lane.b32.xlu1 %v4918_v26, 256 }
 0x640   :  { %4913 = vbcast.lane.b32.xlu1 %v4903_v46, 272  ;;  %v4470_v46 = vand.u32 4294901760, %v4469_v58 }
 0x642   :  { %v3830_v15 = vpop.f32.mrb[48].mxu1 }
 0x643   :  { %v18136_v53 = vpop.f32.mrb[49].mxu1  ;;  %v3831_v48 = vadd.f32 %v16639_v55, %v3830_v15 }
 0x644   :  { %4939 = vbcast.lane.b32.xlu1 %v4933_v35, 264 }
 0x646   :  { %v3840_v38 = vpop.f32.mrb[50].mxu1 }
 0x647   :  { %v18139_v43 = vpop.f32.mrb[51].mxu1  ;;  %v3841_v37 = vadd.f32 %v16639_v55, %v3840_v38 }
 0x648   :  { %4950 = vbcast.lane.b32.xlu1 %v4948_v31, 256 }
 0x64a   :  { %v3850_v16 = vpop.f32.mrb[52].mxu1 }
 0x64b   :  { %v18142_v5 = vpop.f32.mrb[53].mxu1  ;;  %v3851_v60 = vadd.f32 %v16639_v55, %v3850_v16 }
 0x64c   :  { %4943 = vbcast.lane.b32.xlu1 %v4933_v35, 272 }
 0x650   :  { %4969 = vbcast.lane.b32.xlu1 %v4963_v28, 264 }
 0x654   :  { %4980 = vbcast.lane.b32.xlu1 %v4978_v44, 256 }
 0x658   :  { %4973 = vbcast.lane.b32.xlu1 %v4963_v28, 272 }
 0x67a   :  { %v4358_v24 = vpop.f32.mrb[44].mxu0 }
 0x67b   :  { %v21125_v14 = vadd.f32 %v4358_v24, %v3831_v48  ;;  %v18261_v20 = vpop.f32.mrb[45].mxu0 }
 0x67c   :  { %5289 = vadd.xlane.f32.xlu1 %v5288_v19 }
 0x67e   :  { %v4364_v42 = vpop.f32.mrb[46].mxu0 }
 0x67f   :  { %v21127_v45 = vadd.f32 %v4364_v42, %v3841_v37  ;;  %v18264_v50 = vpop.f32.mrb[47].mxu0 }
 0x682   :  { %v4370_v62 = vpop.f32.mrb[48].mxu0 }
 0x683   :  { %v21129_v0 = vadd.f32 %v4370_v62, %v3851_v60  ;;  %v18267_v1 = vpop.f32.mrb[49].mxu0 }
 0x692   :  { %v4377_v10 = vpop.permute.xlu1 %4376 }
 0x693   :  { %v23265_v3 = vmul.f32 %v21125_v14, %v4377_v10 }
 0x695   :  { %v4399_v59 = vand.u32 4294901760, %v23265_v3 }
 0x696   :  { %v4382_v57 = vpop.permute.xlu0 %4381 }
 0x697   :  { %v23269_v13 = vmul.f32 %v21127_v45, %v4382_v57  ;;  %v23272_v52 = vsub.f32 %v23265_v3, %v4399_v59 }
 0x699   :  { %v4402_v40 = vand.u32 4294901760, %v23269_v13  ;;  %v4479_v8 = vand.u32 4294901760, %v23272_v52 }
 0x69a   :  { %v4899_v27 = vpop.permute.xlu0 %4898 }
 0x69b   :  { %v4387_v29 = vpop.permute.xlu1 %4386  ;;  %v23279_v21 = vpack.c.bf16 %v4402_v40, %v4399_v59  ;;  %v23282_v26 = vsub.f32 %v23269_v13, %v4402_v40  ;;  %v4480_v44 = vsub.f32 %v23272_v52, %v4479_v8  ;;  %vm4995_vm9 = vcmp.gt.f32.partialorder %v4899_v27, 0.5 }
 0x69c   :  { %v23284_v41 = vmul.f32 %v21129_v0, %v4387_v29 }
 0x69d   :  { %20220 = vmatpush3.bf16.msra.mxu1 %v23279_v21  ;;  %v4486_v35 = vand.u32 4294901760, %v23282_v26  ;;  %v4481_v16 = vand.u32 4294901760, %v4480_v44  ;;  %v20225_v1 = vpack.c.bf16 %v23282_v26, %v23272_v52 }
 0x69e   :  { %v4925_v31 = vpop.permute.xlu0 %4924  ;;  %18272 = vmatprep.subr.mxu1 %v26405_v2  ;;  %v23290_v28 = vand.u32 4294901760, %v23284_v41  ;;  %v5067_v24 = vsel %vm4995_vm9, %v23284_v41, -inf  ;;  %v5180_v14 = vsel %vm4995_vm9, %v23284_v41, inf }
 0x69f   :  { %v4876_v15 = vpop.permute.xlu1 %4875  ;;  %v4487_v53 = vsub.f32 %v23282_v26, %v4486_v35  ;;  %vm5000_vm10 = vcmp.gt.f32.partialorder %v4925_v31, 0.5  ;;  %v5101_v0 = vsel %vm5086_vm11, %v5067_v24, -inf  ;;  %v5214_v10 = vsel %vm5199_vm13, %v5180_v14, inf }
 0x6a0   :  { %v23296_v38 = vsub.f32 %v23284_v41, %v23290_v28  ;;  %vm4990_vm12 = vcmp.gt.f32.partialorder %v4876_v15, 0.5  ;;  %v5072_v20 = vsel %vm5000_vm10, %v23269_v13, -inf  ;;  %v5185_v37 = vsel %vm5000_vm10, %v23269_v13, inf }
 0x6a1   :  { %18273 = vmatpush3.msra.mxu1 %v23290_v28  ;;  %v4488_v5 = vand.u32 4294901760, %v4487_v53  ;;  %v5062_v50 = vsel %vm4990_vm12, %v23265_v3, -inf  ;;  %v5175_v60 = vsel %vm4990_vm12, %v23265_v3, inf  ;;  %v23320_v59 = vsel %vm5086_vm11, %v5072_v20, -inf }
 0x6a2   :  { %v4936_v43 = vpop.permute.xlu0 %4935  ;;  %18275 = vmatmul.mubr.f32.vlgmr.msra.gmra.mrb[54].mxu1 %v4470_v46  ;;  %20221 = vmatprep.subr.bf16.mxu1 %v26451_v49  ;;  %v4493_v55 = vand.u32 4294901760, %v23296_v38  ;;  %v23323_v57 = vsel %vm5199_vm13, %v5185_v37, inf  ;;  %v23330_v58 = vsel %vm5086_vm11, %v5062_v50, -inf  ;;  %v23333_v52 = vsel %vm5199_vm13, %v5175_v60, inf }
 0x6a3   :  { %v4880_v48 = vpop.permute.xlu1 %4879  ;;  %18283 = vmatprep.mubr.msk.f32.mxu1 %vm22122_vm0, %v26405_v2  ;;  %v20222_v19 = vpack.c.bf16 %v4488_v5, %v4481_v16  ;;  %vm5002_vm15 = vcmp.gt.f32.partialorder %v4936_v43, 0.5  ;;  %v23335_v26 = vpack.c.bf16 %v4486_v35, %v4479_v8 }
 0x6a4   :  { %vm4991_vm14 = vcmp.gt.f32.partialorder %v4880_v48, 0.5  ;;  %v4494_v45 = vsub.f32 %v23296_v38, %v4493_v55  ;;  %v5074_v31 = vsel %vm5002_vm15, %v23265_v3, -inf  ;;  %v5187_v46 = vsel %vm5002_vm15, %v23265_v3, inf }
 0x6a5   :  { %20223 = vmatpush3.bf16.msra.mxu1 %v20222_v19  ;;  %v5063_v40 = vsel %vm4991_vm14, %v23269_v13, -inf  ;;  %v5176_v27 = vsel %vm4991_vm14, %v23269_v13, inf }
 0x6a6   :  { %v4929_v42 = vpop.permute.xlu0 %4928  ;;  %18281 = vmatprep.subr.mxu1 %v26405_v2  ;;  %v4495_v6 = vand.u32 4294901760, %v4494_v45  ;;  %v23347_v43 = vsel %vm5086_vm11, %v5063_v40, -inf  ;;  %v23350_v8 = vsel %vm5199_vm13, %v5176_v27, inf }
 0x6a7   :  { %v4891_v62 = vpop.permute.xlu1 %4890  ;;  %vm5001_vm2 = vcmp.gt.f32.partialorder %v4929_v42, 0.5  ;;  %v5089_v40 = vmax.f32 %v23330_v58, %v23347_v43  ;;  %v5202_v27 = vmin.f32 %v23333_v52, %v23350_v8 }
 0x6a8   :  { %vm4993_vm1 = vcmp.gt.f32.partialorder %v4891_v62, 0.5  ;;  %v5073_v35 = vsel %vm5001_vm2, %v23284_v41, -inf  ;;  %v5186_v16 = vsel %vm5001_vm2, %v23284_v41, inf }
 0x6a9   :  { %18282 = vmatpush3.msra.mxu1 %v4495_v6  ;;  %v5065_v44 = vsel %vm4993_vm1, %v23265_v3, -inf  ;;  %v5178_v15 = vsel %vm4993_vm1, %v23265_v3, inf  ;;  %v23371_v6 = vsel %vm5199_vm13, %v5187_v46, inf  ;;  %v23383_v46 = vsel %vm5199_vm13, %v5186_v16, inf }
 0x6aa   :  { %v4955_v29 = vpop.permute.xlu0 %4954  ;;  %18284 = vmatmul.mubr.msk.f32.vlgmr.msra.gmra.mrb[54].mxu1 %vm4394_vm8, %v23225_v51  ;;  %20224 = vmatprep.subr.bf16.mxu1 %v26451_v49  ;;  %v5098_v19 = vsel %vm5086_vm11, %v5065_v44, -inf  ;;  %v5211_v24 = vsel %vm5199_vm13, %v5178_v15, inf }
 0x6ab   :  { %v4895_v53 = vpop.permute.xlu1 %4894  ;;  %vm5006_vm3 = vcmp.gt.f32.partialorder %v4955_v29, 0.5  ;;  %20226 = vmatpush3.bf16.msra.mxu1 %v20225_v1  ;;  %18292 = vmatprep.mubr.msk.f32.mxu1 %vm22122_vm0, %v26405_v2  ;;  %v23368_v1 = vsel %vm5086_vm11, %v5074_v31, -inf  ;;  %v23380_v31 = vsel %vm5086_vm11, %v5073_v35, -inf }
 0x6ac   :  { %vm4994_vm4 = vcmp.gt.f32.partialorder %v4895_v53, 0.5  ;;  %18290 = vmatprep.subr.mxu1 %v26405_v2  ;;  %v5078_v45 = vsel %vm5006_vm3, %v23269_v13, -inf  ;;  %v5191_v42 = vsel %vm5006_vm3, %v23269_v13, inf }
 0x6ad   :  { %v5066_v5 = vsel %vm4994_vm4, %v23269_v13, -inf  ;;  %v5179_v48 = vsel %vm4994_vm4, %v23269_v13, inf  ;;  %v23386_v15 = vsel %vm5086_vm11, %v5078_v45, -inf  ;;  %v23389_v58 = vsel %vm5199_vm13, %v5191_v42, inf }
 0x6ae   :  { %v5099_v14 = vsel %vm5086_vm11, %v5066_v5, -inf  ;;  %v5212_v20 = vsel %vm5199_vm13, %v5179_v48, inf  ;;  %v4966_v37 = vpop.permute.xlu0 %4965  ;;  %vm5302_vm4 = vcmask 1041409  }
 0x6af   :  { %v5100_v50 = vmax.f32 %v5098_v19, %v5099_v14  ;;  %v5213_v60 = vmin.f32 %v5211_v24, %v5212_v20  ;;  %v4906_v62 = vpop.permute.xlu1 %4905  ;;  %vm5008_vm9 = vcmp.gt.f32.partialorder %v4966_v37, 0.5  ;;  %18291 = vmatpush3.msra.mxu1 %v23296_v38 }
 0x6b0   :  { %vm4996_vm10 = vcmp.gt.f32.partialorder %v4906_v62, 0.5  ;;  %20227 = vmatprep.subr.bf16.mxu1 %v26451_v49 }
 0x6b1   :  { %v5102_v29 = vmax.f32 %v5100_v50, %v5101_v0  ;;  %v5215_v44 = vmin.f32 %v5213_v60, %v5214_v10  ;;  %v5080_v0 = vsel %vm5008_vm9, %v23265_v3, -inf  ;;  %v5193_v10 = vsel %vm5008_vm9, %v23265_v3, inf }
 0x6b2   :  { %v4959_v53 = vpop.permute.xlu0 %4958  ;;  %18293 = vmatmul.mubr.f32.vlgmr.msra.gmra.mrb[54].mxu1 %v23263_v34  ;;  %v5068_v35 = vsel %vm4996_vm10, %v23265_v3, -inf  ;;  %v5181_v16 = vsel %vm4996_vm10, %v23265_v3, inf  ;;  %v23403_v14 = vsel %vm5086_vm11, %v5080_v0, -inf  ;;  %v23406_v20 = vsel %vm5199_vm13, %v5193_v10, inf }
 0x6b3   :  { %v5103_v43 = vrot.slane %v5102_v29, 4  ;;  %v5216_v52 = vrot.slane %v5215_v44, 4  ;;  %v4910_v8 = vpop.permute.xlu1 %4909  ;;  %vm5007_vm12 = vcmp.gt.f32.partialorder %v4959_v53, 0.5  ;;  %20229 = vmatpush3.bf16.msra.mxu1 %v23279_v21  ;;  %18301 = vmatprep.mubr.msk.f32.mxu1 %vm22122_vm0, %v26405_v2  ;;  %v23411_v62 = vsel %vm5086_vm11, %v5068_v35, -inf }
 0x6b4   :  { %vm4997_vm14 = vcmp.gt.f32.partialorder %v4910_v8, 0.5  ;;  %v5079_v19 = vsel %vm5007_vm12, %v23284_v41, -inf  ;;  %v5192_v24 = vsel %vm5007_vm12, %v23284_v41, inf  ;;  %18299 = vmatprep.subr.mxu1 %v26405_v2  ;;  %vm5304_vm12 = vcmask 1042434  }
 0x6b5   :  { %v5104_v5 = vmax.f32 %v5102_v29, %v5103_v43  ;;  %v5217_v48 = vmin.f32 %v5215_v44, %v5216_v52  ;;  %v5069_v37 = vsel %vm4997_vm14, %v23269_v13, -inf  ;;  %v5182_v45 = vsel %vm4997_vm14, %v23269_v13, inf }
 0x6b6   :  { %v4985_v42 = vpop.permute.xlu0 %4984  ;;  %v23414_v29 = vsel %vm5199_vm13, %v5181_v16, inf  ;;  %v23417_v53 = vsel %vm5086_vm11, %v5079_v19, -inf  ;;  %v23420_v43 = vsel %vm5199_vm13, %v5192_v24, inf  ;;  %v5110_v10 = vsel %vm5086_vm11, %v5069_v37, -inf }
 0x6b7   :  { %v5105_v50 = vrot.slane %v5104_v5, 2  ;;  %v5218_v60 = vrot.slane %v5217_v48, 2  ;;  %v4884_v44 = vpop.permute.xlu1 %4883  ;;  %vm5012_vm15 = vcmp.gt.f32.partialorder %v4985_v42, 0.5  ;;  %18300 = vmatpush3.msra.mxu1 %v23290_v28  ;;  %v5223_v8 = vsel %vm5199_vm13, %v5182_v45, inf }
 0x6b8   :  { %vm4992_vm1 = vcmp.gt.f32.partialorder %v4884_v44, 0.5  ;;  %20230 = vmatprep.subr.bf16.mxu1 %v26451_v49  ;;  %v5084_v35 = vsel %vm5012_vm15, %v23269_v13, -inf  ;;  %v5197_v16 = vsel %vm5012_vm15, %v23269_v13, inf  ;;  %v5224_v32 = vmin.f32 %v23414_v29, %v5223_v8 }
 0x6b9   :  { %v5106_v52 = vmax.f32 %v5104_v5, %v5105_v50  ;;  %v5219_v0 = vmin.f32 %v5217_v48, %v5218_v60  ;;  %v5064_v19 = vsel %vm4992_vm1, %v23284_v41, -inf  ;;  %v5177_v24 = vsel %vm4992_vm1, %v23284_v41, inf }
 0x6ba   :  { %v4989_v42 = vpop.permute.xlu0 %4988  ;;  %v5090_v5 = vsel %vm5086_vm11, %v5064_v19, -inf  ;;  %v5203_v48 = vsel %vm5199_vm13, %v5177_v24, inf  ;;  %18302 = vmatmul.mubr.f32.vlgmr.msra.gmra.mrb[54].mxu1 %v4468_v54  ;;  %v5111_v60 = vmax.f32 %v23411_v62, %v5110_v10  ;;  %v23440_v19 = vsel %vm5086_vm11, %v5084_v35, -inf }
 0x6bb   :  { %v5107_v44 = vrot.slane %v5106_v52, 1  ;;  %v5220_v47 = vrot.slane %v5219_v0, 1  ;;  %v4921_v37 = vpop.permute.xlu1 %4920  ;;  %v5091_v45 = vmax.f32 %v5089_v40, %v5090_v5  ;;  %v5204_v50 = vmin.f32 %v5202_v27, %v5203_v48  ;;  %20232 = vmatpush3.bf16.msra.mxu1 %v23335_v26  ;;  %18310 = vmatprep.mubr.msk.f32.mxu1 %vm22122_vm0, %v26405_v2 }
 0x6bc   :  { %vm5013_vm2 = vcmp.gt.f32.partialorder %v4989_v42, 0.5  ;;  %vm4999_vm3 = vcmp.gt.f32.partialorder %v4921_v37, 0.5  ;;  %v23443_v24 = vsel %vm5199_vm13, %v5197_v16, inf  ;;  %18308 = vmatprep.subr.mxu1 %v26405_v2  ;;  %vm5306_vm14 = vcmask 1043459  }
 0x6bd   :  { %v5108_v34 = vmax.f32 %v5106_v52, %v5107_v44  ;;  %v5092_v54 = vrot.slane %v5091_v45, 4  ;;  %v5205_v40 = vrot.slane %v5204_v50, 4  ;;  %v5085_v26 = vsel %vm5013_vm2, %v23284_v41, -inf }
 0x6be   :  { %v5221_v27 = vmin.f32 %v5219_v0, %v5220_v47  ;;  %v5198_v42 = vsel %vm5013_vm2, %v23284_v41, inf  ;;  %v5071_v62 = vsel %vm4999_vm3, %v23265_v3, -inf  ;;  %v5184_v29 = vsel %vm4999_vm3, %v23265_v3, inf }
 0x6bf   :  { %v4914_v10 = vpop.permute.xlu1 %4913  ;;  %v5093_v8 = vmax.f32 %v5091_v45, %v5092_v54  ;;  %v5206_v35 = vmin.f32 %v5204_v50, %v5205_v40  ;;  %v5120_v16 = vsel %vm5086_vm11, %v5071_v62, -inf  ;;  %v5233_v52 = vsel %vm5199_vm13, %v5184_v29, inf  ;;  %18309 = vmatpush3.msra.mxu1 %v4493_v55 }
 0x6c0   :  { %v23457_v47 = vsel %vm5086_vm11, %v5085_v26, -inf  ;;  %v5122_v0 = vmax.f32 %v5120_v16, %v23320_v59  ;;  %v5235_v44 = vmin.f32 %v5233_v52, %v23323_v57  ;;  %vm4998_vm9 = vcmp.gt.f32.partialorder %v4914_v10, 0.5  ;;  %20233 = vmatprep.subr.bf16.mxu1 %v26451_v49 }
 0x6c1   :  { %v5094_v5 = vrot.slane %v5093_v8, 2  ;;  %v5207_v48 = vrot.slane %v5206_v35, 2  ;;  %v5070_v37 = vsel %vm4998_vm9, %v23284_v41, -inf  ;;  %v5183_v45 = vsel %vm4998_vm9, %v23284_v41, inf }
 0x6c2   :  { %v5124_v50 = vmax.f32 %v5122_v0, %v23380_v31  ;;  %v5237_v38 = vmin.f32 %v5235_v44, %v23383_v46  ;;  %v5112_v55 = vsel %vm5086_vm11, %v5070_v37, -inf  ;;  %v5225_v54 = vsel %vm5199_vm13, %v5183_v45, inf  ;;  %18311 = vmatmul.mubr.msk.f32.vlgmr.msra.gmra.mrb[54].mxu1 %vm4394_vm8, %v23225_v51 }
 0x6c3   :  { %v4940_v59 = vpop.permute.xlu1 %4939  ;;  %v5095_v57 = vmax.f32 %v5093_v8, %v5094_v5  ;;  %v5208_v40 = vmin.f32 %v5206_v35, %v5207_v48  ;;  %v5113_v26 = vmax.f32 %v5111_v60, %v5112_v55  ;;  %v5226_v62 = vmin.f32 %v5224_v32, %v5225_v54  ;;  %20235 = vmatpush3.bf16.msra.mxu1 %v23279_v21 }
 0x6c4   :  { %v23472_v29 = vsel %vm5199_vm13, %v5198_v42, inf  ;;  %v5125_v31 = vrot.slane %v5124_v50, 4  ;;  %v5238_v10 = vrot.slane %v5237_v38, 4  ;;  %vm5003_vm10 = vcmp.gt.f32.partialorder %v4940_v59, 0.5  ;;  %18317 = vmatprep.subr.mxu1 %v26405_v2  ;;  %18319 = vmatprep.mubr.msk.f32.mxu1 %vm22122_vm0, %v26405_v2 }
 0x6c5   :  { %v5096_v46 = vrot.slane %v5095_v57, 1  ;;  %v5209_v16 = vrot.slane %v5208_v40, 1  ;;  %v5114_v52 = vrot.slane %v5113_v26, 4  ;;  %v5227_v8 = vrot.slane %v5226_v62, 4 }
 0x6c6   :  { %v5126_v35 = vmax.f32 %v5124_v50, %v5125_v31  ;;  %v5239_v60 = vmin.f32 %v5237_v38, %v5238_v10  ;;  %v5075_v32 = vsel %vm5003_vm10, %v23269_v13, -inf  ;;  %v5188_v21 = vsel %vm5003_vm10, %v23269_v13, inf }
 0x6c7   :  { %v4951_v42 = vpop.permute.xlu1 %4950  ;;  %v5097_v0 = vmax.f32 %v5095_v57, %v5096_v46  ;;  %v5210_v44 = vmin.f32 %v5208_v40, %v5209_v16  ;;  %v5115_v5 = vmax.f32 %v5113_v26, %v5114_v52  ;;  %v5228_v48 = vmin.f32 %v5226_v62, %v5227_v8  ;;  %18318 = vmatpush3.msra.mxu1 %v23290_v28 }
 0x6c8   :  { %v5127_v37 = vrot.slane %v5126_v35, 2  ;;  %v5240_v45 = vrot.slane %v5239_v60, 2  ;;  %v5132_v55 = vsel %vm5086_vm11, %v5075_v32, -inf  ;;  %v5245_v54 = vsel %vm5199_vm13, %v5188_v21, inf  ;;  %20236 = vmatprep.subr.bf16.mxu1 %v26451_v49 }
 0x6c9   :  { %v5303_v50 = vsel %vm5302_vm4, %v5108_v34, %v5097_v0  ;;  %v23485_v38 = vsel %vm5302_vm4, %v5221_v27, %v5210_v44  ;;  %v5116_v59 = vrot.slane %v5115_v5, 2  ;;  %v5229_v57 = vrot.slane %v5228_v48, 2 }
 0x6ca   :  { %v5128_v40 = vmax.f32 %v5126_v35, %v5127_v37  ;;  %v5241_v26 = vmin.f32 %v5239_v60, %v5240_v45  ;;  %v5133_v62 = vmax.f32 %v23368_v1, %v5132_v55  ;;  %v5246_v28 = vmin.f32 %v23371_v6, %v5245_v54  ;;  %18320 = vmatmul.mubr.msk.f32.vlgmr.msra.gmra.mrb[54].mxu1 %vm4394_vm8, %v23225_v51 }
 0x6cb   :  { %v4944_v31 = vpop.permute.xlu1 %4943  ;;  %v5117_v10 = vmax.f32 %v5115_v5, %v5116_v59  ;;  %v5230_v46 = vmin.f32 %v5228_v48, %v5229_v57  ;;  %vm5005_vm15 = vcmp.gt.f32.partialorder %v4951_v42, 0.5  ;;  %18354 = vmatprep.mubr.msk.f32.mxu1 %vm22122_vm0, %v26405_v2  ;;  %vm5308_vm3 = vcmask 1044484  }
 0x6cc   :  { %vm5004_vm1 = vcmp.gt.f32.partialorder %v4944_v31, 0.5  ;;  %v5129_v34 = vrot.slane %v5128_v40, 1  ;;  %v5242_v27 = vrot.slane %v5241_v26, 1  ;;  %v5077_v16 = vsel %vm5005_vm15, %v23265_v3, -inf }
 0x6cd   :  { %v5190_v1 = vsel %vm5005_vm15, %v23265_v3, inf  ;;  %v5118_v52 = vrot.slane %v5117_v10, 1  ;;  %v5231_v6 = vrot.slane %v5230_v46, 1  ;;  %v5142_v8 = vsel %vm5086_vm11, %v5077_v16, -inf }
 0x6ce   :  { %v5255_v51 = vsel %vm5199_vm13, %v5190_v1, inf  ;;  %v5130_v35 = vmax.f32 %v5128_v40, %v5129_v34  ;;  %v23497_v60 = vmin.f32 %v5241_v26, %v5242_v27  ;;  %v5144_v32 = vmax.f32 %v5142_v8, %v23386_v15 }
 0x6cf   :  { %v5257_v21 = vmin.f32 %v5255_v51, %v23389_v58  ;;  %v4970_v42 = vpop.permute.xlu1 %4969  ;;  %v5119_v0 = vmax.f32 %v5117_v10, %v5118_v52  ;;  %v5232_v44 = vmin.f32 %v5230_v46, %v5231_v6  ;;  %v5076_v5 = vsel %vm5004_vm1, %v23284_v41, -inf }
 0x6d0   :  { %v5189_v48 = vsel %vm5004_vm1, %v23284_v41, inf  ;;  %v5146_v37 = vmax.f32 %v5144_v32, %v23417_v53  ;;  %v5134_v55 = vsel %vm5086_vm11, %v5076_v5, -inf  ;;  %vm5009_vm2 = vcmp.gt.f32.partialorder %v4970_v42, 0.5 }
 0x6d1   :  { %v5259_v45 = vmin.f32 %v5257_v21, %v23420_v43  ;;  %v5247_v54 = vsel %vm5199_vm13, %v5189_v48, inf  ;;  %v5135_v15 = vmax.f32 %v5133_v62, %v5134_v55  ;;  %v5305_v58 = vsel %vm5304_vm12, %v5119_v0, %v5303_v50 }
 0x6d2   :  { %v5248_v59 = vmin.f32 %v5246_v28, %v5247_v54  ;;  %v5147_v57 = vrot.slane %v5146_v37, 4  ;;  %v5081_v26 = vsel %vm5009_vm2, %v23269_v13, -inf  ;;  %v5194_v31 = vsel %vm5009_vm2, %v23269_v13, inf }
 0x6d3   :  { %v5260_v40 = vrot.slane %v5259_v45, 4  ;;  %v4981_v10 = vpop.permute.xlu1 %4980  ;;  %v5136_v46 = vrot.slane %v5135_v15, 4  ;;  %v5154_v43 = vsel %vm5086_vm11, %v5081_v26, -inf  ;;  %v5267_v34 = vsel %vm5199_vm13, %v5194_v31, inf }
 0x6d4   :  { %v5249_v53 = vrot.slane %v5248_v59, 4  ;;  %v5148_v27 = vmax.f32 %v5146_v37, %v5147_v57  ;;  %v5155_v62 = vmax.f32 %v23403_v14, %v5154_v43  ;;  %v5268_v28 = vmin.f32 %v23406_v20, %v5267_v34 }
 0x6d5   :  { %v5261_v16 = vmin.f32 %v5259_v45, %v5260_v40  ;;  %v5137_v50 = vmax.f32 %v5135_v15, %v5136_v46  ;;  %vm5011_vm9 = vcmp.gt.f32.partialorder %v4981_v10, 0.5  ;;  %v5307_v52 = vsel %vm5306_vm14, %v5130_v35, %v5305_v58 }
 0x6d6   :  { %v5250_v1 = vmin.f32 %v5248_v59, %v5249_v53  ;;  %vm5310_vm10 = vcmask 1045509   ;;  %v5149_v13 = vrot.slane %v5148_v27, 2  ;;  %v5083_v8 = vsel %vm5011_vm9, %v23265_v3, -inf }
 0x6d7   :  { %v5262_v6 = vrot.slane %v5261_v16, 2  ;;  %v5196_v51 = vsel %vm5011_vm9, %v23265_v3, inf  ;;  %v4974_v32 = vpop.permute.xlu1 %4973  ;;  %v5138_v21 = vrot.slane %v5137_v50, 2  ;;  %v5164_v14 = vsel %vm5086_vm11, %v5083_v8, -inf }
 0x6d8   :  { %v5251_v42 = vrot.slane %v5250_v1, 2  ;;  %v5277_v20 = vsel %vm5199_vm13, %v5196_v51, inf  ;;  %v5150_v0 = vmax.f32 %v5148_v27, %v5149_v13  ;;  %v5166_v48 = vmax.f32 %v5164_v14, %v23440_v19 }
 0x6d9   :  { %v5263_v5 = vmin.f32 %v5261_v16, %v5262_v6  ;;  %v5279_v35 = vmin.f32 %v5277_v20, %v23443_v24  ;;  %v5139_v37 = vmax.f32 %v5137_v50, %v5138_v21  ;;  %vm5010_vm15 = vcmp.gt.f32.partialorder %v4974_v32, 0.5 }
 0x6da   :  { %v5252_v45 = vmin.f32 %v5250_v1, %v5251_v42  ;;  %v5329_v55 = vsel %vm5304_vm12, %v5232_v44, %v23485_v38  ;;  %v5151_v3 = vrot.slane %v5150_v0, 1  ;;  %v5168_v15 = vmax.f32 %v5166_v48, %v23457_v47 }
 0x6db   :  { %v5264_v54 = vrot.slane %v5263_v5, 1  ;;  %v5281_v59 = vmin.f32 %v5279_v35, %v23472_v29  ;;  %v5140_v58 = vrot.slane %v5139_v37, 1  ;;  %v5082_v40 = vsel %vm5010_vm15, %v23284_v41, -inf }
 0x6dc   :  { %v5253_v57 = vrot.slane %v5252_v45, 1  ;;  %v5195_v19 = vsel %vm5010_vm15, %v23284_v41, inf  ;;  %v5169_v26 = vrot.slane %v5168_v15, 4  ;;  %v5156_v31 = vsel %vm5086_vm11, %v5082_v40, -inf  ;;  %v5345_v40 = vld [vmem:[%s26515_s13 + $0x10] sm:$0xff] }
 0x6dd   :  { %v5282_v24 = vrot.slane %v5281_v59, 4  ;;  %v5269_v10 = vsel %vm5199_vm13, %v5195_v19, inf  ;;  %v5141_v46 = vmax.f32 %v5139_v37, %v5140_v58  ;;  %v5157_v44 = vmax.f32 %v5155_v62, %v5156_v31  ;;  %v5343_v58 = vld [vmem:[%s26515_s13] sm:$0xff] }
 0x6de   :  { %v5254_v38 = vmin.f32 %v5252_v45, %v5253_v57  ;;  %v5270_v53 = vmin.f32 %v5268_v28, %v5269_v10  ;;  %v5170_v43 = vmax.f32 %v5168_v15, %v5169_v26  ;;  %v5152_v34 = vmax.f32 %v5150_v0, %v5151_v3  ;;  %v5344_v57 = vld [vmem:[%s26515_s13 + $0x8] sm:$0xff]  ;;  %v5347_v10 = vld [vmem:[%s26515_s13 + $0x20] sm:$0xff] }
 0x6df   :  { %v5283_v47 = vmin.f32 %v5281_v59, %v5282_v24  ;;  %v5265_v29 = vmin.f32 %v5263_v5, %v5264_v54  ;;  %v5158_v27 = vrot.slane %v5157_v44, 4  ;;  %v5309_v50 = vsel %vm5308_vm3, %v5141_v46, %v5307_v52  ;;  %v5346_v24 = vld [vmem:[%s26515_s13 + $0x18] sm:$0xff]  ;;  %v5348_v46 = vld [vmem:[%s26515_s13 + $0x28] sm:$0xff] }
 0x6e0   :  { %v5271_v16 = vrot.slane %v5270_v53, 4  ;;  %v5330_v41 = vsel %vm5306_vm14, %v23497_v60, %v5329_v55  ;;  %v5171_v1 = vrot.slane %v5170_v43, 2  ;;  %v5311_v6 = vsel %vm5310_vm10, %v5152_v34, %v5309_v50  ;;  %v5350_v50 = vld [vmem:[%s26515_s13 + $0x38] sm:$0xff] }
 0x6e1   :  { %v5284_v13 = vrot.slane %v5283_v47, 2  ;;  %v5331_v8 = vsel %vm5308_vm3, %v5254_v38, %v5330_v41  ;;  %v5159_v51 = vmax.f32 %v5157_v44, %v5158_v27  ;;  %vm5312_vm1 = vcmask 1046534  }
 0x6e2   :  { %v5272_v62 = vmin.f32 %v5270_v53, %v5271_v16  ;;  %v5332_v28 = vsel %vm5310_vm10, %v5265_v29, %v5331_v8  ;;  %v5172_v32 = vmax.f32 %v5170_v43, %v5171_v1  ;;  %vm5314_vm2 = vcmask 1047559   ;;  %v5349_v16 = vld [vmem:[%s26515_s13 + $0x30] sm:$0xff] }
 0x6e3   :  { %v5285_v21 = vmin.f32 %v5283_v47, %v5284_v13  ;;  %v5160_v42 = vrot.slane %v5159_v51, 2  ;;  %v5360_v19 = vand.u32 4294901760, %v5343_v58  ;;  %v5363_v26 = vand.u32 4294901760, %v5344_v57 }
 0x6e4   :  { %v5273_v14 = vrot.slane %v5272_v62, 2  ;;  %v5173_v0 = vrot.slane %v5172_v32, 1  ;;  %v5366_v31 = vand.u32 4294901760, %v5345_v40  ;;  %v5369_v38 = vand.u32 4294901760, %v5346_v24 }
 0x6e5   :  { %v5161_v20 = vmax.f32 %v5159_v51, %v5160_v42  ;;  %v5286_v60 = vrot.slane %v5285_v21, 1  ;;  %v5372_v44 = vand.u32 4294901760, %v5347_v10  ;;  %v5375_v53 = vand.u32 4294901760, %v5348_v46 }
 0x6e6   :  { %v5274_v52 = vmin.f32 %v5272_v62, %v5273_v14  ;;  %v5174_v45 = vmax.f32 %v5172_v32, %v5173_v0  ;;  %v23548_v43 = vsub.f32 %v5343_v58, %v5360_v19  ;;  %v23550_v47 = vsub.f32 %v5344_v57, %v5363_v26  ;;  %v5352_v32 = vld [vmem:[%s26515_s13 + $0x48] sm:$0xff] }
 0x6e7   :  { %v5162_v5 = vrot.slane %v5161_v20, 1  ;;  %v5287_v55 = vmin.f32 %v5285_v21, %v5286_v60  ;;  %v23552_v34 = vsub.f32 %v5345_v40, %v5366_v31  ;;  %v23554_v29 = vpack.c.bf16 %v5363_v26, %v5360_v19  ;;  %v5353_v60 = vld [vmem:[%s26515_s13 + $0x50] sm:$0xff] }
 0x6e8   :  { %v5275_v48 = vrot.slane %v5274_v52, 1  ;;  %v23556_v27 = vsub.f32 %v5346_v24, %v5369_v38  ;;  %v20285_v41 = vpack.c.bf16 %v23550_v47, %v23548_v43  ;;  %v23564_v1 = vpack.c.bf16 %v5369_v38, %v5366_v31 }
 0x6e9   :  { %v5163_v35 = vmax.f32 %v5161_v20, %v5162_v5  ;;  %20238 = vmatpush3.bf16.msra.mxu1 %v23554_v29  ;;  %v23566_v13 = vsub.f32 %v5347_v10, %v5372_v44  ;;  %v5378_v51 = vand.u32 4294901760, %v5349_v16  ;;  %v5381_v62 = vand.u32 4294901760, %v5350_v50  ;;  %v5354_v5 = vld [vmem:[%s26515_s13 + $0x58] sm:$0xff] }
 0x6ea   :  { %v5276_v37 = vmin.f32 %v5274_v52, %v5275_v48  ;;  %20239 = vmatprep.subr.bf16.mxu1 %v26451_v49  ;;  %20286 = vmatpush3.bf16.msra.mxu0 %v20285_v41  ;;  %v20288_v8 = vpack.c.bf16 %v23556_v27, %v23552_v34  ;;  %v23577_v21 = vpack.c.bf16 %v5375_v53, %v5372_v44  ;;  %v5387_v0 = vand.u32 4294901760, %v5352_v32  ;;  %v5357_v44 = vld [vmem:[%s26515_s13 + $0x70] sm:$0xff] }
 0x6eb   :  { %v5313_v3 = vsel %vm5312_vm1, %v5163_v35, %v5311_v6  ;;  %v23568_v6 = vsub.f32 %v5348_v46, %v5375_v53  ;;  %20287 = vmatprep.subr.bf16.mxu0 %v26451_v49  ;;  %v23582_v14 = vsub.f32 %v5349_v16, %v5378_v51  ;;  %v23584_v20 = vsub.f32 %v5350_v50, %v5381_v62  ;;  %v5358_v53 = vld [vmem:[%s26515_s13 + $0x78] sm:$0xff] }
 0x6ec   :  { %v5333_v54 = vsel %vm5312_vm1, %v5276_v37, %v5332_v28  ;;  %v5315_v15 = vsel %vm5314_vm2, %v5174_v45, %v5313_v3  ;;  %v5351_v28 = vld [vmem:[%s26515_s13 + $0x40] sm:$0xff]  ;;  %v23590_v48 = vpack.c.bf16 %v5381_v62, %v5378_v51  ;;  %v5390_v35 = vand.u32 4294901760, %v5353_v60 }
 0x6ed   :  { %v5334_v59 = vsel %vm5314_vm2, %v5287_v55, %v5333_v54  ;;  %5316 = vrot.lane.b32.xlu0 %v5315_v15, %s22125_s29  ;;  %20241 = vmatpush3.bf16.msra.mxu1 %v23564_v1  ;;  %v20291_v42 = vpack.c.bf16 %v23568_v6, %v23566_v13  ;;  %v5384_v52 = vand.u32 4294901760, %v5351_v28  ;;  %v20294_v37 = vpack.c.bf16 %v23584_v20, %v23582_v14  ;;  %v5355_v54 = vld [vmem:[%s26515_s13 + $0x60] sm:$0xff]  ;;  %v5356_v15 = vld [vmem:[%s26515_s13 + $0x68] sm:$0xff] }
 0x6ee   :  { %20242 = vmatprep.subr.bf16.mxu1 %v26451_v49  ;;  %20289 = vmatpush3.bf16.msra.mxu0 %v20288_v8  ;;  %v23597_v55 = vsub.f32 %v5352_v32, %v5387_v0  ;;  %v5393_v3 = vand.u32 4294901760, %v5354_v5  ;;  %v23605_v58 = vsub.f32 %v5353_v60, %v5390_v35  ;;  %v5396_v19 = vand.u32 4294901760, %v5355_v54 }
 0x6ef   :  { %20290 = vmatprep.subr.bf16.mxu0 %v26451_v49  ;;  %v23595_v45 = vsub.f32 %v5351_v28, %v5384_v52  ;;  %v5399_v26 = vand.u32 4294901760, %v5356_v15  ;;  %v5402_v16 = vand.u32 4294901760, %v5357_v44  ;;  %v5405_v50 = vand.u32 4294901760, %v5358_v53 }
 0x6f0   :  { %v23610_v40 = vsub.f32 %v5354_v5, %v5393_v3  ;;  %v23614_v24 = vpack.c.bf16 %v5393_v3, %v5390_v35  ;;  %v23619_v10 = vsub.f32 %v5355_v54, %v5396_v19  ;;  %v5453_v8 = vand.u32 4294901760, %v23548_v43 }
 0x6f1   :  { %5335 = vrot.lane.b32.xlu0 %v5334_v59, %s22126_s1  ;;  %20244 = vmatpush3.bf16.msra.mxu1 %v23577_v21  ;;  %v23603_v59 = vpack.c.bf16 %v5387_v0, %v5384_v52  ;;  %v20297_v57 = vpack.c.bf16 %v23597_v55, %v23595_v45  ;;  %v23621_v46 = vsub.f32 %v5356_v15, %v5399_v26  ;;  %v5460_v51 = vand.u32 4294901760, %v23550_v47 }
 0x6f2   :  { %20245 = vmatprep.subr.bf16.mxu1 %v26451_v49  ;;  %20292 = vmatpush3.bf16.msra.mxu0 %v20291_v42  ;;  %v20300_v31 = vpack.c.bf16 %v23610_v40, %v23605_v58  ;;  %v23632_v41 = vpack.c.bf16 %v5399_v26, %v5396_v19  ;;  %v5467_v62 = vand.u32 4294901760, %v23552_v34  ;;  %v5474_v28 = vand.u32 4294901760, %v23556_v27 }
 0x6f3   :  { %20293 = vmatprep.subr.bf16.mxu0 %v26451_v49  ;;  %v20303_v38 = vpack.c.bf16 %v23621_v46, %v23619_v10  ;;  %v5550_v32 = vsub.f32 %v5357_v44, %v5402_v16  ;;  %v5557_v42 = vsub.f32 %v5358_v53, %v5405_v50  ;;  %v23639_v52 = vpack.c.bf16 %v5405_v50, %v5402_v16 }
 0x6f4   :  { %v5454_v0 = vsub.f32 %v23548_v43, %v5453_v8  ;;  %v23642_v60 = vpack.c.bf16 %v5460_v51, %v5453_v8  ;;  %v23645_v5 = vpack.c.bf16 %v5474_v28, %v5467_v62  ;;  %v5461_v35 = vsub.f32 %v23550_v47, %v5460_v51 }
 0x6f5   :  { %20247 = vmatpush3.bf16.msra.mxu1 %v23590_v48  ;;  %v20306_v3 = vpack.c.bf16 %v5557_v42, %v5550_v32  ;;  %v5488_v15 = vand.u32 4294901760, %v23568_v6  ;;  %v5468_v19 = vsub.f32 %v23552_v34, %v5467_v62  ;;  %v5475_v26 = vsub.f32 %v23556_v27, %v5474_v28 }
 0x6f6   :  { %20248 = vmatprep.subr.bf16.mxu1 %v26451_v49  ;;  %20295 = vmatpush3.bf16.msra.mxu0 %v20294_v37  ;;  %v5481_v37 = vand.u32 4294901760, %v23566_v13  ;;  %v5455_v54 = vand.u32 4294901760, %v5454_v0  ;;  %v5495_v44 = vand.u32 4294901760, %v23582_v14  ;;  %v5502_v53 = vand.u32 4294901760, %v23584_v20 }
 0x6f7   :  { %20296 = vmatprep.subr.bf16.mxu0 %v26451_v49  ;;  %v5489_v16 = vsub.f32 %v23568_v6, %v5488_v15  ;;  %v5558_v6 = vand.u32 4294901760, %v5557_v42 }
 0x6f8   :  { %v23653_v43 = vpack.c.bf16 %v5488_v15, %v5481_v37  ;;  %v5482_v27 = vsub.f32 %v23566_v13, %v5481_v37  ;;  %v23665_v50 = vpack.c.bf16 %v5502_v53, %v5495_v44  ;;  %v5496_v28 = vsub.f32 %v23582_v14, %v5495_v44  ;;  %v23678_v14 = vld [vmem:[%s26516_s2] sm:$0xff] }
 0x6f9   :  { %20250 = vmatpush3.bf16.msra.mxu1 %v23603_v59  ;;  %v5490_v51 = vand.u32 4294901760, %v5489_v16  ;;  %v5503_v0 = vsub.f32 %v23584_v20, %v5502_v53  ;;  %v5551_v13 = vand.u32 4294901760, %v5550_v32  ;;  %v23681_v20 = vld [vmem:[%s26516_s2 + $0x8] sm:$0xff]  ;;  %v23686_v53 = vld [vmem:[%s26516_s2 + $0x10] sm:$0xff] }
 0x6fa   :  { %20251 = vmatprep.subr.bf16.mxu1 %v26451_v49  ;;  %20298 = vmatpush3.bf16.msra.mxu0 %v20297_v57  ;;  %v5462_v57 = vand.u32 4294901760, %v5461_v35  ;;  %v5483_v8 = vand.u32 4294901760, %v5482_v27  ;;  %v5497_v35 = vand.u32 4294901760, %v5496_v28  ;;  %v26410_v44 = vand.u32 4294901760, %v23681_v20 }
 0x6fb   :  { %20299 = vmatprep.subr.bf16.mxu0 %v26451_v49  ;;  %v23673_v37 = vpack.c.bf16 %v5558_v6, %v5551_v13  ;;  %v5552_v15 = vsub.f32 %v5550_v32, %v5551_v13  ;;  %v23689_v32 = vld [vmem:[%s26516_s2 + $0x18] sm:$0xff]  ;;  %v23721_v13 = vld [vmem:[%s26517_s24 + $0x8] sm:$0xff] }
 0x6fc   :  { %v23657_v47 = vpack.c.bf16 %v5462_v57, %v5455_v54  ;;  %v23667_v62 = vpack.c.bf16 %v5490_v51, %v5483_v8  ;;  %v5559_v57 = vsub.f32 %v5557_v42, %v5558_v6  ;;  %v26409_v42 = vand.u32 4294901760, %v23686_v53 }
 0x6fd   :  { %20253 = vmatpush3.bf16.msra.mxu1 %v23614_v24  ;;  %v26398_v27 = vand.u32 4294901760, %v23689_v32  ;;  %v23701_v8 = vsub.f32 %v23681_v20, %v26410_v44 }
 0x6fe   :  { %20254 = vmatprep.subr.bf16.mxu1 %v26451_v49  ;;  %20301 = vmatpush3.bf16.msra.mxu0 %v20300_v31  ;;  %v5469_v31 = vand.u32 4294901760, %v5468_v19  ;;  %v5553_v19 = vand.u32 4294901760, %v5552_v15  ;;  %v23708_v28 = vsub.f32 %v23686_v53, %v26409_v42  ;;  %v26401_v15 = vand.u32 4294901760, %v23721_v13 }
 0x6ff   :  { %20302 = vmatprep.subr.bf16.mxu0 %v26451_v49 }
 0x700   :  { %v23743_v25 = vsub.f32 %v23721_v13, %v26401_v15 }
 0x701   :  { %20256 = vmatpush3.bf16.msra.mxu1 %v23632_v41 }
 0x702   :  { %20304 = vmatpush3.bf16.msra.mxu0 %v20303_v38  ;;  %20257 = vmatprep.subr.bf16.mxu1 %v26451_v49  ;;  %v5476_v38 = vand.u32 4294901760, %v5475_v26  ;;  %v5560_v26 = vand.u32 4294901760, %v5559_v57  ;;  %v23726_v57 = vld [vmem:[%s26517_s24 + $0x10] sm:$0xff]  ;;  %v26403_v15 = vand.u32 4294901760, %v23743_v25 }
 0x703   :  { %20305 = vmatprep.subr.bf16.mxu0 %v26451_v49  ;;  %v26400_v36 = vand.u32 4294901760, %v23726_v57 }
 0x704   :  { %v23661_v34 = vpack.c.bf16 %v5476_v38, %v5469_v31  ;;  %v23675_v31 = vpack.c.bf16 %v5560_v26, %v5553_v19  ;;  %v26411_v38 = vand.u32 4294901760, %v23678_v14  ;;  %v23729_v19 = vld [vmem:[%s26517_s24 + $0x18] sm:$0xff] }
 0x705   :  { %20259 = vmatpush3.bf16.msra.mxu1 %v23639_v52  ;;  %v26399_v33 = vand.u32 4294901760, %v23729_v19 }
 0x706   :  { %20307 = vmatpush3.bf16.msra.mxu0 %v20306_v3  ;;  %20260 = vmatprep.subr.bf16.mxu1 %v26451_v49  ;;  %v5504_v3 = vand.u32 4294901760, %v5503_v0  ;;  %v23696_v16 = vsub.f32 %v23678_v14, %v26411_v38  ;;  %v23713_v0 = vsub.f32 %v23689_v32, %v26398_v27 }
 0x707   :  { %20332 = vmatprep.subr.bf16.mxu0 %v26451_v49 }
 0x708   :  { %v23671_v54 = vpack.c.bf16 %v5504_v3, %v5497_v35  ;;  %v23718_v3 = vld [vmem:[%s26517_s24] sm:$0xff] }
 0x709   :  { %v26397_v6 = vand.u32 4294901760, %v23718_v3 }
 0x70b   :  { %v23738_v23 = vsub.f32 %v23718_v3, %v26397_v6  ;;  %v23758_v6 = vsub.f32 %v23729_v19, %v26399_v33 }
 0x79d   :  { %v4866_v26 = vpop.f32.mrb[54].mxu1 }
 0x79e   :  { %v23733_v30 = vand.u32 4294901760, %v4866_v26  ;;  %v18321_v39 = vpop.f32.mrb[55].mxu1 }
 0x79f   :  { %v23753_v39 = vsub.f32 %v23726_v57, %v26400_v36  ;;  %v26404_v36 = vand.u32 4294901760, %v23738_v23 }
 0x7a0   :  { %v23746_v35 = vsub.f32 %v4866_v26, %v23733_v30  ;;  %v26407_v26 = vand.u32 4294901760, %v23758_v6 }
 0x7a2   :  { %v26402_v27 = vand.u32 4294901760, %v23746_v35  ;;  %18425 = vmatmul.mubr.f32.vlgmr.msra.gmra.mrb[50].mxu0 %v23746_v35 }
 0x7a3   :  { %20334 = vmatpush3.bf16.msra.mxu0 %v23642_v60  ;;  %18494 = vmatprep.mubr.msk.f32.mxu0 %vm22122_vm0, %v26405_v2  ;;  %v26408_v60 = vand.u32 4294901760, %v23753_v39 }
 0x7a4   :  { %v5443_v51 = vsub.f32 %v23746_v35, %v26402_v27  ;;  %20335 = vmatprep.subr.bf16.mxu0 %v26451_v49  ;;  %v23781_v27 = vpack.c.bf16 %v26403_v15, %v26404_v36  ;;  %v5523_v36 = vand.u32 4294901760, %v23605_v58 }
 0x7a6   :  { %v5444_v33 = vand.u32 4294901760, %v5443_v51  ;;  %v23793_v51 = vpack.c.bf16 %v26407_v26, %v26408_v60  ;;  %v23808_v60 = vld [vmem:[%s26518_s4 + $0x8] sm:$0xff] }
 0x7a7   :  { %20337 = vmatpush3.bf16.msra.mxu0 %v23645_v5  ;;  %v5516_v5 = vand.u32 4294901760, %v23597_v55 }
 0x7a8   :  { %18355 = vmatmul.mubr.f32.vlgmr.msra.gmra.mrb[56].mxu1 %v5444_v33  ;;  %20338 = vmatprep.subr.bf16.mxu0 %v26451_v49  ;;  %v5509_v33 = vand.u32 4294901760, %v23595_v45 }
 0x7a9   :  { %20262 = vmatpush3.bf16.msra.mxu1 %v23657_v47  ;;  %18389 = vmatprep.mubr.msk.f32.mxu1 %vm22122_vm0, %v26405_v2  ;;  %v5517_v15 = vsub.f32 %v23597_v55, %v5516_v5  ;;  %v5530_v2 = vand.u32 4294901760, %v23610_v40 }
 0x7aa   :  { %20263 = vmatprep.subr.bf16.mxu1 %v26451_v49  ;;  %v5510_v47 = vsub.f32 %v23595_v45, %v5509_v33  ;;  %v20345_v26 = vpack.c.bf16 %v5516_v5, %v5509_v33  ;;  %v23818_v33 = vld [vmem:[%s26518_s4 + $0x10] sm:$0xff]  ;;  %v23821_v5 = vld [vmem:[%s26518_s4 + $0x18] sm:$0xff] }
 0x7ab   :  { %20340 = vmatpush3.bf16.msra.mxu0 %v23653_v43  ;;  %v23805_v43 = vld [vmem:[%s26518_s4] sm:$0xff]  ;;  %v5518_v55 = vand.u32 4294901760, %v5517_v15  ;;  %v5531_v42 = vsub.f32 %v23610_v40, %v5530_v2  ;;  %v20348_v38 = vpack.c.bf16 %v5530_v2, %v5523_v36  ;;  %v5537_v15 = vand.u32 4294901760, %v23619_v10 }
 0x7ac   :  { %20341 = vmatprep.subr.bf16.mxu0 %v26451_v49  ;;  %v5511_v45 = vand.u32 4294901760, %v5510_v47  ;;  %v6001_v40 = vsel %vm2505_vm6, %v22562_v56, 0  ;;  %v26415_v2 = vand.u32 4294901760, %v23818_v33 }
 0x7ad   :  { %20265 = vmatpush3.bf16.msra.mxu1 %v23661_v34  ;;  %v5524_v34 = vsub.f32 %v23605_v58, %v5523_v36  ;;  %v5544_v58 = vand.u32 4294901760, %v23621_v46  ;;  %v5532_v44 = vand.u32 4294901760, %v5531_v42 }
 0x7ae   :  { %20266 = vmatprep.subr.bf16.mxu1 %v26451_v49 }
 0x7af   :  { %20343 = vmatpush3.bf16.msra.mxu0 %v23665_v50  ;;  %v5525_v47 = vand.u32 4294901760, %v5524_v34  ;;  %v5538_v50 = vsub.f32 %v23619_v10, %v5537_v15  ;;  %v5545_v61 = vsub.f32 %v23621_v46, %v5544_v58  ;;  %v20351_v10 = vpack.c.bf16 %v5544_v58, %v5537_v15 }
 0x7b0   :  { %20344 = vmatprep.subr.bf16.mxu0 %v26451_v49  ;;  %v26413_v15 = vand.u32 4294901760, %v23701_v8 }
 0x7b1   :  { %20268 = vmatpush3.bf16.msra.mxu1 %v23667_v62  ;;  %v20273_v62 = vpack.c.bf16 %v5518_v55, %v5511_v45  ;;  %v26520_v45 = vand.u32 4294901760, %v23808_v60  ;;  %v20276_v46 = vpack.c.bf16 %v5532_v44, %v5525_v47  ;;  %v5539_v34 = vand.u32 4294901760, %v5538_v50 }
 0x7b2   :  { %20269 = vmatprep.subr.bf16.mxu1 %v26451_v49  ;;  %v5546_v36 = vand.u32 4294901760, %v5545_v61  ;;  %v26414_v44 = vand.u32 4294901760, %v23696_v16  ;;  %v26524_v47 = vand.u32 4294901760, %v23681_v20  ;;  %v26526_v61 = vand.u32 4294901760, %v23689_v32 }
 0x7b3   :  { %20346 = vmatpush3.bf16.msra.mxu0 %v20345_v26  ;;  %v26519_v26 = vand.u32 4294901760, %v23805_v43  ;;  %v23842_v42 = vsub.f32 %v23808_v60, %v26520_v45  ;;  %v26521_v45 = vand.u32 4294901760, %v23821_v5 }
 0x7b4   :  { %20347 = vmatprep.subr.bf16.mxu0 %v26451_v49  ;;  %v20279_v58 = vpack.c.bf16 %v5546_v36, %v5539_v34  ;;  %v6093_v36 = vsub.f32 %v23701_v8, %v26413_v15 }
 0x7b5   :  { %20271 = vmatpush3.bf16.msra.mxu1 %v23671_v54  ;;  %v23837_v56 = vsub.f32 %v23805_v43, %v26519_v26  ;;  %v23844_v54 = vand.u32 4294901760, %v6001_v40  ;;  %v23852_v26 = vsub.f32 %v23818_v33, %v26415_v2  ;;  %v26416_v55 = vand.u32 4294901760, %v23842_v42 }
 0x7b6   :  { %20272 = vmatprep.subr.bf16.mxu1 %v26451_v49  ;;  %v26527_v2 = vmov 0.0  }
 0x7b7   :  { %20349 = vmatpush3.bf16.msra.mxu0 %v20348_v38  ;;  %v23857_v38 = vsub.f32 %v23821_v5, %v26521_v45  ;;  %v23865_v50 = vsub.f32 %v6001_v40, %v23844_v54  ;;  %v26417_v45 = vand.u32 4294901760, %v23837_v56  ;;  %v6086_v40 = vsub.f32 %v23696_v16, %v26414_v44 }
 0x7b8   :  { %20350 = vmatprep.subr.bf16.mxu0 %v26451_v49  ;;  %v7084_v34 = vand.u32 4294901760, %v23852_v26 }
 0x7b9   :  { %20274 = vmatpush3.bf16.msra.mxu1 %v20273_v62  ;;  %26522 = vst [vmem:[#allocation87_spill] sm:$0xff] %v23865_v50  ;;  %v26523_v62 = vand.u32 4294901760, %v23678_v14  ;;  %v26418_v14 = vand.u32 4294901760, %v23713_v0  ;;  %v23886_v20 = vand.u32 4294901760, %v23865_v50 }
 0x7ba   :  { %20275 = vmatprep.subr.bf16.mxu1 %v26451_v49 }
 0x7bb   :  { %20352 = vmatpush3.bf16.msra.mxu0 %v20351_v10  ;;  %v20381_v10 = vpack.c.bf16 %v26524_v47, %v26523_v62  ;;  %v23894_v62 = vpack.c.bf16 %v26416_v55, %v26417_v45  ;;  %v26525_v47 = vand.u32 4294901760, %v23686_v53  ;;  %v6094_v55 = vand.u32 4294901760, %v6093_v36 }
 0x7bc   :  { %20353 = vmatprep.subr.bf16.mxu0 %v26451_v49  ;;  %v6107_v53 = vsub.f32 %v23713_v0, %v26418_v14  ;;  %v6075_v32 = vsub.f32 %v23865_v50, %v23886_v20 }
 0x7bd   :  { %20277 = vmatpush3.bf16.msra.mxu1 %v20276_v46  ;;  %v6099_v46 = vand.u32 4294901760, %v23708_v28  ;;  %v20384_v15 = vpack.c.bf16 %v26526_v61, %v26525_v47 }
 0x7be   :  { %20278 = vmatprep.subr.bf16.mxu1 %v26451_v49  ;;  %v6108_v36 = vand.u32 4294901760, %v6107_v53  ;;  %v23922_v47 = vand.u32 4294901760, %v6075_v32 }
 0x7bf   :  { %20355 = vmatpush3.bf16.msra.mxu0 %v23673_v37  ;;  %v7091_v37 = vand.u32 4294901760, %v23857_v38  ;;  %v6100_v45 = vsub.f32 %v23708_v28, %v6099_v46 }
 0x7c0   :  { %20380 = vmatprep.subr.bf16.mxu0 %v26451_v49  ;;  %26528 = vst [vmem:[#allocation88_spill] sm:$0xff] %v23922_v47 }
 0x7c1   :  { %20280 = vmatpush3.bf16.msra.mxu1 %v20279_v58  ;;  %v23906_v44 = vpack.c.bf16 %v7091_v37, %v7084_v34  ;;  %v6087_v58 = vand.u32 4294901760, %v6086_v40  ;;  %v6101_v40 = vand.u32 4294901760, %v6100_v45 }
 0x7c2   :  { %18495 = vmatmul.mubr.f32.vlgmr.msra.gmra.mrb[52].mxu0 %v23733_v30  ;;  %20281 = vmatprep.subr.bf16.mxu1 %v26451_v49 }
 0x7c3   :  { %20382 = vmatpush3.bf16.msra.mxu0 %v20381_v10  ;;  %18540 = vmatprep.mubr.msk.f32.mxu0 %vm22122_vm0, %v26527_v2  ;;  %v20387_v61 = vpack.c.bf16 %v6094_v55, %v6087_v58  ;;  %v26529_v55 = vand.u32 4294901760, %v23738_v23  ;;  %v26530_v58 = vand.u32 4294901760, %v23743_v25 }
 0x7c4   :  { %20383 = vmatprep.subr.bf16.mxu0 %v26451_v49 }
 0x7c5   :  { %20283 = vmatpush3.bf16.msra.mxu1 %v23675_v31  ;;  %v20390_v31 = vpack.c.bf16 %v6108_v36, %v6101_v40  ;;  %v6578_v45 = vsub.f32 %v23738_v23, %v26529_v55  ;;  %v6585_v53 = vsub.f32 %v23743_v25, %v26530_v58  ;;  %v26531_v40 = vand.u32 4294901760, %v23753_v39  ;;  %v23962_v58 = vpop.xlane.xlu1 %5289 }
 0x7c6   :  { %20308 = vmatprep.subr.bf16.mxu1 %v26451_v49  ;;  %vm5291_vm9 = vcmp.gt.f32.partialorder %v23962_v58, 0.5  ;;  %v26542_v58 = vand.u32 4294901760, %v23808_v60  ;;  %v26544_v60 = vand.u32 4294901760, %v23821_v5 }
 0x7c7   :  { %20385 = vmatpush3.bf16.msra.mxu0 %v20384_v15  ;;  %v6579_v32 = vand.u32 4294901760, %v6578_v45  ;;  %v6592_v36 = vsub.f32 %v23753_v39, %v26531_v40 }
 0x7c8   :  { %18390 = vmatmul.mubr.f32.vlgmr.msra.gmra.mrb[58].mxu1 %v23733_v30  ;;  %20386 = vmatprep.subr.bf16.mxu0 %v26451_v49 }
 0x7c9   :  { %20310 = vmatpush3.bf16.msra.mxu1 %v23554_v29  ;;  %18459 = vmatprep.mubr.msk.f32.mxu1 %vm22122_vm0, %v26527_v2 }
 0x7ca   :  { %18541 = vmatmul.mubr.f32.vlgmr.msra.gmra.mrb[54].mxu0 %v23922_v47  ;;  %20311 = vmatprep.subr.bf16.mxu1 %v26451_v49  ;;  %v26584_v47 = vmov 0.0|0.0  }
 0x7cb   :  { %20388 = vmatpush3.bf16.msra.mxu0 %v20387_v61  ;;  %18551 = vmatprep.mubr.msk.f32.mxu0 %vm22122_vm0, %v26527_v2  ;;  %v6586_v61 = vand.u32 4294901760, %v6585_v53  ;;  %v6593_v53 = vand.u32 4294901760, %v6592_v36 }
 0x7cc   :  { %20389 = vmatprep.subr.bf16.mxu0 %v26451_v49 }
 0x7cd   :  { %20313 = vmatpush3.bf16.msra.mxu1 %v23564_v1  ;;  %v20423_v45 = vpack.c.bf16 %v6586_v61, %v6579_v32  ;;  %v26533_v32 = vand.u32 4294901760, %v23718_v3  ;;  %v26534_v61 = vand.u32 4294901760, %v23721_v13  ;;  %v26536_v3 = vand.u32 4294901760, %v23726_v57 }
 0x7ce   :  { %20314 = vmatprep.subr.bf16.mxu1 %v26451_v49  ;;  %v26537_v13 = vand.u32 4294901760, %v23729_v19  ;;  %v26539_v19 = vand.u32 4294901760, %v23842_v42 }
 0x7cf   :  { %20391 = vmatpush3.bf16.msra.mxu0 %v20390_v31  ;;  %v26532_v31 = vand.u32 4294901760, %v23758_v6  ;;  %v23984_v36 = vpack.c.bf16 %v26534_v61, %v26533_v32 }
 0x7d0   :  { %20398 = vmatprep.subr.bf16.mxu0 %v26451_v49 }
 0x7d1   :  { %20316 = vmatpush3.bf16.msra.mxu1 %v23577_v21  ;;  %v6599_v55 = vsub.f32 %v23758_v6, %v26532_v31 }
 0x7d2   :  { %18552 = vmatmul.mubr.f32.vlgmr.msra.gmra.mrb[56].mxu0 %v23844_v54  ;;  %20317 = vmatprep.subr.bf16.mxu1 %v26451_v49 }
 0x7d3   :  { %20400 = vmatpush3.bf16.msra.mxu0 %v20381_v10  ;;  %18573 = vmatprep.mubr.msk.f32.mxu0 %vm22122_vm0, %v26527_v2  ;;  %v6600_v14 = vand.u32 4294901760, %v6599_v55 }
 0x7d4   :  { %20401 = vmatprep.subr.bf16.mxu0 %v26451_v49 }
 0x7d5   :  { %20319 = vmatpush3.bf16.msra.mxu1 %v23590_v48  ;;  %v20426_v31 = vpack.c.bf16 %v6600_v14, %v6593_v53  ;;  %v26535_v14 = vand.u32 4294901760, %v23746_v35  ;;  %v26538_v35 = vand.u32 4294901760, %v23837_v56 }
 0x7d6   :  { %20320 = vmatprep.subr.bf16.mxu1 %v26451_v49 }
 0x7d7   :  { %20403 = vmatpush3.bf16.msra.mxu0 %v20384_v15  ;;  %v7071_v57 = vsub.f32 %v23837_v56, %v26538_v35 }
 0x7d8   :  { %20410 = vmatprep.subr.bf16.mxu0 %v26451_v49 }
 0x7d9   :  { %20322 = vmatpush3.bf16.msra.mxu1 %v23603_v59 }
 0x7da   :  { %18574 = vmatmul.mubr.f32.vlgmr.msra.gmra.mrb[58].mxu0 %v23886_v20  ;;  %20323 = vmatprep.subr.bf16.mxu1 %v26451_v49 }
 0x7db   :  { %20412 = vmatpush3.bf16.msra.mxu0 %v20381_v10  ;;  %18595 = vmatprep.mubr.msk.f32.mxu0 %vm22122_vm0, %v26527_v2  ;;  %v5317_v10 = vpop.permute.xlu0 %5316 }
 0x7dc   :  { %20413 = vmatprep.subr.bf16.mxu0 %v26451_v49  ;;  %v5319_v40 = vsel %vm5291_vm9, %v5317_v10, 0.0  ;;  %v24001_v10 = vpack.c.bf16 %v26537_v13, %v26536_v3 }
 0x7dd   :  { %20325 = vmatpush3.bf16.msra.mxu1 %v23614_v24 }
 0x7de   :  { %20326 = vmatprep.subr.bf16.mxu1 %v26451_v49 }
 0x7df   :  { %20415 = vmatpush3.bf16.msra.mxu0 %v20384_v15  ;;  %v6493_v15 = vsel %vm2505_vm6, %v5319_v40, 0 }
 0x7e0   :  { %20422 = vmatprep.subr.bf16.mxu0 %v26451_v49  ;;  %v23986_v55 = vand.u32 4294901760, %v6493_v15 }
 0x7e1   :  { %20328 = vmatpush3.bf16.msra.mxu1 %v23632_v41 }
 0x7e2   :  { %18596 = vmatmul.mubr.f32.vlgmr.msra.gmra.mrb[60].mxu0 %v23844_v54  ;;  %20329 = vmatprep.subr.bf16.mxu1 %v26451_v49 }
 0x7e3   :  { %20424 = vmatpush3.bf16.msra.mxu0 %v20423_v45  ;;  %18617 = vmatprep.mubr.msk.f32.mxu0 %vm22122_vm0, %v26527_v2  ;;  %v7078_v45 = vsub.f32 %v23842_v42, %v26539_v19 }
 0x7e4   :  { %20425 = vmatprep.subr.bf16.mxu0 %v26451_v49 }
 0x7e5   :  { %20331 = vmatpush3.bf16.msra.mxu1 %v23639_v52  ;;  %v7079_v40 = vand.u32 4294901760, %v7078_v45 }
 0x7e6   :  { %20356 = vmatprep.subr.bf16.mxu1 %v26451_v49 }
 0x7e7   :  { %20427 = vmatpush3.bf16.msra.mxu0 %v20426_v31  ;;  %v7085_v31 = vsub.f32 %v23852_v26, %v7084_v34 }
 0x7e8   :  { %18460 = vmatmul.mubr.f32.vlgmr.msra.gmra.mrb[60].mxu1 %v26535_v14  ;;  %20434 = vmatprep.subr.bf16.mxu0 %v26451_v49 }
 0x7e9   :  { %20358 = vmatpush3.bf16.msra.mxu1 %v23554_v29  ;;  %18529 = vmatprep.mubr.msk.f32.mxu1 %vm22122_vm0, %v26527_v2  ;;  %v24006_v29 = vsub.f32 %v6493_v15, %v23986_v55  ;;  %v5336_v15 = vpop.permute.xlu0 %5335  ;;  %v7086_v61 = vand.u32 4294901760, %v7085_v31 }
 0x7ea   :  { %18618 = vmatmul.mubr.f32.vlgmr.msra.gmra.mrb[62].mxu0 %v23986_v55  ;;  %20359 = vmatprep.subr.bf16.mxu1 %v26451_v49  ;;  %v5338_v34 = vsel %vm5291_vm9, %v5336_v15, 0.0 }
 0x7eb   :  { %20436 = vmatpush3.bf16.msra.mxu0 %v23984_v36  ;;  %18639 = vmatprep.mubr.msk.f32.mxu0 %vm22122_vm0, %v26527_v2  ;;  %v6566_v53 = vand.u32 4294901760, %v24006_v29  ;;  %v6986_v3 = vsel %vm2505_vm6, %v5338_v34, 0 }
 0x7ec   :  { %20437 = vmatprep.subr.bf16.mxu0 %v26451_v49 }
 0x7ed   :  { %20361 = vmatpush3.bf16.msra.mxu1 %v23564_v1  ;;  %v7072_v1 = vand.u32 4294901760, %v7071_v57  ;;  %v24058_v57 = vand.u32 4294901760, %v6986_v3 }
 0x7ee   :  { %20362 = vmatprep.subr.bf16.mxu1 %v26451_v49 }
 0x7ef   :  { %20439 = vmatpush3.bf16.msra.mxu0 %v24001_v10  ;;  %v20459_v32 = vpack.c.bf16 %v7079_v40, %v7072_v1  ;;  %v8031_v1 = vld [vmem:[%s26540_s20 + $0x8] sm:$0xf] }
 0x7f0   :  { %20446 = vmatprep.subr.bf16.mxu0 %v26451_v49  ;;  %v24089_v40 = vunpack.c.l.bf16 %v8031_v1 }
 0x7f1   :  { %20364 = vmatpush3.bf16.msra.mxu1 %v23577_v21  ;;  %v7092_v21 = vsub.f32 %v23857_v38, %v7091_v37  ;;  %v16687_v37 = vld [vmem:[%s26540_s20] sm:$0xff]  }
 0x7f2   :  { %18640 = vmatmul.mubr.f32.vlgmr.msra.gmra.mrb[64].mxu0 %v6566_v53  ;;  %20365 = vmatprep.subr.bf16.mxu1 %v26451_v49  ;;  %v24056_v35 = vunpack.c.l.bf16 %v16687_v37  ;;  %v24075_v45 = vunpack.c.h.bf16 %v16687_v37 }
 0x7f3   :  { %20448 = vmatpush3.bf16.msra.mxu0 %v23984_v36  ;;  %18661 = vmatprep.mubr.msk.f32.mxu0 %vm22122_vm0, %v26527_v2  ;;  %v7093_v14 = vand.u32 4294901760, %v7092_v21 }
 0x7f4   :  { %20449 = vmatprep.subr.bf16.mxu0 %v26451_v49  ;;  %v8036_v19 = vsel %vm1408_vm5, %v24056_v35, 0  ;;  %v8039_v5 = vsel %vm1408_vm5, %v24075_v45, 0 }
 0x7f5   :  { %20367 = vmatpush3.bf16.msra.mxu1 %v23590_v48  ;;  %v20462_v48 = vpack.c.bf16 %v7093_v14, %v7086_v61  ;;  %v24103_v15 = vsub.f32 %v8039_v5, %v8039_v5  ;;  %v26547_v61 = vand.u32 4294901760, %v23696_v16  ;;  %v26548_v14 = vand.u32 4294901760, %v23701_v8 }
 0x7f6   :  { %20368 = vmatprep.subr.bf16.mxu1 %v26451_v49 }
 0x7f7   :  { %20451 = vmatpush3.bf16.msra.mxu0 %v24001_v10  ;;  %v20405_v34 = vpack.c.bf16 %v26548_v14, %v26547_v61  ;;  %v8122_v37 = vand.u32 4294901760, %v24103_v15 }
 0x7f8   :  { %20458 = vmatprep.subr.bf16.mxu0 %v26451_v49 }
 0x7f9   :  { %20370 = vmatpush3.bf16.msra.mxu1 %v23603_v59  ;;  %v26541_v59 = vand.u32 4294901760, %v23805_v43 }
 0x7fa   :  { %18662 = vmatmul.mubr.f32.vlgmr.msra.gmra.mrb[66].mxu0 %v23986_v55  ;;  %20371 = vmatprep.subr.bf16.mxu1 %v26451_v49 }
 0x7fb   :  { %20460 = vmatpush3.bf16.msra.mxu0 %v20459_v32  ;;  %18683 = vmatprep.mubr.msk.f32.mxu0 %vm22122_vm0, %v26527_v2  ;;  %v24054_v13 = vpack.c.bf16 %v26542_v58, %v26541_v59  ;;  %v26546_v32 = vpack.c.bf16 %v23713_v0, %v23708_v28  ;;  %v8123_v58 = vsub.f32 %v24103_v15, %v8122_v37 }
 0x7fc   :  { %20461 = vmatprep.subr.bf16.mxu0 %v26451_v49 }
 0x7fd   :  { %20373 = vmatpush3.bf16.msra.mxu1 %v23614_v24  ;;  %v26543_v24 = vand.u32 4294901760, %v23818_v33  ;;  %v24084_v33 = vsub.f32 %v8036_v19, %v8036_v19  ;;  %v8124_v28 = vand.u32 4294901760, %v8123_v58 }
 0x7fe   :  { %20374 = vmatprep.subr.bf16.mxu1 %v26451_v49 }
 0x7ff   :  { %20463 = vmatpush3.bf16.msra.mxu0 %v20462_v48  ;;  %v24069_v43 = vpack.c.bf16 %v26544_v60, %v26543_v24  ;;  %v8112_v21 = vand.u32 4294901760, %v24084_v33 }
 0x800   :  { %20470 = vmatprep.subr.bf16.mxu0 %v26451_v49 }
 0x801   :  { %20376 = vmatpush3.bf16.msra.mxu1 %v23632_v41  ;;  %v24078_v41 = vsub.f32 %v6986_v3, %v24058_v57  ;;  %v8113_v48 = vsub.f32 %v24084_v33, %v8112_v21 }
 0x802   :  { %18684 = vmatmul.mubr.f32.vlgmr.msra.gmra.mrb[68].mxu0 %v24058_v57  ;;  %20377 = vmatprep.subr.bf16.mxu1 %v26451_v49 }
 0x803   :  { %20472 = vmatpush3.bf16.msra.mxu0 %v24054_v13  ;;  %18705 = vmatprep.mubr.msk.f32.mxu0 %vm22122_vm0, %v26527_v2  ;;  %v7059_v31 = vand.u32 4294901760, %v24078_v41  ;;  %v8114_v59 = vand.u32 4294901760, %v8113_v48 }
 0x804   :  { %20473 = vmatprep.subr.bf16.mxu0 %v26451_v49 }
 0x805   :  { %20379 = vmatpush3.bf16.msra.mxu1 %v23639_v52  ;;  %v26545_v52 = vpack.c.bf16 %v23701_v8, %v23696_v16  ;;  %v26549_v16 = vand.u32 4294901760, %v23713_v0 }
 0x806   :  { %20392 = vmatprep.subr.bf16.mxu1 %v26451_v49 }
 0x807   :  { %20475 = vmatpush3.bf16.msra.mxu0 %v24069_v43  ;;  %v20408_v8 = vpack.c.bf16 %v26549_v16, %v6099_v46  ;;  %v6567_v46 = vsub.f32 %v24006_v29, %v6566_v53  ;;  %v8583_v16 = vld [vmem:[%s26555_s30 + $0x18] sm:$0xff] }
 0x808   :  { %18530 = vmatmul.mubr.f32.vlgmr.msra.gmra.mrb[62].mxu1 %v23733_v30  ;;  %20482 = vmatprep.subr.bf16.mxu0 %v26451_v49  ;;  %v8042_v30 = vsel %vm1408_vm5, %v24089_v40, 0 }
 0x809   :  { %20394 = vmatpush3.bf16.msra.mxu1 %v26545_v52  ;;  %18562 = vmatprep.mubr.msk.f32.mxu1 %vm22122_vm0, %v26527_v2  ;;  %v24123_v3 = vsub.f32 %v8042_v30, %v8042_v30  ;;  %v6568_v60 = vand.u32 4294901760, %v6567_v46  ;;  %v8581_v30 = vld [vmem:[%s26555_s30 + $0x8] sm:$0xff] }
 0x80a   :  { %18706 = vmatmul.mubr.f32.vlgmr.msra.gmra.mrb[70].mxu0 %v7059_v31  ;;  %20395 = vmatprep.subr.bf16.mxu1 %v26451_v49  ;;  %v8597_v61 = vand.u32 4294901760, %v8581_v30 }
 0x80b   :  { %20484 = vmatpush3.bf16.msra.mxu0 %v24054_v13  ;;  %18727 = vmatprep.mubr.msk.f32.mxu0 %vm22122_vm0, %v26527_v2  ;;  %v8132_v24 = vand.u32 4294901760, %v24123_v3 }
 0x80c   :  { %20485 = vmatprep.subr.bf16.mxu0 %v26451_v49  ;;  %v24374_v48 = vsub.f32 %v8581_v30, %v8597_v61 }
 0x80d   :  { %20397 = vmatpush3.bf16.msra.mxu1 %v26546_v32  ;;  %v8133_v0 = vsub.f32 %v24123_v3, %v8132_v24 }
 0x80e   :  { %20404 = vmatprep.subr.bf16.mxu1 %v26451_v49 }
 0x80f   :  { %20487 = vmatpush3.bf16.msra.mxu0 %v24069_v43 }
 0x810   :  { %18563 = vmatmul.mubr.f32.vlgmr.msra.gmra.mrb[64].mxu1 %v23865_v50  ;;  %18796 = vmatprep.subr.mxu0 %v26527_v2 }
 0x811   :  { %20406 = vmatpush3.bf16.msra.mxu1 %v20405_v34  ;;  %18584 = vmatprep.mubr.msk.f32.mxu1 %vm22122_vm0, %v26527_v2 }
 0x812   :  { %18728 = vmatmul.mubr.f32.vlgmr.msra.gmra.mrb[72].mxu0 %v24058_v57  ;;  %20407 = vmatprep.subr.bf16.mxu1 %v26451_v49 }
 0x813   :  { %18797 = vmatpush3.msra.mxu0 %v22577_v4  ;;  %18798 = vmatprep.mubr.msk.f32.mxu0 %vm22122_vm0, %v26527_v2 }
 0x814   :  { %18807 = vmatprep.subr.mxu0 %v26527_v2 }
 0x815   :  { %20409 = vmatpush3.bf16.msra.mxu1 %v20408_v8 }
 0x816   :  { %18799 = vmatmul.mubr.f32.vlgmr.msra.gmra.mrb[74].mxu0 %v8114_v59  ;;  %20416 = vmatprep.subr.bf16.mxu1 %v26451_v49  ;;  %v8702_v59 = vand.u32 4294901760, %v24374_v48 }
 0x817   :  { %18808 = vmatpush3.msra.mxu0 %v22618_v18  ;;  %18801 = vmatprep.mubr.msk.f32.mxu0 %vm22122_vm0, %v26527_v2  ;;  %v8134_v18 = vand.u32 4294901760, %v8133_v0 }
 0x818   :  { %18585 = vmatmul.mubr.f32.vlgmr.msra.gmra.mrb[66].mxu1 %v23844_v54  ;;  %18818 = vmatprep.subr.mxu0 %v26527_v2  ;;  %v8703_v0 = vsub.f32 %v24374_v48, %v8702_v59 }
 0x819   :  { %20418 = vmatpush3.bf16.msra.mxu1 %v23984_v36  ;;  %18606 = vmatprep.mubr.msk.f32.mxu1 %vm22122_vm0, %v26527_v2  ;;  %v26550_v36 = vpack.c.bf16 %v23743_v25, %v23738_v23  ;;  %v16683_v23 = vld [vmem:[%s26552_s12] sm:$0xff]  }
 0x81a   :  { %18802 = vmatmul.mubr.f32.gmra.mrb[76].mxu0 %v8124_v28  ;;  %20419 = vmatprep.subr.bf16.mxu1 %v26451_v49  ;;  %v24215_v25 = vunpack.c.l.bf16 %v16683_v23 }
 0x81b   :  { %18804 = vmatprep.mubr.msk.f32.mxu0 %vm22122_vm0, %v26527_v2 }
 0x81d   :  { %20421 = vmatpush3.bf16.msra.mxu1 %v24001_v10  ;;  %v26551_v10 = vpack.c.bf16 %v23758_v6, %v23753_v39  ;;  %v26553_v6 = vpack.c.bf16 %v23842_v42, %v23837_v56  ;;  %v7489_v39 = vsel %vm1408_vm5, %v24215_v25, 0  ;;  %v26554_v42 = vpack.c.bf16 %v23857_v38, %v23852_v26 }
 0x81e   :  { %18805 = vmatmul.mubr.f32.gmra.mrb[78].mxu0 %v8134_v18  ;;  %20428 = vmatprep.subr.bf16.mxu1 %v26451_v49  ;;  %v24238_v56 = vsub.f32 %v7489_v39, %v7489_v39 }
 0x81f   :  { %18809 = vmatprep.mubr.msk.f32.mxu0 %vm22122_vm0, %v26527_v2 }
 0x820   :  { %18607 = vmatmul.mubr.f32.vlgmr.msra.gmra.mrb[68].mxu1 %v6568_v60 }
 0x821   :  { %20430 = vmatpush3.bf16.msra.mxu1 %v26550_v36  ;;  %18628 = vmatprep.mubr.msk.f32.mxu1 %vm22122_vm0, %v26527_v2  ;;  %v8704_v36 = vand.u32 4294901760, %v8703_v0 }
 0x822   :  { %18810 = vmatmul.mubr.msk.f32.vlgmr.msra.gmra.mrb[74].mxu0 %vm1408_vm5, %v24056_v35  ;;  %20431 = vmatprep.subr.bf16.mxu1 %v26451_v49 }
 0x823   :  { %18819 = vmatpush3.msra.mxu0 %v22590_v9  ;;  %18812 = vmatprep.mubr.msk.f32.mxu0 %vm22122_vm0, %v26527_v2  ;;  %v7060_v9 = vsub.f32 %v24078_v41, %v7059_v31 }
 0x824   :  { %18829 = vmatprep.subr.mxu0 %v26527_v2 }
 0x825   :  { %20433 = vmatpush3.bf16.msra.mxu1 %v26551_v10 }
 0x826   :  { %18813 = vmatmul.mubr.msk.f32.gmra.mrb[76].mxu0 %vm1408_vm5, %v24075_v45  ;;  %20440 = vmatprep.subr.bf16.mxu1 %v26451_v49 }
 0x827   :  { %18815 = vmatprep.mubr.msk.f32.mxu0 %vm22122_vm0, %v26527_v2 }
 0x828   :  { %18629 = vmatmul.mubr.f32.vlgmr.msra.gmra.mrb[70].mxu1 %v24006_v29 }
 0x829   :  { %20442 = vmatpush3.bf16.msra.mxu1 %v23781_v27  ;;  %18650 = vmatprep.mubr.msk.f32.mxu1 %vm22122_vm0, %v26527_v2  ;;  %v7061_v27 = vand.u32 4294901760, %v7060_v9 }
 0x82a   :  { %18816 = vmatmul.mubr.msk.f32.gmra.mrb[78].mxu0 %vm1408_vm5, %v24089_v40  ;;  %20443 = vmatprep.subr.bf16.mxu1 %v26451_v49 }
 0x82b   :  { %18820 = vmatprep.mubr.msk.f32.mxu0 %vm22122_vm0, %v26527_v2 }
 0x82d   :  { %20445 = vmatpush3.bf16.msra.mxu1 %v23793_v51  ;;  %v24228_v51 = vunpack.c.h.bf16 %v16683_v23 }
 0x82e   :  { %18821 = vmatmul.mubr.f32.vlgmr.msra.gmra.mrb[74].mxu0 %v24084_v33  ;;  %20452 = vmatprep.subr.bf16.mxu1 %v26451_v49 }
 0x82f   :  { %18830 = vmatpush3.msra.mxu0 %v22577_v4  ;;  %18823 = vmatprep.mubr.msk.f32.mxu0 %vm22122_vm0, %v26527_v2  ;;  %v7492_v29 = vsel %vm1408_vm5, %v24228_v51, 0 }
 0x830   :  { %18651 = vmatmul.mubr.f32.vlgmr.msra.gmra.mrb[72].mxu1 %v23986_v55  ;;  %18840 = vmatprep.subr.mxu0 %v26527_v2  ;;  %v7484_v55 = vld [vmem:[%s26552_s12 + $0x8] sm:$0xf] }
 0x831   :  { %20454 = vmatpush3.bf16.msra.mxu1 %v24054_v13  ;;  %18672 = vmatprep.mubr.msk.f32.mxu1 %vm22122_vm0, %v26527_v2  ;;  %v24245_v53 = vunpack.c.l.bf16 %v7484_v55  ;;  %v24254_v13 = vsub.f32 %v7492_v29, %v7492_v29 }
 0x832   :  { %18824 = vmatmul.mubr.f32.gmra.mrb[76].mxu0 %v24103_v15  ;;  %20455 = vmatprep.subr.bf16.mxu1 %v26451_v49  ;;  %v8580_v15 = vld [vmem:[%s26555_s30] sm:$0xff] }
 0x833   :  { %18826 = vmatprep.mubr.msk.f32.mxu0 %vm22122_vm0, %v26527_v2  ;;  %v7495_v26 = vsel %vm1408_vm5, %v24245_v53, 0  ;;  %v8594_v32 = vand.u32 4294901760, %v8580_v15 }
 0x834   :  { %v7584_v19 = vsub.f32 %v7495_v26, %v7495_v26 }
 0x835   :  { %20457 = vmatpush3.bf16.msra.mxu1 %v24069_v43  ;;  %v7575_v43 = vand.u32 4294901760, %v24254_v13  ;;  %v24372_v34 = vsub.f32 %v8580_v15, %v8594_v32 }
 0x836   :  { %18827 = vmatmul.mubr.f32.gmra.mrb[78].mxu0 %v24123_v3  ;;  %20464 = vmatprep.subr.bf16.mxu1 %v26451_v49  ;;  %v7585_v1 = vand.u32 4294901760, %v7584_v19  ;;  %v8582_v3 = vld [vmem:[%s26555_s30 + $0x10] sm:$0xff] }
 0x837   :  { %18831 = vmatprep.mubr.msk.f32.mxu0 %vm22122_vm0, %v26527_v2  ;;  %v8695_v8 = vand.u32 4294901760, %v24372_v34  ;;  %v8600_v58 = vand.u32 4294901760, %v8582_v3 }
 0x838   :  { %18673 = vmatmul.mubr.f32.vlgmr.msra.gmra.mrb[74].mxu1 %v7061_v27 }
 0x839   :  { %20466 = vmatpush3.bf16.msra.mxu1 %v26553_v6  ;;  %18694 = vmatprep.mubr.msk.f32.mxu1 %vm22122_vm0, %v26527_v2  ;;  %v8696_v28 = vsub.f32 %v24372_v34, %v8695_v8  ;;  %v24382_v46 = vsub.f32 %v8582_v3, %v8600_v58 }
 0x83a   :  { %18832 = vmatmul.mubr.f32.vlgmr.msra.gmra.mrb[74].mxu0 %v8112_v21  ;;  %20467 = vmatprep.subr.bf16.mxu1 %v26451_v49 }
 0x83b   :  { %18841 = vmatpush3.msra.mxu0 %v22601_v12  ;;  %18834 = vmatprep.mubr.msk.f32.mxu0 %vm22122_vm0, %v26527_v2  ;;  %v7565_v12 = vand.u32 4294901760, %v24238_v56  ;;  %v8697_v60 = vand.u32 4294901760, %v8696_v28  ;;  %v8709_v10 = vand.u32 4294901760, %v24382_v46 }
 0x83c   :  { %18851 = vmatprep.subr.mxu0 %v26527_v2 }
 0x83d   :  { %20469 = vmatpush3.bf16.msra.mxu1 %v26554_v42  ;;  %v7566_v38 = vsub.f32 %v24238_v56, %v7565_v12  ;;  %v8710_v27 = vsub.f32 %v24382_v46, %v8709_v10 }
 0x83e   :  { %18835 = vmatmul.mubr.f32.gmra.mrb[76].mxu0 %v8122_v37  ;;  %20476 = vmatprep.subr.bf16.mxu1 %v26451_v49 }
 0x83f   :  { %18837 = vmatprep.mubr.msk.f32.mxu0 %vm22122_vm0, %v26527_v2 }
 0x840   :  { %18695 = vmatmul.mubr.f32.vlgmr.msra.gmra.mrb[76].mxu1 %v24078_v41  ;;  %v7576_v41 = vsub.f32 %v24254_v13, %v7575_v43 }
 0x841   :  { %20478 = vmatpush3.bf16.msra.mxu1 %v23894_v62  ;;  %18716 = vmatprep.mubr.msk.f32.mxu1 %vm22122_vm0, %v26527_v2  ;;  %v7567_v62 = vand.u32 4294901760, %v7566_v38 }
 0x842   :  { %18838 = vmatmul.mubr.f32.gmra.mrb[78].mxu0 %v8132_v24  ;;  %20479 = vmatprep.subr.bf16.mxu1 %v26451_v49  ;;  %v8603_v24 = vand.u32 4294901760, %v8583_v16 }
 0x843   :  { %18842 = vmatprep.mubr.msk.f32.mxu0 %vm22122_vm0, %v26527_v2 }
 0x844   :  { %v24384_v18 = vsub.f32 %v8583_v16, %v8603_v24  ;;  %v24395_v29 = vpack.c.bf16 %v8603_v24, %v8600_v58 }
 0x845   :  { %20481 = vmatpush3.bf16.msra.mxu1 %v23906_v44  ;;  %v7586_v44 = vsub.f32 %v7584_v19, %v7585_v1 }
 0x846   :  { %18843 = vmatmul.mubr.msk.f32.vlgmr.msra.gmra.mrb[74].mxu0 %vm1408_vm5, %v24056_v35  ;;  %18730 = vmatprep.subr.mxu1 %v26527_v2  ;;  %v8716_v9 = vand.u32 4294901760, %v24384_v18  ;;  %v20504_v26 = vpack.c.bf16 %v24384_v18, %v24382_v46 }
 0x847   :  { %18852 = vmatpush3.msra.mxu0 %v22577_v4  ;;  %18845 = vmatprep.mubr.msk.f32.mxu0 %vm22122_vm0, %v26527_v2  ;;  %v7577_v4 = vand.u32 4294901760, %v7576_v41 }
 0x848   :  { %18717 = vmatmul.mubr.f32.vlgmr.msra.gmra.mrb[78].mxu1 %v24058_v57  ;;  %20494 = vmatprep.subr.bf16.mxu0 %v26451_v49  ;;  %v7587_v57 = vand.u32 4294901760, %v7586_v44  ;;  %v8717_v6 = vsub.f32 %v24384_v18, %v8716_v9 }
 0x849   :  { %18731 = vmatpush3.msra.mxu1 %v22571_v63  ;;  %18732 = vmatprep.mubr.msk.f32.mxu1 %vm22122_vm0, %v26527_v2 }
 0x84a   :  { %18846 = vmatmul.mubr.msk.f32.gmra.mrb[76].mxu0 %vm1408_vm5, %v24075_v45  ;;  %18741 = vmatprep.subr.mxu1 %v26527_v2  ;;  %v8718_v55 = vand.u32 4294901760, %v8717_v6 }
 0x84b   :  { %18848 = vmatprep.mubr.msk.f32.mxu0 %vm22122_vm0, %v26527_v2 }
 0x84c   :  { %18733 = vmatmul.mubr.f32.vlgmr.msra.gmra.mrb[80].mxu1 %v7567_v62 }
 0x84d   :  { %18742 = vmatpush3.msra.mxu1 %v22626_v22  ;;  %18735 = vmatprep.mubr.msk.f32.mxu1 %vm22122_vm0, %v26527_v2 }
 0x84e   :  { %18849 = vmatmul.mubr.msk.f32.gmra.mrb[78].mxu0 %vm1408_vm5, %v24089_v40  ;;  %18752 = vmatprep.subr.mxu1 %v26527_v2 }
 0x84f   :  { %18853 = vmatprep.mubr.msk.f32.mxu0 %vm22122_vm0, %v26527_v2 }
 0x850   :  { %18736 = vmatmul.mubr.f32.gmra.mrb[82].mxu1 %v7577_v4  ;;  %v24404_v4 = vpack.c.bf16 %v8702_v59, %v8695_v8 }
 0x851   :  { %18738 = vmatprep.mubr.msk.f32.mxu1 %vm22122_vm0, %v26527_v2 }
 0x852   :  { %18854 = vmatmul.mubr.msk.f32.vlgmr.msra.gmra.mrb[74].mxu0 %vm1408_vm5, %v24056_v35 }
 0x853   :  { %18856 = vmatprep.mubr.msk.f32.mxu0 %vm22122_vm0, %v26527_v2 }
 0x854   :  { %18739 = vmatmul.mubr.f32.gmra.mrb[84].mxu1 %v7587_v57  ;;  %v24406_v57 = vpack.c.bf16 %v8716_v9, %v8709_v10 }
 0x855   :  { %18743 = vmatprep.mubr.msk.f32.mxu1 %vm22122_vm0, %v26527_v2 }
 0x856   :  { %18857 = vmatmul.mubr.msk.f32.gmra.mrb[76].mxu0 %vm1408_vm5, %v24075_v45 }
 0x857   :  { %18859 = vmatprep.mubr.msk.f32.mxu0 %vm22122_vm0, %v26527_v2 }
 0x858   :  { %18744 = vmatmul.mubr.msk.f32.vlgmr.msra.gmra.mrb[80].mxu1 %vm1408_vm5, %v24215_v25 }
 0x859   :  { %18753 = vmatpush3.msra.mxu1 %v22584_v7  ;;  %18746 = vmatprep.mubr.msk.f32.mxu1 %vm22122_vm0, %v26527_v2 }
 0x85a   :  { %18860 = vmatmul.mubr.msk.f32.gmra.mrb[78].mxu0 %vm1408_vm5, %v24089_v40  ;;  %18763 = vmatprep.subr.mxu1 %v26527_v2 }
 0x85b   :  { %18887 = vmatprep.mubr.msk.f32.mxu0 %vm22122_vm0, %v26527_v2 }
 0x85c   :  { %18747 = vmatmul.mubr.msk.f32.gmra.mrb[82].mxu1 %vm1408_vm5, %v24228_v51 }
 0x85d   :  { %18749 = vmatprep.mubr.msk.f32.mxu1 %vm22122_vm0, %v26527_v2 }
 0x860   :  { %18750 = vmatmul.mubr.msk.f32.gmra.mrb[84].mxu1 %vm1408_vm5, %v24245_v53 }
 0x861   :  { %18754 = vmatprep.mubr.msk.f32.mxu1 %vm22122_vm0, %v26527_v2 }
 0x864   :  { %18755 = vmatmul.mubr.f32.vlgmr.msra.gmra.mrb[80].mxu1 %v24238_v56  ;;  %v24390_v56 = vpack.c.bf16 %v8597_v61, %v8594_v32 }
 0x865   :  { %18764 = vmatpush3.msra.mxu1 %v22571_v63  ;;  %18757 = vmatprep.mubr.msk.f32.mxu1 %vm22122_vm0, %v26527_v2 }
 0x866   :  { %18774 = vmatprep.subr.mxu1 %v26527_v2 }
 0x868   :  { %18758 = vmatmul.mubr.f32.gmra.mrb[82].mxu1 %v24254_v13 }
 0x869   :  { %18760 = vmatprep.mubr.msk.f32.mxu1 %vm22122_vm0, %v26527_v2 }
 0x86c   :  { %18761 = vmatmul.mubr.f32.gmra.mrb[84].mxu1 %v7584_v19 }
 0x86d   :  { %18765 = vmatprep.mubr.msk.f32.mxu1 %vm22122_vm0, %v26527_v2 }
 0x870   :  { %18766 = vmatmul.mubr.f32.vlgmr.msra.gmra.mrb[80].mxu1 %v7565_v12  ;;  %v20501_v12 = vpack.c.bf16 %v24374_v48, %v24372_v34 }
 0x871   :  { %18775 = vmatpush3.msra.mxu1 %v22595_v11  ;;  %18768 = vmatprep.mubr.msk.f32.mxu1 %vm22122_vm0, %v26527_v2 }
 0x872   :  { %18785 = vmatprep.subr.mxu1 %v26527_v2 }
 0x874   :  { %18769 = vmatmul.mubr.f32.gmra.mrb[82].mxu1 %v7575_v43 }
 0x875   :  { %v5701_v7 = vpop.f32.mrb[50].mxu0  ;;  %18771 = vmatprep.mubr.msk.f32.mxu1 %vm22122_vm0, %v26527_v2 }
 0x876   :  { %v18426_v22 = vpop.f32.mrb[51].mxu0 }
 0x878   :  { %18772 = vmatmul.mubr.f32.gmra.mrb[84].mxu1 %v7585_v1 }
 0x879   :  { %18776 = vmatprep.mubr.msk.f32.mxu1 %vm22122_vm0, %v26527_v2 }
 0x87b   :  { %v5446_v35 = vpop.f32.mrb[56].mxu1 }
 0x87c   :  { %18777 = vmatmul.mubr.msk.f32.vlgmr.msra.gmra.mrb[80].mxu1 %vm1408_vm5, %v24215_v25  ;;  %v18356_v11 = vpop.f32.mrb[57].mxu1 }
 0x87d   :  { %18786 = vmatpush3.msra.mxu1 %v22571_v63  ;;  %18779 = vmatprep.mubr.msk.f32.mxu1 %vm22122_vm0, %v26527_v2 }
 0x87e   :  { %20488 = vmatprep.subr.bf16.mxu1 %v26451_v49 }
 0x880   :  { %18780 = vmatmul.mubr.msk.f32.gmra.mrb[82].mxu1 %vm1408_vm5, %v24228_v51 }
 0x881   :  { %18782 = vmatprep.mubr.msk.f32.mxu1 %vm22122_vm0, %v26527_v2 }
 0x884   :  { %18783 = vmatmul.mubr.msk.f32.gmra.mrb[84].mxu1 %vm1408_vm5, %v24245_v53 }
 0x885   :  { %18787 = vmatprep.mubr.msk.f32.mxu1 %vm22122_vm0, %v26527_v2 }
 0x888   :  { %18788 = vmatmul.mubr.msk.f32.vlgmr.msra.gmra.mrb[80].mxu1 %vm1408_vm5, %v24215_v25  ;;  %v20495_v25 = vpack.c.bf16 %v8704_v36, %v8697_v60 }
 0x889   :  { %18790 = vmatprep.mubr.msk.f32.mxu1 %vm22122_vm0, %v26527_v2  ;;  %20490 = vmatpush3.bf16.msra.mxu1 %v24390_v56 }
 0x88a   :  { %20496 = vmatpush3.bf16.msra.mxu0 %v20495_v25  ;;  %20491 = vmatprep.subr.bf16.mxu1 %v26451_v49 }
 0x88b   :  { %20497 = vmatprep.subr.bf16.mxu0 %v26451_v49 }
 0x88c   :  { %18791 = vmatmul.mubr.msk.f32.gmra.mrb[82].mxu1 %vm1408_vm5, %v24228_v51  ;;  %v8711_v51 = vand.u32 4294901760, %v8710_v27 }
 0x88d   :  { %18793 = vmatprep.mubr.msk.f32.mxu1 %vm22122_vm0, %v26527_v2  ;;  %20493 = vmatpush3.bf16.msra.mxu1 %v24395_v29 }
 0x88e   :  { %v20498_v42 = vpack.c.bf16 %v8718_v55, %v8711_v51  ;;  %20500 = vmatprep.subr.bf16.mxu1 %v26451_v49 }
 0x890   :  { %18794 = vmatmul.mubr.msk.f32.gmra.mrb[84].mxu1 %vm1408_vm5, %v24245_v53  ;;  %20499 = vmatpush3.bf16.msra.mxu0 %v20498_v42 }
 0x891   :  { %18870 = vmatprep.mubr.msk.f32.mxu1 %vm22122_vm0, %v26527_v2  ;;  %20506 = vmatprep.subr.bf16.mxu0 %v26451_v49 }
 0x895   :  { %v5909_v63 = vpop.f32.mrb[52].mxu0 }
 0x896   :  { %v18496_v45 = vpop.f32.mrb[53].mxu0 }
 0x89b   :  { %v5597_v33 = vpop.f32.mrb[58].mxu1 }
 0x89c   :  { %v5598_v5 = vadd.f32 %v5597_v33, %v5446_v35  ;;  %v18391_v40 = vpop.f32.mrb[59].mxu1 }
 0x89d   :  { %v24368_v31 = vpop.f32.mrb[54].mxu0 }
 0x89e   :  { %v18542_v52 = vpop.f32.mrb[55].mxu0  ;;  %v5702_v21 = vadd.f32 %v5701_v7, %v5598_v5 }
 0x8a5   :  { %v6169_v14 = vpop.f32.mrb[56].mxu0 }
 0x8a6   :  { %v18553_v37 = vpop.f32.mrb[57].mxu0 }
 0x8ad   :  { %v6326_v23 = vpop.f32.mrb[58].mxu0 }
 0x8ae   :  { %v18575_v39 = vpop.f32.mrb[59].mxu0 }
 0x8b5   :  { %v6484_v53 = vpop.f32.mrb[60].mxu0 }
 0x8b6   :  { %v18597_v13 = vpop.f32.mrb[61].mxu0 }
 0x8bb   :  { %v5790_v38 = vpop.f32.mrb[60].mxu1 }
 0x8bc   :  { %v5791_v43 = vadd.f32 %v5790_v38, %v5702_v21  ;;  %v18461_v19 = vpop.f32.mrb[61].mxu1 }
 0x8bd   :  { %v6661_v62 = vpop.f32.mrb[62].mxu0 }
 0x8be   :  { %v18619_v41 = vpop.f32.mrb[63].mxu0  ;;  %v5910_v1 = vadd.f32 %v5909_v63, %v5791_v43 }
 0x8c5   :  { %v6818_v44 = vpop.f32.mrb[64].mxu0 }
 0x8c6   :  { %v18641_v7 = vpop.f32.mrb[65].mxu0 }
 0x8cd   :  { %v6976_v22 = vpop.f32.mrb[66].mxu0 }
 0x8ce   :  { %v18663_v35 = vpop.f32.mrb[67].mxu0 }
 0x8d5   :  { %v7154_v11 = vpop.f32.mrb[68].mxu0 }
 0x8d6   :  { %v18685_v45 = vpop.f32.mrb[69].mxu0 }
 0x8d7   :  { %v24418_v45 = vld [vmem:[%s26556_s5 + $0x8] sm:$0xff] }
 0x8db   :  { %v5996_v33 = vpop.f32.mrb[62].mxu1 }
 0x8dc   :  { %v5997_v5 = vadd.f32 %v5996_v33, %v5910_v1  ;;  %v18531_v40 = vpop.f32.mrb[63].mxu1 }
 0x8dd   :  { %v7311_v52 = vpop.f32.mrb[70].mxu0 }
 0x8de   :  { %v6079_v21 = vadd.f32 %v24368_v31, %v5997_v5  ;;  %v18707_v15 = vpop.f32.mrb[71].mxu0 }
 0x8df   :  { %v9177_v15 = vand.u32 4294901760, %v24418_v45 }
 0x8e0   :  { %v6170_v30 = vadd.f32 %v6169_v14, %v6079_v21 }
 0x8e3   :  { %v6249_v32 = vpop.f32.mrb[64].mxu1 }
 0x8e4   :  { %v6250_v63 = vadd.f32 %v6249_v32, %v6170_v30  ;;  %v18564_v61 = vpop.f32.mrb[65].mxu1 }
 0x8e5   :  { %v7469_v37 = vpop.f32.mrb[72].mxu0  ;;  %v24438_v61 = vld [vmem:[%s26556_s5 + $0x18] sm:$0xff] }
 0x8e6   :  { %v18729_v3 = vpop.f32.mrb[73].mxu0  ;;  %v6327_v16 = vadd.f32 %v6326_v23, %v6250_v63  ;;  %v24435_v63 = vld [vmem:[%s26556_s5 + $0x10] sm:$0xff] }
 0x8eb   :  { %v6409_v8 = vpop.f32.mrb[66].mxu1 }
 0x8ec   :  { %v6410_v59 = vadd.f32 %v6409_v8, %v6327_v16  ;;  %v18586_v58 = vpop.f32.mrb[67].mxu1 }
 0x8ee   :  { %v6485_v24 = vadd.f32 %v6484_v53, %v6410_v59 }
 0x8f3   :  { %v6570_v28 = vpop.f32.mrb[68].mxu1 }
 0x8f4   :  { %v6662_v0 = vadd.f32 %v6661_v62, %v6570_v28  ;;  %v18608_v60 = vpop.f32.mrb[69].mxu1  ;;  %v9180_v28 = vand.u32 4294901760, %v24435_v63 }
 0x8fb   :  { %v6741_v36 = vpop.f32.mrb[70].mxu1 }
 0x8fc   :  { %v6742_v10 = vadd.f32 %v6741_v36, %v6662_v0  ;;  %v18630_v9 = vpop.f32.mrb[71].mxu1 }
 0x8fe   :  { %v6819_v25 = vadd.f32 %v6818_v44, %v6742_v10  ;;  %v9183_v10 = vand.u32 4294901760, %v24438_v61 }
 0x903   :  { %v6901_v31 = vpop.f32.mrb[72].mxu1 }
 0x904   :  { %v6902_v27 = vadd.f32 %v6901_v31, %v6819_v25  ;;  %v18652_v14 = vpop.f32.mrb[73].mxu1 }
 0x906   :  { %v6977_v6 = vadd.f32 %v6976_v22, %v6902_v27 }
 0x908   :  { %v6980_v39 = vadd.f32 %v6977_v6, %v6485_v24  ;;  %v24455_v24 = vsub.f32 %v24418_v45, %v9177_v15 }
 0x90a   :  { %v9282_v27 = vand.u32 4294901760, %v24455_v24 }
 0x90b   :  { %v7063_v51 = vpop.f32.mrb[74].mxu1 }
 0x90c   :  { %v7155_v55 = vadd.f32 %v7154_v11, %v7063_v51  ;;  %v18674_v23 = vpop.f32.mrb[75].mxu1  ;;  %v24415_v11 = vld [vmem:[%s26556_s5] sm:$0xff]  ;;  %v24481_v51 = vsub.f32 %v24438_v61, %v9183_v10 }
 0x90d   :  { %v9174_v21 = vand.u32 4294901760, %v24415_v11 }
 0x90f   :  { %v24450_v58 = vsub.f32 %v24415_v11, %v9174_v21 }
 0x911   :  { %v9275_v31 = vand.u32 4294901760, %v24450_v58 }
 0x913   :  { %v7234_v42 = vpop.f32.mrb[76].mxu1  ;;  %v9276_v34 = vsub.f32 %v24450_v58, %v9275_v31 }
 0x914   :  { %v7235_v13 = vadd.f32 %v7234_v42, %v7155_v55  ;;  %v18696_v53 = vpop.f32.mrb[77].mxu1  ;;  %v9296_v42 = vand.u32 4294901760, %v24481_v51 }
 0x915   :  { %v9277_v46 = vand.u32 4294901760, %v9276_v34 }
 0x916   :  { %v7312_v38 = vadd.f32 %v7311_v52, %v7235_v13 }
 0x91b   :  { %v7394_v43 = vpop.f32.mrb[78].mxu1 }
 0x91c   :  { %v7395_v19 = vadd.f32 %v7394_v43, %v7312_v38  ;;  %v18718_v62 = vpop.f32.mrb[79].mxu1 }
 0x91e   :  { %v7470_v41 = vadd.f32 %v7469_v37, %v7395_v19 }
 0x920   :  { %v24409_v1 = vadd.f32 %v7470_v41, %v6980_v39  ;;  %v24476_v39 = vsub.f32 %v24435_v63, %v9180_v28  ;;  %v20537_v63 = vpack.c.bf16 %v24455_v24, %v24450_v58  ;;  %v9804_v58 = vld [vmem:[%s26557_s10] sm:$0xff] }
 0x922   :  { %v9289_v23 = vand.u32 4294901760, %v24476_v39 }
 0x925   :  { %v8560_v44 = vpop.f32.mrb[74].mxu0 }
 0x926   :  { %v8585_v7 = vsel %vm2505_vm6, %v8560_v44, 0  ;;  %v18855_v22 = vpop.f32.mrb[75].mxu0 }
 0x927   :  { %v24412_v35 = vand.u32 4294901760, %v8585_v7 }
 0x929   :  { %v24421_v33 = vsub.f32 %v8585_v7, %v24412_v35  ;;  %v8566_v5 = vpop.f32.mrb[76].mxu0  ;;  %18888 = vmatmul.mubr.f32.vlgmr.msra.gmra.mrb[80].mxu0 %v24412_v35 }
 0x92a   :  { %v8588_v40 = vsel %vm2505_vm6, %v8566_v5, 0  ;;  %v18858_v52 = vpop.f32.mrb[77].mxu0  ;;  %18890 = vmatprep.mubr.msk.f32.mxu0 %vm22122_vm0, %v26527_v2  ;;  %20508 = vmatpush3.bf16.msra.mxu0 %v24390_v56 }
 0x92b   :  { %v8664_v30 = vand.u32 4294901760, %v24421_v33  ;;  %v24431_v32 = vand.u32 4294901760, %v8588_v40  ;;  %20509 = vmatprep.subr.bf16.mxu0 %v26451_v49 }
 0x92d   :  { %v8665_v37 = vsub.f32 %v24421_v33, %v8664_v30  ;;  %v8673_v3 = vsub.f32 %v8588_v40, %v24431_v32  ;;  %v8572_v16 = vpop.f32.mrb[78].mxu0  ;;  %18891 = vmatmul.mubr.f32.gmra.mrb[82].mxu0 %v24431_v32 }
 0x92e   :  { %v8591_v8 = vsel %vm2505_vm6, %v8572_v16, 0  ;;  %v18861_v59 = vpop.f32.mrb[79].mxu0  ;;  %18893 = vmatprep.mubr.msk.f32.mxu0 %vm22122_vm0, %v26527_v2  ;;  %20511 = vmatpush3.bf16.msra.mxu0 %v24395_v29 }
 0x92f   :  { %v8666_v0 = vand.u32 4294901760, %v8665_v37  ;;  %v8674_v60 = vand.u32 4294901760, %v8673_v3  ;;  %v24458_v36 = vand.u32 4294901760, %v8591_v8  ;;  %20518 = vmatprep.subr.bf16.mxu0 %v26451_v49 }
 0x931   :  { %v8683_v9 = vsub.f32 %v8591_v8, %v24458_v36  ;;  %18871 = vmatmul.mubr.f32.vlgmr.msra.gmra.mrb[86].mxu1 %v8666_v0  ;;  %18894 = vmatmul.mubr.f32.gmra.mrb[84].mxu0 %v24458_v36  ;;  %v8675_v25 = vsub.f32 %v8673_v3, %v8674_v60  ;;  %v20540_v8 = vpack.c.bf16 %v24481_v51, %v24476_v39 }
 0x932   :  { %18873 = vmatprep.mubr.msk.f32.mxu1 %vm22122_vm0, %v26527_v2  ;;  %18921 = vmatprep.mubr.msk.f32.mxu0 %vm22122_vm0, %v26527_v2  ;;  %v20549_v0 = vpack.c.bf16 %v9282_v27, %v9275_v31 }
 0x933   :  { %v8684_v14 = vand.u32 4294901760, %v8683_v9  ;;  %v8676_v6 = vand.u32 4294901760, %v8675_v25  ;;  %20502 = vmatpush3.bf16.msra.mxu1 %v20501_v12  ;;  %v9283_v12 = vsub.f32 %v24455_v24, %v9282_v27  ;;  %v9805_v24 = vld [vmem:[%s26557_s10 + $0x8] sm:$0xff]  ;;  %v9806_v27 = vld [vmem:[%s26557_s10 + $0x10] sm:$0xff] }
 0x934   :  { %20503 = vmatprep.subr.bf16.mxu1 %v26451_v49 }
 0x935   :  { %18874 = vmatmul.mubr.f32.gmra.mrb[88].mxu1 %v8676_v6  ;;  %18922 = vmatmul.mubr.f32.vlgmr.msra.gmra.mrb[86].mxu0 %v8664_v30  ;;  %v8685_v55 = vsub.f32 %v8683_v9, %v8684_v14  ;;  %v9284_v18 = vand.u32 4294901760, %v9283_v12  ;;  %v9808_v6 = vld [vmem:[%s26557_s10 + $0x20] sm:$0xff] }
 0x936   :  { %18876 = vmatprep.mubr.msk.f32.mxu1 %vm22122_vm0, %v26527_v2  ;;  %18924 = vmatprep.mubr.msk.f32.mxu0 %vm22122_vm0, %v26527_v2  ;;  %v9841_v34 = vand.u32 4294901760, %v9808_v6 }
 0x937   :  { %v8686_v48 = vand.u32 4294901760, %v8685_v55  ;;  %20505 = vmatpush3.bf16.msra.mxu1 %v20504_v26  ;;  %20520 = vmatpush3.bf16.msra.mxu0 %v24390_v56  ;;  %v9290_v56 = vsub.f32 %v24476_v39, %v9289_v23  ;;  %v9297_v26 = vsub.f32 %v24481_v51, %v9296_v42  ;;  %v9835_v39 = vand.u32 4294901760, %v9806_v27  ;;  %v9809_v55 = vld [vmem:[%s26557_s10 + $0x28] sm:$0xff] }
 0x938   :  { %20521 = vmatprep.subr.bf16.mxu0 %v26451_v49  ;;  %20512 = vmatprep.subr.bf16.mxu1 %v26451_v49 }
 0x939   :  { %18877 = vmatmul.mubr.f32.gmra.mrb[90].mxu1 %v8686_v48  ;;  %18925 = vmatmul.mubr.f32.gmra.mrb[88].mxu0 %v8674_v60  ;;  %v9291_v13 = vand.u32 4294901760, %v9290_v56  ;;  %v9298_v53 = vand.u32 4294901760, %v9297_v26  ;;  %v20552_v60 = vpack.c.bf16 %v9296_v42, %v9289_v23  ;;  %v9844_v48 = vand.u32 4294901760, %v9809_v55  ;;  %v9811_v56 = vld [vmem:[%s26557_s10 + $0x38] sm:$0xff] }
 0x93a   :  { %18904 = vmatprep.mubr.msk.f32.mxu1 %vm22122_vm0, %v26527_v2  ;;  %18927 = vmatprep.mubr.msk.f32.mxu0 %vm22122_vm0, %v26527_v2  ;;  %v24644_v23 = vsub.f32 %v9806_v27, %v9835_v39 }
 0x93b   :  { %20523 = vmatpush3.bf16.msra.mxu0 %v24395_v29  ;;  %v20531_v29 = vpack.c.bf16 %v9284_v18, %v9277_v46  ;;  %v20534_v38 = vpack.c.bf16 %v9298_v53, %v9291_v13  ;;  %v24648_v46 = vsub.f32 %v9808_v6, %v9841_v34  ;;  %v9810_v18 = vld [vmem:[%s26557_s10 + $0x30] sm:$0xff]  ;;  %v24652_v26 = vsub.f32 %v9809_v55, %v9844_v48 }
 0x93c   :  { %20530 = vmatprep.subr.bf16.mxu0 %v26451_v49  ;;  %v9850_v13 = vand.u32 4294901760, %v9811_v56  ;;  %v24655_v53 = vpack.c.bf16 %v9844_v48, %v9841_v34 }
 0x93d   :  { %18905 = vmatmul.mubr.f32.vlgmr.msra.gmra.mrb[92].mxu1 %v24421_v33  ;;  %18928 = vmatmul.mubr.f32.gmra.mrb[90].mxu0 %v8684_v14  ;;  %v9807_v14 = vld [vmem:[%s26557_s10 + $0x18] sm:$0xff]  ;;  %v20591_v27 = vpack.c.bf16 %v24652_v26, %v24648_v46 }
 0x93e   :  { %18907 = vmatprep.mubr.msk.f32.mxu1 %vm22122_vm0, %v26527_v2  ;;  %18955 = vmatprep.mubr.msk.f32.mxu0 %vm22122_vm0, %v26527_v2  ;;  %v9838_v51 = vand.u32 4294901760, %v9807_v14 }
 0x93f   :  { %20514 = vmatpush3.bf16.msra.mxu1 %v24404_v4  ;;  %v20525_v4 = vpack.c.bf16 %v9177_v15, %v9174_v21 }
 0x940   :  { %20515 = vmatprep.subr.bf16.mxu1 %v26451_v49  ;;  %v24642_v12 = vpack.c.bf16 %v9838_v51, %v9835_v39  ;;  %v24646_v42 = vsub.f32 %v9807_v14, %v9838_v51 }
 0x941   :  { %18908 = vmatmul.mubr.f32.gmra.mrb[94].mxu1 %v8673_v3  ;;  %18956 = vmatmul.mubr.f32.vlgmr.msra.gmra.mrb[92].mxu0 %v24412_v35 }
 0x942   :  { %18910 = vmatprep.mubr.msk.f32.mxu1 %vm22122_vm0, %v26527_v2  ;;  %18958 = vmatprep.mubr.msk.f32.mxu0 %vm22122_vm0, %v26527_v2 }
 0x943   :  { %20517 = vmatpush3.bf16.msra.mxu1 %v24406_v57  ;;  %20532 = vmatpush3.bf16.msra.mxu0 %v20531_v29  ;;  %v20528_v57 = vpack.c.bf16 %v9183_v10, %v9180_v28  ;;  %v9832_v10 = vand.u32 4294901760, %v9805_v24  ;;  %v9847_v29 = vand.u32 4294901760, %v9810_v18 }
 0x944   :  { %20533 = vmatprep.subr.bf16.mxu0 %v26451_v49  ;;  %20524 = vmatprep.subr.bf16.mxu1 %v26451_v49 }
 0x945   :  { %18911 = vmatmul.mubr.f32.gmra.mrb[96].mxu1 %v8683_v9  ;;  %18959 = vmatmul.mubr.f32.gmra.mrb[94].mxu0 %v24431_v32  ;;  %v24634_v31 = vsub.f32 %v9805_v24, %v9832_v10  ;;  %v20588_v24 = vpack.c.bf16 %v24646_v42, %v24644_v23 }
 0x946   :  { %18938 = vmatprep.mubr.msk.f32.mxu1 %vm22122_vm0, %v26527_v2  ;;  %18961 = vmatprep.mubr.msk.f32.mxu0 %vm22122_vm0, %v26527_v2 }
 0x947   :  { %20535 = vmatpush3.bf16.msra.mxu0 %v20534_v38  ;;  %v24658_v38 = vsub.f32 %v9810_v18, %v9847_v29 }
 0x948   :  { %20542 = vmatprep.subr.bf16.mxu0 %v26451_v49 }
 0x949   :  { %18939 = vmatmul.mubr.f32.vlgmr.msra.gmra.mrb[98].mxu1 %v24412_v35  ;;  %18962 = vmatmul.mubr.f32.gmra.mrb[96].mxu0 %v24458_v36 }
 0x94a   :  { %18941 = vmatprep.mubr.msk.f32.mxu1 %vm22122_vm0, %v26527_v2  ;;  %18989 = vmatprep.mubr.msk.f32.mxu0 %vm22122_vm0, %v26527_v2 }
 0x94b   :  { %20526 = vmatpush3.bf16.msra.mxu1 %v20525_v4 }
 0x94c   :  { %20527 = vmatprep.subr.bf16.mxu1 %v26451_v49 }
 0x94d   :  { %18942 = vmatmul.mubr.f32.gmra.mrb[100].mxu1 %v24431_v32 }
 0x94e   :  { %18944 = vmatprep.mubr.msk.f32.mxu1 %vm22122_vm0, %v26527_v2 }
 0x94f   :  { %20529 = vmatpush3.bf16.msra.mxu1 %v20528_v57 }
 0x950   :  { %20536 = vmatprep.subr.bf16.mxu1 %v26451_v49 }
 0x951   :  { %18945 = vmatmul.mubr.f32.gmra.mrb[102].mxu1 %v24458_v36  ;;  %v9829_v36 = vand.u32 4294901760, %v9804_v58 }
 0x952   :  { %18972 = vmatprep.mubr.msk.f32.mxu1 %vm22122_vm0, %v26527_v2 }
 0x953   :  { %v24630_v9 = vpack.c.bf16 %v9832_v10, %v9829_v36  ;;  %v24632_v25 = vsub.f32 %v9804_v58, %v9829_v36 }
 0x95b   :  { %v8013_v43 = vpop.f32.mrb[80].mxu1 }
 0x95c   :  { %v9165_v19 = vsel %vm2505_vm6, %v8013_v43, 0  ;;  %v18789_v62 = vpop.f32.mrb[81].mxu1  ;;  %v9941_v43 = vand.u32 4294901760, %v24634_v31 }
 0x95d   :  { %v24558_v41 = vand.u32 4294901760, %v9165_v19 }
 0x95f   :  { %v9243_v44 = vsub.f32 %v9165_v19, %v24558_v41  ;;  %v8019_v7 = vpop.f32.mrb[82].mxu1  ;;  %18990 = vmatmul.mubr.f32.vlgmr.msra.gmra.mrb[98].mxu0 %v24558_v41  ;;  %v24665_v19 = vpack.c.bf16 %v9850_v13, %v9847_v29 }
 0x960   :  { %v9168_v22 = vsel %vm2505_vm6, %v8019_v7, 0  ;;  %v18792_v35 = vpop.f32.mrb[83].mxu1  ;;  %18992 = vmatprep.mubr.msk.f32.mxu0 %vm22122_vm0, %v26527_v2  ;;  %20544 = vmatpush3.bf16.msra.mxu0 %v20525_v4 }
 0x961   :  { %v9244_v11 = vand.u32 4294901760, %v9243_v44  ;;  %v24565_v45 = vand.u32 4294901760, %v9168_v22  ;;  %20545 = vmatprep.subr.bf16.mxu0 %v26451_v49  ;;  %v9955_v35 = vand.u32 4294901760, %v24646_v42 }
 0x963   :  { %v9245_v33 = vsub.f32 %v9243_v44, %v9244_v11  ;;  %v9253_v5 = vsub.f32 %v9168_v22, %v24565_v45  ;;  %v8025_v40 = vpop.f32.mrb[84].mxu1  ;;  %18993 = vmatmul.mubr.f32.gmra.mrb[100].mxu0 %v24565_v45  ;;  %v9948_v22 = vand.u32 4294901760, %v24644_v23 }
 0x964   :  { %v9171_v52 = vsel %vm2505_vm6, %v8025_v40, 0  ;;  %v18795_v21 = vpop.f32.mrb[85].mxu1  ;;  %18995 = vmatprep.mubr.msk.f32.mxu0 %vm22122_vm0, %v26527_v2  ;;  %20547 = vmatpush3.bf16.msra.mxu0 %v20528_v57 }
 0x965   :  { %v9246_v15 = vand.u32 4294901760, %v9245_v33  ;;  %v9254_v30 = vand.u32 4294901760, %v9253_v5  ;;  %v9262_v32 = vand.u32 4294901760, %v9171_v52  ;;  %20554 = vmatprep.subr.bf16.mxu0 %v26451_v49  ;;  %v9956_v33 = vsub.f32 %v24646_v42, %v9955_v35 }
 0x966   :  { %v9969_v21 = vand.u32 4294901760, %v24652_v26 }
 0x967   :  { %v9263_v61 = vsub.f32 %v9171_v52, %v9262_v32  ;;  %18973 = vmatmul.mubr.f32.vlgmr.msra.gmra.mrb[104].mxu1 %v9246_v15  ;;  %18996 = vmatmul.mubr.f32.gmra.mrb[102].mxu0 %v9262_v32  ;;  %v9255_v37 = vsub.f32 %v9253_v5, %v9254_v30  ;;  %v9957_v40 = vand.u32 4294901760, %v9956_v33  ;;  %v9962_v52 = vand.u32 4294901760, %v24648_v46 }
 0x968   :  { %18975 = vmatprep.mubr.msk.f32.mxu1 %vm22122_vm0, %v26527_v2  ;;  %19023 = vmatprep.mubr.msk.f32.mxu0 %vm22122_vm0, %v26527_v2 }
 0x969   :  { %v9264_v3 = vand.u32 4294901760, %v9263_v61  ;;  %v9256_v16 = vand.u32 4294901760, %v9255_v37  ;;  %20538 = vmatpush3.bf16.msra.mxu1 %v20537_v63  ;;  %v9976_v63 = vand.u32 4294901760, %v24658_v38 }
 0x96a   :  { %20539 = vmatprep.subr.bf16.mxu1 %v26451_v49 }
 0x96b   :  { %18976 = vmatmul.mubr.f32.gmra.mrb[106].mxu1 %v9256_v16  ;;  %19024 = vmatmul.mubr.f32.vlgmr.msra.gmra.mrb[104].mxu0 %v9244_v11  ;;  %v9265_v59 = vsub.f32 %v9263_v61, %v9264_v3  ;;  %v9977_v16 = vsub.f32 %v24658_v38, %v9976_v63 }
 0x96c   :  { %18978 = vmatprep.mubr.msk.f32.mxu1 %vm22122_vm0, %v26527_v2  ;;  %19026 = vmatprep.mubr.msk.f32.mxu0 %vm22122_vm0, %v26527_v2 }
 0x96d   :  { %v9266_v28 = vand.u32 4294901760, %v9265_v59  ;;  %20541 = vmatpush3.bf16.msra.mxu1 %v20540_v8  ;;  %20556 = vmatpush3.bf16.msra.mxu0 %v20525_v4  ;;  %v24660_v4 = vsub.f32 %v9811_v56, %v9850_v13 }
 0x96e   :  { %20557 = vmatprep.subr.bf16.mxu0 %v26451_v49  ;;  %20548 = vmatprep.subr.bf16.mxu1 %v26451_v49 }
 0x96f   :  { %18979 = vmatmul.mubr.f32.gmra.mrb[108].mxu1 %v9266_v28  ;;  %19027 = vmatmul.mubr.f32.gmra.mrb[106].mxu0 %v9254_v30  ;;  %v9963_v30 = vsub.f32 %v24648_v46, %v9962_v52  ;;  %v9978_v28 = vand.u32 4294901760, %v9977_v16  ;;  %v20594_v6 = vpack.c.bf16 %v24660_v4, %v24658_v38 }
 0x970   :  { %19006 = vmatprep.mubr.msk.f32.mxu1 %vm22122_vm0, %v26527_v2  ;;  %19029 = vmatprep.mubr.msk.f32.mxu0 %vm22122_vm0, %v26527_v2 }
 0x971   :  { %20559 = vmatpush3.bf16.msra.mxu0 %v20528_v57  ;;  %v9934_v57 = vand.u32 4294901760, %v24632_v25  ;;  %v9964_v37 = vand.u32 4294901760, %v9963_v30 }
 0x972   :  { %20632 = vmatprep.subr.bf16.mxu0 %v26451_v49 }
 0x973   :  { %19007 = vmatmul.mubr.f32.vlgmr.msra.gmra.mrb[110].mxu1 %v9243_v44  ;;  %19030 = vmatmul.mubr.f32.gmra.mrb[108].mxu0 %v9264_v3  ;;  %v9935_v62 = vsub.f32 %v24632_v25, %v9934_v57 }
 0x974   :  { %19009 = vmatprep.mubr.msk.f32.mxu1 %vm22122_vm0, %v26527_v2  ;;  %19057 = vmatprep.mubr.msk.f32.mxu0 %vm22122_vm0, %v26527_v2 }
 0x975   :  { %20550 = vmatpush3.bf16.msra.mxu1 %v20549_v0  ;;  %v9936_v44 = vand.u32 4294901760, %v9935_v62 }
 0x976   :  { %20551 = vmatprep.subr.bf16.mxu1 %v26451_v49 }
 0x977   :  { %19010 = vmatmul.mubr.f32.gmra.mrb[112].mxu1 %v9253_v5  ;;  %19058 = vmatmul.mubr.f32.vlgmr.msra.gmra.mrb[110].mxu0 %v24558_v41 }
 0x978   :  { %19012 = vmatprep.mubr.msk.f32.mxu1 %vm22122_vm0, %v26527_v2  ;;  %19060 = vmatprep.mubr.msk.f32.mxu0 %vm22122_vm0, %v26527_v2 }
 0x979   :  { %20553 = vmatpush3.bf16.msra.mxu1 %v20552_v60  ;;  %v20585_v60 = vpack.c.bf16 %v24634_v31, %v24632_v25 }
 0x97a   :  { %20560 = vmatprep.subr.bf16.mxu1 %v26451_v49 }
 0x97b   :  { %19013 = vmatmul.mubr.f32.gmra.mrb[114].mxu1 %v9263_v61  ;;  %19061 = vmatmul.mubr.f32.gmra.mrb[112].mxu0 %v24565_v45  ;;  %v9983_v61 = vand.u32 4294901760, %v24660_v4 }
 0x97c   :  { %19040 = vmatprep.mubr.msk.f32.mxu1 %vm22122_vm0, %v26527_v2  ;;  %19063 = vmatprep.mubr.msk.f32.mxu0 %vm22122_vm0, %v26527_v2 }
 0x97d   :  { %v9984_v8 = vsub.f32 %v24660_v4, %v9983_v61 }
 0x97f   :  { %19041 = vmatmul.mubr.f32.vlgmr.msra.gmra.mrb[116].mxu1 %v24558_v41  ;;  %19064 = vmatmul.mubr.f32.gmra.mrb[114].mxu0 %v9262_v32  ;;  %v9942_v41 = vsub.f32 %v24634_v31, %v9941_v43  ;;  %v9985_v0 = vand.u32 4294901760, %v9984_v8 }
 0x980   :  { %19043 = vmatprep.mubr.msk.f32.mxu1 %vm22122_vm0, %v26527_v2  ;;  %19222 = vmatprep.mubr.msk.f32.mxu0 %vm22122_vm0, %v26527_v2 }
 0x981   :  { %20562 = vmatpush3.bf16.msra.mxu1 %v24630_v9  ;;  %v9943_v7 = vand.u32 4294901760, %v9942_v41  ;;  %v24702_v58 = vpack.c.bf16 %v9985_v0, %v9978_v28 }
 0x982   :  { %20563 = vmatprep.subr.bf16.mxu1 %v26451_v49 }
 0x983   :  { %19044 = vmatmul.mubr.f32.gmra.mrb[118].mxu1 %v24565_v45  ;;  %v24677_v11 = vpack.c.bf16 %v9943_v7, %v9936_v44  ;;  %v9949_v45 = vsub.f32 %v24644_v23, %v9948_v22 }
 0x984   :  { %19046 = vmatprep.mubr.msk.f32.mxu1 %vm22122_vm0, %v26527_v2 }
 0x985   :  { %20565 = vmatpush3.bf16.msra.mxu1 %v24642_v12  ;;  %v9950_v5 = vand.u32 4294901760, %v9949_v45 }
 0x986   :  { %20566 = vmatprep.subr.bf16.mxu1 %v26451_v49 }
 0x987   :  { %19047 = vmatmul.mubr.f32.gmra.mrb[120].mxu1 %v9262_v32  ;;  %v24688_v15 = vpack.c.bf16 %v9957_v40, %v9950_v5  ;;  %v9970_v32 = vsub.f32 %v24652_v26, %v9969_v21 }
 0x988   :  { %19082 = vmatprep.mubr.msk.f32.mxu1 %vm22122_vm0, %v26527_v2 }
 0x989   :  { %20568 = vmatpush3.bf16.msra.mxu1 %v24655_v53  ;;  %v9971_v3 = vand.u32 4294901760, %v9970_v32 }
 0x98a   :  { %20569 = vmatprep.subr.bf16.mxu1 %v26451_v49 }
 0x98b   :  { %v24698_v59 = vpack.c.bf16 %v9971_v3, %v9964_v37 }
 0x98d   :  { %20571 = vmatpush3.bf16.msra.mxu1 %v24665_v19 }
 0x98e   :  { %20572 = vmatprep.subr.bf16.mxu1 %v26451_v49 }
 0x9fc   :  { %v8779_v36 = vpop.f32.mrb[80].mxu0 }
 0x9fd   :  { %v18889_v10 = vpop.f32.mrb[81].mxu0 }
 0xa00   :  { %v8785_v14 = vpop.f32.mrb[82].mxu0 }
 0xa01   :  { %v18892_v39 = vpop.f32.mrb[83].mxu0 }
 0xa04   :  { %v8668_v51 = vpop.f32.mrb[86].mxu1  ;;  %v8791_v55 = vpop.f32.mrb[84].mxu0 }
 0xa05   :  { %v8780_v34 = vadd.f32 %v8779_v36, %v8668_v51  ;;  %v18872_v48 = vpop.f32.mrb[87].mxu1  ;;  %v18895_v18 = vpop.f32.mrb[85].mxu0 }
 0xa08   :  { %v8678_v56 = vpop.f32.mrb[88].mxu1  ;;  %v8962_v29 = vpop.f32.mrb[86].mxu0 }
 0xa09   :  { %v8786_v13 = vadd.f32 %v8785_v14, %v8678_v56  ;;  %v18875_v62 = vpop.f32.mrb[89].mxu1  ;;  %v18923_v41 = vpop.f32.mrb[87].mxu0  ;;  %v24714_v14 = vpack.c.bf16 %v9941_v43, %v9934_v57  ;;  %v24720_v56 = vpack.c.bf16 %v9955_v35, %v9948_v22  ;;  %v24724_v57 = vpack.c.bf16 %v9969_v21, %v9962_v52 }
 0xa0c   :  { %v8688_v44 = vpop.f32.mrb[90].mxu1  ;;  %v8970_v7 = vpop.f32.mrb[88].mxu0 }
 0xa0d   :  { %v8792_v45 = vadd.f32 %v8791_v55, %v8688_v44  ;;  %v18878_v33 = vpop.f32.mrb[91].mxu1  ;;  %v18926_v5 = vpop.f32.mrb[89].mxu0 }
 0xa10   :  { %v8871_v40 = vpop.f32.mrb[92].mxu1  ;;  %v8978_v30 = vpop.f32.mrb[90].mxu0 }
 0xa11   :  { %v8872_v32 = vadd.f32 %v8871_v40, %v8780_v34  ;;  %v18906_v37 = vpop.f32.mrb[93].mxu1  ;;  %v18929_v3 = vpop.f32.mrb[91].mxu0 }
 0xa13   :  { %v8963_v16 = vadd.f32 %v8962_v29, %v8872_v32 }
 0xa14   :  { %v8878_v8 = vpop.f32.mrb[94].mxu1  ;;  %v9148_v28 = vpop.f32.mrb[92].mxu0 }
 0xa15   :  { %v8879_v0 = vadd.f32 %v8878_v8, %v8786_v13  ;;  %v18909_v36 = vpop.f32.mrb[95].mxu1  ;;  %v18957_v10 = vpop.f32.mrb[93].mxu0 }
 0xa17   :  { %v8971_v39 = vadd.f32 %v8970_v7, %v8879_v0 }
 0xa18   :  { %v8885_v51 = vpop.f32.mrb[96].mxu1  ;;  %v9154_v55 = vpop.f32.mrb[94].mxu0 }
 0xa19   :  { %v8886_v48 = vadd.f32 %v8885_v51, %v8792_v45  ;;  %v18912_v18 = vpop.f32.mrb[97].mxu1  ;;  %v18960_v34 = vpop.f32.mrb[95].mxu0  ;;  %v24726_v45 = vpack.c.bf16 %v9983_v61, %v9976_v63 }
 0xa1b   :  { %v8979_v29 = vadd.f32 %v8978_v30, %v8886_v48 }
 0xa1c   :  { %v9061_v13 = vpop.f32.mrb[98].mxu1  ;;  %v9160_v62 = vpop.f32.mrb[96].mxu0 }
 0xa1d   :  { %v9062_v41 = vadd.f32 %v9061_v13, %v8963_v16  ;;  %v18940_v44 = vpop.f32.mrb[99].mxu1  ;;  %v18963_v33 = vpop.f32.mrb[97].mxu0 }
 0xa1f   :  { %v9149_v43 = vadd.f32 %v9148_v28, %v9062_v41 }
 0xa20   :  { %v9067_v7 = vpop.f32.mrb[100].mxu1 }
 0xa21   :  { %v9068_v5 = vadd.f32 %v9067_v7, %v8971_v39  ;;  %v18943_v40 = vpop.f32.mrb[101].mxu1 }
 0xa23   :  { %v9155_v32 = vadd.f32 %v9154_v55, %v9068_v5 }
 0xa24   :  { %v9073_v37 = vpop.f32.mrb[102].mxu1 }
 0xa25   :  { %v9074_v22 = vadd.f32 %v9073_v37, %v8979_v29  ;;  %v18946_v35 = vpop.f32.mrb[103].mxu1 }
 0xa27   :  { %v9161_v30 = vadd.f32 %v9160_v62, %v9074_v22 }
 0xa32   :  { %v9359_v3 = vpop.f32.mrb[98].mxu0 }
 0xa33   :  { %v18991_v8 = vpop.f32.mrb[99].mxu0 }
 0xa36   :  { %v9365_v16 = vpop.f32.mrb[100].mxu0 }
 0xa37   :  { %v18994_v0 = vpop.f32.mrb[101].mxu0 }
 0xa3a   :  { %v9248_v36 = vpop.f32.mrb[104].mxu1  ;;  %v9371_v10 = vpop.f32.mrb[102].mxu0 }
 0xa3b   :  { %v9249_v51 = vadd.f32 %v9248_v36, %v9149_v43  ;;  %v18974_v52 = vpop.f32.mrb[105].mxu1  ;;  %v18997_v21 = vpop.f32.mrb[103].mxu0 }
 0xa3d   :  { %v9360_v28 = vadd.f32 %v9359_v3, %v9249_v51 }
 0xa3e   :  { %v9258_v48 = vpop.f32.mrb[106].mxu1  ;;  %v9542_v63 = vpop.f32.mrb[104].mxu0 }
 0xa3f   :  { %v9259_v61 = vadd.f32 %v9258_v48, %v9155_v32  ;;  %v18977_v39 = vpop.f32.mrb[107].mxu1  ;;  %v19025_v18 = vpop.f32.mrb[105].mxu0 }
 0xa40   :  { %v16662_v18 = vld [vmem:[#allocation19] ss:$0 sm:$0xff] }
 0xa41   :  { %v9366_v55 = vadd.f32 %v9365_v16, %v9259_v61 }
 0xa42   :  { %v9268_v34 = vpop.f32.mrb[108].mxu1  ;;  %v9550_v29 = vpop.f32.mrb[106].mxu0 }
 0xa43   :  { %v9269_v13 = vadd.f32 %v9268_v34, %v9161_v30  ;;  %v18980_v62 = vpop.f32.mrb[109].mxu1  ;;  %v19028_v41 = vpop.f32.mrb[107].mxu0 }
 0xa44   :  { %v16663_v41 = vld [vmem:[#allocation22] ss:$0 sm:$0xff] }
 0xa45   :  { %v9372_v44 = vadd.f32 %v9371_v10, %v9269_v13 }
 0xa46   :  { %v9451_v33 = vpop.f32.mrb[110].mxu1  ;;  %v9558_v7 = vpop.f32.mrb[108].mxu0 }
 0xa47   :  { %v9452_v5 = vadd.f32 %v9451_v33, %v9360_v28  ;;  %v19008_v40 = vpop.f32.mrb[111].mxu1  ;;  %v19031_v43 = vpop.f32.mrb[109].mxu0 }
 0xa49   :  { %v9543_v37 = vadd.f32 %v9542_v63, %v9452_v5 }
 0xa4a   :  { %v9458_v22 = vpop.f32.mrb[112].mxu1  ;;  %v9728_v35 = vpop.f32.mrb[110].mxu0 }
 0xa4b   :  { %v9459_v3 = vadd.f32 %v9458_v22, %v9366_v55  ;;  %v19011_v8 = vpop.f32.mrb[113].mxu1  ;;  %v19059_v32 = vpop.f32.mrb[111].mxu0 }
 0xa4d   :  { %v9551_v0 = vadd.f32 %v9550_v29, %v9459_v3 }
 0xa4e   :  { %v9465_v36 = vpop.f32.mrb[114].mxu1  ;;  %v9734_v16 = vpop.f32.mrb[112].mxu0 }
 0xa4f   :  { %v9466_v51 = vadd.f32 %v9465_v36, %v9372_v44  ;;  %v19014_v52 = vpop.f32.mrb[115].mxu1  ;;  %v19062_v30 = vpop.f32.mrb[113].mxu0 }
 0xa51   :  { %v9559_v21 = vadd.f32 %v9558_v7, %v9466_v51 }
 0xa52   :  { %v9641_v48 = vpop.f32.mrb[116].mxu1  ;;  %v9740_v10 = vpop.f32.mrb[114].mxu0 }
 0xa53   :  { %v9642_v61 = vadd.f32 %v9641_v48, %v9543_v37  ;;  %v19042_v39 = vpop.f32.mrb[117].mxu1  ;;  %v19065_v28 = vpop.f32.mrb[115].mxu0 }
 0xa55   :  { %v9729_v34 = vadd.f32 %v9728_v35, %v9642_v61 }
 0xa56   :  { %v9647_v63 = vpop.f32.mrb[118].mxu1 }
 0xa57   :  { %v9751_v13 = vadd.f32 %v16662_v18, %v9729_v34  ;;  %v9648_v62 = vadd.f32 %v9647_v63, %v9551_v0  ;;  %v19045_v55 = vpop.f32.mrb[119].mxu1 }
 0xa59   :  { %v9735_v33 = vadd.f32 %v9734_v16, %v9648_v62  ;;  %v9754_v29 = vmax.f32 %v9751_v13, 0.0 }
 0xa5a   :  { %v9653_v5 = vpop.f32.mrb[120].mxu1 }
 0xa5b   :  { %v9752_v40 = vadd.f32 %v16662_v18, %v9735_v33  ;;  %v9654_v44 = vadd.f32 %v9653_v5, %v9559_v21  ;;  %v19048_v43 = vpop.f32.mrb[121].mxu1  ;;  %v9764_v22 = vmul.f32 %v16663_v41, %v9754_v29  ;;  %v9820_v7 = vsel %vm3689_vm7, %v9754_v29, 0 }
 0xa5c   :  { %v24729_v3 = vand.u32 4294901760, %v9820_v7 }
 0xa5d   :  { %v9741_v37 = vadd.f32 %v9740_v10, %v9654_v44  ;;  %v9767_v8 = vsel %vm3689_vm7, %v9764_v22, 0.0  ;;  %v9755_v35 = vmax.f32 %v9752_v40, 0.0  ;;  %v26560_v40 = vsub.s32 1, %v23222_v17 }
 0xa5e   :  { %v24733_v32 = vsub.f32 %v9820_v7, %v24729_v3  ;;  %9768 = vadd.xlane.f32.xlu0 %v9767_v8  ;;  %v26561_v22 = vsub.s32 2, %v23222_v17  ;;  %v26563_v8 = vsub.s32 4, %v23222_v17 }
 0xa5f   :  { %v9753_v0 = vadd.f32 %v16662_v18, %v9741_v37  ;;  %v9765_v36 = vmul.f32 %v16663_v41, %v9755_v35  ;;  %v9823_v16 = vsel %vm3689_vm7, %v9755_v35, 0 }
 0xa60   :  { %v9903_v51 = vand.u32 4294901760, %v24733_v32  ;;  %v24737_v52 = vand.u32 4294901760, %v9823_v16 }
 0xa61   :  { %v9770_v30 = vsel %vm3689_vm7, %v9765_v36, 0.0  ;;  %v9756_v21 = vmax.f32 %v9753_v0, 0.0  ;;  %v26565_v36 = vsub.s32 6, %v23222_v17 }
 0xa62   :  { %v9904_v48 = vsub.f32 %v24733_v32, %v9903_v51  ;;  %v9912_v10 = vsub.f32 %v9823_v16, %v24737_v52  ;;  %9771 = vadd.xlane.f32.xlu1 %v9770_v30 }
 0xa63   :  { %v9766_v61 = vmul.f32 %v16663_v41, %v9756_v21  ;;  %v9826_v39 = vsel %vm3689_vm7, %v9756_v21, 0 }
 0xa64   :  { %v9905_v28 = vand.u32 4294901760, %v9904_v48  ;;  %v24743_v18 = vand.u32 4294901760, %v9826_v39  ;;  %v9913_v34 = vand.u32 4294901760, %v9912_v10  ;;  %v16665_v48 = vld [vmem:[#allocation21] ss:$0 sm:$0xff] }
 0xa65   :  { %v9773_v63 = vsel %vm3689_vm7, %v9766_v61, 0.0 }
 0xa66   :  { %19083 = vmatmul.mubr.f32.vlgmr.msra.gmra.mrb[122].mxu1 %v9905_v28  ;;  %v9922_v13 = vsub.f32 %v9826_v39, %v24743_v18  ;;  %9774 = vadd.xlane.f32.xlu1 %v9773_v63  ;;  %v9914_v62 = vsub.f32 %v9912_v10, %v9913_v34 }
 0xa67   :  { %20574 = vmatpush3.bf16.msra.mxu1 %v24677_v11  ;;  %19085 = vmatprep.mubr.msk.f32.mxu1 %vm22122_vm0, %v26527_v2 }
 0xa68   :  { %20575 = vmatprep.subr.bf16.mxu1 %v26451_v49  ;;  %v9915_v55 = vand.u32 4294901760, %v9914_v62  ;;  %v9923_v41 = vand.u32 4294901760, %v9922_v13 }
 0xa6a   :  { %19086 = vmatmul.mubr.f32.gmra.mrb[124].mxu1 %v9915_v55  ;;  %v9924_v33 = vsub.f32 %v9922_v13, %v9923_v41 }
 0xa6b   :  { %20577 = vmatpush3.bf16.msra.mxu1 %v24688_v15  ;;  %19088 = vmatprep.mubr.msk.f32.mxu1 %vm22122_vm0, %v26527_v2 }
 0xa6c   :  { %20578 = vmatprep.subr.bf16.mxu1 %v26451_v49  ;;  %v9925_v29 = vand.u32 4294901760, %v9924_v33 }
 0xa6e   :  { %19089 = vmatmul.mubr.f32.gmra.mrb[126].mxu1 %v9925_v29 }
 0xa6f   :  { %20580 = vmatpush3.bf16.msra.mxu1 %v24698_v59  ;;  %19107 = vmatprep.mubr.msk.f32.mxu1 %vm22122_vm0, %v26527_v2 }
 0xa70   :  { %20581 = vmatprep.subr.bf16.mxu1 %v26451_v49 }
 0xa73   :  { %20583 = vmatpush3.bf16.msra.mxu1 %v24702_v58 }
 0xa74   :  { %20584 = vmatprep.subr.bf16.mxu1 %v26451_v49 }
 0xa76   :  { %19108 = vmatmul.mubr.f32.vlgmr.msra.gmra.mrb[122].mxu1 %v24729_v3 }
 0xa77   :  { %20586 = vmatpush3.bf16.msra.mxu1 %v20585_v60  ;;  %19110 = vmatprep.mubr.msk.f32.mxu1 %vm22122_vm0, %v26527_v2 }
 0xa78   :  { %20587 = vmatprep.subr.bf16.mxu1 %v26451_v49 }
 0xa7a   :  { %19111 = vmatmul.mubr.f32.gmra.mrb[124].mxu1 %v24737_v52 }
 0xa7b   :  { %20589 = vmatpush3.bf16.msra.mxu1 %v20588_v24  ;;  %19113 = vmatprep.mubr.msk.f32.mxu1 %vm22122_vm0, %v26527_v2  ;;  %v10469_v24 = vld [vmem:[%s26558_s6] sm:$0xf] }
 0xa7c   :  { %20590 = vmatprep.subr.bf16.mxu1 %v26451_v49 }
 0xa7e   :  { %19114 = vmatmul.mubr.f32.gmra.mrb[126].mxu1 %v24743_v18 }
 0xa7f   :  { %20592 = vmatpush3.bf16.msra.mxu1 %v20591_v27  ;;  %19132 = vmatprep.mubr.msk.f32.mxu1 %vm22122_vm0, %v26527_v2 }
 0xa80   :  { %20593 = vmatprep.subr.bf16.mxu1 %v26451_v49 }
 0xa83   :  { %20595 = vmatpush3.bf16.msra.mxu1 %v20594_v6 }
 0xa84   :  { %20596 = vmatprep.subr.bf16.mxu1 %v26451_v49 }
 0xa86   :  { %19133 = vmatmul.mubr.f32.vlgmr.msra.gmra.mrb[122].mxu1 %v24733_v32  ;;  %v26564_v32 = vsub.s32 5, %v23222_v17 }
 0xa87   :  { %20598 = vmatpush3.bf16.msra.mxu1 %v24630_v9  ;;  %19135 = vmatprep.mubr.msk.f32.mxu1 %vm22122_vm0, %v26527_v2 }
 0xa88   :  { %20599 = vmatprep.subr.bf16.mxu1 %v26451_v49 }
 0xa8a   :  { %19136 = vmatmul.mubr.f32.gmra.mrb[124].mxu1 %v9912_v10 }
 0xa8b   :  { %20601 = vmatpush3.bf16.msra.mxu1 %v24642_v12  ;;  %19138 = vmatprep.mubr.msk.f32.mxu1 %vm22122_vm0, %v26527_v2 }
 0xa8c   :  { %20602 = vmatprep.subr.bf16.mxu1 %v26451_v49 }
 0xa8e   :  { %19139 = vmatmul.mubr.f32.gmra.mrb[126].mxu1 %v9922_v13 }
 0xa8f   :  { %20604 = vmatpush3.bf16.msra.mxu1 %v24655_v53  ;;  %19157 = vmatprep.mubr.msk.f32.mxu1 %vm22122_vm0, %v26527_v2 }
 0xa90   :  { %20605 = vmatprep.subr.bf16.mxu1 %v26451_v49 }
 0xa93   :  { %20607 = vmatpush3.bf16.msra.mxu1 %v24665_v19 }
 0xa94   :  { %20608 = vmatprep.subr.bf16.mxu1 %v26451_v49 }
 0xa96   :  { %19158 = vmatmul.mubr.f32.vlgmr.msra.gmra.mrb[122].mxu1 %v9903_v51  ;;  %v26566_v51 = vsub.s32 7, %v23222_v17 }
 0xa97   :  { %20610 = vmatpush3.bf16.msra.mxu1 %v24714_v14  ;;  %19160 = vmatprep.mubr.msk.f32.mxu1 %vm22122_vm0, %v26527_v2  ;;  %v24842_v14 = vunpack.c.l.bf16 %v10469_v24 }
 0xa98   :  { %20611 = vmatprep.subr.bf16.mxu1 %v26451_v49 }
 0xa99   :  { %v10964_v44 = vrot.slane %v24842_v14, %v26560_v40  ;;  %v10979_v7 = vrot.slane %v24842_v14, %v26561_v22  ;;  %v11009_v35 = vrot.slane %v24842_v14, %v26563_v8  ;;  %v11024_v0 = vrot.slane %v24842_v14, %v26564_v32 }
 0xa9a   :  { %19161 = vmatmul.mubr.f32.gmra.mrb[124].mxu1 %v9913_v34  ;;  %v11039_v16 = vrot.slane %v24842_v14, %v26565_v36  ;;  %v11362_v30 = vsel %vm4394_vm8, %v24842_v14, 0.0  ;;  %v10472_v21 = vsel %vm4394_vm8, %v24842_v14, 0 }
 0xa9b   :  { %20613 = vmatpush3.bf16.msra.mxu1 %v24720_v56  ;;  %19163 = vmatprep.mubr.msk.f32.mxu1 %vm22122_vm0, %v26527_v2  ;;  %v24872_v10 = vsub.f32 %v10472_v21, %v10472_v21 }
 0xa9c   :  { %20614 = vmatprep.subr.bf16.mxu1 %v26451_v49 }
 0xa9d   :  { %v10544_v34 = vand.u32 4294901760, %v24872_v10 }
 0xa9e   :  { %19164 = vmatmul.mubr.f32.gmra.mrb[126].mxu1 %v9923_v41 }
 0xa9f   :  { %20616 = vmatpush3.bf16.msra.mxu1 %v24724_v57  ;;  %19182 = vmatprep.mubr.msk.f32.mxu1 %vm22122_vm0, %v26527_v2  ;;  %v26559_v57 = vsub.s32 0, %v23222_v17 }
 0xaa0   :  { %20617 = vmatprep.subr.bf16.mxu1 %v26451_v49 }
 0xaa3   :  { %20619 = vmatpush3.bf16.msra.mxu1 %v24726_v45  ;;  %v10949_v45 = vrot.slane %v24842_v14, %v26559_v57 }
 0xaa4   :  { %20620 = vmatprep.subr.bf16.mxu1 %v26451_v49 }
 0xaa6   :  { %19183 = vmatmul.mubr.f32.vlgmr.msra.gmra.mrb[122].mxu1 %v24729_v3 }
 0xaa7   :  { %20622 = vmatpush3.bf16.msra.mxu1 %v24630_v9  ;;  %19185 = vmatprep.mubr.msk.f32.mxu1 %vm22122_vm0, %v26527_v2  ;;  %v16664_v9 = vld [vmem:[#allocation3] ss:$0 sm:$0xff] }
 0xaa8   :  { %20623 = vmatprep.subr.bf16.mxu1 %v26451_v49 }
 0xaaa   :  { %19186 = vmatmul.mubr.f32.gmra.mrb[124].mxu1 %v24737_v52 }
 0xaab   :  { %20625 = vmatpush3.bf16.msra.mxu1 %v24642_v12  ;;  %19188 = vmatprep.mubr.msk.f32.mxu1 %vm22122_vm0, %v26527_v2 }
 0xaac   :  { %20626 = vmatprep.subr.bf16.mxu1 %v26451_v49 }
 0xaae   :  { %19189 = vmatmul.mubr.f32.gmra.mrb[126].mxu1 %v24743_v18 }
 0xaaf   :  { %20628 = vmatpush3.bf16.msra.mxu1 %v24655_v53  ;;  %19207 = vmatprep.mubr.msk.f32.mxu1 %vm22122_vm0, %v26527_v2 }
 0xab0   :  { %20629 = vmatprep.subr.bf16.mxu1 %v26451_v49 }
 0xab3   :  { %20631 = vmatpush3.bf16.msra.mxu1 %v24665_v19 }
 0xab4   :  { %20698 = vmatprep.subr.bf16.mxu1 %v26451_v49 }
 0xab6   :  { %19208 = vmatmul.mubr.f32.vlgmr.msra.gmra.mrb[122].mxu1 %v24729_v3  ;;  %v26562_v3 = vsub.s32 3, %v23222_v17 }
 0xab7   :  { %19210 = vmatprep.mubr.msk.f32.mxu1 %vm22122_vm0, %v26527_v2 }
 0xab8   :  { %v10994_v37 = vrot.slane %v24842_v14, %v26562_v3 }
 0xaba   :  { %19211 = vmatmul.mubr.f32.gmra.mrb[124].mxu1 %v24737_v52  ;;  %v11054_v52 = vrot.slane %v24842_v14, %v26566_v51 }
 0xabb   :  { %19213 = vmatprep.mubr.msk.f32.mxu1 %vm22122_vm0, %v26527_v2 }
 0xabe   :  { %19214 = vmatmul.mubr.f32.gmra.mrb[126].mxu1 %v24743_v18 }
 0xabf   :  { %19372 = vmatprep.mubr.msk.f32.mxu1 %vm22122_vm0, %v26527_v2 }
 0xaeb   :  { %v9769_v25 = vpop.xlane.xlu0 %9768 }
 0xaec   :  { %v9783_v31 = vadd.f32 %v16664_v9, %v9769_v25  ;;  %v10545_v25 = vsub.f32 %v24872_v10, %v10544_v34 }
 0xaee   :  { %v9786_v12 = vsub.f32 0.0, %v9783_v31 }
 0xaef   :  { %v9772_v23 = vpop.xlane.xlu1 %9771 }
 0xaf0   :  { %v9789_v42 = vmul.f32 1.442695, %v9786_v12  ;;  %v9784_v46 = vadd.f32 %v16664_v9, %v9772_v23 }
 0xaf2   :  { %21459 = vpow2.f32 %v9789_v42  ;;  %v9787_v26 = vsub.f32 0.0, %v9784_v46 }
 0xaf3   :  { %v9775_v53 = vpop.xlane.xlu1 %9774 }
 0xaf4   :  { %v9791_v38 = vmul.f32 1.442695, %v9787_v26  ;;  %v9785_v4 = vadd.f32 %v16664_v9, %v9775_v53 }
 0xaf6   :  { %21461 = vpow2.f32 %v9791_v38  ;;  %v9788_v19 = vsub.f32 0.0, %v9785_v4 }
 0xaf8   :  { %v9793_v11 = vmul.f32 1.442695, %v9788_v19 }
 0xafa   :  { %21463 = vpow2.f32 %v9793_v11 }
 0xafc   :  { %v21460_v15 = vpop.eup %21459 }
 0xafd   :  { %v9795_v59 = vadd.f32 1.0, %v21460_v15 }
 0xaff   :  { %21465 = vrcp.f32 %v9795_v59 }
 0xb00   :  { %v21462_v60 = vpop.eup %21461 }
 0xb01   :  { %v9796_v58 = vadd.f32 1.0, %v21462_v60  ;;  %v10546_v60 = vand.u32 4294901760, %v10545_v25 }
 0xb03   :  { %21467 = vrcp.f32 %v9796_v58 }
 0xb04   :  { %v21464_v27 = vpop.eup %21463 }
 0xb05   :  { %v9797_v6 = vadd.f32 1.0, %v21464_v27 }
 0xb07   :  { %21469 = vrcp.f32 %v9797_v6 }
 0xb09   :  { %v21466_v56 = vpop.eup %21465 }
 0xb0a   :  { %10453 = vperm.xlu0 %21446, %v21466_v56  }
 0xb0d   :  { %v21468_v5 = vpop.eup %21467 }
 0xb0e   :  { %10458 = vperm.xlu1 %21445, %v21468_v5   ;;  %10951 = vbcast.lane.b32.xlu0 %v10949_v45, 256 }
 0xb11   :  { %v21470_v43 = vpop.eup %21469 }
 0xb12   :  { %10463 = vperm.xlu1 %21445, %v21470_v43   ;;  %10966 = vbcast.lane.b32.xlu0 %v10964_v44, 256 }
 0xb16   :  { %10981 = vbcast.lane.b32.xlu0 %v10979_v7, 256  ;;  %10955 = vbcast.lane.b32.xlu1 %v10949_v45, 264 }
 0xb1a   :  { %10959 = vbcast.lane.b32.xlu0 %v10949_v45, 272  ;;  %10970 = vbcast.lane.b32.xlu1 %v10964_v44, 264 }
 0xb1e   :  { %10996 = vbcast.lane.b32.xlu0 %v10994_v37, 256  ;;  %10985 = vbcast.lane.b32.xlu1 %v10979_v7, 264 }
 0xb22   :  { %10989 = vbcast.lane.b32.xlu0 %v10979_v7, 272  ;;  %10974 = vbcast.lane.b32.xlu1 %v10964_v44, 272 }
 0xb26   :  { %11015 = vbcast.lane.b32.xlu0 %v11009_v35, 264  ;;  %11000 = vbcast.lane.b32.xlu1 %v10994_v37, 264 }
 0xb2a   :  { %11026 = vbcast.lane.b32.xlu0 %v11024_v0, 256  ;;  %11011 = vbcast.lane.b32.xlu1 %v11009_v35, 256 }
 0xb2e   :  { %11019 = vbcast.lane.b32.xlu0 %v11009_v35, 272  ;;  %11004 = vbcast.lane.b32.xlu1 %v10994_v37, 272 }
 0xb32   :  { %11045 = vbcast.lane.b32.xlu0 %v11039_v16, 264  ;;  %11030 = vbcast.lane.b32.xlu1 %v11024_v0, 264 }
 0xb36   :  { %11056 = vbcast.lane.b32.xlu0 %v11054_v52, 256  ;;  %11041 = vbcast.lane.b32.xlu1 %v11039_v16, 256 }
 0xb3a   :  { %11049 = vbcast.lane.b32.xlu0 %v11039_v16, 272  ;;  %11034 = vbcast.lane.b32.xlu1 %v11024_v0, 272 }
 0xb3e   :  { %11060 = vbcast.lane.b32.xlu1 %v11054_v52, 264 }
 0xb42   :  { %11064 = vbcast.lane.b32.xlu1 %v11054_v52, 272 }
 0xb59   :  { %11363 = vadd.xlane.f32.xlu0 %v11362_v30 }
 0xb89   :  { %v10435_v61 = vpop.f32.mrb[122].mxu1  ;;  %v10454_v17 = vpop.permute.xlu0 %10453 }
 0xb8a   :  { %v21130_v39 = vadd.f32 %v16665_v48, %v10435_v61  ;;  %v19209_v28 = vpop.f32.mrb[123].mxu1 }
 0xb8c   :  { %v24874_v18 = vmul.f32 %v21130_v39, %v10454_v17 }
 0xb8d   :  { %v10441_v63 = vpop.f32.mrb[124].mxu1  ;;  %v10952_v13 = vpop.permute.xlu0 %10951 }
 0xb8e   :  { %v21131_v62 = vadd.f32 %v16665_v48, %v10441_v63  ;;  %vm11066_vm5 = vcmp.gt.f32.partialorder %v10952_v13, 0.5  ;;  %v19212_v55 = vpop.f32.mrb[125].mxu1  ;;  %v10459_v41 = vpop.permute.xlu1 %10458  ;;  %v10475_v33 = vand.u32 4294901760, %v24874_v18 }
 0xb8f   :  { %v11138_v31 = vsel %vm11066_vm5, %v24874_v18, -inf  ;;  %v11250_v12 = vsel %vm11066_vm5, %v24874_v18, inf }
 0xb90   :  { %v24878_v29 = vmul.f32 %v21131_v62, %v10459_v41  ;;  %v24881_v9 = vsub.f32 %v24874_v18, %v10475_v33  ;;  %v11162_v58 = vsel %vm5086_vm11, %v11138_v31, -inf  ;;  %v11274_v24 = vsel %vm5199_vm13, %v11250_v12, inf }
 0xb91   :  { %v10447_v23 = vpop.f32.mrb[126].mxu1  ;;  %v10967_v42 = vpop.permute.xlu0 %10966 }
 0xb92   :  { %v21132_v46 = vadd.f32 %v16665_v48, %v10447_v23  ;;  %vm11069_vm7 = vcmp.gt.f32.partialorder %v10967_v42, 0.5  ;;  %v19215_v26 = vpop.f32.mrb[127].mxu1  ;;  %v10464_v53 = vpop.permute.xlu1 %10463  ;;  %v10478_v38 = vand.u32 4294901760, %v24878_v29  ;;  %v10555_v4 = vand.u32 4294901760, %v24881_v9 }
 0xb93   :  { %v11141_v19 = vsel %vm11069_vm7, %v24874_v18, -inf  ;;  %v11253_v11 = vsel %vm11069_vm7, %v24874_v18, inf }
 0xb94   :  { %v24892_v15 = vmul.f32 %v21132_v46, %v10464_v53  ;;  %v24894_v59 = vpack.c.bf16 %v10478_v38, %v10475_v33  ;;  %v24899_v6 = vsub.f32 %v24878_v29, %v10478_v38  ;;  %v10556_v56 = vsub.f32 %v24881_v9, %v10555_v4 }
 0xb95   :  { %v10982_v27 = vpop.permute.xlu0 %10981  ;;  %v24905_v57 = vsel %vm5086_vm11, %v11141_v19, -inf  ;;  %v24908_v45 = vsel %vm5199_vm13, %v11253_v11, inf }
 0xb96   :  { %vm11072_vm15 = vcmp.gt.f32.partialorder %v10982_v27, 0.5  ;;  %20634 = vmatpush3.bf16.msra.mxu0 %v24894_v59  ;;  %v10956_v5 = vpop.permute.xlu1 %10955  ;;  %v24912_v40 = vand.u32 4294901760, %v24892_v15  ;;  %v10557_v22 = vand.u32 4294901760, %v10556_v56  ;;  %v10562_v36 = vand.u32 4294901760, %v24899_v6 }
 0xb97   :  { %v11144_v44 = vsel %vm11072_vm15, %v24874_v18, -inf  ;;  %v11256_v43 = vsel %vm11072_vm15, %v24874_v18, inf  ;;  %vm11067_vm9 = vcmp.gt.f32.partialorder %v10956_v5, 0.5  ;;  %19220 = vmatprep.subr.mxu0 %v26527_v2  ;;  %v20639_v21 = vpack.c.bf16 %v24899_v6, %v24881_v9 }
 0xb98   :  { %v24918_v7 = vsel %vm5086_vm11, %v11144_v44, -inf  ;;  %v24921_v3 = vsel %vm5199_vm13, %v11256_v43, inf  ;;  %v11139_v37 = vsel %vm11067_vm9, %v24878_v29, -inf  ;;  %v11251_v8 = vsel %vm11067_vm9, %v24878_v29, inf }
 0xb99   :  { %v11163_v35 = vsel %vm5086_vm11, %v11139_v37, -inf  ;;  %v11275_v32 = vsel %vm5199_vm13, %v11251_v8, inf  ;;  %v10960_v0 = vpop.permute.xlu0 %10959  ;;  %v24930_v16 = vsub.f32 %v24892_v15, %v24912_v40  ;;  %v10563_v17 = vsub.f32 %v24899_v6, %v10562_v36 }
 0xb9a   :  { %v11164_v51 = vmax.f32 %v11162_v58, %v11163_v35  ;;  %v11276_v52 = vmin.f32 %v11274_v24, %v11275_v32  ;;  %vm11068_vm5 = vcmp.gt.f32.partialorder %v10960_v0, 0.5  ;;  %19221 = vmatpush3.msra.mxu0 %v24912_v40  ;;  %v10971_v30 = vpop.permute.xlu1 %10970 }
 0xb9b   :  { %v11140_v48 = vsel %vm11068_vm5, %v24892_v15, -inf  ;;  %v11252_v61 = vsel %vm11068_vm5, %v24892_v15, inf  ;;  %vm11070_vm7 = vcmp.gt.f32.partialorder %v10971_v30, 0.5  ;;  %19223 = vmatmul.mubr.f32.vlgmr.msra.gmra.mrb[116].mxu0 %v10546_v60  ;;  %20635 = vmatprep.subr.bf16.mxu0 %v26451_v49  ;;  %v10564_v23 = vand.u32 4294901760, %v10563_v17 }
 0xb9c   :  { %v11165_v39 = vsel %vm5086_vm11, %v11140_v48, -inf  ;;  %v11277_v28 = vsel %vm5199_vm13, %v11252_v61, inf  ;;  %v11142_v63 = vsel %vm11070_vm7, %v24878_v29, -inf  ;;  %v11254_v13 = vsel %vm11070_vm7, %v24878_v29, inf  ;;  %19231 = vmatprep.mubr.msk.f32.mxu0 %vm22122_vm0, %v26527_v2 }
 0xb9d   :  { %v11166_v62 = vmax.f32 %v11164_v51, %v11165_v39  ;;  %v11278_v55 = vmin.f32 %v11276_v52, %v11277_v28  ;;  %v11174_v41 = vsel %vm5086_vm11, %v11142_v63, -inf  ;;  %v11286_v33 = vsel %vm5199_vm13, %v11254_v13, inf  ;;  %v10997_v25 = vpop.permute.xlu0 %10996 }
 0xb9e   :  { %v11175_v31 = vmax.f32 %v24905_v57, %v11174_v41  ;;  %v11287_v12 = vmin.f32 %v24908_v45, %v11286_v33  ;;  %vm11075_vm15 = vcmp.gt.f32.partialorder %v10997_v25, 0.5  ;;  %v10986_v42 = vpop.permute.xlu1 %10985  ;;  %v20636_v60 = vpack.c.bf16 %v10564_v23, %v10557_v22 }
 0xb9f   :  { %v11167_v46 = vrot.slane %v11166_v62, 4  ;;  %v11279_v26 = vrot.slane %v11278_v55, 4  ;;  %v11147_v53 = vsel %vm11075_vm15, %v24874_v18, -inf  ;;  %v11259_v38 = vsel %vm11075_vm15, %v24874_v18, inf }
 0xba0   :  { %v24954_v19 = vsel %vm5086_vm11, %v11147_v53, -inf  ;;  %v24957_v11 = vsel %vm5199_vm13, %v11259_v38, inf  ;;  %vm11073_vm9 = vcmp.gt.f32.partialorder %v10986_v42, 0.5  ;;  %20637 = vmatpush3.bf16.msra.mxu0 %v20636_v60  ;;  %v10569_v44 = vand.u32 4294901760, %v24930_v16 }
 0xba1   :  { %v11168_v58 = vmax.f32 %v11166_v62, %v11167_v46  ;;  %v11280_v24 = vmin.f32 %v11278_v55, %v11279_v26  ;;  %v11145_v27 = vsel %vm11073_vm9, %v24878_v29, -inf  ;;  %v11257_v56 = vsel %vm11073_vm9, %v24878_v29, inf  ;;  %v10990_v57 = vpop.permute.xlu0 %10989  ;;  %19229 = vmatprep.subr.mxu0 %v26527_v2 }
 0xba2   :  { %v11185_v45 = vsel %vm5086_vm11, %v11145_v27, -inf  ;;  %v11297_v5 = vsel %vm5199_vm13, %v11257_v56, inf  ;;  %vm11074_vm5 = vcmp.gt.f32.partialorder %v10990_v57, 0.5  ;;  %v10975_v43 = vpop.permute.xlu1 %10974  ;;  %v10570_v51 = vsub.f32 %v24930_v16, %v10569_v44 }
 0xba3   :  { %v11169_v37 = vrot.slane %v11168_v58, 2  ;;  %v11281_v8 = vrot.slane %v11280_v24, 2  ;;  %v11186_v22 = vmax.f32 %v24918_v7, %v11185_v45  ;;  %v11298_v35 = vmin.f32 %v24921_v3, %v11297_v5 }
 0xba4   :  { %v11146_v32 = vsel %vm11074_vm5, %v24892_v15, -inf  ;;  %v11258_v0 = vsel %vm11074_vm5, %v24892_v15, inf  ;;  %vm11071_vm7 = vcmp.gt.f32.partialorder %v10975_v43, 0.5  ;;  %v10571_v39 = vand.u32 4294901760, %v10570_v51 }
 0xba5   :  { %v11170_v52 = vmax.f32 %v11168_v58, %v11169_v37  ;;  %v11282_v30 = vmin.f32 %v11280_v24, %v11281_v8  ;;  %v11187_v48 = vsel %vm5086_vm11, %v11146_v32, -inf  ;;  %v11299_v61 = vsel %vm5199_vm13, %v11258_v0, inf  ;;  %v11016_v7 = vpop.permute.xlu0 %11015 }
 0xba6   :  { %v11188_v17 = vmax.f32 %v11186_v22, %v11187_v48  ;;  %v11300_v3 = vmin.f32 %v11298_v35, %v11299_v61  ;;  %v11143_v28 = vsel %vm11071_vm7, %v24892_v15, -inf  ;;  %v11001_v63 = vpop.permute.xlu1 %11000  ;;  %v11255_v41 = vsel %vm11071_vm7, %v24892_v15, inf  ;;  %19230 = vmatpush3.msra.mxu0 %v10571_v39 }
 0xba7   :  { %v11171_v13 = vrot.slane %v11170_v52, 1  ;;  %v11283_v62 = vrot.slane %v11282_v30, 1  ;;  %v11176_v55 = vsel %vm5086_vm11, %v11143_v28, -inf  ;;  %v11288_v42 = vsel %vm5199_vm13, %v11255_v41, inf  ;;  %19232 = vmatmul.mubr.msk.f32.vlgmr.msra.gmra.mrb[116].mxu0 %vm4394_vm8, %v24842_v14  ;;  %20638 = vmatprep.subr.bf16.mxu0 %v26451_v49 }
 0xba8   :  { %v11189_v33 = vrot.slane %v11188_v17, 4  ;;  %v11301_v25 = vrot.slane %v11300_v3, 4  ;;  %v11177_v23 = vmax.f32 %v11175_v31, %v11176_v55  ;;  %v11289_v53 = vmin.f32 %v11287_v12, %v11288_v42  ;;  %20640 = vmatpush3.bf16.msra.mxu0 %v20639_v21  ;;  %19240 = vmatprep.mubr.msk.f32.mxu0 %vm22122_vm0, %v26527_v2 }
 0xba9   :  { %v24978_v46 = vmax.f32 %v11170_v52, %v11171_v13  ;;  %v24980_v26 = vmin.f32 %v11282_v30, %v11283_v62  ;;  %vm11079_vm15 = vcmp.gt.f32.partialorder %v11016_v7, 0.5  ;;  %v11027_v38 = vpop.permute.xlu0 %11026  ;;  %vm11076_vm9 = vcmp.gt.f32.partialorder %v11001_v63, 0.5  ;;  %19238 = vmatprep.subr.mxu0 %v26527_v2 }
 0xbaa   :  { %v11190_v60 = vmax.f32 %v11188_v17, %v11189_v33  ;;  %v11302_v58 = vmin.f32 %v11300_v3, %v11301_v25  ;;  %v11178_v24 = vrot.slane %v11177_v23, 4  ;;  %v11151_v31 = vsel %vm11079_vm15, %v24878_v29, -inf  ;;  %v11012_v12 = vpop.permute.xlu1 %11011 }
 0xbab   :  { %v11290_v27 = vrot.slane %v11289_v53, 4  ;;  %v11207_v56 = vsel %vm5086_vm11, %v11151_v31, -inf  ;;  %v11263_v57 = vsel %vm11079_vm15, %v24878_v29, inf  ;;  %v11148_v8 = vsel %vm11076_vm9, %v24878_v29, -inf }
 0xbac   :  { %v11191_v45 = vrot.slane %v11190_v60, 2  ;;  %v11303_v5 = vrot.slane %v11302_v58, 2  ;;  %v11179_v43 = vmax.f32 %v11177_v23, %v11178_v24  ;;  %v11319_v37 = vsel %vm5199_vm13, %v11263_v57, inf  ;;  %19239 = vmatpush3.msra.mxu0 %v24930_v16 }
 0xbad   :  { %v11291_v21 = vmin.f32 %v11289_v53, %v11290_v27  ;;  %v11260_v22 = vsel %vm11076_vm9, %v24878_v29, inf  ;;  %vm11081_vm5 = vcmp.gt.f32.partialorder %v11027_v38, 0.5  ;;  %v11020_v35 = vpop.permute.xlu0 %11019  ;;  %v11196_v52 = vsel %vm5086_vm11, %v11148_v8, -inf  ;;  %20641 = vmatprep.subr.bf16.mxu0 %v26451_v49 }
 0xbae   :  { %v11192_v32 = vmax.f32 %v11190_v60, %v11191_v45  ;;  %v11304_v0 = vmin.f32 %v11302_v58, %v11303_v5  ;;  %v11180_v51 = vrot.slane %v11179_v43, 2  ;;  %v11005_v30 = vpop.permute.xlu1 %11004  ;;  %v11197_v61 = vmax.f32 %v24954_v19, %v11196_v52 }
 0xbaf   :  { %v11292_v48 = vrot.slane %v11291_v21, 2  ;;  %v11308_v7 = vsel %vm5199_vm13, %v11260_v22, inf  ;;  %v11153_v17 = vsel %vm11081_vm5, %v24874_v18, -inf  ;;  %v11265_v55 = vsel %vm11081_vm5, %v24874_v18, inf  ;;  %19241 = vmatmul.mubr.f32.vlgmr.msra.gmra.mrb[116].mxu0 %v24872_v10 }
 0xbb0   :  { %v11193_v3 = vrot.slane %v11192_v32, 1  ;;  %v11305_v39 = vrot.slane %v11304_v0, 1  ;;  %v11181_v28 = vmax.f32 %v11179_v43, %v11180_v51  ;;  %v11309_v63 = vmin.f32 %v24957_v11, %v11308_v7  ;;  %20643 = vmatpush3.bf16.msra.mxu0 %v24894_v59  ;;  %19249 = vmatprep.mubr.msk.f32.mxu0 %vm22122_vm0, %v26527_v2 }
 0xbb1   :  { %v11293_v13 = vmin.f32 %v11291_v21, %v11292_v48  ;;  %v25006_v62 = vsel %vm5086_vm11, %v11153_v17, -inf  ;;  %vm11078_vm7 = vcmp.gt.f32.partialorder %v11012_v12, 0.5  ;;  %v25016_v25 = vsel %vm5199_vm13, %v11265_v55, inf  ;;  %19247 = vmatprep.subr.mxu0 %v26527_v2  ;;  %v11046_v38 = vpop.permute.xlu0 %11045 }
 0xbb2   :  { %v25011_v19 = vmax.f32 %v11192_v32, %v11193_v3  ;;  %v25013_v41 = vmin.f32 %v11304_v0, %v11305_v39  ;;  %v11182_v33 = vrot.slane %v11181_v28, 1  ;;  %v11031_v11 = vpop.permute.xlu1 %11030  ;;  %v11150_v42 = vsel %vm11078_vm7, %v24874_v18, -inf }
 0xbb3   :  { %v11294_v23 = vrot.slane %v11293_v13, 1  ;;  %v11262_v53 = vsel %vm11078_vm7, %v24874_v18, inf  ;;  %vm11080_vm15 = vcmp.gt.f32.partialorder %v11020_v35, 0.5  ;;  %v11206_v58 = vsel %vm5086_vm11, %v11150_v42, -inf }
 0xbb4   :  { %v11183_v60 = vmax.f32 %v11181_v28, %v11182_v33  ;;  %v11318_v24 = vsel %vm5199_vm13, %v11262_v53, inf  ;;  %v11152_v31 = vsel %vm11080_vm15, %v24892_v15, -inf  ;;  %v11208_v27 = vmax.f32 %v11206_v58, %v11207_v56  ;;  %19248 = vmatpush3.msra.mxu0 %v24912_v40 }
 0xbb5   :  { %v11295_v12 = vmin.f32 %v11293_v13, %v11294_v23  ;;  %v11320_v57 = vmin.f32 %v11318_v24, %v11319_v37  ;;  %v11209_v45 = vsel %vm5086_vm11, %v11152_v31, -inf  ;;  %v11264_v43 = vsel %vm11080_vm15, %v24892_v15, inf  ;;  %20644 = vmatprep.subr.bf16.mxu0 %v26451_v49  ;;  %v11057_v33 = vpop.permute.xlu0 %11056 }
 0xbb6   :  { %v25030_v5 = vsel %vm5302_vm4, %v11183_v60, %v24978_v46  ;;  %vm11077_vm9 = vcmp.gt.f32.partialorder %v11005_v30, 0.5  ;;  %vm11085_vm5 = vcmp.gt.f32.partialorder %v11046_v38, 0.5  ;;  %v11042_v21 = vpop.permute.xlu1 %11041  ;;  %v11210_v22 = vmax.f32 %v11208_v27, %v11209_v45 }
 0xbb7   :  { %v25036_v8 = vsel %vm5302_vm4, %v11295_v12, %v24980_v26  ;;  %v11321_v56 = vsel %vm5199_vm13, %v11264_v43, inf  ;;  %v11149_v37 = vsel %vm11077_vm9, %v24892_v15, -inf  ;;  %v11261_v32 = vsel %vm11077_vm9, %v24892_v15, inf  ;;  %19250 = vmatmul.mubr.f32.vlgmr.msra.gmra.mrb[116].mxu0 %v10544_v34 }
 0xbb8   :  { %v11322_v46 = vmin.f32 %v11320_v57, %v11321_v56  ;;  %v11198_v35 = vsel %vm5086_vm11, %v11149_v37, -inf  ;;  %v11157_v0 = vsel %vm11085_vm5, %v24878_v29, -inf  ;;  %v11211_v51 = vrot.slane %v11210_v22, 4  ;;  %19258 = vmatprep.mubr.msk.f32.mxu0 %vm22122_vm0, %v26527_v2 }
 0xbb9   :  { %v11199_v52 = vmax.f32 %v11197_v61, %v11198_v35  ;;  %v11310_v26 = vsel %vm5199_vm13, %v11261_v32, inf  ;;  %v25047_v30 = vsel %vm5086_vm11, %v11157_v0, -inf  ;;  %v11269_v17 = vsel %vm11085_vm5, %v24878_v29, inf  ;;  %v11050_v37 = vpop.permute.xlu0 %11049 }
 0xbba   :  { %v11323_v48 = vrot.slane %v11322_v46, 4  ;;  %v11311_v7 = vmin.f32 %v11309_v63, %v11310_v26  ;;  %vm11082_vm4 = vcmp.gt.f32.partialorder %v11031_v11, 0.5  ;;  %v25055_v3 = vpop.permute.xlu1 %11034  ;;  %v11212_v61 = vmax.f32 %v11210_v22, %v11211_v51 }
 0xbbb   :  { %v11200_v39 = vrot.slane %v11199_v52, 4  ;;  %v25058_v28 = vsel %vm5199_vm13, %v11269_v17, inf  ;;  %v11154_v13 = vsel %vm11082_vm4, %v24878_v29, -inf  ;;  %v11266_v55 = vsel %vm11082_vm4, %v24878_v29, inf }
 0xbbc   :  { %v11324_v10 = vmin.f32 %v11322_v46, %v11323_v48  ;;  %v11312_v34 = vrot.slane %v11311_v7, 4  ;;  %v11218_v63 = vsel %vm5086_vm11, %v11154_v13, -inf  ;;  %v11213_v11 = vrot.slane %v11212_v61, 2 }
 0xbbd   :  { %v11201_v23 = vmax.f32 %v11199_v52, %v11200_v39  ;;  %v11219_v42 = vmax.f32 %v25006_v62, %v11218_v63  ;;  %v11330_v53 = vsel %vm5199_vm13, %v11266_v55, inf  ;;  %v20645_v24 = vpack.c.bf16 %v10562_v36, %v10555_v4 }
 0xbbe   :  { %v11325_v38 = vrot.slane %v11324_v10, 2  ;;  %v11313_v60 = vmin.f32 %v11311_v7, %v11312_v34  ;;  %v11331_v58 = vmin.f32 %v25016_v25, %v11330_v53  ;;  %v11214_v31 = vmax.f32 %v11212_v61, %v11213_v11  ;;  %v11061_v43 = vpop.permute.xlu1 %11060 }
 0xbbf   :  { %v11202_v12 = vrot.slane %v11201_v23, 2  ;;  %vm11087_vm7 = vcmp.gt.f32.partialorder %v11057_v33, 0.5  ;;  %vm11084_vm15 = vcmp.gt.f32.partialorder %v11042_v21, 0.5  ;;  %20646 = vmatpush3.bf16.msra.mxu0 %v20645_v24  ;;  %vm11086_vm9 = vcmp.gt.f32.partialorder %v11050_v37, 0.5 }
 0xbc0   :  { %v11326_v27 = vmin.f32 %v11324_v10, %v11325_v38  ;;  %v11314_v57 = vrot.slane %v11313_v60, 2  ;;  %v11159_v62 = vsel %vm11087_vm7, %v24874_v18, -inf  ;;  %v11271_v45 = vsel %vm11087_vm7, %v24874_v18, inf  ;;  %19256 = vmatprep.subr.mxu0 %v26527_v2 }
 0xbc1   :  { %v11215_v22 = vrot.slane %v11214_v31, 1  ;;  %v11203_v56 = vmax.f32 %v11201_v23, %v11202_v12  ;;  %v25073_v25 = vsel %vm5086_vm11, %v11159_v62, -inf  ;;  %v25076_v9 = vsel %vm5199_vm13, %v11271_v45, inf }
 0xbc2   :  { %v11327_v4 = vrot.slane %v11326_v27, 1  ;;  %v11315_v6 = vmin.f32 %v11313_v60, %v11314_v57  ;;  %v11156_v36 = vsel %vm11084_vm15, %v24874_v18, -inf  ;;  %v11268_v21 = vsel %vm11084_vm15, %v24874_v18, inf  ;;  %v11065_v16 = vpop.permute.xlu1 %11064 }
 0xbc3   :  { %v25081_v46 = vmax.f32 %v11214_v31, %v11215_v22  ;;  %v11204_v35 = vrot.slane %v11203_v56, 1  ;;  %v11228_v32 = vsel %vm5086_vm11, %v11156_v36, -inf  ;;  %v11340_v0 = vsel %vm5199_vm13, %v11268_v21, inf  ;;  %19257 = vmatpush3.msra.mxu0 %v10569_v44 }
 0xbc4   :  { %v25085_v51 = vmin.f32 %v11326_v27, %v11327_v4  ;;  %v11316_v52 = vrot.slane %v11315_v6, 1  ;;  %v11230_v26 = vmax.f32 %v11228_v32, %v25047_v30  ;;  %v11342_v48 = vmin.f32 %v11340_v0, %v25058_v28  ;;  %20647 = vmatprep.subr.bf16.mxu0 %v26451_v49  ;;  %19259 = vmatmul.mubr.msk.f32.vlgmr.msra.gmra.mrb[116].mxu0 %vm4394_vm8, %v24842_v14 }
 0xbc5   :  { %v11205_v7 = vmax.f32 %v11203_v56, %v11204_v35  ;;  %vm11083_vm5 = vcmp.gt.f32.partialorder %v25055_v3, 0.5  ;;  %vm11088_vm4 = vcmp.gt.f32.partialorder %v11061_v43, 0.5  ;;  %v11158_v17 = vsel %vm11086_vm9, %v24892_v15, -inf  ;;  %20649 = vmatpush3.bf16.msra.mxu0 %v24894_v59  ;;  %19267 = vmatprep.mubr.msk.f32.mxu0 %vm22122_vm0, %v26527_v2 }
 0xbc6   :  { %v11317_v18 = vmin.f32 %v11315_v6, %v11316_v52  ;;  %v11270_v30 = vsel %vm11086_vm9, %v24892_v15, inf  ;;  %v11155_v61 = vsel %vm11083_vm5, %v24892_v15, -inf  ;;  %v11231_v44 = vsel %vm5086_vm11, %v11158_v17, -inf  ;;  %19265 = vmatprep.subr.mxu0 %v26527_v2 }
 0xbc7   :  { %v11343_v3 = vsel %vm5199_vm13, %v11270_v30, inf  ;;  %v11220_v39 = vsel %vm5086_vm11, %v11155_v61, -inf  ;;  %v11267_v28 = vsel %vm11083_vm5, %v24892_v15, inf  ;;  %v11232_v13 = vmax.f32 %v11230_v26, %v11231_v44 }
 0xbc8   :  { %v11344_v10 = vmin.f32 %v11342_v48, %v11343_v3  ;;  %v11221_v34 = vmax.f32 %v11219_v42, %v11220_v39  ;;  %v11332_v63 = vsel %vm5199_vm13, %v11267_v28, inf  ;;  %v11160_v55 = vsel %vm11088_vm4, %v24878_v29, -inf }
 0xbc9   :  { %v11333_v59 = vmin.f32 %v11331_v58, %v11332_v63  ;;  %v11272_v33 = vsel %vm11088_vm4, %v24878_v29, inf  ;;  %vm11089_vm7 = vcmp.gt.f32.partialorder %v11065_v16, 0.5  ;;  %v11233_v11 = vrot.slane %v11232_v13, 4  ;;  %19266 = vmatpush3.msra.mxu0 %v24912_v40 }
 0xbca   :  { %v11345_v23 = vrot.slane %v11344_v10, 4  ;;  %v11222_v53 = vrot.slane %v11221_v34, 4  ;;  %v11240_v38 = vsel %vm5086_vm11, %v11160_v55, -inf  ;;  %v11352_v24 = vsel %vm5199_vm13, %v11272_v33, inf  ;;  %20650 = vmatprep.subr.bf16.mxu0 %v26451_v49  ;;  %v11410_v33 = vld [vmem:[%s26567_s8] sm:$0xff] }
 0xbcb   :  { %v11334_v60 = vrot.slane %v11333_v59, 4  ;;  %v11241_v42 = vmax.f32 %v25073_v25, %v11240_v38  ;;  %v11161_v58 = vsel %vm11089_vm7, %v24892_v15, -inf  ;;  %v11234_v31 = vmax.f32 %v11232_v13, %v11233_v11  ;;  %v11411_v11 = vld [vmem:[%s26567_s8 + $0x8] sm:$0xff] }
 0xbcc   :  { %v11346_v29 = vmin.f32 %v11344_v10, %v11345_v23  ;;  %v11223_v12 = vmax.f32 %v11221_v34, %v11222_v53  ;;  %v11353_v27 = vmin.f32 %v25076_v9, %v11352_v24  ;;  %v11242_v62 = vsel %vm5086_vm11, %v11161_v58, -inf  ;;  %19268 = vmatmul.mubr.msk.f32.vlgmr.msra.gmra.mrb[116].mxu0 %vm4394_vm8, %v24842_v14  ;;  %v11412_v23 = vld [vmem:[%s26567_s8 + $0x10] sm:$0xff]  ;;  %v11414_v58 = vld [vmem:[%s26567_s8 + $0x20] sm:$0xff] }
 0xbcd   :  { %v11335_v57 = vmin.f32 %v11333_v59, %v11334_v60  ;;  %v11273_v40 = vsel %vm11089_vm7, %v24892_v15, inf  ;;  %v11377_v45 = vsel %vm5304_vm12, %v25011_v19, %v25030_v5  ;;  %v11235_v43 = vrot.slane %v11234_v31, 2  ;;  %19302 = vmatprep.mubr.msk.f32.mxu0 %vm22122_vm0, %v26527_v2 }
 0xbce   :  { %v11347_v22 = vrot.slane %v11346_v29, 2  ;;  %v11224_v56 = vrot.slane %v11223_v12, 2  ;;  %v11243_v25 = vmax.f32 %v11241_v42, %v11242_v62  ;;  %v11354_v4 = vsel %vm5199_vm13, %v11273_v40, inf  ;;  %v11413_v42 = vld [vmem:[%s26567_s8 + $0x18] sm:$0xff] }
 0xbcf   :  { %v11336_v9 = vrot.slane %v11335_v57, 2  ;;  %v11378_v6 = vsel %vm5306_vm14, %v11205_v7, %v11377_v45  ;;  %v11396_v14 = vsel %vm5304_vm12, %v25013_v41, %v25036_v8  ;;  %v11236_v15 = vmax.f32 %v11234_v31, %v11235_v43  ;;  %v11415_v31 = vld [vmem:[%s26567_s8 + $0x28] sm:$0xff] }
 0xbd0   :  { %v11348_v36 = vmin.f32 %v11346_v29, %v11347_v22  ;;  %v11225_v21 = vmax.f32 %v11223_v12, %v11224_v56  ;;  %v11244_v19 = vrot.slane %v11243_v25, 4  ;;  %v11355_v37 = vmin.f32 %v11353_v27, %v11354_v4  ;;  %v11416_v56 = vld [vmem:[%s26567_s8 + $0x30] sm:$0xff] }
 0xbd1   :  { %v11337_v5 = vmin.f32 %v11335_v57, %v11336_v9  ;;  %v11379_v35 = vsel %vm5308_vm3, %v25081_v46, %v11378_v6  ;;  %v11397_v32 = vsel %vm5306_vm14, %v11317_v18, %v11396_v14  ;;  %v11237_v0 = vrot.slane %v11236_v15, 1 }
 0xbd2   :  { %v11349_v52 = vrot.slane %v11348_v36, 1  ;;  %v11226_v26 = vrot.slane %v11225_v21, 1  ;;  %v11245_v48 = vmax.f32 %v11243_v25, %v11244_v19  ;;  %v11356_v17 = vrot.slane %v11355_v37, 4  ;;  %v11417_v25 = vld [vmem:[%s26567_s8 + $0x38] sm:$0xff]  ;;  %v11418_v19 = vld [vmem:[%s26567_s8 + $0x40] sm:$0xff] }
 0xbd3   :  { %v11338_v7 = vrot.slane %v11337_v5, 1  ;;  %v11398_v41 = vsel %vm5308_vm3, %v25085_v51, %v11397_v32  ;;  %v11238_v61 = vmax.f32 %v11236_v15, %v11237_v0  ;;  %v11427_v38 = vand.u32 4294901760, %v11410_v33 }
 0xbd4   :  { %v11227_v8 = vmax.f32 %v11225_v21, %v11226_v26  ;;  %v11246_v30 = vrot.slane %v11245_v48, 2  ;;  %v11350_v16 = vmin.f32 %v11348_v36, %v11349_v52  ;;  %v11357_v46 = vmin.f32 %v11355_v37, %v11356_v17 }
 0xbd5   :  { %v11339_v44 = vmin.f32 %v11337_v5, %v11338_v7  ;;  %v11430_v60 = vand.u32 4294901760, %v11411_v11  ;;  %v11433_v24 = vand.u32 4294901760, %v11412_v23  ;;  %v11436_v29 = vand.u32 4294901760, %v11413_v42  ;;  %v11419_v5 = vld [vmem:[%s26567_s8 + $0x48] sm:$0xff]  ;;  %v11421_v7 = vld [vmem:[%s26567_s8 + $0x58] sm:$0xff] }
 0xbd6   :  { %v11247_v3 = vmax.f32 %v11245_v48, %v11246_v30  ;;  %v11380_v18 = vsel %vm5310_vm10, %v11227_v8, %v11379_v35  ;;  %v11358_v39 = vrot.slane %v11357_v46, 2  ;;  %v11439_v12 = vand.u32 4294901760, %v11414_v58  ;;  %v11420_v48 = vld [vmem:[%s26567_s8 + $0x50] sm:$0xff] }
 0xbd7   :  { %v11381_v28 = vsel %vm5312_vm1, %v11238_v61, %v11380_v18  ;;  %v11399_v13 = vsel %vm5310_vm10, %v11339_v44, %v11398_v41  ;;  %v11442_v27 = vand.u32 4294901760, %v11415_v31  ;;  %v25152_v62 = vsub.f32 %v11410_v33, %v11427_v38  ;;  %v11422_v44 = vld [vmem:[%s26567_s8 + $0x60] sm:$0xff]  ;;  %v11424_v33 = vld [vmem:[%s26567_s8 + $0x70] sm:$0xff] }
 0xbd8   :  { %v11248_v51 = vrot.slane %v11247_v3, 1  ;;  %v11400_v10 = vsel %vm5312_vm1, %v11350_v16, %v11399_v13  ;;  %v11359_v34 = vmin.f32 %v11357_v46, %v11358_v39  ;;  %v25154_v40 = vsub.f32 %v11411_v11, %v11430_v60  ;;  %v11423_v46 = vld [vmem:[%s26567_s8 + $0x68] sm:$0xff]  ;;  %v11425_v11 = vld [vmem:[%s26567_s8 + $0x78] sm:$0xff] }
 0xbd9   :  { %v25156_v45 = vsub.f32 %v11412_v23, %v11433_v24  ;;  %v25158_v43 = vsub.f32 %v11413_v42, %v11436_v29  ;;  %v25160_v22 = vpack.c.bf16 %v11430_v60, %v11427_v38  ;;  %v25168_v4 = vsub.f32 %v11414_v58, %v11439_v12 }
 0xbda   :  { %v11249_v63 = vmax.f32 %v11247_v3, %v11248_v51  ;;  %v11360_v59 = vrot.slane %v11359_v34, 1  ;;  %v20699_v9 = vpack.c.bf16 %v25154_v40, %v25152_v62  ;;  %v25170_v6 = vpack.c.bf16 %v11436_v29, %v11433_v24 }
 0xbdb   :  { %20652 = vmatpush3.bf16.msra.mxu0 %v25160_v22  ;;  %v20702_v14 = vpack.c.bf16 %v25158_v43, %v25156_v45  ;;  %v25174_v15 = vsub.f32 %v11415_v31, %v11442_v27  ;;  %v11445_v36 = vand.u32 4294901760, %v11416_v56  ;;  %v11448_v21 = vand.u32 4294901760, %v11417_v25 }
 0xbdc   :  { %v11382_v55 = vsel %vm5314_vm2, %v11249_v63, %v11381_v28  ;;  %v11361_v53 = vmin.f32 %v11359_v34, %v11360_v59  ;;  %20700 = vmatpush3.bf16.msra.mxu1 %v20699_v9  ;;  %20653 = vmatprep.subr.bf16.mxu0 %v26451_v49  ;;  %v25181_v37 = vpack.c.bf16 %v11442_v27, %v11439_v12  ;;  %v11451_v35 = vand.u32 4294901760, %v11418_v19 }
 0xbdd   :  { %11383 = vrot.lane.b32.xlu1 %v11382_v55, %s22125_s29  ;;  %20701 = vmatprep.subr.bf16.mxu1 %v26451_v49  ;;  %v20705_v32 = vpack.c.bf16 %v25174_v15, %v25168_v4  ;;  %v25185_v0 = vsub.f32 %v11416_v56, %v11445_v36  ;;  %v25187_v52 = vsub.f32 %v11417_v25, %v11448_v21  ;;  %v11454_v26 = vand.u32 4294901760, %v11419_v5 }
 0xbde   :  { %v11401_v57 = vsel %vm5314_vm2, %v11361_v53, %v11400_v10  ;;  %v25194_v17 = vsub.f32 %v11418_v19, %v11451_v35  ;;  %v25196_v41 = vpack.c.bf16 %v11448_v21, %v11445_v36  ;;  %v11457_v61 = vand.u32 4294901760, %v11420_v48  ;;  %v25253_v36 = vld [vmem:[%s26568_s16 + $0x8] sm:$0xff] }
 0xbdf   :  { %20655 = vmatpush3.bf16.msra.mxu0 %v25170_v6  ;;  %v20708_v8 = vpack.c.bf16 %v25187_v52, %v25185_v0  ;;  %v25200_v30 = vsub.f32 %v11419_v5, %v11454_v26  ;;  %v11460_v16 = vand.u32 4294901760, %v11421_v7  ;;  %v25207_v3 = vpack.c.bf16 %v11454_v26, %v11451_v35  ;;  %v25258_v5 = vld [vmem:[%s26568_s16 + $0x10] sm:$0xff]  ;;  %v25261_v35 = vld [vmem:[%s26568_s16 + $0x18] sm:$0xff] }
 0xbe0   :  { %20703 = vmatpush3.bf16.msra.mxu1 %v20702_v14  ;;  %20656 = vmatprep.subr.bf16.mxu0 %v26451_v49  ;;  %v11463_v18 = vand.u32 4294901760, %v11422_v44  ;;  %v25211_v28 = vsub.f32 %v11420_v48, %v11457_v61  ;;  %v11466_v51 = vand.u32 4294901760, %v11423_v46  ;;  %v11469_v53 = vand.u32 4294901760, %v11424_v33  ;;  %v25250_v14 = vld [vmem:[%s26568_s16] sm:$0xff] }
 0xbe1   :  { %11402 = vrot.lane.b32.xlu1 %v11401_v57, %s22126_s1  ;;  %20704 = vmatprep.subr.bf16.mxu1 %v26451_v49  ;;  %v20711_v39 = vpack.c.bf16 %v25200_v30, %v25194_v17  ;;  %v25213_v13 = vsub.f32 %v11421_v7, %v11460_v16  ;;  %v25218_v10 = vpack.c.bf16 %v11460_v16, %v11457_v61  ;;  %v11472_v38 = vand.u32 4294901760, %v11425_v11 }
 0xbe2   :  { %v25222_v63 = vsub.f32 %v11422_v44, %v11463_v18  ;;  %v25224_v59 = vsub.f32 %v11423_v46, %v11466_v51  ;;  %v25236_v23 = vpack.c.bf16 %v11466_v51, %v11463_v18  ;;  %v11617_v60 = vsub.f32 %v11424_v33, %v11469_v53  ;;  %v25289_v46 = vld [vmem:[#allocation24] sm:$0xff]  ;;  %v25291_v18 = vld [vmem:[#allocation24 + $0x8] sm:$0xff] }
 0xbe3   :  { %20658 = vmatpush3.bf16.msra.mxu0 %v25181_v37  ;;  %v20714_v34 = vpack.c.bf16 %v25213_v13, %v25211_v28  ;;  %v11624_v42 = vsub.f32 %v11425_v11, %v11472_v38  ;;  %v25240_v24 = vpack.c.bf16 %v11472_v38, %v11469_v53  ;;  %v26426_v21 = vand.u32 4294901760, %v25250_v14 }
 0xbe4   :  { %20706 = vmatpush3.bf16.msra.mxu1 %v20705_v32  ;;  %20659 = vmatprep.subr.bf16.mxu0 %v26451_v49  ;;  %v20717_v55 = vpack.c.bf16 %v25224_v59, %v25222_v63  ;;  %v11618_v31 = vand.u32 4294901760, %v11617_v60  ;;  %v26425_v19 = vand.u32 4294901760, %v25253_v36  ;;  %v26420_v32 = vand.u32 4294901760, %v25258_v5 }
 0xbe5   :  { %20707 = vmatprep.subr.bf16.mxu1 %v26451_v49  ;;  %v20720_v58 = vpack.c.bf16 %v11624_v42, %v11617_v60  ;;  %v11625_v29 = vand.u32 4294901760, %v11624_v42  ;;  %v26419_v26 = vand.u32 4294901760, %v25261_v35  ;;  %v25268_v48 = vsub.f32 %v25250_v14, %v26426_v21 }
 0xbe6   :  { %v11619_v27 = vsub.f32 %v11617_v60, %v11618_v31  ;;  %v25273_v7 = vsub.f32 %v25253_v36, %v26425_v19  ;;  %v25280_v61 = vsub.f32 %v25258_v5, %v26420_v32  ;;  %v26424_v51 = vand.u32 4294901760, %v25291_v18  ;;  %v25599_v50 = vpop.xlane.xlu0 %11363 }
 0xbe7   :  { %20661 = vmatpush3.bf16.msra.mxu0 %v25196_v41  ;;  %v25245_v12 = vpack.c.bf16 %v11625_v29, %v11618_v31  ;;  %v11626_v57 = vsub.f32 %v11624_v42, %v11625_v29  ;;  %v25285_v16 = vsub.f32 %v25261_v35, %v26419_v26  ;;  %v11520_v33 = vand.u32 4294901760, %v25152_v62 }
 0xbe8   :  { %20709 = vmatpush3.bf16.msra.mxu1 %v20708_v8  ;;  %20662 = vmatprep.subr.bf16.mxu0 %v26451_v49  ;;  %v11620_v56 = vand.u32 4294901760, %v11619_v27  ;;  %v11527_v11 = vand.u32 4294901760, %v25154_v40  ;;  %v11534_v53 = vand.u32 4294901760, %v25156_v45  ;;  %v11569_v21 = vand.u32 4294901760, %v25187_v52 }
 0xbe9   :  { %20710 = vmatprep.subr.bf16.mxu1 %v26451_v49  ;;  %v11627_v25 = vand.u32 4294901760, %v11626_v57  ;;  %v11521_v60 = vsub.f32 %v25152_v62, %v11520_v33  ;;  %v11541_v57 = vand.u32 4294901760, %v25158_v43  ;;  %v25317_v62 = vsub.f32 %v25291_v18, %v26424_v51 }
 0xbea   :  { %v11528_v42 = vsub.f32 %v25154_v40, %v11527_v11  ;;  %v20747_v40 = vpack.c.bf16 %v11527_v11, %v11520_v33  ;;  %v11555_v11 = vand.u32 4294901760, %v25174_v15  ;;  %vm11365_vm8 = vcmp.gt.f32.partialorder %v25599_v50, 0.5 }
 0xbeb   :  { %20664 = vmatpush3.bf16.msra.mxu0 %v25207_v3  ;;  %v25247_v9 = vpack.c.bf16 %v11627_v25, %v11620_v56  ;;  %v11535_v25 = vsub.f32 %v25156_v45, %v11534_v53  ;;  %v11522_v26 = vand.u32 4294901760, %v11521_v60 }
 0xbec   :  { %20712 = vmatpush3.bf16.msra.mxu1 %v20711_v39  ;;  %20665 = vmatprep.subr.bf16.mxu0 %v26451_v49  ;;  %v26421_v39 = vand.u32 4294901760, %v25289_v46  ;;  %v11529_v32 = vand.u32 4294901760, %v11528_v42  ;;  %v11556_v51 = vsub.f32 %v25174_v15, %v11555_v11  ;;  %v11562_v42 = vand.u32 4294901760, %v25185_v0 }
 0xbed   :  { %20713 = vmatprep.subr.bf16.mxu1 %v26451_v49  ;;  %v11536_v60 = vand.u32 4294901760, %v11535_v25  ;;  %v26430_v25 = vand.u32 4294901760, %v25317_v62 }
 0xbee   :  { %v25312_v56 = vsub.f32 %v25289_v46, %v26421_v39 }
 0xbef   :  { %20667 = vmatpush3.bf16.msra.mxu0 %v25218_v10 }
 0xbf0   :  { %20715 = vmatpush3.bf16.msra.mxu1 %v20714_v34  ;;  %20668 = vmatprep.subr.bf16.mxu0 %v26451_v49  ;;  %v25295_v34 = vld [vmem:[#allocation24 + $0x10] sm:$0xff] }
 0xbf1   :  { %20716 = vmatprep.subr.bf16.mxu1 %v26451_v49 }
 0xbf3   :  { %20670 = vmatpush3.bf16.msra.mxu0 %v25236_v23 }
 0xbf4   :  { %20718 = vmatpush3.bf16.msra.mxu1 %v20717_v55  ;;  %20671 = vmatprep.subr.bf16.mxu0 %v26451_v49  ;;  %v25297_v55 = vld [vmem:[#allocation24 + $0x18] sm:$0xff] }
 0xbf5   :  { %20719 = vmatprep.subr.bf16.mxu1 %v26451_v49  ;;  %v26422_v31 = vand.u32 4294901760, %v25297_v55 }
 0xbf7   :  { %20673 = vmatpush3.bf16.msra.mxu0 %v25240_v24  ;;  %v25334_v33 = vsub.f32 %v25297_v55, %v26422_v31 }
 0xbf8   :  { %20721 = vmatpush3.bf16.msra.mxu1 %v20720_v58  ;;  %20674 = vmatprep.subr.bf16.mxu0 %v26451_v49  ;;  %v26423_v58 = vand.u32 4294901760, %v25295_v34 }
 0xbf9   :  { %20746 = vmatprep.subr.bf16.mxu1 %v26451_v49 }
 0xbfa   :  { %v25329_v39 = vsub.f32 %v25295_v34, %v26423_v58 }
 0xc9f   :  { %v10942_v38 = vpop.f32.mrb[116].mxu0 }
 0xca0   :  { %v25306_v29 = vand.u32 4294901760, %v10942_v38  ;;  %v19269_v27 = vpop.f32.mrb[117].mxu0 }
 0xca1   :  { %v11542_v27 = vsub.f32 %v25158_v43, %v11541_v57  ;;  %v11548_v43 = vand.u32 4294901760, %v25168_v4 }
 0xca2   :  { %v25321_v44 = vsub.f32 %v10942_v38, %v25306_v29  ;;  %v20750_v38 = vpack.c.bf16 %v11541_v57, %v11534_v53  ;;  %v12644_v57 = vand.u32 4294901760, %v25312_v56 }
 0xca3   :  { %v11543_v31 = vand.u32 4294901760, %v11542_v27  ;;  %v11549_v58 = vsub.f32 %v25168_v4, %v11548_v43  ;;  %v20753_v19 = vpack.c.bf16 %v11555_v11, %v11548_v43  ;;  %v11557_v4 = vand.u32 4294901760, %v11556_v51 }
 0xca4   :  { %v26427_v45 = vand.u32 4294901760, %v25321_v44  ;;  %19373 = vmatmul.mubr.f32.vlgmr.msra.gmra.mrb[128].mxu1 %v25321_v44  ;;  %v25359_v15 = vpack.c.bf16 %v26430_v25, %v12644_v57  ;;  %v11576_v51 = vand.u32 4294901760, %v25194_v17  ;;  %v20756_v43 = vpack.c.bf16 %v11569_v21, %v11562_v42 }
 0xca5   :  { %20748 = vmatpush3.bf16.msra.mxu1 %v20747_v40  ;;  %19442 = vmatprep.mubr.msk.f32.mxu1 %vm22122_vm0, %v26527_v2  ;;  %v20675_v40 = vpack.c.bf16 %v11529_v32, %v11522_v26  ;;  %v20678_v27 = vpack.c.bf16 %v11543_v31, %v11536_v60  ;;  %v11563_v32 = vsub.f32 %v25185_v0, %v11562_v42  ;;  %v26428_v31 = vand.u32 4294901760, %v25334_v33 }
 0xca6   :  { %v11510_v8 = vsub.f32 %v25321_v44, %v26427_v45  ;;  %20749 = vmatprep.subr.bf16.mxu1 %v26451_v49  ;;  %v11550_v45 = vand.u32 4294901760, %v11549_v58  ;;  %v11570_v26 = vsub.f32 %v25187_v52, %v11569_v21  ;;  %v11583_v58 = vand.u32 4294901760, %v25200_v30 }
 0xca7   :  { %v11577_v52 = vsub.f32 %v25194_v17, %v11576_v51  ;;  %v11564_v60 = vand.u32 4294901760, %v11563_v32  ;;  %v11590_v21 = vand.u32 4294901760, %v25211_v28 }
 0xca8   :  { %v11511_v53 = vand.u32 4294901760, %v11510_v8  ;;  %v26429_v8 = vand.u32 4294901760, %v25329_v39  ;;  %v11584_v11 = vsub.f32 %v25200_v30, %v11583_v58  ;;  %v20759_v42 = vpack.c.bf16 %v11583_v58, %v11576_v51  ;;  %v25395_v51 = vld [vmem:[%s26569_s11 + $0x10] sm:$0xff]  ;;  %v25398_v58 = vld [vmem:[%s26569_s11 + $0x18] sm:$0xff] }
 0xca9   :  { %20751 = vmatpush3.bf16.msra.mxu1 %v20750_v38  ;;  %v20681_v38 = vpack.c.bf16 %v11557_v4, %v11550_v45  ;;  %v11578_v17 = vand.u32 4294901760, %v11577_v52  ;;  %v11591_v45 = vsub.f32 %v25211_v28, %v11590_v21  ;;  %v11604_v52 = vand.u32 4294901760, %v25222_v63 }
 0xcaa   :  { %19303 = vmatmul.mubr.f32.vlgmr.msra.gmra.mrb[118].mxu0 %v11511_v53  ;;  %20752 = vmatprep.subr.bf16.mxu1 %v26451_v49  ;;  %v25374_v0 = vpack.c.bf16 %v26428_v31, %v26429_v8  ;;  %v25383_v53 = vld [vmem:[%s26569_s11] sm:$0xff]  ;;  %v25386_v31 = vld [vmem:[%s26569_s11 + $0x8] sm:$0xff]  ;;  %v11585_v30 = vand.u32 4294901760, %v11584_v11  ;;  %v11611_v28 = vand.u32 4294901760, %v25224_v59 }
 0xcab   :  { %20676 = vmatpush3.bf16.msra.mxu0 %v20675_v40  ;;  %19337 = vmatprep.mubr.msk.f32.mxu0 %vm22122_vm0, %v26527_v2  ;;  %v11571_v40 = vand.u32 4294901760, %v11570_v26  ;;  %v26438_v32 = vand.u32 4294901760, %v25383_v53  ;;  %v26435_v26 = vand.u32 4294901760, %v25386_v31  ;;  %v26570_v11 = vld [vmem:[#allocation86_spill] sm:$0xff]  ;;  %v11605_v8 = vsub.f32 %v25222_v63, %v11604_v52 }
 0xcac   :  { %20677 = vmatprep.subr.bf16.mxu0 %v26451_v49  ;;  %v11612_v25 = vsub.f32 %v25224_v59, %v11611_v28  ;;  %v20765_v63 = vpack.c.bf16 %v11611_v28, %v11604_v52  ;;  %v26433_v52 = vand.u32 4294901760, %v25268_v48  ;;  %v26432_v28 = vand.u32 4294901760, %v25273_v7 }
 0xcad   :  { %20754 = vmatpush3.bf16.msra.mxu1 %v20753_v19  ;;  %v11597_v19 = vand.u32 4294901760, %v25213_v13  ;;  %v20684_v4 = vpack.c.bf16 %v11571_v40, %v11564_v60  ;;  %v11592_v60 = vand.u32 4294901760, %v11591_v45  ;;  %v26596_v50 = vand.u32 4294901760, %v25383_v53 }
 0xcae   :  { %20755 = vmatprep.subr.bf16.mxu1 %v26451_v49 }
 0xcaf   :  { %20679 = vmatpush3.bf16.msra.mxu0 %v20678_v27  ;;  %v11598_v27 = vsub.f32 %v25213_v13, %v11597_v19  ;;  %v12068_v13 = vsel %vm2505_vm6, %v26570_v11, 0 }
 0xcb0   :  { %20680 = vmatprep.subr.bf16.mxu0 %v26451_v49 }
 0xcb1   :  { %20757 = vmatpush3.bf16.msra.mxu1 %v20756_v43  ;;  %v20762_v43 = vpack.c.bf16 %v11597_v19, %v11590_v21  ;;  %v11599_v40 = vand.u32 4294901760, %v11598_v27  ;;  %v26431_v21 = vand.u32 4294901760, %v25398_v58  ;;  %v25413_v19 = vsub.f32 %v25383_v53, %v26438_v32 }
 0xcb2   :  { %20758 = vmatprep.subr.bf16.mxu1 %v26451_v49  ;;  %v11606_v27 = vand.u32 4294901760, %v11605_v8  ;;  %v26599_v53 = vand.u32 4294901760, %v25398_v58 }
 0xcb3   :  { %20682 = vmatpush3.bf16.msra.mxu0 %v20681_v38  ;;  %v20687_v38 = vpack.c.bf16 %v11585_v30, %v11578_v17  ;;  %v25418_v17 = vsub.f32 %v25386_v31, %v26435_v26  ;;  %v25420_v30 = vand.u32 4294901760, %v12068_v13  ;;  %v20690_v59 = vpack.c.bf16 %v11599_v40, %v11592_v60  ;;  %v25503_v26 = vld [vmem:[#allocation28] sm:$0xff] }
 0xcb4   :  { %20683 = vmatprep.subr.bf16.mxu0 %v26451_v49  ;;  %v26571_v60 = vand.u32 4294901760, %v25250_v14  ;;  %v26572_v40 = vand.u32 4294901760, %v25253_v36  ;;  %v26446_v45 = vand.u32 4294901760, %v25413_v19  ;;  %v26436_v14 = vand.u32 4294901760, %v25280_v61 }
 0xcb5   :  { %20760 = vmatpush3.bf16.msra.mxu1 %v20759_v42  ;;  %v26434_v42 = vand.u32 4294901760, %v25395_v51  ;;  %v25441_v8 = vsub.f32 %v12068_v13, %v25420_v30  ;;  %v12153_v13 = vsub.f32 %v25268_v48, %v26433_v52  ;;  %v26437_v36 = vand.u32 4294901760, %v25285_v16 }
 0xcb6   :  { %20761 = vmatprep.subr.bf16.mxu1 %v26451_v49 }
 0xcb7   :  { %20685 = vmatpush3.bf16.msra.mxu0 %v20684_v4  ;;  %v11613_v4 = vand.u32 4294901760, %v11612_v25  ;;  %v25428_v11 = vsub.f32 %v25395_v51, %v26434_v42  ;;  %v26576_v25 = vand.u32 4294901760, %v25261_v35  ;;  %v12174_v35 = vsub.f32 %v25285_v16, %v26437_v36 }
 0xcb8   :  { %20686 = vmatprep.subr.bf16.mxu0 %v26451_v49 }
 0xcb9   :  { %20763 = vmatpush3.bf16.msra.mxu1 %v20762_v43  ;;  %v25433_v43 = vsub.f32 %v25398_v58, %v26431_v21  ;;  %v26445_v21 = vand.u32 4294901760, %v25418_v17 }
 0xcba   :  { %20764 = vmatprep.subr.bf16.mxu1 %v26451_v49 }
 0xcbb   :  { %20688 = vmatpush3.bf16.msra.mxu0 %v20687_v38  ;;  %v20693_v38 = vpack.c.bf16 %v11613_v4, %v11606_v27  ;;  %v25464_v27 = vand.u32 4294901760, %v25441_v8  ;;  %v26444_v4 = vand.u32 4294901760, %v25428_v11 }
 0xcbc   :  { %20689 = vmatprep.subr.bf16.mxu0 %v26451_v49 }
 0xcbd   :  { %20766 = vmatpush3.bf16.msra.mxu1 %v20765_v63  ;;  %v25449_v63 = vpack.c.bf16 %v26572_v40, %v26571_v60  ;;  %26573 = vst [vmem:[#allocation86_spill] sm:$0xff] %v25464_v27  ;;  %v25472_v60 = vpack.c.bf16 %v26445_v21, %v26446_v45  ;;  %v26575_v40 = vand.u32 4294901760, %v25258_v5  ;;  %v12167_v5 = vsub.f32 %v25280_v61, %v26436_v14  ;;  %v25505_v14 = vld [vmem:[#allocation28 + $0x8] sm:$0xff] }
 0xcbe   :  { %20767 = vmatprep.subr.bf16.mxu1 %v26451_v49 }
 0xcbf   :  { %20691 = vmatpush3.bf16.msra.mxu0 %v20690_v59  ;;  %v12160_v59 = vsub.f32 %v25273_v7, %v26432_v28  ;;  %26574 = vst [vmem:[#allocation89_spill] sm:$0xff] %v25472_v60  ;;  %v25480_v28 = vpack.c.bf16 %v26576_v25, %v26575_v40  ;;  %v12142_v25 = vsub.f32 %v25441_v8, %v25464_v27  ;;  %v12175_v40 = vand.u32 4294901760, %v12174_v35 }
 0xcc0   :  { %20692 = vmatprep.subr.bf16.mxu0 %v26451_v49 }
 0xcc1   :  { %20769 = vmatpush3.bf16.msra.mxu1 %v25245_v12  ;;  %v26439_v12 = vand.u32 4294901760, %v25433_v43  ;;  %v12161_v42 = vand.u32 4294901760, %v12160_v59  ;;  %v12168_v59 = vand.u32 4294901760, %v12167_v5  ;;  %v25508_v36 = vand.u32 4294901760, %v12142_v25 }
 0xcc2   :  { %20794 = vmatprep.subr.bf16.mxu1 %v26451_v49  ;;  %v26443_v5 = vand.u32 4294901760, %v25505_v14 }
 0xcc3   :  { %20694 = vmatpush3.bf16.msra.mxu0 %v20693_v38  ;;  %v25486_v52 = vpack.c.bf16 %v26439_v12, %v26444_v4  ;;  %v12154_v38 = vand.u32 4294901760, %v12153_v13  ;;  %26578 = vst [vmem:[#allocation91_spill] sm:$0xff] %v25508_v36  ;;  %v20804_v35 = vpack.c.bf16 %v12175_v40, %v12168_v59 }
 0xcc4   :  { %19443 = vmatmul.mubr.f32.vlgmr.msra.gmra.mrb[130].mxu1 %v25306_v29  ;;  %20695 = vmatprep.subr.bf16.mxu0 %v26451_v49 }
 0xcc5   :  { %26577 = vst [vmem:[#allocation90_spill] sm:$0xff] %v25486_v52  ;;  %20796 = vmatpush3.bf16.msra.mxu1 %v25449_v63  ;;  %19488 = vmatprep.mubr.msk.f32.mxu1 %vm22122_vm0, %v26527_v2  ;;  %v20801_v13 = vpack.c.bf16 %v12161_v42, %v12154_v38  ;;  %v25516_v42 = vld [vmem:[#allocation28 + $0x18] sm:$0xff]  ;;  %v26440_v38 = vand.u32 4294901760, %v25503_v26  ;;  %v26587_v52 = vand.u32 4294901760, %v25321_v44 }
 0xcc6   :  { %20797 = vmatprep.subr.bf16.mxu1 %v26451_v49  ;;  %v26441_v32 = vand.u32 4294901760, %v25516_v42 }
 0xcc7   :  { %20697 = vmatpush3.bf16.msra.mxu0 %v25247_v9  ;;  %v25514_v9 = vld [vmem:[#allocation28 + $0x10] sm:$0xff]  ;;  %v25532_v12 = vsub.f32 %v25503_v26, %v26440_v38 }
 0xcc8   :  { %20722 = vmatprep.subr.bf16.mxu0 %v26451_v49  ;;  %v26442_v25 = vand.u32 4294901760, %v25514_v9  ;;  %v25548_v40 = vsub.f32 %v25516_v42, %v26441_v32 }
 0xcc9   :  { %20799 = vmatpush3.bf16.msra.mxu1 %v25480_v28  ;;  %v26448_v38 = vand.u32 4294901760, %v25532_v12 }
 0xcca   :  { %19338 = vmatmul.mubr.f32.vlgmr.msra.gmra.mrb[120].mxu0 %v25306_v29  ;;  %20800 = vmatprep.subr.bf16.mxu1 %v26451_v49  ;;  %v25543_v59 = vsub.f32 %v25514_v9, %v26442_v25  ;;  %v26579_v25 = vand.u32 4294901760, %v25317_v62  ;;  %v26455_v21 = vand.u32 4294901760, %v25548_v40 }
 0xccb   :  { %20724 = vmatpush3.bf16.msra.mxu0 %v25160_v22  ;;  %19407 = vmatprep.mubr.msk.f32.mxu0 %vm22122_vm0, %v26527_v2 }
 0xccc   :  { %19489 = vmatmul.mubr.f32.vlgmr.msra.gmra.mrb[132].mxu1 %v25508_v36  ;;  %20725 = vmatprep.subr.bf16.mxu0 %v26451_v49  ;;  %v26456_v4 = vand.u32 4294901760, %v25543_v59 }
 0xccd   :  { %20802 = vmatpush3.bf16.msra.mxu1 %v20801_v13  ;;  %19499 = vmatprep.mubr.msk.f32.mxu1 %vm22122_vm0, %v26527_v2  ;;  %v25537_v13 = vsub.f32 %v25505_v14, %v26443_v5  ;;  %v12652_v5 = vsub.f32 %v25317_v62, %v26579_v25 }
 0xcce   :  { %20803 = vmatprep.subr.bf16.mxu1 %v26451_v49 }
 0xccf   :  { %20727 = vmatpush3.bf16.msra.mxu0 %v25170_v6  ;;  %v26447_v32 = vand.u32 4294901760, %v25537_v13  ;;  %v26601_v58 = vand.u32 4294901760, %v25537_v13 }
 0xcd0   :  { %20728 = vmatprep.subr.bf16.mxu0 %v26451_v49 }
 0xcd1   :  { %20805 = vmatpush3.bf16.msra.mxu1 %v20804_v35  ;;  %v12645_v35 = vsub.f32 %v25312_v56, %v12644_v57  ;;  %v25579_v45 = vpack.c.bf16 %v26447_v32, %v26448_v38  ;;  %v25588_v57 = vpack.c.bf16 %v26455_v21, %v26456_v4  ;;  %v12653_v32 = vand.u32 4294901760, %v12652_v5  ;;  %v25606_v21 = vld [vmem:[#allocation27] sm:$0xff]  ;;  %v25608_v4 = vld [vmem:[#allocation27 + $0x8] sm:$0xff] }
 0xcd2   :  { %20812 = vmatprep.subr.bf16.mxu1 %v26451_v49  ;;  %v26582_v38 = vand.u32 4294901760, %v25329_v39 }
 0xcd3   :  { %20730 = vmatpush3.bf16.msra.mxu0 %v25181_v37  ;;  %26580 = vst [vmem:[#allocation92_spill] sm:$0xff] %v25579_v45  ;;  %26581 = vst [vmem:[#allocation93_spill] sm:$0xff] %v25588_v57  ;;  %v12646_v25 = vand.u32 4294901760, %v12645_v35  ;;  %v25614_v57 = vld [vmem:[#allocation27 + $0x18] sm:$0xff] }
 0xcd4   :  { %19500 = vmatmul.mubr.f32.vlgmr.msra.gmra.mrb[134].mxu1 %v25420_v30  ;;  %20731 = vmatprep.subr.bf16.mxu0 %v26451_v49  ;;  %v12659_v36 = vsub.f32 %v25329_v39, %v26582_v38 }
 0xcd5   :  { %20814 = vmatpush3.bf16.msra.mxu1 %v25449_v63  ;;  %19521 = vmatprep.mubr.msk.f32.mxu1 %vm22122_vm0, %v26527_v2  ;;  %v20837_v5 = vpack.c.bf16 %v12653_v32, %v12646_v25  ;;  %v26458_v32 = vand.u32 4294901760, %v25608_v4  ;;  %v26586_v25 = vand.u32 4294901760, %v25291_v18 }
 0xcd6   :  { %20815 = vmatprep.subr.bf16.mxu1 %v26451_v49  ;;  %v12660_v35 = vand.u32 4294901760, %v12659_v36 }
 0xcd7   :  { %20733 = vmatpush3.bf16.msra.mxu0 %v25196_v41 }
 0xcd8   :  { %20734 = vmatprep.subr.bf16.mxu0 %v26451_v49 }
 0xcd9   :  { %20817 = vmatpush3.bf16.msra.mxu1 %v25480_v28 }
 0xcda   :  { %20824 = vmatprep.subr.bf16.mxu1 %v26451_v49 }
 0xcdb   :  { %20736 = vmatpush3.bf16.msra.mxu0 %v25207_v3 }
 0xcdc   :  { %19522 = vmatmul.mubr.f32.vlgmr.msra.gmra.mrb[136].mxu1 %v25464_v27  ;;  %20737 = vmatprep.subr.bf16.mxu0 %v26451_v49  ;;  %v26583_v27 = vand.u32 4294901760, %v25334_v33 }
 0xcdd   :  { %20826 = vmatpush3.bf16.msra.mxu1 %v25449_v63  ;;  %19543 = vmatprep.mubr.msk.f32.mxu1 %vm22122_vm0, %v26527_v2  ;;  %v11384_v63 = vpop.permute.xlu1 %11383 }
 0xcde   :  { %v12666_v49 = vsub.f32 %v25334_v33, %v26583_v27  ;;  %20827 = vmatprep.subr.bf16.mxu1 %v26584_v47  ;;  %v25612_v27 = vld [vmem:[#allocation27 + $0x10] sm:$0xff]  ;;  %v11386_v45 = vsel %vm11365_vm8, %v11384_v63, 0.0 }
 0xcdf   :  { %20739 = vmatpush3.bf16.msra.mxu0 %v25218_v10  ;;  %v12560_v63 = vsel %vm2505_vm6, %v11386_v45, 0 }
 0xce0   :  { %20740 = vmatprep.subr.bf16.mxu0 %v26584_v47  ;;  %v12667_v38 = vand.u32 4294901760, %v12666_v49  ;;  %v26457_v49 = vand.u32 4294901760, %v25606_v21  ;;  %v25646_v36 = vand.u32 4294901760, %v12560_v63 }
 0xce1   :  { %20829 = vmatpush3.bf16.msra.mxu1 %v25480_v28 }
 0xce2   :  { %20836 = vmatprep.subr.bf16.mxu1 %v26584_v47  ;;  %v20840_v28 = vpack.c.bf16 %v12667_v38, %v12660_v35  ;;  %v25638_v35 = vsub.f32 %v25608_v4, %v26458_v32  ;;  %v26585_v38 = vand.u32 4294901760, %v25289_v46 }
 0xce3   :  { %20742 = vmatpush3.bf16.msra.mxu0 %v25236_v23 }
 0xce4   :  { %19544 = vmatmul.mubr.f32.vlgmr.msra.gmra.mrb[138].mxu1 %v25420_v30  ;;  %20743 = vmatprep.subr.bf16.mxu0 %v26584_v47  ;;  %v25644_v45 = vpack.c.bf16 %v26586_v25, %v26585_v38 }
 0xce5   :  { %20838 = vmatpush3.bf16.msra.mxu1 %v20837_v5  ;;  %19565 = vmatprep.mubr.msk.f32.mxu1 %vm22122_vm0, %v26527_v2  ;;  %v25633_v5 = vsub.f32 %v25606_v21, %v26457_v49  ;;  %v26588_v49 = vand.u32 4294901760, %v25612_v27 }
 0xce6   :  { %20839 = vmatprep.subr.bf16.mxu1 %v26584_v47 }
 0xce7   :  { %20745 = vmatpush3.bf16.msra.mxu0 %v25240_v24  ;;  %v25654_v60 = vsub.f32 %v25612_v27, %v26588_v49  ;;  %v26591_v49 = vand.u32 4294901760, %v25297_v55  ;;  %v26460_v38 = vand.u32 4294901760, %v25633_v5  ;;  %v26592_v55 = vand.u32 4294901760, %v25413_v19 }
 0xce8   :  { %20770 = vmatprep.subr.bf16.mxu0 %v26584_v47 }
 0xce9   :  { %20841 = vmatpush3.bf16.msra.mxu1 %v20840_v28  ;;  %v26589_v28 = vand.u32 4294901760, %v25614_v57 }
 0xcea   :  { %19408 = vmatmul.mubr.f32.vlgmr.msra.gmra.mrb[122].mxu0 %v26587_v52  ;;  %20848 = vmatprep.subr.bf16.mxu1 %v26584_v47  ;;  %v26590_v52 = vand.u32 4294901760, %v25295_v34  ;;  %v26459_v34 = vand.u32 4294901760, %v25638_v35 }
 0xceb   :  { %v25659_v46 = vsub.f32 %v25614_v57, %v26589_v28  ;;  %20772 = vmatpush3.bf16.msra.mxu0 %v25160_v22  ;;  %19477 = vmatprep.mubr.msk.f32.mxu0 %vm22122_vm0, %v26527_v2  ;;  %v25680_v22 = vsub.f32 %v12560_v63, %v25646_v36  ;;  %v13138_v28 = vsub.f32 %v25413_v19, %v26592_v55 }
 0xcec   :  { %19566 = vmatmul.mubr.f32.vlgmr.msra.gmra.mrb[140].mxu1 %v25646_v36  ;;  %20773 = vmatprep.subr.bf16.mxu0 %v26584_v47  ;;  %v25675_v25 = vpack.c.bf16 %v26591_v49, %v26590_v52  ;;  %v26593_v52 = vand.u32 4294901760, %v25418_v17  ;;  %v25702_v18 = vpack.c.bf16 %v26459_v34, %v26460_v38  ;;  %v26595_v38 = vand.u32 4294901760, %v25433_v43 }
 0xced   :  { %20850 = vmatpush3.bf16.msra.mxu1 %v25644_v45  ;;  %19587 = vmatprep.mubr.msk.f32.mxu1 %vm22122_vm0, %v26527_v2  ;;  %v26461_v49 = vand.u32 4294901760, %v25680_v22  ;;  %v26462_v44 = vand.u32 4294901760, %v25659_v46 }
 0xcee   :  { %20851 = vmatprep.subr.bf16.mxu1 %v26584_v47  ;;  %v13145_v63 = vsub.f32 %v25418_v17, %v26593_v52  ;;  %v13139_v52 = vand.u32 4294901760, %v13138_v28 }
 0xcef   :  { %20775 = vmatpush3.bf16.msra.mxu0 %v25170_v6  ;;  %v26463_v6 = vand.u32 4294901760, %v25654_v60 }
 0xcf0   :  { %20776 = vmatprep.subr.bf16.mxu0 %v26584_v47  ;;  %v13146_v32 = vand.u32 4294901760, %v13145_v63 }
 0xcf1   :  { %20853 = vmatpush3.bf16.msra.mxu1 %v25675_v25  ;;  %v25712_v55 = vpack.c.bf16 %v26462_v44, %v26463_v6  ;;  %v11403_v44 = vpop.permute.xlu1 %11402 }
 0xcf2   :  { %20860 = vmatprep.subr.bf16.mxu1 %v26584_v47  ;;  %v20873_v6 = vpack.c.bf16 %v13146_v32, %v13139_v52 }
 0xcf3   :  { %20778 = vmatpush3.bf16.msra.mxu0 %v25181_v37  ;;  %v26594_v37 = vand.u32 4294901760, %v25428_v11 }
 0xcf4   :  { %19588 = vmatmul.mubr.f32.vlgmr.msra.gmra.mrb[142].mxu1 %v26461_v49  ;;  %20779 = vmatprep.subr.bf16.mxu0 %v26584_v47  ;;  %v13159_v49 = vsub.f32 %v25433_v43, %v26595_v38 }
 0xcf5   :  { %20862 = vmatpush3.bf16.msra.mxu1 %v25644_v45  ;;  %19609 = vmatprep.mubr.msk.f32.mxu1 %vm22122_vm0, %v26527_v2  ;;  %v13152_v34 = vsub.f32 %v25428_v11, %v26594_v37  ;;  %v11405_v37 = vsel %vm11365_vm8, %v11403_v44, 0.0 }
 0xcf6   :  { %20863 = vmatprep.subr.bf16.mxu1 %v26584_v47  ;;  %v13160_v63 = vand.u32 4294901760, %v13159_v49  ;;  %v13053_v32 = vsel %vm2505_vm6, %v11405_v37, 0  ;;  %v13650_v49 = vsub.f32 %v25537_v13, %v26601_v58  ;;  %v26604_v37 = vand.u32 4294901760, %v25548_v40 }
 0xcf7   :  { %20781 = vmatpush3.bf16.msra.mxu0 %v25196_v41  ;;  %v13153_v28 = vand.u32 4294901760, %v13152_v34  ;;  %v25745_v38 = vand.u32 4294901760, %v13053_v32 }
 0xcf8   :  { %20782 = vmatprep.subr.bf16.mxu0 %v26584_v47  ;;  %v13651_v52 = vand.u32 4294901760, %v13650_v49 }
 0xcf9   :  { %20865 = vmatpush3.bf16.msra.mxu1 %v25675_v25  ;;  %v20876_v41 = vpack.c.bf16 %v13160_v63, %v13153_v28  ;;  %v26603_v28 = vand.u32 4294901760, %v25543_v59 }
 0xcfa   :  { %20872 = vmatprep.subr.bf16.mxu1 %v26584_v47 }
 0xcfb   :  { %20784 = vmatpush3.bf16.msra.mxu0 %v25207_v3  ;;  %v26597_v3 = vand.u32 4294901760, %v25386_v31  ;;  %v25761_v31 = vsub.f32 %v13053_v32, %v25745_v38  ;;  %v13657_v63 = vsub.f32 %v25543_v59, %v26603_v28  ;;  %v26605_v32 = vpack.c.bf16 %v25285_v16, %v25280_v61 }
 0xcfc   :  { %19610 = vmatmul.mubr.f32.vlgmr.msra.gmra.mrb[144].mxu1 %v25646_v36  ;;  %20785 = vmatprep.subr.bf16.mxu0 %v26584_v47 }
 0xcfd   :  { %20874 = vmatpush3.bf16.msra.mxu1 %v20873_v6  ;;  %19631 = vmatprep.mubr.msk.f32.mxu1 %vm22122_vm0, %v26527_v2  ;;  %v25743_v44 = vpack.c.bf16 %v26597_v3, %v26596_v50  ;;  %v13126_v6 = vand.u32 4294901760, %v25761_v31  ;;  %v26606_v50 = vand.u32 4294901760, %v25268_v48  ;;  %v26607_v3 = vand.u32 4294901760, %v25273_v7 }
 0xcfe   :  { %20875 = vmatprep.subr.bf16.mxu1 %v26584_v47 }
 0xcff   :  { %20787 = vmatpush3.bf16.msra.mxu0 %v25218_v10  ;;  %v26598_v10 = vand.u32 4294901760, %v25395_v51 }
 0xd00   :  { %20788 = vmatprep.subr.bf16.mxu0 %v26584_v47 }
 0xd01   :  { %20877 = vmatpush3.bf16.msra.mxu1 %v20876_v41  ;;  %v25756_v34 = vpack.c.bf16 %v26599_v53, %v26598_v10  ;;  %v13664_v41 = vsub.f32 %v25548_v40, %v26604_v37  ;;  %v20819_v10 = vpack.c.bf16 %v26607_v3, %v26606_v50  ;;  %v16643_v53 = vld [vmem:[#allocation18] ss:$0 sm:$0xff]  ;;  %v26616_v50 = vand.u32 4294901760, %v25638_v35 }
 0xd02   :  { %20884 = vmatprep.subr.bf16.mxu1 %v26584_v47  ;;  %v7481_v49 = vadd.f32 %v16643_v53, %v24409_v1 }
 0xd03   :  { %20790 = vmatpush3.bf16.msra.mxu0 %v25236_v23  ;;  %v26600_v23 = vand.u32 4294901760, %v25532_v12  ;;  %v13665_v58 = vand.u32 4294901760, %v13664_v41  ;;  %v14135_v3 = vsub.f32 %v25638_v35, %v26616_v50 }
 0xd04   :  { %19632 = vmatmul.mubr.f32.vlgmr.msra.gmra.mrb[146].mxu1 %v25745_v38  ;;  %20791 = vmatprep.subr.bf16.mxu0 %v26584_v47  ;;  %v13558_v1 = vsel %vm2505_vm6, %v7481_v49, 0  ;;  %v26620_v49 = vpack.c.bf16 %v25334_v33, %v25329_v39  ;;  %v26621_v33 = vand.u32 4294901760, %v25606_v21  ;;  %v26623_v21 = vand.u32 4294901760, %v25612_v27 }
 0xd05   :  { %20886 = vmatpush3.bf16.msra.mxu1 %v25743_v44  ;;  %19653 = vmatprep.mubr.msk.f32.mxu1 %vm22122_vm0, %v26527_v2  ;;  %v13643_v51 = vsub.f32 %v25532_v12, %v26600_v23  ;;  %v25826_v28 = vand.u32 4294901760, %v13558_v1  ;;  %v26625_v27 = vpack.c.bf16 %v25418_v17, %v25413_v19  ;;  %v26628_v19 = vld [vmem:[#allocation90_spill] sm:$0xff] }
 0xd06   :  { %20887 = vmatprep.subr.bf16.mxu1 %v26584_v47 }
 0xd07   :  { %20793 = vmatpush3.bf16.msra.mxu0 %v25240_v24  ;;  %v26602_v24 = vpack.c.bf16 %v25273_v7, %v25268_v48  ;;  %v26608_v48 = vand.u32 4294901760, %v25280_v61  ;;  %v26609_v7 = vand.u32 4294901760, %v25285_v16  ;;  %v26610_v61 = vand.u32 4294901760, %v25503_v26 }
 0xd08   :  { %20806 = vmatprep.subr.bf16.mxu0 %v26584_v47  ;;  %v26611_v16 = vand.u32 4294901760, %v25505_v14  ;;  %v26613_v26 = vand.u32 4294901760, %v25514_v9  ;;  %v26614_v14 = vand.u32 4294901760, %v25516_v42  ;;  %v26615_v9 = vand.u32 4294901760, %v25633_v5 }
 0xd09   :  { %20889 = vmatpush3.bf16.msra.mxu1 %v25756_v34 }
 0xd0a   :  { %19478 = vmatmul.mubr.f32.vlgmr.msra.gmra.mrb[124].mxu0 %v25306_v29  ;;  %20896 = vmatprep.subr.bf16.mxu1 %v26584_v47  ;;  %v13644_v29 = vand.u32 4294901760, %v13643_v51  ;;  %v13658_v51 = vand.u32 4294901760, %v13657_v63  ;;  %v26612_v63 = vand.u32 4294901760, %v25680_v22  ;;  %v25842_v41 = vpack.c.bf16 %v26614_v14, %v26613_v26 }
 0xd0b   :  { %20808 = vmatpush3.bf16.msra.mxu0 %v26602_v24  ;;  %19510 = vmatprep.mubr.msk.f32.mxu0 %vm22122_vm0, %v26527_v2  ;;  %v20822_v24 = vpack.c.bf16 %v26609_v7, %v26608_v48  ;;  %v14128_v42 = vsub.f32 %v25633_v5, %v26615_v9  ;;  %v15045_v9 = vld [vmem:[%s26637_s21 + $0x10] sm:$0xff] }
 0xd0c   :  { %19654 = vmatmul.mubr.f32.vlgmr.msra.gmra.mrb[148].mxu1 %v13126_v6  ;;  %20809 = vmatprep.subr.bf16.mxu0 %v26584_v47  ;;  %v20909_v23 = vpack.c.bf16 %v13651_v52, %v13644_v29  ;;  %v20912_v29 = vpack.c.bf16 %v13665_v58, %v13658_v51  ;;  %v25823_v52 = vpack.c.bf16 %v26611_v16, %v26610_v61  ;;  %v26618_v51 = vand.u32 4294901760, %v25654_v60 }
 0xd0d   :  { %20898 = vmatpush3.bf16.msra.mxu1 %v25743_v44  ;;  %19675 = vmatprep.mubr.msk.f32.mxu1 %vm22122_vm0, %v26527_v2  ;;  %v12634_v37 = vsub.f32 %v25680_v22, %v26612_v63  ;;  %v14129_v53 = vand.u32 4294901760, %v14128_v42  ;;  %v15046_v42 = vld [vmem:[%s26637_s21 + $0x18] sm:$0xff] }
 0xd0e   :  { %20899 = vmatprep.subr.bf16.mxu1 %v26584_v47 }
 0xd0f   :  { %20811 = vmatpush3.bf16.msra.mxu0 %v26605_v32  ;;  %v12635_v32 = vand.u32 4294901760, %v12634_v37  ;;  %v15044_v37 = vld [vmem:[%s26637_s21 + $0x8] sm:$0xff] }
 0xd10   :  { %20818 = vmatprep.subr.bf16.mxu0 %v26584_v47  ;;  %v15054_v14 = vand.u32 4294901760, %v15044_v37 }
 0xd11   :  { %20901 = vmatpush3.bf16.msra.mxu1 %v25756_v34 }
 0xd12   :  { %19511 = vmatmul.mubr.f32.vlgmr.msra.gmra.mrb[126].mxu0 %v25441_v8  ;;  %20908 = vmatprep.subr.bf16.mxu1 %v26584_v47 }
 0xd13   :  { %20820 = vmatpush3.bf16.msra.mxu0 %v20819_v10  ;;  %19532 = vmatprep.mubr.msk.f32.mxu0 %vm22122_vm0, %v26527_v2 }
 0xd14   :  { %19676 = vmatmul.mubr.f32.vlgmr.msra.gmra.mrb[150].mxu1 %v25745_v38  ;;  %20821 = vmatprep.subr.bf16.mxu0 %v26584_v47 }
 0xd15   :  { %20910 = vmatpush3.bf16.msra.mxu1 %v20909_v23  ;;  %19697 = vmatprep.mubr.msk.f32.mxu1 %vm22122_vm0, %v26527_v2  ;;  %v14136_v23 = vand.u32 4294901760, %v14135_v3  ;;  %v15057_v3 = vand.u32 4294901760, %v15045_v9 }
 0xd16   :  { %20911 = vmatprep.subr.bf16.mxu1 %v26584_v47 }
 0xd17   :  { %20823 = vmatpush3.bf16.msra.mxu0 %v20822_v24  ;;  %v20945_v48 = vpack.c.bf16 %v14136_v23, %v14129_v53  ;;  %v26018_v23 = vsub.f32 %v15045_v9, %v15057_v3 }
 0xd18   :  { %20830 = vmatprep.subr.bf16.mxu0 %v26584_v47 }
 0xd19   :  { %20913 = vmatpush3.bf16.msra.mxu1 %v20912_v29 }
 0xd1a   :  { %19533 = vmatmul.mubr.f32.vlgmr.msra.gmra.mrb[128].mxu0 %v25420_v30  ;;  %20920 = vmatprep.subr.bf16.mxu1 %v26584_v47 }
 0xd1b   :  { %20832 = vmatpush3.bf16.msra.mxu0 %v25644_v45  ;;  %19554 = vmatprep.mubr.msk.f32.mxu0 %vm22122_vm0, %v26527_v2  ;;  %v25847_v45 = vsub.f32 %v13558_v1, %v25826_v28 }
 0xd1c   :  { %19698 = vmatmul.mubr.f32.vlgmr.msra.gmra.mrb[152].mxu1 %v25826_v28  ;;  %20833 = vmatprep.subr.bf16.mxu0 %v26584_v47 }
 0xd1d   :  { %20922 = vmatpush3.bf16.msra.mxu1 %v25823_v52  ;;  %19719 = vmatprep.mubr.msk.f32.mxu1 %vm22122_vm0, %v26527_v2  ;;  %v13631_v10 = vand.u32 4294901760, %v25847_v45 }
 0xd1e   :  { %20923 = vmatprep.subr.bf16.mxu1 %v26584_v47 }
 0xd1f   :  { %20835 = vmatpush3.bf16.msra.mxu0 %v25675_v25  ;;  %v26617_v25 = vpack.c.bf16 %v25317_v62, %v25312_v56  ;;  %v14142_v56 = vsub.f32 %v25654_v60, %v26618_v51  ;;  %v26619_v62 = vand.u32 4294901760, %v25659_v46  ;;  %v13632_v17 = vsub.f32 %v25847_v45, %v13631_v10 }
 0xd20   :  { %20842 = vmatprep.subr.bf16.mxu0 %v26584_v47 }
 0xd21   :  { %20925 = vmatpush3.bf16.msra.mxu1 %v25842_v41  ;;  %v14149_v58 = vsub.f32 %v25659_v46, %v26619_v62  ;;  %v14143_v7 = vand.u32 4294901760, %v14142_v56 }
 0xd22   :  { %19555 = vmatmul.mubr.f32.vlgmr.msra.gmra.mrb[130].mxu0 %v12635_v32  ;;  %20932 = vmatprep.subr.bf16.mxu1 %v26584_v47  ;;  %v26008_v32 = vsub.f32 %v15044_v37, %v15054_v14 }
 0xd23   :  { %20844 = vmatpush3.bf16.msra.mxu0 %v26617_v25  ;;  %19576 = vmatprep.mubr.msk.f32.mxu0 %vm22122_vm0, %v26527_v2  ;;  %v14150_v24 = vand.u32 4294901760, %v14149_v58 }
 0xd24   :  { %19720 = vmatmul.mubr.f32.vlgmr.msra.gmra.mrb[154].mxu1 %v13631_v10  ;;  %20845 = vmatprep.subr.bf16.mxu0 %v26584_v47  ;;  %v15060_v10 = vand.u32 4294901760, %v15046_v42  ;;  %v15139_v62 = vand.u32 4294901760, %v26008_v32 }
 0xd25   :  { %20934 = vmatpush3.bf16.msra.mxu1 %v25823_v52  ;;  %19741 = vmatprep.mubr.msk.f32.mxu1 %vm22122_vm0, %v26527_v2  ;;  %v20948_v39 = vpack.c.bf16 %v14150_v24, %v14143_v7  ;;  %v15146_v24 = vand.u32 4294901760, %v26018_v23 }
 0xd26   :  { %20935 = vmatprep.subr.bf16.mxu1 %v26584_v47  ;;  %v26016_v53 = vpack.c.bf16 %v15060_v10, %v15057_v3  ;;  %v26020_v51 = vsub.f32 %v15046_v42, %v15060_v10 }
 0xd27   :  { %20847 = vmatpush3.bf16.msra.mxu0 %v26620_v49  ;;  %v15140_v49 = vsub.f32 %v26008_v32, %v15139_v62 }
 0xd28   :  { %20854 = vmatprep.subr.bf16.mxu0 %v26584_v47 }
 0xd29   :  { %20937 = vmatpush3.bf16.msra.mxu1 %v25842_v41  ;;  %v15141_v7 = vand.u32 4294901760, %v15140_v49 }
 0xd2a   :  { %19577 = vmatmul.mubr.f32.vlgmr.msra.gmra.mrb[132].mxu0 %v25680_v22  ;;  %20944 = vmatprep.subr.bf16.mxu1 %v26584_v47 }
 0xd2b   :  { %20856 = vmatpush3.bf16.msra.mxu0 %v25359_v15  ;;  %19598 = vmatprep.mubr.msk.f32.mxu0 %vm22122_vm0, %v26527_v2  ;;  %v26622_v15 = vand.u32 4294901760, %v25608_v4  ;;  %v26624_v4 = vand.u32 4294901760, %v25614_v57  ;;  %v26626_v57 = vpack.c.bf16 %v25433_v43, %v25428_v11  ;;  %v13633_v11 = vand.u32 4294901760, %v13632_v17 }
 0xd2c   :  { %19742 = vmatmul.mubr.f32.vlgmr.msra.gmra.mrb[156].mxu1 %v25826_v28  ;;  %20857 = vmatprep.subr.bf16.mxu0 %v26584_v47  ;;  %v26629_v43 = vpack.c.bf16 %v25537_v13, %v25532_v12  ;;  %v26632_v12 = vld [vmem:[#allocation93_spill] sm:$0xff]  ;;  %v26633_v13 = vld [vmem:[#allocation88_spill] sm:$0xff]  ;;  %v21026_v17 = vpack.c.bf16 %v26020_v51, %v26018_v23 }
 0xd2d   :  { %20946 = vmatpush3.bf16.msra.mxu1 %v20945_v48  ;;  %19763 = vmatprep.mubr.msk.f32.mxu1 %vm22122_vm0, %v26527_v2  ;;  %v20939_v22 = vpack.c.bf16 %v26622_v15, %v26621_v33 }
 0xd2e   :  { %20947 = vmatprep.subr.bf16.mxu1 %v26584_v47 }
 0xd2f   :  { %20859 = vmatpush3.bf16.msra.mxu0 %v25374_v0  ;;  %v13127_v0 = vsub.f32 %v25761_v31, %v13126_v6 }
 0xd30   :  { %20866 = vmatprep.subr.bf16.mxu0 %v26584_v47 }
 0xd31   :  { %20949 = vmatpush3.bf16.msra.mxu1 %v20948_v39  ;;  %v15153_v39 = vand.u32 4294901760, %v26020_v51 }
 0xd32   :  { %19599 = vmatmul.mubr.f32.vlgmr.msra.gmra.mrb[134].mxu0 %v25646_v36  ;;  %20956 = vmatprep.subr.bf16.mxu1 %v26584_v47  ;;  %v20942_v36 = vpack.c.bf16 %v26624_v4, %v26623_v21 }
 0xd33   :  { %20868 = vmatpush3.bf16.msra.mxu0 %v25743_v44  ;;  %19620 = vmatprep.mubr.msk.f32.mxu0 %vm22122_vm0, %v26527_v2  ;;  %v13128_v44 = vand.u32 4294901760, %v13127_v0  ;;  %v15147_v0 = vsub.f32 %v26018_v23, %v15146_v24  ;;  %v15154_v21 = vsub.f32 %v26020_v51, %v15153_v39 }
 0xd34   :  { %19764 = vmatmul.mubr.f32.vlgmr.msra.gmra.mrb[158].mxu1 %v23844_v54  ;;  %20869 = vmatprep.subr.bf16.mxu0 %v26584_v47 }
 0xd35   :  { %20958 = vmatpush3.bf16.msra.mxu1 %v20939_v22  ;;  %19785 = vmatprep.mubr.msk.f32.mxu1 %vm22122_vm0, %v26527_v2 }
 0xd36   :  { %20959 = vmatprep.subr.bf16.mxu1 %v26584_v47 }
 0xd37   :  { %20871 = vmatpush3.bf16.msra.mxu0 %v25756_v34  ;;  %v26631_v34 = vld [vmem:[#allocation92_spill] sm:$0xff] }
 0xd38   :  { %20878 = vmatprep.subr.bf16.mxu0 %v26584_v47 }
 0xd39   :  { %20961 = vmatpush3.bf16.msra.mxu1 %v20942_v36 }
 0xd3a   :  { %19621 = vmatmul.mubr.f32.vlgmr.msra.gmra.mrb[136].mxu0 %v13128_v44  ;;  %20968 = vmatprep.subr.bf16.mxu1 %v26584_v47  ;;  %v15155_v44 = vand.u32 4294901760, %v15154_v21 }
 0xd3b   :  { %20880 = vmatpush3.bf16.msra.mxu0 %v26625_v27  ;;  %19642 = vmatprep.mubr.msk.f32.mxu0 %vm22122_vm0, %v26527_v2 }
 0xd3c   :  { %19786 = vmatmul.mubr.f32.vlgmr.msra.gmra.mrb[160].mxu1 %v23886_v20  ;;  %20881 = vmatprep.subr.bf16.mxu0 %v26584_v47  ;;  %v26627_v20 = vld [vmem:[#allocation89_spill] sm:$0xff] }
 0xd3d   :  { %20970 = vmatpush3.bf16.msra.mxu1 %v20939_v22  ;;  %19807 = vmatprep.mubr.msk.f32.mxu1 %vm22122_vm0, %v26527_v2 }
 0xd3e   :  { %20971 = vmatprep.subr.bf16.mxu1 %v26584_v47 }
 0xd3f   :  { %20883 = vmatpush3.bf16.msra.mxu0 %v26626_v57 }
 0xd40   :  { %20890 = vmatprep.subr.bf16.mxu0 %v26584_v47 }
 0xd41   :  { %20973 = vmatpush3.bf16.msra.mxu1 %v20942_v36 }
 0xd42   :  { %19643 = vmatmul.mubr.f32.vlgmr.msra.gmra.mrb[138].mxu0 %v25761_v31  ;;  %21010 = vmatprep.subr.bf16.mxu1 %v26584_v47  ;;  %v26636_v31 = vld [vmem:[#allocation87_spill] sm:$0xff] }
 0xd43   :  { %20892 = vmatpush3.bf16.msra.mxu0 %v26627_v20  ;;  %19664 = vmatprep.mubr.msk.f32.mxu0 %vm22122_vm0, %v26527_v2 }
 0xd44   :  { %19808 = vmatmul.mubr.f32.vlgmr.msra.gmra.mrb[162].mxu1 %v23844_v54  ;;  %20893 = vmatprep.subr.bf16.mxu0 %v26584_v47 }
 0xd45   :  { %19884 = vmatprep.mubr.msk.f32.mxu1 %vm22122_vm0, %v26527_v2 }
 0xd47   :  { %20895 = vmatpush3.bf16.msra.mxu0 %v26628_v19 }
 0xd48   :  { %20902 = vmatprep.subr.bf16.mxu0 %v26584_v47 }
 0xd4a   :  { %19665 = vmatmul.mubr.f32.vlgmr.msra.gmra.mrb[140].mxu0 %v25745_v38  ;;  %v26630_v38 = vpack.c.bf16 %v25548_v40, %v25543_v59  ;;  %v26634_v59 = vpack.c.bf16 %v25638_v35, %v25633_v5  ;;  %v26635_v40 = vpack.c.bf16 %v25659_v46, %v25654_v60 }
 0xd4b   :  { %20904 = vmatpush3.bf16.msra.mxu0 %v25823_v52  ;;  %19686 = vmatprep.mubr.msk.f32.mxu0 %vm22122_vm0, %v26527_v2 }
 0xd4c   :  { %20905 = vmatprep.subr.bf16.mxu0 %v26584_v47 }
 0xd4f   :  { %20907 = vmatpush3.bf16.msra.mxu0 %v25842_v41 }
 0xd50   :  { %20914 = vmatprep.subr.bf16.mxu0 %v26584_v47 }
 0xd52   :  { %19687 = vmatmul.mubr.f32.vlgmr.msra.gmra.mrb[142].mxu0 %v13633_v11 }
 0xd53   :  { %20916 = vmatpush3.bf16.msra.mxu0 %v26629_v43  ;;  %19708 = vmatprep.mubr.msk.f32.mxu0 %vm22122_vm0, %v26527_v2 }
 0xd54   :  { %20917 = vmatprep.subr.bf16.mxu0 %v26584_v47 }
 0xd57   :  { %20919 = vmatpush3.bf16.msra.mxu0 %v26630_v38 }
 0xd58   :  { %20926 = vmatprep.subr.bf16.mxu0 %v26584_v47 }
 0xd5a   :  { %19709 = vmatmul.mubr.f32.vlgmr.msra.gmra.mrb[144].mxu0 %v25847_v45 }
 0xd5b   :  { %20928 = vmatpush3.bf16.msra.mxu0 %v26631_v34  ;;  %19730 = vmatprep.mubr.msk.f32.mxu0 %vm22122_vm0, %v26527_v2 }
 0xd5c   :  { %20929 = vmatprep.subr.bf16.mxu0 %v26584_v47 }
 0xd5f   :  { %20931 = vmatpush3.bf16.msra.mxu0 %v26632_v12 }
 0xd60   :  { %20938 = vmatprep.subr.bf16.mxu0 %v26584_v47 }
 0xd62   :  { %19731 = vmatmul.mubr.f32.vlgmr.msra.gmra.mrb[146].mxu0 %v25826_v28 }
 0xd63   :  { %20940 = vmatpush3.bf16.msra.mxu0 %v20939_v22  ;;  %19752 = vmatprep.mubr.msk.f32.mxu0 %vm22122_vm0, %v26527_v2 }
 0xd64   :  { %20941 = vmatprep.subr.bf16.mxu0 %v26584_v47 }
 0xd67   :  { %20943 = vmatpush3.bf16.msra.mxu0 %v20942_v36  ;;  %v15148_v36 = vand.u32 4294901760, %v15147_v0 }
 0xd68   :  { %20950 = vmatprep.subr.bf16.mxu0 %v26584_v47 }
 0xd69   :  { %v26038_v27 = vpack.c.bf16 %v15155_v44, %v15148_v36 }
 0xd6a   :  { %19753 = vmatmul.mubr.f32.vlgmr.msra.gmra.mrb[148].mxu0 %v26633_v13 }
 0xd6b   :  { %20952 = vmatpush3.bf16.msra.mxu0 %v26634_v59  ;;  %19774 = vmatprep.mubr.msk.f32.mxu0 %vm22122_vm0, %v26527_v2 }
 0xd6c   :  { %20953 = vmatprep.subr.bf16.mxu0 %v26584_v47 }
 0xd6f   :  { %20955 = vmatpush3.bf16.msra.mxu0 %v26635_v40 }
 0xd70   :  { %20962 = vmatprep.subr.bf16.mxu0 %v26584_v47 }
 0xd72   :  { %19775 = vmatmul.mubr.f32.vlgmr.msra.gmra.mrb[150].mxu0 %v26636_v31 }
 0xd73   :  { %20964 = vmatpush3.bf16.msra.mxu0 %v25702_v18  ;;  %19796 = vmatprep.mubr.msk.f32.mxu0 %vm22122_vm0, %v26527_v2 }
 0xd74   :  { %20965 = vmatprep.subr.bf16.mxu0 %v26584_v47 }
 0xd77   :  { %20967 = vmatpush3.bf16.msra.mxu0 %v25712_v55  ;;  %v11768_v5 = vpop.f32.mrb[128].mxu1 }
 0xd78   :  { %v19374_v35 = vpop.f32.mrb[129].mxu1  ;;  %20974 = vmatprep.subr.bf16.mxu0 %v26584_v47 }
 0xd79   :  { %v26052_v35 = vpack.c.bf16 %v15153_v39, %v15146_v24 }
 0xd7a   :  { %19797 = vmatmul.mubr.f32.vlgmr.msra.gmra.mrb[152].mxu0 %v23844_v54  ;;  %v15043_v54 = vld [vmem:[%s26637_s21] sm:$0xff] }
 0xd7b   :  { %19818 = vmatprep.mubr.msk.f32.mxu0 %vm22122_vm0, %v26527_v2  ;;  %v15051_v26 = vand.u32 4294901760, %v15043_v54 }
 0xd7d   :  { %v11513_v60 = vpop.f32.mrb[118].mxu0  ;;  %v26004_v41 = vpack.c.bf16 %v15054_v14, %v15051_v26  ;;  %v26006_v45 = vsub.f32 %v15043_v54, %v15051_v26 }
 0xd7e   :  { %v19304_v46 = vpop.f32.mrb[119].mxu0 }
 0xd7f   :  { %21012 = vmatpush3.bf16.msra.mxu1 %v26004_v41  ;;  %v15132_v56 = vand.u32 4294901760, %v26006_v45  ;;  %v21023_v4 = vpack.c.bf16 %v26008_v32, %v26006_v45  ;;  %v14540_v46 = vld [vmem:[#allocation31 + $0x8] sm:$0xff] }
 0xd80   :  { %21013 = vmatprep.subr.bf16.mxu1 %v26584_v47 }
 0xd81   :  { %v15133_v58 = vsub.f32 %v26006_v45, %v15132_v56  ;;  %v26046_v13 = vpack.c.bf16 %v15139_v62, %v15132_v56 }
 0xd83   :  { %21015 = vmatpush3.bf16.msra.mxu1 %v26016_v53  ;;  %v15134_v48 = vand.u32 4294901760, %v15133_v58 }
 0xd84   :  { %21016 = vmatprep.subr.bf16.mxu1 %v26584_v47 }
 0xd85   :  { %v26032_v22 = vpack.c.bf16 %v15141_v7, %v15134_v48 }
 0xd97   :  { %v11976_v18 = vpop.f32.mrb[130].mxu1 }
 0xd98   :  { %v19444_v6 = vpop.f32.mrb[131].mxu1 }
 0xd9d   :  { %v11664_v29 = vpop.f32.mrb[120].mxu0 }
 0xd9e   :  { %v11665_v1 = vadd.f32 %v11664_v29, %v11513_v60  ;;  %v19339_v55 = vpop.f32.mrb[121].mxu0  ;;  %v14539_v60 = vld [vmem:[#allocation31] sm:$0xff]  ;;  %v14557_v29 = vand.u32 4294901760, %v14540_v46 }
 0xd9f   :  { %v25998_v61 = vpop.f32.mrb[132].mxu1  ;;  %v14554_v6 = vand.u32 4294901760, %v14539_v60  ;;  %v14542_v55 = vld [vmem:[#allocation31 + $0x18] sm:$0xff] }
 0xda0   :  { %v19490_v16 = vpop.f32.mrb[133].mxu1  ;;  %v11769_v52 = vadd.f32 %v11768_v5, %v11665_v1  ;;  %v14541_v1 = vld [vmem:[#allocation31 + $0x10] sm:$0xff]  ;;  %v14563_v37 = vand.u32 4294901760, %v14542_v55 }
 0xda1   :  { %v26056_v16 = vsub.f32 %v14539_v60, %v14554_v6  ;;  %v14560_v54 = vand.u32 4294901760, %v14541_v1 }
 0xda2   :  { %v26068_v10 = vsub.f32 %v14542_v55, %v14563_v37 }
 0xda3   :  { %v26064_v42 = vpack.c.bf16 %v14563_v37, %v14560_v54  ;;  %v26066_v3 = vsub.f32 %v14541_v1, %v14560_v54  ;;  %v14635_v62 = vand.u32 4294901760, %v26056_v16 }
 0xda4   :  { %v14656_v39 = vand.u32 4294901760, %v26068_v10 }
 0xda5   :  { %v14636_v48 = vsub.f32 %v26056_v16, %v14635_v62  ;;  %v14649_v24 = vand.u32 4294901760, %v26066_v3 }
 0xda7   :  { %v26000_v28 = vpop.f32.mrb[134].mxu1  ;;  %v14650_v44 = vsub.f32 %v26066_v3, %v14649_v24 }
 0xda8   :  { %v19501_v63 = vpop.f32.mrb[135].mxu1 }
 0xdaf   :  { %v26013_v50 = vpop.f32.mrb[136].mxu1 }
 0xdb0   :  { %v19523_v25 = vpop.f32.mrb[137].mxu1 }
 0xdb7   :  { %v26030_v33 = vpop.f32.mrb[138].mxu1 }
 0xdb8   :  { %v19545_v15 = vpop.f32.mrb[139].mxu1 }
 0xdb9   :  { %v14637_v15 = vand.u32 4294901760, %v14636_v48 }
 0xdbd   :  { %v11857_v57 = vpop.f32.mrb[122].mxu0 }
 0xdbe   :  { %v11858_v20 = vadd.f32 %v11857_v57, %v11769_v52  ;;  %v19409_v19 = vpop.f32.mrb[123].mxu0  ;;  %v26058_v52 = vsub.f32 %v14540_v46, %v14557_v29 }
 0xdbf   :  { %v26042_v11 = vpop.f32.mrb[140].mxu1 }
 0xdc0   :  { %v19567_v43 = vpop.f32.mrb[141].mxu1  ;;  %v11977_v38 = vadd.f32 %v11976_v18, %v11858_v20  ;;  %v26054_v18 = vpack.c.bf16 %v14557_v29, %v14554_v6  ;;  %v14642_v58 = vand.u32 4294901760, %v26058_v52  ;;  %v14657_v20 = vsub.f32 %v26068_v10, %v14656_v39 }
 0xdc2   :  { %20976 = vmatpush3.bf16.msra.mxu0 %v26054_v18  ;;  %v14643_v7 = vsub.f32 %v26058_v52, %v14642_v58 }
 0xdc3   :  { %20977 = vmatprep.subr.bf16.mxu0 %v26584_v47 }
 0xdc4   :  { %v14644_v0 = vand.u32 4294901760, %v14643_v7 }
 0xdc6   :  { %20979 = vmatpush3.bf16.msra.mxu0 %v26064_v42  ;;  %v26083_v57 = vpack.c.bf16 %v14644_v0, %v14637_v15 }
 0xdc7   :  { %v26044_v34 = vpop.f32.mrb[142].mxu1  ;;  %20980 = vmatprep.subr.bf16.mxu0 %v26584_v47 }
 0xdc8   :  { %v19589_v12 = vpop.f32.mrb[143].mxu1 }
 0xdc9   :  { %v14658_v12 = vand.u32 4294901760, %v14657_v20 }
 0xdcf   :  { %v26048_v59 = vpop.f32.mrb[144].mxu1 }
 0xdd0   :  { %v19611_v40 = vpop.f32.mrb[145].mxu1 }
 0xdd7   :  { %v26050_v31 = vpop.f32.mrb[146].mxu1 }
 0xdd8   :  { %v19633_v5 = vpop.f32.mrb[147].mxu1 }
 0xddd   :  { %v12063_v63 = vpop.f32.mrb[124].mxu0 }
 0xdde   :  { %v12064_v26 = vadd.f32 %v12063_v63, %v11977_v38  ;;  %v19479_v14 = vpop.f32.mrb[125].mxu0  ;;  %v14651_v38 = vand.u32 4294901760, %v14650_v44 }
 0xddf   :  { %v26061_v9 = vpop.f32.mrb[148].mxu1 }
 0xde0   :  { %v12146_v25 = vadd.f32 %v25998_v61, %v12064_v26  ;;  %v19655_v56 = vpop.f32.mrb[149].mxu1  ;;  %v26089_v5 = vpack.c.bf16 %v14658_v12, %v14651_v38  ;;  %v26112_v38 = vld [vmem:[#allocation34 + $0x10] sm:$0xff] }
 0xde1   :  { %v26099_v56 = vpack.c.bf16 %v14656_v39, %v14649_v24  ;;  %v26109_v24 = vld [vmem:[#allocation34 + $0x8] sm:$0xff] }
 0xde2   :  { %v12237_v49 = vadd.f32 %v26000_v28, %v12146_v25  ;;  %v26097_v25 = vpack.c.bf16 %v14642_v58, %v14635_v62  ;;  %v26107_v58 = vld [vmem:[#allocation34] sm:$0xff] }
 0xde5   :  { %v12316_v61 = vpop.f32.mrb[126].mxu0 }
 0xde6   :  { %v12317_v21 = vadd.f32 %v12316_v61, %v12237_v49  ;;  %v19512_v36 = vpop.f32.mrb[127].mxu0 }
 0xde7   :  { %v26081_v28 = vpop.f32.mrb[150].mxu1 }
 0xde8   :  { %v19677_v19 = vpop.f32.mrb[151].mxu1  ;;  %v12394_v43 = vadd.f32 %v26013_v50, %v12317_v21 }
 0xded   :  { %v12476_v46 = vpop.f32.mrb[128].mxu0 }
 0xdee   :  { %v12477_v6 = vadd.f32 %v12476_v46, %v12394_v43  ;;  %v19534_v29 = vpop.f32.mrb[129].mxu0  ;;  %v26467_v46 = vand.u32 4294901760, %v26107_v58 }
 0xdef   :  { %v13726_v1 = vpop.f32.mrb[152].mxu1  ;;  %v26465_v29 = vand.u32 4294901760, %v26112_v38 }
 0xdf0   :  { %v12552_v55 = vadd.f32 %v26030_v33, %v12477_v6  ;;  %v19699_v63 = vpop.f32.mrb[153].mxu1 }
 0xdf5   :  { %v12637_v54 = vpop.f32.mrb[130].mxu0 }
 0xdf6   :  { %v12729_v50 = vadd.f32 %v26042_v11, %v12637_v54  ;;  %v19556_v37 = vpop.f32.mrb[131].mxu0 }
 0xdf7   :  { %v26095_v26 = vpop.f32.mrb[154].mxu1 }
 0xdf8   :  { %v19721_v14 = vpop.f32.mrb[155].mxu1 }
 0xdfd   :  { %v12808_v49 = vpop.f32.mrb[132].mxu0 }
 0xdfe   :  { %v12809_v48 = vadd.f32 %v12808_v49, %v12729_v50  ;;  %v19578_v7 = vpop.f32.mrb[133].mxu0  ;;  %v26135_v50 = vsub.f32 %v26112_v38, %v26465_v29 }
 0xdff   :  { %v26101_v61 = vpop.f32.mrb[156].mxu1 }
 0xe00   :  { %v19743_v15 = vpop.f32.mrb[157].mxu1  ;;  %v12886_v33 = vadd.f32 %v26044_v34, %v12809_v48  ;;  %v26114_v34 = vld [vmem:[#allocation34 + $0x18] sm:$0xff] }
 0xe05   :  { %v12968_v0 = vpop.f32.mrb[134].mxu0 }
 0xe06   :  { %v12969_v21 = vadd.f32 %v12968_v0, %v12886_v33  ;;  %v19600_v36 = vpop.f32.mrb[135].mxu0 }
 0xe07   :  { %v26104_v11 = vpop.f32.mrb[158].mxu1 }
 0xe08   :  { %v13044_v44 = vadd.f32 %v26048_v59, %v12969_v21  ;;  %v19765_v20 = vpop.f32.mrb[159].mxu1  ;;  %v26466_v59 = vand.u32 4294901760, %v26109_v24  ;;  %v26469_v21 = vand.u32 4294901760, %v26135_v50 }
 0xe0a   :  { %v13047_v62 = vadd.f32 %v13044_v44, %v12552_v55  ;;  %v26464_v55 = vand.u32 4294901760, %v26114_v34  ;;  %v26130_v63 = vsub.f32 %v26109_v24, %v26466_v59 }
 0xe0c   :  { %v26140_v37 = vsub.f32 %v26114_v34, %v26464_v55  ;;  %v15624_v15 = vand.u32 4294901760, %v26130_v63 }
 0xe0d   :  { %v13130_v39 = vpop.f32.mrb[136].mxu0 }
 0xe0e   :  { %v13222_v19 = vadd.f32 %v26050_v31, %v13130_v39  ;;  %v19622_v43 = vpop.f32.mrb[137].mxu0  ;;  %v26125_v31 = vsub.f32 %v26107_v58, %v26467_v46  ;;  %v26468_v36 = vand.u32 4294901760, %v26140_v37 }
 0xe0f   :  { %v26116_v12 = vpop.f32.mrb[160].mxu1 }
 0xe10   :  { %v19787_v6 = vpop.f32.mrb[161].mxu1  ;;  %v15617_v7 = vand.u32 4294901760, %v26125_v31  ;;  %v26159_v20 = vpack.c.bf16 %v26468_v36, %v26469_v21 }
 0xe11   :  { %v16669_v6 = vld [vmem:[#allocation25] ss:$0 sm:$0xff] }
 0xe12   :  { %v26153_v44 = vpack.c.bf16 %v15624_v15, %v15617_v7 }
 0xe15   :  { %v13301_v54 = vpop.f32.mrb[138].mxu0 }
 0xe16   :  { %v13302_v14 = vadd.f32 %v13301_v54, %v13222_v19  ;;  %v19644_v49 = vpop.f32.mrb[139].mxu0 }
 0xe17   :  { %v26142_v48 = vpop.f32.mrb[162].mxu1 }
 0xe18   :  { %v19809_v33 = vpop.f32.mrb[163].mxu1  ;;  %v13379_v0 = vadd.f32 %v26061_v9, %v13302_v14 }
 0xe1d   :  { %v13461_v39 = vpop.f32.mrb[140].mxu0 }
 0xe1e   :  { %v13462_v19 = vadd.f32 %v13461_v39, %v13379_v0  ;;  %v19666_v43 = vpop.f32.mrb[141].mxu0 }
 0xe20   :  { %v13537_v9 = vadd.f32 %v26081_v28, %v13462_v19 }
 0xe22   :  { %v13540_v54 = vadd.f32 %v13537_v9, %v13047_v62 }
 0xe24   :  { %v13548_v14 = vadd.f32 %v16669_v6, %v13540_v54 }
 0xe25   :  { %v13635_v49 = vpop.f32.mrb[142].mxu0 }
 0xe26   :  { %v15048_v33 = vsel %vm2505_vm6, %v13548_v14, 0  ;;  %v13727_v60 = vadd.f32 %v13726_v1, %v13635_v49  ;;  %v19688_v40 = vpop.f32.mrb[143].mxu0 }
 0xe27   :  { %v26163_v55 = vand.u32 4294901760, %v15048_v33 }
 0xe29   :  { %v15120_v29 = vsub.f32 %v15048_v33, %v26163_v55 }
 0xe2b   :  { %v15121_v59 = vand.u32 4294901760, %v15120_v29 }
 0xe2d   :  { %v13806_v46 = vpop.f32.mrb[144].mxu0  ;;  %v15122_v36 = vsub.f32 %v15120_v29, %v15121_v59 }
 0xe2e   :  { %v13807_v21 = vadd.f32 %v13806_v46, %v13727_v60  ;;  %v19710_v0 = vpop.f32.mrb[145].mxu0 }
 0xe2f   :  { %v15123_v39 = vand.u32 4294901760, %v15122_v36 }
 0xe30   :  { %v13884_v28 = vadd.f32 %v26095_v26, %v13807_v21 }
 0xe31   :  { %19885 = vmatmul.mubr.f32.vlgmr.msra.gmra.mrb[164].mxu1 %v15123_v39  ;;  %v26641_v39 = vand.u32 4294901760, %v26109_v24 }
 0xe32   :  { %21018 = vmatpush3.bf16.msra.mxu1 %v26032_v22  ;;  %19895 = vmatprep.mubr.msk.f32.mxu1 %vm22122_vm0, %v26527_v2 }
 0xe33   :  { %21019 = vmatprep.subr.bf16.mxu1 %v26584_v47 }
 0xe35   :  { %v13966_v40 = vpop.f32.mrb[146].mxu0 }
 0xe36   :  { %v13967_v1 = vadd.f32 %v13966_v40, %v13884_v28  ;;  %21021 = vmatpush3.bf16.msra.mxu1 %v26038_v27  ;;  %v19732_v62 = vpop.f32.mrb[147].mxu0 }
 0xe37   :  { %21022 = vmatprep.subr.bf16.mxu1 %v26584_v47 }
 0xe38   :  { %v14042_v60 = vadd.f32 %v26101_v61, %v13967_v1  ;;  %v26643_v1 = vand.u32 4294901760, %v26114_v34 }
 0xe39   :  { %19896 = vmatmul.mubr.f32.vlgmr.msra.gmra.mrb[166].mxu1 %v26163_v55 }
 0xe3a   :  { %21024 = vmatpush3.bf16.msra.mxu1 %v21023_v4  ;;  %19906 = vmatprep.mubr.msk.f32.mxu1 %vm22122_vm0, %v26527_v2 }
 0xe3b   :  { %21025 = vmatprep.subr.bf16.mxu1 %v26584_v47 }
 0xe3d   :  { %v14120_v22 = vpop.f32.mrb[148].mxu0 }
 0xe3e   :  { %v14121_v26 = vadd.f32 %v14120_v22, %v14042_v60  ;;  %21027 = vmatpush3.bf16.msra.mxu1 %v21026_v17  ;;  %v19754_v27 = vpop.f32.mrb[149].mxu0  ;;  %v15618_v17 = vsub.f32 %v26125_v31, %v15617_v7  ;;  %v26638_v7 = vand.u32 4294901760, %v26135_v50 }
 0xe3f   :  { %21028 = vmatprep.subr.bf16.mxu1 %v26584_v47 }
 0xe40   :  { %v14212_v61 = vadd.f32 %v26104_v11, %v14121_v26  ;;  %v15632_v36 = vsub.f32 %v26135_v50, %v26638_v7 }
 0xe41   :  { %19907 = vmatmul.mubr.f32.vlgmr.msra.gmra.mrb[168].mxu1 %v15120_v29  ;;  %v15619_v29 = vand.u32 4294901760, %v15618_v17 }
 0xe42   :  { %21030 = vmatpush3.bf16.msra.mxu1 %v26004_v41  ;;  %19917 = vmatprep.mubr.msk.f32.mxu1 %vm22122_vm0, %v26527_v2  ;;  %v15633_v9 = vand.u32 4294901760, %v15632_v36 }
 0xe43   :  { %21031 = vmatprep.subr.bf16.mxu1 %v26584_v47 }
 0xe45   :  { %v14291_v45 = vpop.f32.mrb[150].mxu0 }
 0xe46   :  { %v14292_v32 = vadd.f32 %v14291_v45, %v14212_v61  ;;  %21033 = vmatpush3.bf16.msra.mxu1 %v26016_v53  ;;  %v19776_v4 = vpop.f32.mrb[151].mxu0 }
 0xe47   :  { %21034 = vmatprep.subr.bf16.mxu1 %v26584_v47 }
 0xe48   :  { %v14369_v23 = vadd.f32 %v26116_v12, %v14292_v32  ;;  %v15625_v12 = vsub.f32 %v26130_v63, %v15624_v15  ;;  %v26639_v15 = vand.u32 4294901760, %v26140_v37 }
 0xe49   :  { %19918 = vmatmul.mubr.f32.vlgmr.msra.gmra.mrb[170].mxu1 %v15121_v59  ;;  %v16670_v59 = vld [vmem:[#allocation30] ss:$0 sm:$0xff] }
 0xe4a   :  { %21036 = vmatpush3.bf16.msra.mxu1 %v26046_v13  ;;  %19928 = vmatprep.mubr.msk.f32.mxu1 %vm22122_vm0, %v26527_v2  ;;  %v15639_v19 = vsub.f32 %v26140_v37, %v26639_v15 }
 0xe4b   :  { %21037 = vmatprep.subr.bf16.mxu1 %v26584_v47 }
 0xe4c   :  { %v15640_v6 = vand.u32 4294901760, %v15639_v19 }
 0xe4d   :  { %v14451_v51 = vpop.f32.mrb[152].mxu0 }
 0xe4e   :  { %v14452_v11 = vadd.f32 %v14451_v51, %v14369_v23  ;;  %21039 = vmatpush3.bf16.msra.mxu1 %v26052_v35  ;;  %v19798_v46 = vpop.f32.mrb[153].mxu0  ;;  %v15626_v35 = vand.u32 4294901760, %v15625_v12  ;;  %v21056_v49 = vpack.c.bf16 %v15640_v6, %v15633_v9 }
 0xe4f   :  { %21040 = vmatprep.subr.bf16.mxu1 %v26584_v47 }
 0xe50   :  { %v14527_v13 = vadd.f32 %v26142_v48, %v14452_v11 }
 0xe51   :  { %19929 = vmatmul.mubr.f32.vlgmr.msra.gmra.mrb[172].mxu1 %v26163_v55 }
 0xe52   :  { %v14537_v21 = vadd.f32 %v16670_v59, %v14527_v13  ;;  %21042 = vmatpush3.bf16.msra.mxu1 %v26004_v41  ;;  %19939 = vmatprep.mubr.msk.f32.mxu1 %vm22122_vm0, %v26527_v2  ;;  %v21053_v41 = vpack.c.bf16 %v15626_v35, %v15619_v29 }
 0xe53   :  { %21043 = vmatprep.subr.bf16.mxu1 %v26584_v47 }
 0xe54   :  { %v14538_v48 = vmax.f32 %v14537_v21, 0.0 }
 0xe56   :  { %v14551_v43 = vsel %vm2505_vm6, %v14538_v48, 0  ;;  %21045 = vmatpush3.bf16.msra.mxu1 %v26016_v53  ;;  %v26640_v53 = vand.u32 4294901760, %v26107_v58  ;;  %v26645_v58 = vpack.c.bf16 %v26058_v52, %v26056_v16  ;;  %v26647_v16 = vld [vmem:[#allocation91_spill] sm:$0xff]  ;;  %v21062_v52 = vpack.c.bf16 %v26140_v37, %v26135_v50 }
 0xe57   :  { %v14622_v54 = vand.u32 4294901760, %v14551_v43  ;;  %21052 = vmatprep.subr.bf16.mxu1 %v26584_v47 }
 0xe58   :  { %v21047_v28 = vpack.c.bf16 %v26641_v39, %v26640_v53 }
 0xe59   :  { %v14623_v14 = vsub.f32 %v14551_v43, %v14622_v54  ;;  %19940 = vmatmul.mubr.f32.vlgmr.msra.gmra.mrb[174].mxu1 %v26163_v55  ;;  %v26642_v55 = vand.u32 4294901760, %v26112_v38 }
 0xe5a   :  { %21054 = vmatpush3.bf16.msra.mxu1 %v21053_v41  ;;  %19961 = vmatprep.mubr.msk.f32.mxu1 %vm22122_vm0, %v26527_v2 }
 0xe5b   :  { %21055 = vmatprep.subr.bf16.mxu1 %v26584_v47  ;;  %v14624_v33 = vand.u32 4294901760, %v14623_v14  ;;  %v21050_v62 = vpack.c.bf16 %v26643_v1, %v26642_v55 }
 0xe5d   :  { %v14625_v0 = vsub.f32 %v14623_v14, %v14624_v33 }
 0xe5e   :  { %21057 = vmatpush3.bf16.msra.mxu1 %v21056_v49 }
 0xe5f   :  { %21064 = vmatprep.subr.bf16.mxu1 %v26584_v47  ;;  %v14626_v40 = vand.u32 4294901760, %v14625_v0 }
 0xe61   :  { %19962 = vmatmul.mubr.f32.vlgmr.msra.gmra.mrb[176].mxu1 %v25420_v30  ;;  %19819 = vmatmul.mubr.f32.vlgmr.msra.gmra.mrb[154].mxu0 %v14626_v40 }
 0xe62   :  { %20982 = vmatpush3.bf16.msra.mxu0 %v26083_v57  ;;  %21066 = vmatpush3.bf16.msra.mxu1 %v21047_v28  ;;  %v26644_v57 = vld [vmem:[#allocation86_spill] sm:$0xff] }
 0xe63   :  { %20983 = vmatprep.subr.bf16.mxu0 %v26584_v47  ;;  %21067 = vmatprep.subr.bf16.mxu1 %v26584_v47 }
 0xe64   :  { %19983 = vmatprep.mubr.msk.f32.mxu1 %vm22122_vm0, %v26527_v2  ;;  %19829 = vmatprep.mubr.msk.f32.mxu0 %vm22122_vm0, %v26527_v2 }
 0xe66   :  { %20985 = vmatpush3.bf16.msra.mxu0 %v26089_v5  ;;  %21069 = vmatpush3.bf16.msra.mxu1 %v21050_v62  ;;  %v26646_v5 = vpack.c.bf16 %v26068_v10, %v26066_v3  ;;  %v16030_v3 = vld [vmem:[#allocation37 + $0x8] sm:$0xff]  ;;  %v16031_v10 = vld [vmem:[#allocation37 + $0x10] sm:$0xff] }
 0xe67   :  { %20986 = vmatprep.subr.bf16.mxu0 %v26584_v47  ;;  %21076 = vmatprep.subr.bf16.mxu1 %v26584_v47  ;;  %v16050_v24 = vand.u32 4294901760, %v16031_v10 }
 0xe69   :  { %19984 = vmatmul.mubr.f32.vlgmr.msra.gmra.mrb[178].mxu1 %v26644_v57  ;;  %19830 = vmatmul.mubr.f32.vlgmr.msra.gmra.mrb[154].mxu0 %v14622_v54  ;;  %v26306_v50 = vsub.f32 %v16031_v10, %v16050_v24 }
 0xe6a   :  { %20988 = vmatpush3.bf16.msra.mxu0 %v26645_v58  ;;  %21078 = vmatpush3.bf16.msra.mxu1 %v21047_v28 }
 0xe6b   :  { %20989 = vmatprep.subr.bf16.mxu0 %v26584_v47  ;;  %21079 = vmatprep.subr.bf16.mxu1 %v26584_v47  ;;  %v16139_v61 = vand.u32 4294901760, %v26306_v50 }
 0xe6c   :  { %20005 = vmatprep.mubr.msk.f32.mxu1 %vm22122_vm0, %v26527_v2  ;;  %19840 = vmatprep.mubr.msk.f32.mxu0 %vm22122_vm0, %v26527_v2 }
 0xe6d   :  { %v16140_v51 = vsub.f32 %v26306_v50, %v16139_v61 }
 0xe6e   :  { %20991 = vmatpush3.bf16.msra.mxu0 %v26646_v5  ;;  %21081 = vmatpush3.bf16.msra.mxu1 %v21050_v62 }
 0xe6f   :  { %20992 = vmatprep.subr.bf16.mxu0 %v26584_v47  ;;  %v16141_v59 = vand.u32 4294901760, %v16140_v51 }
 0xe71   :  { %20006 = vmatmul.mubr.f32.vlgmr.msra.gmra.mrb[180].mxu1 %v25420_v30  ;;  %19841 = vmatmul.mubr.f32.vlgmr.msra.gmra.mrb[154].mxu0 %v14623_v14 }
 0xe72   :  { %20994 = vmatpush3.bf16.msra.mxu0 %v26054_v18  ;;  %19851 = vmatprep.mubr.msk.f32.mxu0 %vm22122_vm0, %v26527_v2 }
 0xe73   :  { %20995 = vmatprep.subr.bf16.mxu0 %v26584_v47 }
 0xe76   :  { %20997 = vmatpush3.bf16.msra.mxu0 %v26064_v42 }
 0xe77   :  { %20998 = vmatprep.subr.bf16.mxu0 %v26584_v47 }
 0xe79   :  { %19852 = vmatmul.mubr.f32.vlgmr.msra.gmra.mrb[154].mxu0 %v14624_v33 }
 0xe7a   :  { %21000 = vmatpush3.bf16.msra.mxu0 %v26097_v25  ;;  %19862 = vmatprep.mubr.msk.f32.mxu0 %vm22122_vm0, %v26527_v2  ;;  %v16047_v25 = vand.u32 4294901760, %v16030_v3 }
 0xe7b   :  { %21001 = vmatprep.subr.bf16.mxu0 %v26584_v47 }
 0xe7e   :  { %21003 = vmatpush3.bf16.msra.mxu0 %v26099_v56  ;;  %v16032_v56 = vld [vmem:[#allocation37 + $0x18] sm:$0xff] }
 0xe7f   :  { %21004 = vmatprep.subr.bf16.mxu0 %v26584_v47  ;;  %v16053_v38 = vand.u32 4294901760, %v16032_v56 }
 0xe81   :  { %19863 = vmatmul.mubr.f32.vlgmr.msra.gmra.mrb[154].mxu0 %v14622_v54  ;;  %v26308_v37 = vsub.f32 %v16032_v56, %v16053_v38 }
 0xe82   :  { %21006 = vmatpush3.bf16.msra.mxu0 %v26054_v18  ;;  %19873 = vmatprep.mubr.msk.f32.mxu0 %vm22122_vm0, %v26527_v2  ;;  %v21059_v18 = vpack.c.bf16 %v26130_v63, %v26125_v31  ;;  %v26304_v63 = vsub.f32 %v16030_v3, %v16047_v25 }
 0xe83   :  { %21007 = vmatprep.subr.bf16.mxu0 %v26584_v47  ;;  %v16146_v45 = vand.u32 4294901760, %v26308_v37  ;;  %v21098_v35 = vpack.c.bf16 %v26308_v37, %v26306_v50 }
 0xe84   :  { %v16132_v22 = vand.u32 4294901760, %v26304_v63 }
 0xe85   :  { %v16147_v17 = vsub.f32 %v26308_v37, %v16146_v45  ;;  %v21110_v9 = vpack.c.bf16 %v16146_v45, %v16139_v61 }
 0xe86   :  { %21009 = vmatpush3.bf16.msra.mxu0 %v26064_v42  ;;  %v16029_v42 = vld [vmem:[#allocation37] sm:$0xff]  ;;  %v16133_v27 = vsub.f32 %v26304_v63, %v16132_v22 }
 0xe87   :  { %21046 = vmatprep.subr.bf16.mxu0 %v26584_v47  ;;  %v16148_v13 = vand.u32 4294901760, %v16147_v17 }
 0xe88   :  { %v16134_v23 = vand.u32 4294901760, %v16133_v27 }
 0xe89   :  { %19874 = vmatmul.mubr.f32.vlgmr.msra.gmra.mrb[154].mxu0 %v14622_v54  ;;  %v21092_v29 = vpack.c.bf16 %v16148_v13, %v16141_v59 }
 0xe8a   :  { %21048 = vmatpush3.bf16.msra.mxu0 %v21047_v28  ;;  %19950 = vmatprep.mubr.msk.f32.mxu0 %vm22122_vm0, %v26527_v2 }
 0xe8b   :  { %21049 = vmatprep.subr.bf16.mxu0 %v26584_v47 }
 0xe8e   :  { %21051 = vmatpush3.bf16.msra.mxu0 %v21050_v62  ;;  %v16671_v62 = vld [vmem:[#allocation33] ss:$0 sm:$0xff] }
 0xe8f   :  { %21058 = vmatprep.subr.bf16.mxu0 %v26584_v47 }
 0xe91   :  { %19951 = vmatmul.mubr.f32.vlgmr.msra.gmra.mrb[156].mxu0 %v26647_v16 }
 0xe92   :  { %21060 = vmatpush3.bf16.msra.mxu0 %v21059_v18  ;;  %19972 = vmatprep.mubr.msk.f32.mxu0 %vm22122_vm0, %v26527_v2 }
 0xe93   :  { %21061 = vmatprep.subr.bf16.mxu0 %v26584_v47 }
 0xe96   :  { %21063 = vmatpush3.bf16.msra.mxu0 %v21062_v52 }
 0xe97   :  { %21070 = vmatprep.subr.bf16.mxu0 %v26584_v47 }
 0xe99   :  { %19973 = vmatmul.mubr.f32.vlgmr.msra.gmra.mrb[158].mxu0 %v25441_v8  ;;  %v16044_v8 = vand.u32 4294901760, %v16029_v42 }
 0xe9a   :  { %21072 = vmatpush3.bf16.msra.mxu0 %v26153_v44  ;;  %19994 = vmatprep.mubr.msk.f32.mxu0 %vm22122_vm0, %v26527_v2 }
 0xe9b   :  { %21073 = vmatprep.subr.bf16.mxu0 %v26584_v47  ;;  %v26300_v34 = vpack.c.bf16 %v16047_v25, %v16044_v8  ;;  %v26302_v31 = vsub.f32 %v16029_v42, %v16044_v8 }
 0xe9d   :  { %v16125_v60 = vand.u32 4294901760, %v26302_v31  ;;  %v21095_v21 = vpack.c.bf16 %v26304_v63, %v26302_v31 }
 0xe9e   :  { %21075 = vmatpush3.bf16.msra.mxu0 %v26159_v20  ;;  %v26311_v20 = vpack.c.bf16 %v16053_v38, %v16050_v24 }
 0xe9f   :  { %21082 = vmatprep.subr.bf16.mxu0 %v26584_v47  ;;  %v16126_v26 = vsub.f32 %v26302_v31, %v16125_v60  ;;  %v21107_v41 = vpack.c.bf16 %v16132_v22, %v16125_v60  ;;  %v16672_v31 = vld [vmem:[#allocation36] ss:$0 sm:$0xff] }
 0xea1   :  { %19995 = vmatmul.mubr.f32.vlgmr.msra.gmra.mrb[160].mxu0 %v25420_v30  ;;  %v16127_v4 = vand.u32 4294901760, %v16126_v26 }
 0xea2   :  { %20016 = vmatprep.mubr.msk.f32.mxu0 %vm22122_vm0, %v26527_v2  ;;  %21084 = vmatpush3.bf16.msra.mxu0 %v26300_v34 }
 0xea3   :  { %21085 = vmatprep.subr.bf16.mxu0 %v26584_v47  ;;  %v21089_v12 = vpack.c.bf16 %v16134_v23, %v16127_v4 }
 0xea6   :  { %21087 = vmatpush3.bf16.msra.mxu0 %v26311_v20 }
 0xea7   :  { %21088 = vmatprep.subr.bf16.mxu0 %v26584_v47 }
 0xf04   :  { %v15125_v30 = vpop.f32.mrb[164].mxu1 }
 0xf05   :  { %v19886_v44 = vpop.f32.mrb[165].mxu1 }
 0xf0c   :  { %v15216_v32 = vpop.f32.mrb[166].mxu1 }
 0xf0d   :  { %v15217_v11 = vadd.f32 %v15216_v32, %v15125_v30  ;;  %v19897_v46 = vpop.f32.mrb[167].mxu1 }
 0xf14   :  { %v15296_v7 = vpop.f32.mrb[168].mxu1 }
 0xf15   :  { %v15297_v36 = vadd.f32 %v15296_v7, %v15217_v11  ;;  %v19908_v15 = vpop.f32.mrb[169].mxu1 }
 0xf1c   :  { %v15373_v19 = vpop.f32.mrb[170].mxu1 }
 0xf1d   :  { %v15374_v48 = vadd.f32 %v15373_v19, %v15297_v36  ;;  %v19919_v43 = vpop.f32.mrb[171].mxu1 }
 0xf24   :  { %v15456_v6 = vpop.f32.mrb[172].mxu1 }
 0xf25   :  { %v15457_v54 = vadd.f32 %v15456_v6, %v15374_v48  ;;  %v19930_v14 = vpop.f32.mrb[173].mxu1 }
 0xf2c   :  { %v15531_v49 = vpop.f32.mrb[174].mxu1 }
 0xf2d   :  { %v15532_v33 = vadd.f32 %v15531_v49, %v15457_v54  ;;  %v19941_v0 = vpop.f32.mrb[175].mxu1 }
 0xf34   :  { %v15701_v53 = vpop.f32.mrb[176].mxu1 }
 0xf35   :  { %v19963_v39 = vpop.f32.mrb[177].mxu1 }
 0xf3c   :  { %v15858_v28 = vpop.f32.mrb[178].mxu1 }
 0xf3d   :  { %v19985_v40 = vpop.f32.mrb[179].mxu1 }
 0xf44   :  { %v16016_v55 = vpop.f32.mrb[180].mxu1 }
 0xf45   :  { %v20007_v1 = vpop.f32.mrb[181].mxu1 }
 0xf5c   :  { %v15034_v57 = vpop.f32.mrb[154].mxu0 }
 0xf5d   :  { %v21133_v58 = vadd.f32 %v16671_v62, %v15034_v57  ;;  %v19875_v5 = vpop.f32.mrb[155].mxu0 }
 0xf5f   :  { %15038 = vst.msk [vmem:[#allocation40] sm:$0xff] %vm2505_vm6, %v21133_v58 }
 0xf64   :  { %v15610_v18 = vpop.f32.mrb[156].mxu0 }
 0xf65   :  { %v15611_v16 = vadd.f32 %v15610_v18, %v15532_v33  ;;  %v19952_v52 = vpop.f32.mrb[157].mxu0 }
 0xf67   :  { %v15702_v42 = vadd.f32 %v15701_v53, %v15611_v16 }
 0xf6c   :  { %v15781_v3 = vpop.f32.mrb[158].mxu0 }
 0xf6d   :  { %v15782_v10 = vadd.f32 %v15781_v3, %v15702_v42  ;;  %v19974_v8 = vpop.f32.mrb[159].mxu0 }
 0xf6f   :  { %v15859_v25 = vadd.f32 %v15858_v28, %v15782_v10 }
 0xf74   :  { %v15941_v56 = vpop.f32.mrb[160].mxu0 }
 0xf75   :  { %v15942_v24 = vadd.f32 %v15941_v56, %v15859_v25  ;;  %v19996_v38 = vpop.f32.mrb[161].mxu0 }
 0xf77   :  { %v16017_v63 = vadd.f32 %v16016_v55, %v15942_v24 }
 0xf79   :  { %v16027_v50 = vadd.f32 %v16672_v31, %v16017_v63 }
 0xf7b   :  { %v16028_v30 = vmax.f32 %v16027_v50, 0.0 }
 0xf7d   :  { %v16041_v37 = vsel %vm2505_vm6, %v16028_v30, 0 }
 0xf7e   :  { %v16112_v44 = vand.u32 4294901760, %v16041_v37 }
 0xf80   :  { %v16113_v60 = vsub.f32 %v16041_v37, %v16112_v44 }
 0xf82   :  { %v16114_v22 = vand.u32 4294901760, %v16113_v60 }
 0xf84   :  { %v16115_v26 = vsub.f32 %v16113_v60, %v16114_v22 }
 0xf86   :  { %v16116_v27 = vand.u32 4294901760, %v16115_v26 }
 0xf88   :  { %20017 = vmatmul.mubr.f32.vlgmr.msra.gmra.mrb[162].mxu0 %v16116_v27 }
 0xf89   :  { %21090 = vmatpush3.bf16.msra.mxu0 %v21089_v12  ;;  %20027 = vmatprep.mubr.msk.f32.mxu0 %vm22122_vm0, %v26527_v2 }
 0xf8a   :  { %21091 = vmatprep.subr.bf16.mxu0 %v26584_v47 }
 0xf8d   :  { %21093 = vmatpush3.bf16.msra.mxu0 %v21092_v29 }
 0xf8e   :  { %21094 = vmatprep.subr.bf16.mxu0 %v26584_v47 }
 0xf90   :  { %20028 = vmatmul.mubr.f32.vlgmr.msra.gmra.mrb[162].mxu0 %v16112_v44 }
 0xf91   :  { %21096 = vmatpush3.bf16.msra.mxu0 %v21095_v21  ;;  %20038 = vmatprep.mubr.msk.f32.mxu0 %vm22122_vm0, %v26527_v2 }
 0xf92   :  { %21097 = vmatprep.subr.bf16.mxu0 %v26584_v47 }
 0xf95   :  { %21099 = vmatpush3.bf16.msra.mxu0 %v21098_v35 }
 0xf96   :  { %21100 = vmatprep.subr.bf16.mxu0 %v26584_v47 }
 0xf98   :  { %20039 = vmatmul.mubr.f32.vlgmr.msra.gmra.mrb[162].mxu0 %v16113_v60 }
 0xf99   :  { %21102 = vmatpush3.bf16.msra.mxu0 %v26300_v34  ;;  %20049 = vmatprep.mubr.msk.f32.mxu0 %vm22122_vm0, %v26527_v2 }
 0xf9a   :  { %21103 = vmatprep.subr.bf16.mxu0 %v26584_v47 }
 0xf9d   :  { %21105 = vmatpush3.bf16.msra.mxu0 %v26311_v20 }
 0xf9e   :  { %21106 = vmatprep.subr.bf16.mxu0 %v26584_v47 }
 0xfa0   :  { %20050 = vmatmul.mubr.f32.vlgmr.msra.gmra.mrb[162].mxu0 %v16114_v22 }
 0xfa1   :  { %21108 = vmatpush3.bf16.msra.mxu0 %v21107_v41  ;;  %20060 = vmatprep.mubr.msk.f32.mxu0 %vm22122_vm0, %v26527_v2 }
 0xfa2   :  { %21109 = vmatprep.subr.bf16.mxu0 %v26584_v47 }
 0xfa5   :  { %21111 = vmatpush3.bf16.msra.mxu0 %v21110_v9 }
 0xfa6   :  { %21112 = vmatprep.subr.bf16.mxu0 %v26584_v47 }
 0xfa8   :  { %20061 = vmatmul.mubr.f32.vlgmr.msra.gmra.mrb[162].mxu0 %v16112_v44 }
 0xfa9   :  { %21114 = vmatpush3.bf16.msra.mxu0 %v26300_v34  ;;  %20071 = vmatprep.mubr.msk.f32.mxu0 %vm22122_vm0, %v26527_v2 }
 0xfaa   :  { %21115 = vmatprep.subr.bf16.mxu0 %v26584_v47 }
 0xfad   :  { %21117 = vmatpush3.bf16.msra.mxu0 %v26311_v20 }
 0xfb0   :  { %20072 = vmatmul.mubr.f32.vlgmr.msra.gmra.mrb[162].mxu0 %v16112_v44 }
 0xfb1   :  { %21988 = shalt.err (!%p21985_p6)
}
 0xfb2   :  { %s21989_s18 = scalar_lea.hbm %s22360_s17, 128 }
 0xfb3   :  { %p21990_p7 = scmp.ne.s32.totalorder %s22360_s17, %s21989_s18  ;;  %p21993_p8 = scmp.lt.u32.totalorder %s21989_s18, %s22360_s17 }
 0xfb5   :  { %p21995_p9 = pnand %p21993_p8, %p21990_p7 }
 0xfb7   :  { %21998 = shalt.err (!%p21995_p9)
}
 0xfb8   :  { %16538 = dma.vmem_to_hbm [thread:$0]  %s16536_s23, 128, %s22360_s17, [#allocation6]   ;;  %v16673_v2 = vld [vmem:[#allocation39] ss:$0 sm:$0xff] }
 0xfb9   :  { %s22128_s9 = smov [#allocation41]  }
 0xfba   :  { %s16545_s19 = sshll.u32 %s22128_s9, 4  ;;  %s16546_s19 = int_to_ptr.vmem [resolvable:$true] %s16545_s19 }
 0xfbb   :  { %s21999_s25 = scalar_lea.vmem %s16546_s19, 128  ;;  %p22004_p11 = scmp.lt.s32.totalorder %s16546_s19, %s16546_s19 }
 0xfbc   :  { %p22000_p10 = scmp.ne.s32.totalorder %s16546_s19, %s21999_s25  ;;  %p22005_p12 = scmp.lt.s32.totalorder %s21999_s25, %s21999_s25 }
 0xfbe   :  { %p22006_p13 = por %p22005_p12, %p22004_p11 }
 0xfc0   :  { %p22007_p0 = pnand %p22006_p13, %p22000_p10 }
0x1083   :  { %v16524_v47 = vpop.f32.mrb[162].mxu0 }
0x1084   :  { %v21134_v34 = vadd.f32 %v16673_v2, %v16524_v47  ;;  %v20073_v20 = vpop.f32.mrb[163].mxu0 }
0x1086   :  { %16528 = vst.msk [vmem:[#allocation41] sm:$0xff] %vm2505_vm6, %v21134_v34 }
0x1087   :  { %22010 = shalt.err (!%p22007_p0)
}
0x1088   :  { %s22011_s17 = scalar_lea.hbm %s22365_s28, 128 }
0x1089   :  { %p22012_p1 = scmp.ne.s32.totalorder %s22365_s28, %s22011_s17  ;;  %p22015_p2 = scmp.lt.u32.totalorder %s22011_s17, %s22365_s28 }
0x108b   :  { %p22017_p3 = pnand %p22015_p2, %p22012_p1 }
0x108d   :  { %22020 = shalt.err (!%p22017_p3)
}
0x108e   :  { %16548 = dma.vmem_to_hbm [thread:$0]  %s16546_s19, 128, %s22365_s28, [#allocation42]  }
0x108f   :  { %22045 = dma.done.wait [#allocation6], 128  }
0x1090   :  { %22046 = vsyncadd [#allocation6], 4294967168 }
0x1091   :  { %22047 = dma.done.wait [#allocation42], 128  }
0x1092   :  { %22048 = vsyncadd [#allocation42], 4294967168 }
0x1093   :  { %16555 = vsyncpa [#allocation5], 1 }
0x1094   :  { %16556 = vsyncpa [#allocation8], 1 }
0x1095   :  { %16557 = vsyncpa [#allocation11], 1 }
0x1096   :  { %16558 = vsyncpa [#allocation14], 1 }
0x1097   :  { %16559 = vsyncpa [#allocation17], 1 }
0x1098   :  { %16560 = vsyncpa [#allocation20], 1 }
0x1099   :  { %16561 = vsyncpa [#allocation23], 1 }
0x109a   :  { %16562 = vsyncpa [#allocation26], 1 }
0x109b   :  { %16563 = vsyncpa [#allocation29], 1 }
0x109c   :  { %16564 = vsyncpa [#allocation32], 1 }
0x109d   :  { %16565 = vsyncpa [#allocation35], 1 }
0x109e   :  { %16566 = vsyncpa [#allocation38], 1 }
0x109f   :  { %16567 = vsyncpa [#allocation6], 1 }
0x10a0   :  { %16568 = vsyncpa [#allocation42], 1 }

</bundles_post_ra>
